<compile_context>
chip_gen: v6e
topology: v6e:2x2x1
jax: 0.10.0
libtpu: 0.0.40
codegen_flags: <defaults>
</compile_context>

<pallas_src>
import functools

import jax
import jax.numpy as jnp
from jax.experimental import pallas as pl
from jax.experimental.pallas import tpu as pltpu

_LANE = 128


def _round_up(x, m):
    return ((x + m - 1) // m) * m


# ----------------------------------------------------------------------------
# In-kernel helpers
# ----------------------------------------------------------------------------
def _zero_border(pad_ref, h, w):
    """Zero only the 1-pixel border of a (h+2, w+2, C) padded scratch."""
    c = pad_ref.shape[-1]
    zrow = jnp.zeros((1, w + 2, c), pad_ref.dtype)
    pad_ref[pl.ds(0, 1), :, :] = zrow
    pad_ref[pl.ds(h + 1, 1), :, :] = zrow
    zcol = jnp.zeros((h + 2, 1, c), pad_ref.dtype)
    pad_ref[:, pl.ds(0, 1), :] = zcol
    pad_ref[:, pl.ds(w + 1, 1), :] = zcol


def _conv3x3_taps(pad_ref, w_ref, *, h_out, w_out, stride):
    """3x3 conv as 9 per-tap MXU dots accumulated in f32 (no patch-matrix materialization).

    pad_ref: (Hin+2, Win+2, Cin) zero-padded input scratch (compute dtype)
    w_ref:   (9, Cin, Cout) per-tap weight slabs (BN scale folded in)
    returns: (h_out*w_out, Cout) float32
    """
    cin = pad_ref.shape[-1]
    cout = w_ref.shape[-1]
    m = h_out * w_out
    acc = jnp.zeros((m, cout), jnp.float32)
    for ky in range(3):
        for kx in range(3):
            if stride == 1:
                p = pad_ref[pl.ds(ky, h_out), pl.ds(kx, w_out), :]
            else:
                p = pad_ref[pl.ds(ky, h_out, stride), pl.ds(kx, w_out, stride), :]
            acc = acc + jnp.dot(p.reshape(m, cin), w_ref[3 * ky + kx],
                                preferred_element_type=jnp.float32)
    return acc


# ----------------------------------------------------------------------------
# Fused BasicBlock kernel: conv1 -> bn1 -> relu -> conv2 -> bn2 -> (+shortcut) -> relu
# ----------------------------------------------------------------------------
def _basic_block_kernel(*refs, stride, has_proj):
    if has_proj:
        (x_hbm, w1_ref, b1_ref, w2_ref, b2_ref, xs_ref, wsc_ref, bsc_ref,
         o_ref, xpad_ref, y1pad_ref, dma_sem) = refs
    else:
        (x_hbm, w1_ref, b1_ref, w2_ref, b2_ref,
         o_ref, xpad_ref, y1pad_ref, dma_sem) = refs
        xs_ref = wsc_ref = bsc_ref = None

    n = pl.program_id(0)
    hin, win, cin = xpad_ref.shape[0] - 2, xpad_ref.shape[1] - 2, xpad_ref.shape[2]
    ho, wo, cout = y1pad_ref.shape[0] - 2, y1pad_ref.shape[1] - 2, y1pad_ref.shape[2]
    m = ho * wo

    # DMA this batch element from HBM straight into the interior of the padded scratch;
    # zero only the (disjoint) 1-px border while the DMA is in flight.
    cp = pltpu.make_async_copy(
        x_hbm.at[n], xpad_ref.at[pl.ds(1, hin), pl.ds(1, win), :], dma_sem)
    cp.start()
    _zero_border(xpad_ref, hin, win)
    _zero_border(y1pad_ref, ho, wo)
    cp.wait()

    # conv1 (stride s) + folded-BN bias + ReLU -> padded VMEM scratch (no HBM round trip).
    y1 = jnp.maximum(_conv3x3_taps(xpad_ref, w1_ref, h_out=ho, w_out=wo, stride=stride)
                     + b1_ref[...], 0.0)
    y1pad_ref[pl.ds(1, ho), pl.ds(1, wo), :] = (
        y1.reshape(ho, wo, cout).astype(y1pad_ref.dtype))

    # conv2 (stride 1) + folded-BN bias.
    out = _conv3x3_taps(y1pad_ref, w2_ref, h_out=ho, w_out=wo, stride=1) + b2_ref[...]

    # Shortcut: fused 1x1 projection (pre-downsampled input) or identity from xpad interior.
    if has_proj:
        xs = xs_ref[0].reshape(m, cin)
        out = out + (jnp.dot(xs, wsc_ref[...], preferred_element_type=jnp.float32)
                     + bsc_ref[...])
    else:
        out = out + xpad_ref[pl.ds(1, ho), pl.ds(1, wo), :].reshape(m, cout).astype(jnp.float32)

    out = jnp.maximum(out, 0.0)
    o_ref[0] = out.reshape(ho, wo, cout).astype(o_ref.dtype)


# ----------------------------------------------------------------------------
# BasicBlock forward (NCHW in / NCHW out)
# ----------------------------------------------------------------------------
def basic_block_forward(x_nchw, params, stride=1, compute_dtype=jnp.float32):
    x = jnp.transpose(x_nchw, (0, 2, 3, 1))            # NCHW -> NHWC (once per block here;
    N, H, W, Cin = x.shape                              #  in a real net: once per model)
    Cout = params["w1"].shape[-1]
    assert H % stride == 0 and W % stride == 0
    Ho, Wo = H // stride, W // stride

    Cin_p = _round_up(Cin, _LANE)
    Cout_p = _round_up(Cout, _LANE)

    # Lane-dense channel padding + cast to compute dtype ONCE (review: no hot-path casts).
    xp = jnp.pad(x, ((0, 0), (0, 0), (0, 0), (0, Cin_p - Cin))).astype(compute_dtype)

    # Fold BN scale into weights; reshape to (9, Cin, Cout) per-tap slabs.
    w1 = params["w1"] * params["s1"]
    w1 = jnp.pad(w1, ((0, 0), (0, 0), (0, Cin_p - Cin), (0, Cout_p - Cout)))
    w1 = w1.reshape(9, Cin_p, Cout_p).astype(compute_dtype)
    b1 = jnp.pad(params["b1"], (0, Cout_p - Cout)).reshape(1, Cout_p).astype(jnp.float32)

    w2 = params["w2"] * params["s2"]
    w2 = jnp.pad(w2, ((0, 0), (0, 0), (0, Cout_p - Cout), (0, Cout_p - Cout)))
    w2 = w2.reshape(9, Cout_p, Cout_p).astype(compute_dtype)
    b2 = jnp.pad(params["b2"], (0, Cout_p - Cout)).reshape(1, Cout_p).astype(jnp.float32)

    has_proj = (stride != 1) or (Cin != Cout)

    inputs = [xp, w1, b1, w2, b2]
    in_specs = [
        pl.BlockSpec(memory_space=pl.ANY),                        # raw HBM; manual DMA
        pl.BlockSpec((9, Cin_p, Cout_p), lambda n: (0, 0, 0)),
        pl.BlockSpec((1, Cout_p), lambda n: (0, 0)),
        pl.BlockSpec((9, Cout_p, Cout_p), lambda n: (0, 0, 0)),
        pl.BlockSpec((1, Cout_p), lambda n: (0, 0)),
    ]
    if has_proj:
        xs = xp if stride == 1 else xp[:, ::stride, ::stride, :]  # pre-downsampled shortcut
        wsc = params["w_sc"] * params["s_sc"]
        wsc = jnp.pad(wsc, ((0, Cin_p - Cin), (0, Cout_p - Cout))).astype(compute_dtype)
        bsc = jnp.pad(params["b_sc"], (0, Cout_p - Cout)).reshape(1, Cout_p).astype(jnp.float32)
        inputs += [xs, wsc, bsc]
        in_specs += [
            pl.BlockSpec((1, Ho, Wo, Cin_p), lambda n: (n, 0, 0, 0)),
            pl.BlockSpec((Cin_p, Cout_p), lambda n: (0, 0)),
            pl.BlockSpec((1, Cout_p), lambda n: (0, 0)),
        ]

    kernel = functools.partial(_basic_block_kernel, stride=stride, has_proj=has_proj)

    out = pl.pallas_call(
        kernel,
        grid=(N,),
        in_specs=in_specs,
        out_specs=pl.BlockSpec((1, Ho, Wo, Cout_p), lambda n: (n, 0, 0, 0)),
        out_shape=jax.ShapeDtypeStruct((N, Ho, Wo, Cout_p), x.dtype),
        scratch_shapes=[
            pltpu.VMEM((H + 2, W + 2, Cin_p), compute_dtype),     # padded input
            pltpu.VMEM((Ho + 2, Wo + 2, Cout_p), compute_dtype),  # padded conv1 output
            pltpu.SemaphoreType.DMA,
        ],
        compiler_params=pltpu.CompilerParams(
            dimension_semantics=("parallel",),
            vmem_limit_bytes=64 * 1024 * 1024),
    )(*inputs)

    out = out[..., :Cout]                               # drop channel padding
    return jnp.transpose(out, (0, 3, 1, 2))             # NHWC -> NCHW


# ----------------------------------------------------------------------------
# Parameter init + pure-JAX reference
# ----------------------------------------------------------------------------
def fuse_bn(gamma, beta, mean, var, eps=1e-5):
    scale = gamma / jnp.sqrt(var + eps)
    return scale, beta - mean * scale


def init_params(key, in_c, out_c):
    ks = jax.random.split(key, 12)

    def bn(k0, k1, k2, k3):
        gamma = jax.random.uniform(k0, (out_c,), minval=0.5, maxval=1.5)
        beta = 0.1 * jax.random.normal(k1, (out_c,))
        mean = 0.1 * jax.random.normal(k2, (out_c,))
        var = jax.random.uniform(k3, (out_c,), minval=0.5, maxval=1.5)
        return fuse_bn(gamma, beta, mean, var)

    w1 = 0.1 * jax.random.normal(ks[0], (3, 3, in_c, out_c), jnp.float32)
    w2 = 0.1 * jax.random.normal(ks[1], (3, 3, out_c, out_c), jnp.float32)
    w_sc = 0.1 * jax.random.normal(ks[2], (in_c, out_c), jnp.float32)
    s1, b1 = bn(ks[3], ks[4], ks[5], ks[6])
    s2, b2 = bn(ks[7], ks[8], ks[9], ks[10])
    gamma = jax.random.uniform(ks[11], (out_c,), minval=0.5, maxval=1.5)
    s_sc, b_sc = fuse_bn(gamma, jnp.zeros((out_c,)), jnp.zeros((out_c,)), jnp.ones((out_c,)))
    return dict(w1=w1, s1=s1, b1=b1, w2=w2, s2=s2, b2=b2, w_sc=w_sc, s_sc=s_sc, b_sc=b_sc)


def ref_basic_block(x_nchw, p, stride=1):
    x = jnp.transpose(x_nchw, (0, 2, 3, 1))
    dn = ("NHWC", "HWIO", "NHWC")
    in_c, out_c = x.shape[-1], p["w1"].shape[-1]
    y = jax.lax.conv_general_dilated(x, p["w1"], (stride, stride), ((1, 1), (1, 1)),
                                     dimension_numbers=dn)
    y = jnp.maximum(y * p["s1"] + p["b1"], 0.0)
    y2 = jax.lax.conv_general_dilated(y, p["w2"], (1, 1), ((1, 1), (1, 1)),
                                      dimension_numbers=dn)
    y2 = y2 * p["s2"] + p["b2"]
    if stride != 1 or in_c != out_c:
        w_sc4 = p["w_sc"].reshape(1, 1, in_c, out_c)
        sc = jax.lax.conv_general_dilated(x, w_sc4, (stride, stride), ((0, 0), (0, 0)),
                                          dimension_numbers=dn)
        sc = sc * p["s_sc"] + p["b_sc"]
    else:
        sc = x
    out = jnp.maximum(y2 + sc, 0.0)
    return jnp.transpose(out, (0, 3, 1, 2))


# ----------------------------------------------------------------------------
if __name__ == "__main__":
    key = jax.random.PRNGKey(0)

    configs = [
        # (Cin, Cout, stride, compute_dtype, atol/rtol)      exercised path
        (4, 8, 1, jnp.float32, 1e-3),    # projection shortcut, stride 1
        (8, 8, 1, jnp.float32, 1e-3),    # identity shortcut
        (4, 8, 2, jnp.float32, 1e-3),    # in-kernel stride + projection shortcut
        (4, 8, 2, jnp.bfloat16, 5e-2),   # bf16 MXU path (tolerance set by bf16 mantissa)
    ]

    N, H, W = 2, 16, 16
    for i, (Cin, Cout, stride, cdt, tol) in enumerate(configs):
        k_x, k_p = jax.random.split(jax.random.fold_in(key, i))
        x = jax.random.normal(k_x, (N, Cin, H, W), jnp.float32)      # NCHW, like PyTorch
        params = init_params(k_p, Cin, Cout)

        out = jax.block_until_ready(
            basic_block_forward(x, params, stride=stride, compute_dtype=cdt))
        ref = jax.block_until_ready(ref_basic_block(x, params, stride=stride))

        assert out.shape == (N, Cout, H // stride, W // stride)
        assert jnp.allclose(out, ref, atol=tol, rtol=tol), f"mismatch in config {i}"

    print("KERNEL_OK")
</pallas_src>

<mosaic_0001>
module attributes {stable_mosaic.version = 11 : i64} {
  func.func @_basic_block_kernel(%arg0: i32, %arg1: memref<2x16x16x128xf32, #tpu.memory_space<any>>, %arg2: memref<9x128x128xf32, #tpu.memory_space<vmem>>, %arg3: memref<1x128xf32, #tpu.memory_space<vmem>>, %arg4: memref<9x128x128xf32, #tpu.memory_space<vmem>>, %arg5: memref<1x128xf32, #tpu.memory_space<vmem>>, %arg6: memref<1x16x16x128xf32, #tpu.memory_space<vmem>>, %arg7: memref<128x128xf32, #tpu.memory_space<vmem>>, %arg8: memref<1x128xf32, #tpu.memory_space<vmem>>, %arg9: memref<1x16x16x128xf32, #tpu.memory_space<vmem>>, %arg10: memref<18x18x128xf32, #tpu.memory_space<vmem>>, %arg11: memref<18x18x128xf32, #tpu.memory_space<vmem>>, %arg12: memref<!tpu.dma_semaphore, #tpu.memory_space<semaphore_mem>>) attributes {dimension_semantics = [#tpu.dimension_semantics<parallel>], iteration_bounds = array<i64: 2>, scalar_prefetch = 0 : i64, scratch_operands = 3 : i64, tpu.core_type = #tpu.core_type<tc>, window_params = [{}, {pipeline_mode = #tpu.pipeline_mode<synchronous>, transform_indices = @transform_1, window_bounds = array<i64: 9, 128, 128>}, {pipeline_mode = #tpu.pipeline_mode<synchronous>, transform_indices = @transform_2, window_bounds = array<i64: 1, 128>}, {pipeline_mode = #tpu.pipeline_mode<synchronous>, transform_indices = @transform_3, window_bounds = array<i64: 9, 128, 128>}, {pipeline_mode = #tpu.pipeline_mode<synchronous>, transform_indices = @transform_4, window_bounds = array<i64: 1, 128>}, {transform_indices = @transform_5, window_bounds = array<i64: 1, 16, 16, 128>}, {pipeline_mode = #tpu.pipeline_mode<synchronous>, transform_indices = @transform_6, window_bounds = array<i64: 128, 128>}, {pipeline_mode = #tpu.pipeline_mode<synchronous>, transform_indices = @transform_7, window_bounds = array<i64: 1, 128>}, {transform_indices = @transform_8, window_bounds = array<i64: 1, 16, 16, 128>}]} {
    %c0_i32 = arith.constant 0 : i32
    %c0_i32_0 = arith.constant 0 : i32
    %c0_i32_1 = arith.constant 0 : i32
    %0 = tpu.memref_slice %arg1[%arg0, %c0_i32, %c0_i32_0, %c0_i32_1] : memref<2x16x16x128xf32, #tpu.memory_space<any>> -> memref<1x16x16x128xf32, #tpu.memory_space<any>>
    %1 = tpu.memref_squeeze %0 : memref<1x16x16x128xf32, #tpu.memory_space<any>> -> memref<16x16x128xf32, #tpu.memory_space<any>>
    %c1_i32 = arith.constant 1 : i32
    %c1_i32_2 = arith.constant 1 : i32
    %c0_i32_3 = arith.constant 0 : i32
    %2 = tpu.memref_slice %arg10[%c1_i32, %c1_i32_2, %c0_i32_3] : memref<18x18x128xf32, #tpu.memory_space<vmem>> -> memref<16x16x128xf32, #tpu.memory_space<vmem>>
    tpu.enqueue_dma source(%1 : memref<16x16x128xf32, #tpu.memory_space<any>>) target(%2 : memref<16x16x128xf32, #tpu.memory_space<vmem>>) target_semaphore(%arg12 : memref<!tpu.dma_semaphore, #tpu.memory_space<semaphore_mem>>)
    %cst = arith.constant 0.000000e+00 : f32
    %3 = vector.broadcast %cst : f32 to vector<1x18x128xf32>
    %c0 = arith.constant 0 : index
    %c0_4 = arith.constant 0 : index
    %c0_5 = arith.constant 0 : index
    %4 = vector.load %arg10[%c0, %c0_4, %c0_5] : memref<18x18x128xf32, #tpu.memory_space<vmem>>, vector<1x18x128xf32>
    tpu.vector_store %arg10[%c0, %c0_4, %c0_5], %3 {strides = array<i32>} : memref<18x18x128xf32, #tpu.memory_space<vmem>>, vector<1x18x128xf32>,
    %c17 = arith.constant 17 : index
    %c0_6 = arith.constant 0 : index
    %c0_7 = arith.constant 0 : index
    %5 = vector.load %arg10[%c17, %c0_6, %c0_7] : memref<18x18x128xf32, #tpu.memory_space<vmem>>, vector<1x18x128xf32>
    tpu.vector_store %arg10[%c17, %c0_6, %c0_7], %3 {strides = array<i32>} : memref<18x18x128xf32, #tpu.memory_space<vmem>>, vector<1x18x128xf32>,
    %cst_8 = arith.constant 0.000000e+00 : f32
    %6 = vector.broadcast %cst_8 : f32 to vector<18x1x128xf32>
    %c0_9 = arith.constant 0 : index
    %c0_10 = arith.constant 0 : index
    %c0_11 = arith.constant 0 : index
    %7 = vector.load %arg10[%c0_9, %c0_10, %c0_11] : memref<18x18x128xf32, #tpu.memory_space<vmem>>, vector<18x1x128xf32>
    tpu.vector_store %arg10[%c0_9, %c0_10, %c0_11], %6 {strides = array<i32>} : memref<18x18x128xf32, #tpu.memory_space<vmem>>, vector<18x1x128xf32>,
    %c0_12 = arith.constant 0 : index
    %c17_13 = arith.constant 17 : index
    %c0_14 = arith.constant 0 : index
    %8 = vector.load %arg10[%c0_12, %c17_13, %c0_14] : memref<18x18x128xf32, #tpu.memory_space<vmem>>, vector<18x1x128xf32>
    tpu.vector_store %arg10[%c0_12, %c17_13, %c0_14], %6 {strides = array<i32>} : memref<18x18x128xf32, #tpu.memory_space<vmem>>, vector<18x1x128xf32>,
    %cst_15 = arith.constant 0.000000e+00 : f32
    %9 = vector.broadcast %cst_15 : f32 to vector<1x18x128xf32>
    %c0_16 = arith.constant 0 : index
    %c0_17 = arith.constant 0 : index
    %c0_18 = arith.constant 0 : index
    %10 = vector.load %arg11[%c0_16, %c0_17, %c0_18] : memref<18x18x128xf32, #tpu.memory_space<vmem>>, vector<1x18x128xf32>
    tpu.vector_store %arg11[%c0_16, %c0_17, %c0_18], %9 {strides = array<i32>} : memref<18x18x128xf32, #tpu.memory_space<vmem>>, vector<1x18x128xf32>,
    %c17_19 = arith.constant 17 : index
    %c0_20 = arith.constant 0 : index
    %c0_21 = arith.constant 0 : index
    %11 = vector.load %arg11[%c17_19, %c0_20, %c0_21] : memref<18x18x128xf32, #tpu.memory_space<vmem>>, vector<1x18x128xf32>
    tpu.vector_store %arg11[%c17_19, %c0_20, %c0_21], %9 {strides = array<i32>} : memref<18x18x128xf32, #tpu.memory_space<vmem>>, vector<1x18x128xf32>,
    %cst_22 = arith.constant 0.000000e+00 : f32
    %12 = vector.broadcast %cst_22 : f32 to vector<18x1x128xf32>
    %c0_23 = arith.constant 0 : index
    %c0_24 = arith.constant 0 : index
    %c0_25 = arith.constant 0 : index
    %13 = vector.load %arg11[%c0_23, %c0_24, %c0_25] : memref<18x18x128xf32, #tpu.memory_space<vmem>>, vector<18x1x128xf32>
    tpu.vector_store %arg11[%c0_23, %c0_24, %c0_25], %12 {strides = array<i32>} : memref<18x18x128xf32, #tpu.memory_space<vmem>>, vector<18x1x128xf32>,
    %c0_26 = arith.constant 0 : index
    %c17_27 = arith.constant 17 : index
    %c0_28 = arith.constant 0 : index
    %14 = vector.load %arg11[%c0_26, %c17_27, %c0_28] : memref<18x18x128xf32, #tpu.memory_space<vmem>>, vector<18x1x128xf32>
    tpu.vector_store %arg11[%c0_26, %c17_27, %c0_28], %12 {strides = array<i32>} : memref<18x18x128xf32, #tpu.memory_space<vmem>>, vector<18x1x128xf32>,
    %c0_i32_29 = arith.constant 0 : i32
    %c0_i32_30 = arith.constant 0 : i32
    %c0_i32_31 = arith.constant 0 : i32
    %15 = tpu.memref_slice %arg1[%arg0, %c0_i32_29, %c0_i32_30, %c0_i32_31] : memref<2x16x16x128xf32, #tpu.memory_space<any>> -> memref<1x16x16x128xf32, #tpu.memory_space<any>>
    %16 = tpu.memref_squeeze %15 : memref<1x16x16x128xf32, #tpu.memory_space<any>> -> memref<16x16x128xf32, #tpu.memory_space<any>>
    %c1_i32_32 = arith.constant 1 : i32
    %c1_i32_33 = arith.constant 1 : i32
    %c0_i32_34 = arith.constant 0 : i32
    %17 = tpu.memref_slice %arg10[%c1_i32_32, %c1_i32_33, %c0_i32_34] : memref<18x18x128xf32, #tpu.memory_space<vmem>> -> memref<16x16x128xf32, #tpu.memory_space<vmem>>
    tpu.wait_dma2 semaphore(%arg12 : memref<!tpu.dma_semaphore, #tpu.memory_space<semaphore_mem>>) src(%16 : memref<16x16x128xf32, #tpu.memory_space<any>>) dst(%17 : memref<16x16x128xf32, #tpu.memory_space<vmem>>)
    %cst_35 = arith.constant 0.000000e+00 : f32
    %18 = vector.broadcast %cst_35 : f32 to vector<256x128xf32>
    %c0_36 = arith.constant 0 : index
    %c0_37 = arith.constant 0 : index
    %c0_38 = arith.constant 0 : index
    %19 = vector.load %arg10[%c0_36, %c0_37, %c0_38] : memref<18x18x128xf32, #tpu.memory_space<vmem>>, vector<16x16x128xf32>
    %20 = vector.shape_cast %19 : vector<16x16x128xf32> to vector<256x128xf32>
    %c0_39 = arith.constant 0 : index
    %c0_40 = arith.constant 0 : index
    %c0_41 = arith.constant 0 : index
    %21 = vector.load %arg2[%c0_39, %c0_40, %c0_41] : memref<9x128x128xf32, #tpu.memory_space<vmem>>, vector<1x128x128xf32>
    %22 = vector.shape_cast %21 : vector<1x128x128xf32> to vector<128x128xf32>
    %cst_42 = arith.constant dense<0.000000e+00> : vector<256x128xf32>
    %23 = tpu.matmul %20, %22, %cst_42 {dimension_numbers = #tpu.dot_dimension_numbers<[1], [0], [0], [1], [0, 0, 1, 1], [], []>} : vector<256x128xf32>, vector<128x128xf32>, vector<256x128xf32> -> vector<256x128xf32>
    %24 = arith.addf %18, %23 : vector<256x128xf32>
    %c0_43 = arith.constant 0 : index
    %c1 = arith.constant 1 : index
    %c0_44 = arith.constant 0 : index
    %25 = vector.load %arg10[%c0_43, %c1, %c0_44] : memref<18x18x128xf32, #tpu.memory_space<vmem>>, vector<16x16x128xf32>
    %26 = vector.shape_cast %25 : vector<16x16x128xf32> to vector<256x128xf32>
    %c1_45 = arith.constant 1 : index
    %c0_46 = arith.constant 0 : index
    %c0_47 = arith.constant 0 : index
    %27 = vector.load %arg2[%c1_45, %c0_46, %c0_47] : memref<9x128x128xf32, #tpu.memory_space<vmem>>, vector<1x128x128xf32>
    %28 = vector.shape_cast %27 : vector<1x128x128xf32> to vector<128x128xf32>
    %cst_48 = arith.constant dense<0.000000e+00> : vector<256x128xf32>
    %29 = tpu.matmul %26, %28, %cst_48 {dimension_numbers = #tpu.dot_dimension_numbers<[1], [0], [0], [1], [0, 0, 1, 1], [], []>} : vector<256x128xf32>, vector<128x128xf32>, vector<256x128xf32> -> vector<256x128xf32>
    %30 = arith.addf %24, %29 : vector<256x128xf32>
    %c0_49 = arith.constant 0 : index
    %c2 = arith.constant 2 : index
    %c0_50 = arith.constant 0 : index
    %31 = vector.load %arg10[%c0_49, %c2, %c0_50] : memref<18x18x128xf32, #tpu.memory_space<vmem>>, vector<16x16x128xf32>
    %32 = vector.shape_cast %31 : vector<16x16x128xf32> to vector<256x128xf32>
    %c2_51 = arith.constant 2 : index
    %c0_52 = arith.constant 0 : index
    %c0_53 = arith.constant 0 : index
    %33 = vector.load %arg2[%c2_51, %c0_52, %c0_53] : memref<9x128x128xf32, #tpu.memory_space<vmem>>, vector<1x128x128xf32>
    %34 = vector.shape_cast %33 : vector<1x128x128xf32> to vector<128x128xf32>
    %cst_54 = arith.constant dense<0.000000e+00> : vector<256x128xf32>
    %35 = tpu.matmul %32, %34, %cst_54 {dimension_numbers = #tpu.dot_dimension_numbers<[1], [0], [0], [1], [0, 0, 1, 1], [], []>} : vector<256x128xf32>, vector<128x128xf32>, vector<256x128xf32> -> vector<256x128xf32>
    %36 = arith.addf %30, %35 : vector<256x128xf32>
    %c1_55 = arith.constant 1 : index
    %c0_56 = arith.constant 0 : index
    %c0_57 = arith.constant 0 : index
    %37 = vector.load %arg10[%c1_55, %c0_56, %c0_57] : memref<18x18x128xf32, #tpu.memory_space<vmem>>, vector<16x16x128xf32>
    %38 = vector.shape_cast %37 : vector<16x16x128xf32> to vector<256x128xf32>
    %c3 = arith.constant 3 : index
    %c0_58 = arith.constant 0 : index
    %c0_59 = arith.constant 0 : index
    %39 = vector.load %arg2[%c3, %c0_58, %c0_59] : memref<9x128x128xf32, #tpu.memory_space<vmem>>, vector<1x128x128xf32>
    %40 = vector.shape_cast %39 : vector<1x128x128xf32> to vector<128x128xf32>
    %cst_60 = arith.constant dense<0.000000e+00> : vector<256x128xf32>
    %41 = tpu.matmul %38, %40, %cst_60 {dimension_numbers = #tpu.dot_dimension_numbers<[1], [0], [0], [1], [0, 0, 1, 1], [], []>} : vector<256x128xf32>, vector<128x128xf32>, vector<256x128xf32> -> vector<256x128xf32>
    %42 = arith.addf %36, %41 : vector<256x128xf32>
    %c1_61 = arith.constant 1 : index
    %c1_62 = arith.constant 1 : index
    %c0_63 = arith.constant 0 : index
    %43 = vector.load %arg10[%c1_61, %c1_62, %c0_63] : memref<18x18x128xf32, #tpu.memory_space<vmem>>, vector<16x16x128xf32>
    %44 = vector.shape_cast %43 : vector<16x16x128xf32> to vector<256x128xf32>
    %c4 = arith.constant 4 : index
    %c0_64 = arith.constant 0 : index
    %c0_65 = arith.constant 0 : index
    %45 = vector.load %arg2[%c4, %c0_64, %c0_65] : memref<9x128x128xf32, #tpu.memory_space<vmem>>, vector<1x128x128xf32>
    %46 = vector.shape_cast %45 : vector<1x128x128xf32> to vector<128x128xf32>
    %cst_66 = arith.constant dense<0.000000e+00> : vector<256x128xf32>
    %47 = tpu.matmul %44, %46, %cst_66 {dimension_numbers = #tpu.dot_dimension_numbers<[1], [0], [0], [1], [0, 0, 1, 1], [], []>} : vector<256x128xf32>, vector<128x128xf32>, vector<256x128xf32> -> vector<256x128xf32>
    %48 = arith.addf %42, %47 : vector<256x128xf32>
    %c1_67 = arith.constant 1 : index
    %c2_68 = arith.constant 2 : index
    %c0_69 = arith.constant 0 : index
    %49 = vector.load %arg10[%c1_67, %c2_68, %c0_69] : memref<18x18x128xf32, #tpu.memory_space<vmem>>, vector<16x16x128xf32>
    %50 = vector.shape_cast %49 : vector<16x16x128xf32> to vector<256x128xf32>
    %c5 = arith.constant 5 : index
    %c0_70 = arith.constant 0 : index
    %c0_71 = arith.constant 0 : index
    %51 = vector.load %arg2[%c5, %c0_70, %c0_71] : memref<9x128x128xf32, #tpu.memory_space<vmem>>, vector<1x128x128xf32>
    %52 = vector.shape_cast %51 : vector<1x128x128xf32> to vector<128x128xf32>
    %cst_72 = arith.constant dense<0.000000e+00> : vector<256x128xf32>
    %53 = tpu.matmul %50, %52, %cst_72 {dimension_numbers = #tpu.dot_dimension_numbers<[1], [0], [0], [1], [0, 0, 1, 1], [], []>} : vector<256x128xf32>, vector<128x128xf32>, vector<256x128xf32> -> vector<256x128xf32>
    %54 = arith.addf %48, %53 : vector<256x128xf32>
    %c2_73 = arith.constant 2 : index
    %c0_74 = arith.constant 0 : index
    %c0_75 = arith.constant 0 : index
    %55 = vector.load %arg10[%c2_73, %c0_74, %c0_75] : memref<18x18x128xf32, #tpu.memory_space<vmem>>, vector<16x16x128xf32>
    %56 = vector.shape_cast %55 : vector<16x16x128xf32> to vector<256x128xf32>
    %c6 = arith.constant 6 : index
    %c0_76 = arith.constant 0 : index
    %c0_77 = arith.constant 0 : index
    %57 = vector.load %arg2[%c6, %c0_76, %c0_77] : memref<9x128x128xf32, #tpu.memory_space<vmem>>, vector<1x128x128xf32>
    %58 = vector.shape_cast %57 : vector<1x128x128xf32> to vector<128x128xf32>
    %cst_78 = arith.constant dense<0.000000e+00> : vector<256x128xf32>
    %59 = tpu.matmul %56, %58, %cst_78 {dimension_numbers = #tpu.dot_dimension_numbers<[1], [0], [0], [1], [0, 0, 1, 1], [], []>} : vector<256x128xf32>, vector<128x128xf32>, vector<256x128xf32> -> vector<256x128xf32>
    %60 = arith.addf %54, %59 : vector<256x128xf32>
    %c2_79 = arith.constant 2 : index
    %c1_80 = arith.constant 1 : index
    %c0_81 = arith.constant 0 : index
    %61 = vector.load %arg10[%c2_79, %c1_80, %c0_81] : memref<18x18x128xf32, #tpu.memory_space<vmem>>, vector<16x16x128xf32>
    %62 = vector.shape_cast %61 : vector<16x16x128xf32> to vector<256x128xf32>
    %c7 = arith.constant 7 : index
    %c0_82 = arith.constant 0 : index
    %c0_83 = arith.constant 0 : index
    %63 = vector.load %arg2[%c7, %c0_82, %c0_83] : memref<9x128x128xf32, #tpu.memory_space<vmem>>, vector<1x128x128xf32>
    %64 = vector.shape_cast %63 : vector<1x128x128xf32> to vector<128x128xf32>
    %cst_84 = arith.constant dense<0.000000e+00> : vector<256x128xf32>
    %65 = tpu.matmul %62, %64, %cst_84 {dimension_numbers = #tpu.dot_dimension_numbers<[1], [0], [0], [1], [0, 0, 1, 1], [], []>} : vector<256x128xf32>, vector<128x128xf32>, vector<256x128xf32> -> vector<256x128xf32>
    %66 = arith.addf %60, %65 : vector<256x128xf32>
    %c2_85 = arith.constant 2 : index
    %c2_86 = arith.constant 2 : index
    %c0_87 = arith.constant 0 : index
    %67 = vector.load %arg10[%c2_85, %c2_86, %c0_87] : memref<18x18x128xf32, #tpu.memory_space<vmem>>, vector<16x16x128xf32>
    %68 = vector.shape_cast %67 : vector<16x16x128xf32> to vector<256x128xf32>
    %c8 = arith.constant 8 : index
    %c0_88 = arith.constant 0 : index
    %c0_89 = arith.constant 0 : index
    %69 = vector.load %arg2[%c8, %c0_88, %c0_89] : memref<9x128x128xf32, #tpu.memory_space<vmem>>, vector<1x128x128xf32>
    %70 = vector.shape_cast %69 : vector<1x128x128xf32> to vector<128x128xf32>
    %cst_90 = arith.constant dense<0.000000e+00> : vector<256x128xf32>
    %71 = tpu.matmul %68, %70, %cst_90 {dimension_numbers = #tpu.dot_dimension_numbers<[1], [0], [0], [1], [0, 0, 1, 1], [], []>} : vector<256x128xf32>, vector<128x128xf32>, vector<256x128xf32> -> vector<256x128xf32>
    %72 = arith.addf %66, %71 : vector<256x128xf32>
    %c0_91 = arith.constant 0 : index
    %c0_92 = arith.constant 0 : index
    %73 = vector.load %arg3[%c0_91, %c0_92] : memref<1x128xf32, #tpu.memory_space<vmem>>, vector<1x128xf32>
    %74 = vector.broadcast %73 : vector<1x128xf32> to vector<256x128xf32>
    %75 = arith.addf %72, %74 : vector<256x128xf32>
    %cst_93 = arith.constant 0.000000e+00 : f32
    %76 = vector.broadcast %cst_93 : f32 to vector<256x128xf32>
    %77 = arith.maximumf %75, %76 : vector<256x128xf32>
    %78 = vector.shape_cast %77 : vector<256x128xf32> to vector<16x16x128xf32>
    %c1_94 = arith.constant 1 : index
    %c1_95 = arith.constant 1 : index
    %c0_96 = arith.constant 0 : index
    %79 = vector.load %arg11[%c1_94, %c1_95, %c0_96] : memref<18x18x128xf32, #tpu.memory_space<vmem>>, vector<16x16x128xf32>
    tpu.vector_store %arg11[%c1_94, %c1_95, %c0_96], %78 {strides = array<i32>} : memref<18x18x128xf32, #tpu.memory_space<vmem>>, vector<16x16x128xf32>,
    %cst_97 = arith.constant 0.000000e+00 : f32
    %80 = vector.broadcast %cst_97 : f32 to vector<256x128xf32>
    %c0_98 = arith.constant 0 : index
    %c0_99 = arith.constant 0 : index
    %c0_100 = arith.constant 0 : index
    %81 = vector.load %arg11[%c0_98, %c0_99, %c0_100] : memref<18x18x128xf32, #tpu.memory_space<vmem>>, vector<16x16x128xf32>
    %82 = vector.shape_cast %81 : vector<16x16x128xf32> to vector<256x128xf32>
    %c0_101 = arith.constant 0 : index
    %c0_102 = arith.constant 0 : index
    %c0_103 = arith.constant 0 : index
    %83 = vector.load %arg4[%c0_101, %c0_102, %c0_103] : memref<9x128x128xf32, #tpu.memory_space<vmem>>, vector<1x128x128xf32>
    %84 = vector.shape_cast %83 : vector<1x128x128xf32> to vector<128x128xf32>
    %cst_104 = arith.constant dense<0.000000e+00> : vector<256x128xf32>
    %85 = tpu.matmul %82, %84, %cst_104 {dimension_numbers = #tpu.dot_dimension_numbers<[1], [0], [0], [1], [0, 0, 1, 1], [], []>} : vector<256x128xf32>, vector<128x128xf32>, vector<256x128xf32> -> vector<256x128xf32>
    %86 = arith.addf %80, %85 : vector<256x128xf32>
    %c0_105 = arith.constant 0 : index
    %c1_106 = arith.constant 1 : index
    %c0_107 = arith.constant 0 : index
    %87 = vector.load %arg11[%c0_105, %c1_106, %c0_107] : memref<18x18x128xf32, #tpu.memory_space<vmem>>, vector<16x16x128xf32>
    %88 = vector.shape_cast %87 : vector<16x16x128xf32> to vector<256x128xf32>
    %c1_108 = arith.constant 1 : index
    %c0_109 = arith.constant 0 : index
    %c0_110 = arith.constant 0 : index
    %89 = vector.load %arg4[%c1_108, %c0_109, %c0_110] : memref<9x128x128xf32, #tpu.memory_space<vmem>>, vector<1x128x128xf32>
    %90 = vector.shape_cast %89 : vector<1x128x128xf32> to vector<128x128xf32>
    %cst_111 = arith.constant dense<0.000000e+00> : vector<256x128xf32>
    %91 = tpu.matmul %88, %90, %cst_111 {dimension_numbers = #tpu.dot_dimension_numbers<[1], [0], [0], [1], [0, 0, 1, 1], [], []>} : vector<256x128xf32>, vector<128x128xf32>, vector<256x128xf32> -> vector<256x128xf32>
    %92 = arith.addf %86, %91 : vector<256x128xf32>
    %c0_112 = arith.constant 0 : index
    %c2_113 = arith.constant 2 : index
    %c0_114 = arith.constant 0 : index
    %93 = vector.load %arg11[%c0_112, %c2_113, %c0_114] : memref<18x18x128xf32, #tpu.memory_space<vmem>>, vector<16x16x128xf32>
    %94 = vector.shape_cast %93 : vector<16x16x128xf32> to vector<256x128xf32>
    %c2_115 = arith.constant 2 : index
    %c0_116 = arith.constant 0 : index
    %c0_117 = arith.constant 0 : index
    %95 = vector.load %arg4[%c2_115, %c0_116, %c0_117] : memref<9x128x128xf32, #tpu.memory_space<vmem>>, vector<1x128x128xf32>
    %96 = vector.shape_cast %95 : vector<1x128x128xf32> to vector<128x128xf32>
    %cst_118 = arith.constant dense<0.000000e+00> : vector<256x128xf32>
    %97 = tpu.matmul %94, %96, %cst_118 {dimension_numbers = #tpu.dot_dimension_numbers<[1], [0], [0], [1], [0, 0, 1, 1], [], []>} : vector<256x128xf32>, vector<128x128xf32>, vector<256x128xf32> -> vector<256x128xf32>
    %98 = arith.addf %92, %97 : vector<256x128xf32>
    %c1_119 = arith.constant 1 : index
    %c0_120 = arith.constant 0 : index
    %c0_121 = arith.constant 0 : index
    %99 = vector.load %arg11[%c1_119, %c0_120, %c0_121] : memref<18x18x128xf32, #tpu.memory_space<vmem>>, vector<16x16x128xf32>
    %100 = vector.shape_cast %99 : vector<16x16x128xf32> to vector<256x128xf32>
    %c3_122 = arith.constant 3 : index
    %c0_123 = arith.constant 0 : index
    %c0_124 = arith.constant 0 : index
    %101 = vector.load %arg4[%c3_122, %c0_123, %c0_124] : memref<9x128x128xf32, #tpu.memory_space<vmem>>, vector<1x128x128xf32>
    %102 = vector.shape_cast %101 : vector<1x128x128xf32> to vector<128x128xf32>
    %cst_125 = arith.constant dense<0.000000e+00> : vector<256x128xf32>
    %103 = tpu.matmul %100, %102, %cst_125 {dimension_numbers = #tpu.dot_dimension_numbers<[1], [0], [0], [1], [0, 0, 1, 1], [], []>} : vector<256x128xf32>, vector<128x128xf32>, vector<256x128xf32> -> vector<256x128xf32>
    %104 = arith.addf %98, %103 : vector<256x128xf32>
    %c1_126 = arith.constant 1 : index
    %c1_127 = arith.constant 1 : index
    %c0_128 = arith.constant 0 : index
    %105 = vector.load %arg11[%c1_126, %c1_127, %c0_128] : memref<18x18x128xf32, #tpu.memory_space<vmem>>, vector<16x16x128xf32>
    %106 = vector.shape_cast %105 : vector<16x16x128xf32> to vector<256x128xf32>
    %c4_129 = arith.constant 4 : index
    %c0_130 = arith.constant 0 : index
    %c0_131 = arith.constant 0 : index
    %107 = vector.load %arg4[%c4_129, %c0_130, %c0_131] : memref<9x128x128xf32, #tpu.memory_space<vmem>>, vector<1x128x128xf32>
    %108 = vector.shape_cast %107 : vector<1x128x128xf32> to vector<128x128xf32>
    %cst_132 = arith.constant dense<0.000000e+00> : vector<256x128xf32>
    %109 = tpu.matmul %106, %108, %cst_132 {dimension_numbers = #tpu.dot_dimension_numbers<[1], [0], [0], [1], [0, 0, 1, 1], [], []>} : vector<256x128xf32>, vector<128x128xf32>, vector<256x128xf32> -> vector<256x128xf32>
    %110 = arith.addf %104, %109 : vector<256x128xf32>
    %c1_133 = arith.constant 1 : index
    %c2_134 = arith.constant 2 : index
    %c0_135 = arith.constant 0 : index
    %111 = vector.load %arg11[%c1_133, %c2_134, %c0_135] : memref<18x18x128xf32, #tpu.memory_space<vmem>>, vector<16x16x128xf32>
    %112 = vector.shape_cast %111 : vector<16x16x128xf32> to vector<256x128xf32>
    %c5_136 = arith.constant 5 : index
    %c0_137 = arith.constant 0 : index
    %c0_138 = arith.constant 0 : index
    %113 = vector.load %arg4[%c5_136, %c0_137, %c0_138] : memref<9x128x128xf32, #tpu.memory_space<vmem>>, vector<1x128x128xf32>
    %114 = vector.shape_cast %113 : vector<1x128x128xf32> to vector<128x128xf32>
    %cst_139 = arith.constant dense<0.000000e+00> : vector<256x128xf32>
    %115 = tpu.matmul %112, %114, %cst_139 {dimension_numbers = #tpu.dot_dimension_numbers<[1], [0], [0], [1], [0, 0, 1, 1], [], []>} : vector<256x128xf32>, vector<128x128xf32>, vector<256x128xf32> -> vector<256x128xf32>
    %116 = arith.addf %110, %115 : vector<256x128xf32>
    %c2_140 = arith.constant 2 : index
    %c0_141 = arith.constant 0 : index
    %c0_142 = arith.constant 0 : index
    %117 = vector.load %arg11[%c2_140, %c0_141, %c0_142] : memref<18x18x128xf32, #tpu.memory_space<vmem>>, vector<16x16x128xf32>
    %118 = vector.shape_cast %117 : vector<16x16x128xf32> to vector<256x128xf32>
    %c6_143 = arith.constant 6 : index
    %c0_144 = arith.constant 0 : index
    %c0_145 = arith.constant 0 : index
    %119 = vector.load %arg4[%c6_143, %c0_144, %c0_145] : memref<9x128x128xf32, #tpu.memory_space<vmem>>, vector<1x128x128xf32>
    %120 = vector.shape_cast %119 : vector<1x128x128xf32> to vector<128x128xf32>
    %cst_146 = arith.constant dense<0.000000e+00> : vector<256x128xf32>
    %121 = tpu.matmul %118, %120, %cst_146 {dimension_numbers = #tpu.dot_dimension_numbers<[1], [0], [0], [1], [0, 0, 1, 1], [], []>} : vector<256x128xf32>, vector<128x128xf32>, vector<256x128xf32> -> vector<256x128xf32>
    %122 = arith.addf %116, %121 : vector<256x128xf32>
    %c2_147 = arith.constant 2 : index
    %c1_148 = arith.constant 1 : index
    %c0_149 = arith.constant 0 : index
    %123 = vector.load %arg11[%c2_147, %c1_148, %c0_149] : memref<18x18x128xf32, #tpu.memory_space<vmem>>, vector<16x16x128xf32>
    %124 = vector.shape_cast %123 : vector<16x16x128xf32> to vector<256x128xf32>
    %c7_150 = arith.constant 7 : index
    %c0_151 = arith.constant 0 : index
    %c0_152 = arith.constant 0 : index
    %125 = vector.load %arg4[%c7_150, %c0_151, %c0_152] : memref<9x128x128xf32, #tpu.memory_space<vmem>>, vector<1x128x128xf32>
    %126 = vector.shape_cast %125 : vector<1x128x128xf32> to vector<128x128xf32>
    %cst_153 = arith.constant dense<0.000000e+00> : vector<256x128xf32>
    %127 = tpu.matmul %124, %126, %cst_153 {dimension_numbers = #tpu.dot_dimension_numbers<[1], [0], [0], [1], [0, 0, 1, 1], [], []>} : vector<256x128xf32>, vector<128x128xf32>, vector<256x128xf32> -> vector<256x128xf32>
    %128 = arith.addf %122, %127 : vector<256x128xf32>
    %c2_154 = arith.constant 2 : index
    %c2_155 = arith.constant 2 : index
    %c0_156 = arith.constant 0 : index
    %129 = vector.load %arg11[%c2_154, %c2_155, %c0_156] : memref<18x18x128xf32, #tpu.memory_space<vmem>>, vector<16x16x128xf32>
    %130 = vector.shape_cast %129 : vector<16x16x128xf32> to vector<256x128xf32>
    %c8_157 = arith.constant 8 : index
    %c0_158 = arith.constant 0 : index
    %c0_159 = arith.constant 0 : index
    %131 = vector.load %arg4[%c8_157, %c0_158, %c0_159] : memref<9x128x128xf32, #tpu.memory_space<vmem>>, vector<1x128x128xf32>
    %132 = vector.shape_cast %131 : vector<1x128x128xf32> to vector<128x128xf32>
    %cst_160 = arith.constant dense<0.000000e+00> : vector<256x128xf32>
    %133 = tpu.matmul %130, %132, %cst_160 {dimension_numbers = #tpu.dot_dimension_numbers<[1], [0], [0], [1], [0, 0, 1, 1], [], []>} : vector<256x128xf32>, vector<128x128xf32>, vector<256x128xf32> -> vector<256x128xf32>
    %134 = arith.addf %128, %133 : vector<256x128xf32>
    %c0_161 = arith.constant 0 : index
    %c0_162 = arith.constant 0 : index
    %135 = vector.load %arg5[%c0_161, %c0_162] : memref<1x128xf32, #tpu.memory_space<vmem>>, vector<1x128xf32>
    %136 = vector.broadcast %135 : vector<1x128xf32> to vector<256x128xf32>
    %137 = arith.addf %134, %136 : vector<256x128xf32>
    %c0_163 = arith.constant 0 : index
    %c0_164 = arith.constant 0 : index
    %c0_165 = arith.constant 0 : index
    %c0_166 = arith.constant 0 : index
    %138 = vector.load %arg6[%c0_163, %c0_164, %c0_165, %c0_166] : memref<1x16x16x128xf32, #tpu.memory_space<vmem>>, vector<1x16x16x128xf32>
    %139 = vector.shape_cast %138 : vector<1x16x16x128xf32> to vector<16x16x128xf32>
    %140 = vector.shape_cast %139 : vector<16x16x128xf32> to vector<256x128xf32>
    %c0_167 = arith.constant 0 : index
    %c0_168 = arith.constant 0 : index
    %141 = vector.load %arg7[%c0_167, %c0_168] : memref<128x128xf32, #tpu.memory_space<vmem>>, vector<128x128xf32>
    %cst_169 = arith.constant dense<0.000000e+00> : vector<256x128xf32>
    %142 = tpu.matmul %140, %141, %cst_169 {dimension_numbers = #tpu.dot_dimension_numbers<[1], [0], [0], [1], [0, 0, 1, 1], [], []>} : vector<256x128xf32>, vector<128x128xf32>, vector<256x128xf32> -> vector<256x128xf32>
    %c0_170 = arith.constant 0 : index
    %c0_171 = arith.constant 0 : index
    %143 = vector.load %arg8[%c0_170, %c0_171] : memref<1x128xf32, #tpu.memory_space<vmem>>, vector<1x128xf32>
    %144 = vector.broadcast %143 : vector<1x128xf32> to vector<256x128xf32>
    %145 = arith.addf %142, %144 : vector<256x128xf32>
    %146 = arith.addf %137, %145 : vector<256x128xf32>
    %cst_172 = arith.constant 0.000000e+00 : f32
    %147 = vector.broadcast %cst_172 : f32 to vector<256x128xf32>
    %148 = arith.maximumf %146, %147 : vector<256x128xf32>
    %149 = vector.shape_cast %148 : vector<256x128xf32> to vector<16x16x128xf32>
    %c0_173 = arith.constant 0 : index
    %c0_174 = arith.constant 0 : index
    %c0_175 = arith.constant 0 : index
    %c0_176 = arith.constant 0 : index
    %150 = vector.load %arg9[%c0_173, %c0_174, %c0_175, %c0_176] : memref<1x16x16x128xf32, #tpu.memory_space<vmem>>, vector<1x16x16x128xf32>
    %151 = vector.shape_cast %150 : vector<1x16x16x128xf32> to vector<16x16x128xf32>
    %152 = vector.shape_cast %149 : vector<16x16x128xf32> to vector<1x16x16x128xf32>
    tpu.vector_store %arg9[%c0_173, %c0_174, %c0_175, %c0_176], %152 {strides = array<i32>} : memref<1x16x16x128xf32, #tpu.memory_space<vmem>>, vector<1x16x16x128xf32>,
    return
  }
  func.func @transform_1(%arg0: i32) -> (i32, i32, i32) {
    %c0_i32 = arith.constant 0 : i32
    %c0_i32_0 = arith.constant 0 : i32
    %c0_i32_1 = arith.constant 0 : i32
    %c0_i32_2 = arith.constant 0 : i32
    return %c0_i32, %c0_i32_0, %c0_i32_1 : i32, i32, i32
  }
  func.func @transform_2(%arg0: i32) -> (i32, i32) {
    %c0_i32 = arith.constant 0 : i32
    %c0_i32_0 = arith.constant 0 : i32
    %c0_i32_1 = arith.constant 0 : i32
    return %c0_i32, %c0_i32_0 : i32, i32
  }
  func.func @transform_3(%arg0: i32) -> (i32, i32, i32) {
    %c0_i32 = arith.constant 0 : i32
    %c0_i32_0 = arith.constant 0 : i32
    %c0_i32_1 = arith.constant 0 : i32
    %c0_i32_2 = arith.constant 0 : i32
    return %c0_i32, %c0_i32_0, %c0_i32_1 : i32, i32, i32
  }
  func.func @transform_4(%arg0: i32) -> (i32, i32) {
    %c0_i32 = arith.constant 0 : i32
    %c0_i32_0 = arith.constant 0 : i32
    %c0_i32_1 = arith.constant 0 : i32
    return %c0_i32, %c0_i32_0 : i32, i32
  }
  func.func @transform_5(%arg0: i32) -> (i32, i32, i32, i32) {
    %c0_i32 = arith.constant 0 : i32
    %c0_i32_0 = arith.constant 0 : i32
    %c0_i32_1 = arith.constant 0 : i32
    %c0_i32_2 = arith.constant 0 : i32
    return %arg0, %c0_i32, %c0_i32_0, %c0_i32_1 : i32, i32, i32, i32
  }
  func.func @transform_6(%arg0: i32) -> (i32, i32) {
    %c0_i32 = arith.constant 0 : i32
    %c0_i32_0 = arith.constant 0 : i32
    %c0_i32_1 = arith.constant 0 : i32
    return %c0_i32, %c0_i32_0 : i32, i32
  }
  func.func @transform_7(%arg0: i32) -> (i32, i32) {
    %c0_i32 = arith.constant 0 : i32
    %c0_i32_0 = arith.constant 0 : i32
    %c0_i32_1 = arith.constant 0 : i32
    return %c0_i32, %c0_i32_0 : i32, i32
  }
  func.func @transform_8(%arg0: i32) -> (i32, i32, i32, i32) {
    %c0_i32 = arith.constant 0 : i32
    %c0_i32_0 = arith.constant 0 : i32
    %c0_i32_1 = arith.constant 0 : i32
    %c0_i32_2 = arith.constant 0 : i32
    return %arg0, %c0_i32, %c0_i32_0, %c0_i32_1 : i32, i32, i32, i32
  }
}

</mosaic_0001>

<bundles_post_ra>
// kernel: tpu_custom_call.1
= control target key start
LH: loop header
LB: loop body
LE: loop exit
PB: predicated region body
PF: predicated region fallthrough
CT: control target
= control target key end

     0   :  { %s11650_s0 = inlined_call_operand.hbm [shape: f32[2,16,16,128], index: 0, kind: input, shape index: {}]   ;;  %s11651_s1 = inlined_call_operand.hbm [shape: f32[9,128,128], index: 1, kind: input, shape index: {}]   ;;  %s11652_s2 = inlined_call_operand.vmem [shape: f32[1,128], index: 2, kind: input, shape index: {}]   ;;  %s11653_s3 = inlined_call_operand.hbm [shape: f32[9,128,128], index: 3, kind: input, shape index: {}]   ;;  %s11654_s4 = inlined_call_operand.vmem [shape: f32[1,128], index: 4, kind: input, shape index: {}]   ;;  %s11655_s5 = inlined_call_operand.hbm [shape: f32[2,16,16,128], index: 5, kind: input, shape index: {}]   ;;  %s11656_s6 = inlined_call_operand.hbm [shape: f32[128,128], index: 6, kind: input, shape index: {}]   ;;  %s11657_s7 = inlined_call_operand.vmem [shape: f32[1,128], index: 7, kind: input, shape index: {}]   ;;  %s11658_s8 = inlined_call_operand.hbm [shape: f32[2,16,16,128], index: 8, kind: output, shape index: {}]  }
   0x1   :  { %11698 = sst [smem:[#allocation105_spill]] %s11651_s1 }
   0x2   :  { %11699 = sst [smem:[#allocation106_spill]] %s11653_s3 }
   0x3   :  { %13 = vsyncpa [#allocation6], 0 }
   0x4   :  { %14 = vsyncpa [#allocation9], 0 }
   0x5   :  { %15 = vsyncpa [#allocation7], 0 }
   0x6   :  { %17 = vsyncpa [#allocation7 + $0x1], 0  ;;  %s9308_s27 = smov 0   ;;  %s9310_s28 = smov 0  }
   0x7   :  { %s9312_s29 = smov 0   ;;  %s9314_s30 = smov 0  }
   0x8 LB: > { %s9329_s9 = sadd.s32 4294967295, %s9246_s30   ;;  %s6461_s10 = sadd.s32 4294967294, %s9246_s30   ;;  %s9246_s30 = sphi %s9314_s30, %s12034_s30   ;;  %s9242_s29 = sphi %s9312_s29, %s12038_s29   ;;  %s9238_s28 = sphi %s9310_s28, %s12037_s28   ;;  %s9234_s27 = sphi %s9308_s27, %s12036_s27  }
   0x9   : > { %s9333_s11 = sadd.s32 1, %s9246_s30   ;;  %s114_s12 = sadd.s32 1, %s9242_s29 }
   0xa   : > { %11700 = sst [smem:[#allocation20_spill]] %s9333_s11  ;;  %s111_s13 = ssub.s32 %s9246_s30, %s9333_s11 }
   0xb   : > { %p121_p0 = scmp.ne.s32.totalorder %s9242_s29, %s9238_s28  ;;  %p112_p1 = scmp.eq.s32.totalorder %s111_s13, 0 }
   0xc   : > { %p122_p2 = scmp.eq.s32.totalorder %s9246_s30, 0  ;;  %p127_p3 = scmp.ne.s32.totalorder %s9238_s28, %s9234_s27 }
   0xd   : > { %p11660_p4 = scmp.eq.s32.totalorder %s9329_s9, 0  ;;  %p193_p7 = scmp.eq.s32.totalorder %s9329_s9, 1 }
   0xe   : > { %s9345_s14 = scalar_select %p112_p1, %s9242_s29, %s114_s12  }
   0xf   : > { %p9347_p5 = por %p122_p2, %p121_p0  ;;  %p9353_p6 = por %p11660_p4, %p127_p3 }
  0x10   : > { %11701 = sst [smem:[#allocation21_spill]] %s9345_s14  ;;  %p199_p8 = scmp.eq.s32.totalorder %s6461_s10, 1 }
  0x11   : > { %s11703_s16 = scalar_select %p9353_p6, 1, 0 }
  0x12   : > { %p6462_p9 = scmp.ge.s32.totalorder %s9246_s30, 1  ;;  %p206_p10 = scmp.lt.s32.totalorder %s9246_s30, 3 }
  0x13   : > { %p9360_p11 = por %p193_p7, %p121_p0  ;;  %p9364_p12 = por %p199_p8, %p127_p3 }
  0x14   : > { %p9368_p13 = pnand %p6462_p9, %p206_p10  ;;  %s9248_s20 = smov [#allocation5]  }
  0x15   : > { %s11704_s17 = scalar_select %p9360_p11, 1, 0 }
  0x16   : > { %s11705_s18 = scalar_select %p9364_p12, 1, 0 }
  0x17   : > { %s11706_s19 = scalar_select %p9368_p13, 1, 0 }
  0x18   : > { %p8970_p1 = pneg %p9368_p13  ;;  %s218_s21 = sshll.u32 %s9248_s20, 4  ;;  %s219_s21 = int_to_ptr.vmem [resolvable:$true] %s218_s21 }
  0x19   : > { %p8991_p3 = scmp.lt.s32.totalorder %s9246_s30, 2  ;;  %s9249_s23 = smov [#allocation8]  }
  0x1a   : > { %p9376_p2 = pnand %p8970_p1, %p11660_p4  ;;  %s234_s24 = sshll.u32 %s9249_s23, 4  ;;  %s235_s24 = int_to_ptr.vmem [resolvable:$true] %s234_s24 }
  0x1b   : > { %s9051_s25 = scalar_lea.vmem %s219_s21, 18432  ;;  %p9059_p12 = scmp.lt.s32.totalorder %s219_s21, %s219_s21 }
  0x1c   : > { %p9042_p7 = pneg %p9376_p2  ;;  %p9052_p8 = scmp.ne.s32.totalorder %s219_s21, %s9051_s25 }
  0x1d   : > { %p9060_p11 = scmp.lt.s32.totalorder %s9051_s25, %s9051_s25 }
  0x1e   : > { %p9054_p9 = pnand %p9052_p8, %p9042_p7 }
  0x1f   : > { %p9061_p1 = por %p9060_p11, %p9059_p12 }
  0x20   : > { %p9055_p10 = pneg %p9054_p9 }
  0x22   : > { %p9062_p4 = pnand %p9061_p1, %p9055_p10 }
  0x24   : > { %9065 = shalt.err (!%p9062_p4)
}
  0x25   : > { %s9250_s26 = smov 128   ;;  %s9251_s10 = smov 8  }
  0x26   : > { %s11708_s1 = sld [smem:[#allocation105_spill]]  ;;  %p9399_p8 = pnand %p8991_p3, %p9347_p5 }
  0x27   : > { %s9077_s23 = scalar_lea.vmem %s235_s24, 18432  ;;  %p9085_p9 = scmp.lt.s32.totalorder %s235_s24, %s235_s24 }
  0x28   : > { %p9078_p4 = scmp.ne.s32.totalorder %s235_s24, %s9077_s23  ;;  %p9086_p10 = scmp.lt.s32.totalorder %s9077_s23, %s9077_s23 }
  0x2a   : > { %p9080_p11 = pnand %p9078_p4, %p9042_p7  ;;  %p9087_p1 = por %p9086_p10, %p9085_p9 }
  0x2c   : > { %8973 = dma.hbm_to_vmem [thread:$0]  (!%p9376_p2), %s11708_s1, 18432, %s219_s21, [#allocation6], %s9250_s26, %s9250_s26, %s9251_s10  }
  0x2d   : > { %p9081_p12 = pneg %p9080_p11 }
  0x2f   : > { %p9088_p0 = pnand %p9087_p1, %p9081_p12 }
  0x31   : > { %9091 = shalt.err (!%p9088_p0)
}
  0x32   : > { %s11710_s3 = sld [smem:[#allocation106_spill]]  ;;  %s9252_s25 = smov [#allocation11]  }
  0x33   : > { %s250_s12 = sshll.u32 %s9252_s25, 4  ;;  %s267_s13 = sand.u32 1, %s9246_s30   ;;  %s251_s12 = int_to_ptr.vmem [resolvable:$true] %s250_s12 }
  0x34   : > { %s9103_s1 = scalar_lea.vmem %s251_s12, 2048  ;;  %p9111_p4 = scmp.lt.s32.totalorder %s251_s12, %s251_s12 }
  0x35   : > { %p9104_p5 = scmp.ne.s32.totalorder %s251_s12, %s9103_s1  ;;  %p9112_p11 = scmp.lt.s32.totalorder %s9103_s1, %s9103_s1 }
  0x37   : > { %p9106_p0 = pnand %p9104_p5, %p9042_p7  ;;  %p9113_p12 = por %p9112_p11, %p9111_p4 }
  0x38   : > { %8976 = dma.hbm_to_vmem [thread:$0]  (!%p9376_p2), %s11710_s3, 18432, %s235_s24, [#allocation9], %s9250_s26, %s9250_s26, %s9251_s10  }
  0x39   : > { %p9107_p3 = pneg %p9106_p0 }
  0x3b   : > { %p9114_p9 = pnand %p9113_p12, %p9107_p3 }
  0x3d   : > { %9117 = shalt.err (!%p9114_p9)
}
  0x3e   : > { %8979 = dma.hbm_to_vmem [thread:$0]  (!%p9376_p2), %s11656_s6, 2048, %s251_s12, [#allocation9], %s9250_s26, %s9250_s26, %s9251_s10  }
  0x3f   : > { %s269_s15 = sand.u32 1, %s9242_s29   ;;  %s6487_s21 = sshll.u32 %s9246_s30, 12 }
  0x40   : > { %s6467_s25 = sshll.u32 %s269_s15, 8  ;;  %s9431_s14 = scalar_lea.hbm %s11655_s5, %s6487_s21 }
  0x41   : > { %s271_s22 = scalar_lea.vmem [#allocation10], %s6467_s25  ;;  %s9435_s24 = scalar_lea.sflag [#allocation6], %s267_s13 }
  0x42   : > { %s278_s11 = sshll.u32 %s271_s22, 4  ;;  %s9118_s23 = scalar_lea.hbm %s9431_s14, 4096  ;;  %s9433_s11 = int_to_ptr.vmem [resolvable:$true] %s278_s11 }
  0x43   : > { %p9119_p7 = scmp.ne.s32.totalorder %s9431_s14, %s9118_s23  ;;  %p9120_p2 = pneg %p9399_p8 }
  0x44   : > { %s9123_s3 = scalar_lea.hbm %s11655_s5, 8192  ;;  %p9124_p5 = scmp.lt.s32.totalorder %s9431_s14, %s11655_s5 }
  0x45   : > { %p9121_p10 = pnand %p9120_p2, %p9119_p7  ;;  %p9125_p0 = scmp.lt.s32.totalorder %s9123_s3, %s9118_s23 }
  0x47   : > { %p9122_p1 = pneg %p9121_p10  ;;  %p9126_p3 = por %p9125_p0, %p9124_p5 }
  0x49   : > { %p9127_p4 = pnand %p9126_p3, %p9122_p1 }
  0x4b   : > { %9130 = shalt.err (!%p9127_p4)
}
  0x4c   : > { %s9131_s13 = scalar_lea.vmem %s9433_s11, 4096  ;;  %s9253_s25 = smov [#allocation10]  }
  0x4d   : > { %p9132_p11 = scmp.ne.s32.totalorder %s9433_s11, %s9131_s13  ;;  %s9136_s22 = sshll.u32 %s9253_s25, 4  ;;  %s9137_s22 = int_to_ptr.vmem [resolvable:$false] %s9136_s22 }
  0x4e   : > { %s9138_s12 = scalar_lea.vmem %s9137_s22, 8192  ;;  %p9139_p7 = scmp.lt.s32.totalorder %s9433_s11, %s9137_s22 }
  0x4f   : > { %p9134_p12 = pnand %p9132_p11, %p9120_p2  ;;  %p9140_p10 = scmp.lt.s32.totalorder %s9138_s12, %s9131_s13 }
  0x51   : > { %p9135_p9 = pneg %p9134_p12  ;;  %p9141_p6 = por %p9140_p10, %p9139_p7 }
  0x53   : > { %p9142_p13 = pnand %p9141_p6, %p9135_p9 }
  0x55   : > { %9145 = shalt.err (!%p9142_p13)
}
  0x56   : > { %8983 = dma.hbm_to_vmem [thread:$0]  (!%p9399_p8), %s9431_s14, 4096, %s9433_s11, %s9435_s24, %s9250_s26, %s9250_s26, %s9251_s10  }
  0x57   : > { %p11711_p2 = scmp.ne.s32.totalorder %s11706_s19, 0 }
  0x59   : > { %290 = sbr.rel (%p11711_p2) target bundleno = 1180 (0x49c), region = 48 }
  0x5e   : > { %p11712_p1 = scmp.eq.s32.totalorder %s9329_s9, 0 }
  0x60   : > { %9211 = dma.done.wait (%p11712_p1), [#allocation6], 18432   ;;  %p11713_p5 = pmov %p11712_p1 }
  0x61   : > { %p11714_p6 = pmov %p11712_p1 }
  0x62   : > { %9213 = vsyncadd (%p11713_p5), [#allocation6], 4294948864 }
  0x63   : > { %9215 = dma.done.wait (%p11714_p6), [#allocation9], 18432   ;;  %p11715_p13 = pmov %p11712_p1 }
  0x64   : > { %s300_s11 = sand.u32 1, %s9329_s9   ;;  %s302_s14 = sand.u32 1, %s9238_s28  }
  0x65   : > { %9217 = vsyncadd (%p11715_p13), [#allocation9], 4294948864  ;;  %s9473_s19 = sshll.u32 %s302_s14, 8  ;;  %s301_s26 = scalar_lea.sflag [#allocation6], %s300_s11 }
  0x66   : > { %s9476_s10 = scalar_lea.vmem [#allocation10], %s9473_s19  ;;  %p11716_p8 = scmp.ne.s32.totalorder %s11703_s16, 0 }
  0x68   : > { %9219 = dma.done.wait (%p11716_p8), %s301_s26, 4096  }
  0x69   : > { %9221 = vsyncadd (%p11716_p8), %s301_s26, 4294963200  ;;  %p11717_p0 = pmov %p11712_p1 }
  0x6b   : > { %9223 = dma.done.wait (%p11717_p0), [#allocation9], 2048   ;;  %p11718_p3 = pmov %p11717_p0 }
  0x6c   : > { %s6488_s20 = sshll.u32 %s9329_s9, 12  ;;  %v9254_v0 = vmov 0.0   ;;  %s9255_s16 = smov [#allocation2 + $0x19]  }
  0x6d   : > { %9225 = vsyncadd (%p11718_p3), [#allocation9], 4294965248  ;;  %s9492_s15 = scalar_lea.hbm %s11650_s0, %s6488_s20  ;;  %391 = vst [vmem:[#allocation3] sm:$0xff] %v9254_v0  ;;  %s344_s3 = sshll.u32 %s9255_s16, 4  ;;  %s345_s3 = int_to_ptr.vmem [resolvable:$true] %s344_s3 }
  0x6e   : > { %392 = vst [vmem:[#allocation3 + $0x8] sm:$0xff] %v9254_v0  ;;  %393 = vst [vmem:[#allocation3 + $0x10] sm:$0x3] %v9254_v0  ;;  %s9146_s21 = scalar_lea.hbm %s9492_s15, 4096  ;;  %s9148_s25 = scalar_lea.hbm %s11650_s0, 8192 }
  0x6f   : > { %395 = vst [vmem:[#allocation3 + $0x198] sm:$0xff] %v9254_v0  ;;  %396 = vst [vmem:[#allocation3 + $0x1a0] sm:$0xff] %v9254_v0  ;;  %p9147_p4 = scmp.ne.s32.totalorder %s9492_s15, %s9146_s21  ;;  %p9149_p11 = scmp.lt.s32.totalorder %s9492_s15, %s11650_s0 }
  0x70   : > { %397 = vst [vmem:[#allocation3 + $0x1a8] sm:$0x3] %v9254_v0  ;;  %399 = vst [vmem:[#allocation3 + $0x18] sm:$0x1] %v9254_v0  ;;  %p9150_p12 = scmp.lt.s32.totalorder %s9148_s25, %s9146_s21 }
  0x71   : > { %400 = vst [vmem:[#allocation3 + $0x30] sm:$0x1] %v9254_v0  ;;  %401 = vst [vmem:[#allocation3 + $0x48] sm:$0x1] %v9254_v0 }
  0x72   : > { %402 = vst [vmem:[#allocation3 + $0x60] sm:$0x1] %v9254_v0  ;;  %403 = vst [vmem:[#allocation3 + $0x78] sm:$0x1] %v9254_v0  ;;  %p9151_p9 = por %p9150_p12, %p9149_p11 }
  0x73   : > { %404 = vst [vmem:[#allocation3 + $0x90] sm:$0x1] %v9254_v0  ;;  %405 = vst [vmem:[#allocation3 + $0xa8] sm:$0x1] %v9254_v0 }
  0x74   : > { %406 = vst [vmem:[#allocation3 + $0xc0] sm:$0x1] %v9254_v0  ;;  %407 = vst [vmem:[#allocation3 + $0xd8] sm:$0x1] %v9254_v0  ;;  %p9152_p7 = pnand %p9151_p9, %p9147_p4 }
  0x75   : > { %408 = vst [vmem:[#allocation3 + $0xf0] sm:$0x1] %v9254_v0  ;;  %409 = vst [vmem:[#allocation3 + $0x108] sm:$0x1] %v9254_v0 }
  0x76   : > { %410 = vst [vmem:[#allocation3 + $0x120] sm:$0x1] %v9254_v0  ;;  %411 = vst [vmem:[#allocation3 + $0x138] sm:$0x1] %v9254_v0 }
  0x77   : > { %412 = vst [vmem:[#allocation3 + $0x150] sm:$0x1] %v9254_v0  ;;  %413 = vst [vmem:[#allocation3 + $0x168] sm:$0x1] %v9254_v0 }
  0x78   : > { %414 = vst [vmem:[#allocation3 + $0x180] sm:$0x1] %v9254_v0  ;;  %417 = vst [vmem:[#allocation3 + $0x29] sm:$0x1] %v9254_v0 }
  0x79   : > { %418 = vst [vmem:[#allocation3 + $0x41] sm:$0x1] %v9254_v0  ;;  %419 = vst [vmem:[#allocation3 + $0x59] sm:$0x1] %v9254_v0 }
  0x7a   : > { %420 = vst [vmem:[#allocation3 + $0x71] sm:$0x1] %v9254_v0  ;;  %421 = vst [vmem:[#allocation3 + $0x89] sm:$0x1] %v9254_v0 }
  0x7b   : > { %422 = vst [vmem:[#allocation3 + $0xa1] sm:$0x1] %v9254_v0  ;;  %423 = vst [vmem:[#allocation3 + $0xb9] sm:$0x1] %v9254_v0 }
  0x7c   : > { %424 = vst [vmem:[#allocation3 + $0xd1] sm:$0x1] %v9254_v0  ;;  %425 = vst [vmem:[#allocation3 + $0xe9] sm:$0x1] %v9254_v0 }
  0x7d   : > { %426 = vst [vmem:[#allocation3 + $0x101] sm:$0x1] %v9254_v0  ;;  %427 = vst [vmem:[#allocation3 + $0x119] sm:$0x1] %v9254_v0 }
  0x7e   : > { %428 = vst [vmem:[#allocation3 + $0x131] sm:$0x1] %v9254_v0  ;;  %429 = vst [vmem:[#allocation3 + $0x149] sm:$0x1] %v9254_v0 }
  0x7f   : > { %430 = vst [vmem:[#allocation3 + $0x161] sm:$0x1] %v9254_v0  ;;  %431 = vst [vmem:[#allocation3 + $0x179] sm:$0x1] %v9254_v0 }
  0x80   : > { %432 = vst [vmem:[#allocation3 + $0x191] sm:$0x1] %v9254_v0  ;;  %398 = vst [vmem:[#allocation3] sm:$0x1] %v9254_v0 }
  0x81   : > { %415 = vst [vmem:[#allocation3 + $0x198] sm:$0x1] %v9254_v0  ;;  %416 = vst [vmem:[#allocation3 + $0x11] sm:$0x1] %v9254_v0 }
  0x82   : > { %433 = vst [vmem:[#allocation3 + $0x1a9] sm:$0x1] %v9254_v0 }
  0x83   : > { %9155 = shalt.err (!%p9152_p7)  }
  0x84   : > { %s9156_s11 = scalar_lea.vmem %s345_s3, 4096  ;;  %s9256_s26 = smov [#allocation2]  }
  0x85   : > { %p9157_p10 = scmp.ne.s32.totalorder %s345_s3, %s9156_s11  ;;  %s9158_s24 = sshll.u32 %s9256_s26, 4  ;;  %s9159_s24 = int_to_ptr.vmem [resolvable:$false] %s9158_s24 }
  0x86   : > { %s9160_s23 = scalar_lea.vmem %s9159_s24, 6912  ;;  %p9161_p2 = scmp.lt.s32.totalorder %s345_s3, %s9159_s24 }
  0x87   : > { %p9162_p1 = scmp.lt.s32.totalorder %s9160_s23, %s9156_s11 }
  0x89   : > { %p9163_p5 = por %p9162_p1, %p9161_p2 }
  0x8b   : > { %p9164_p6 = pnand %p9163_p5, %p9157_p10 }
  0x8d   : > { %9167 = shalt.err (!%p9164_p6)  }
  0x8e   : > { %s9257_s16 = smov 256   ;;  %s9258_s1 = smov 384  }
  0x8f   : > { %s9259_s13 = smov 16  }
  0x90   : > { %347 = dma.hbm_to_vmem [thread:$0]  %s9492_s15, 4096, %s345_s3, [#allocation4], %s9257_s16, %s9258_s1, %s9259_s13 }
  0x91   : > { %348 = vst [vmem:[#allocation2] sm:$0xff] %v9254_v0  ;;  %349 = vst [vmem:[#allocation2 + $0x8] sm:$0xff] %v9254_v0  ;;  %s9589_s15 = scalar_lea.vmem [#allocation12], %s9473_s19 }
  0x92   : > { %350 = vst [vmem:[#allocation2 + $0x10] sm:$0x3] %v9254_v0  ;;  %352 = vst [vmem:[#allocation2 + $0x198] sm:$0xff] %v9254_v0 }
  0x93   : > { %353 = vst [vmem:[#allocation2 + $0x1a0] sm:$0xff] %v9254_v0  ;;  %354 = vst [vmem:[#allocation2 + $0x1a8] sm:$0x3] %v9254_v0 }
  0x94   : > { %356 = vst [vmem:[#allocation2 + $0x18] sm:$0x1] %v9254_v0  ;;  %357 = vst [vmem:[#allocation2 + $0x30] sm:$0x1] %v9254_v0 }
  0x95   : > { %358 = vst [vmem:[#allocation2 + $0x48] sm:$0x1] %v9254_v0  ;;  %359 = vst [vmem:[#allocation2 + $0x60] sm:$0x1] %v9254_v0 }
  0x96   : > { %360 = vst [vmem:[#allocation2 + $0x78] sm:$0x1] %v9254_v0  ;;  %361 = vst [vmem:[#allocation2 + $0x90] sm:$0x1] %v9254_v0 }
  0x97   : > { %362 = vst [vmem:[#allocation2 + $0xa8] sm:$0x1] %v9254_v0  ;;  %363 = vst [vmem:[#allocation2 + $0xc0] sm:$0x1] %v9254_v0 }
  0x98   : > { %364 = vst [vmem:[#allocation2 + $0xd8] sm:$0x1] %v9254_v0  ;;  %365 = vst [vmem:[#allocation2 + $0xf0] sm:$0x1] %v9254_v0 }
  0x99   : > { %366 = vst [vmem:[#allocation2 + $0x108] sm:$0x1] %v9254_v0  ;;  %367 = vst [vmem:[#allocation2 + $0x120] sm:$0x1] %v9254_v0 }
  0x9a   : > { %368 = vst [vmem:[#allocation2 + $0x138] sm:$0x1] %v9254_v0  ;;  %369 = vst [vmem:[#allocation2 + $0x150] sm:$0x1] %v9254_v0 }
  0x9b   : > { %370 = vst [vmem:[#allocation2 + $0x168] sm:$0x1] %v9254_v0  ;;  %371 = vst [vmem:[#allocation2 + $0x180] sm:$0x1] %v9254_v0 }
  0x9c   : > { %374 = vst [vmem:[#allocation2 + $0x29] sm:$0x1] %v9254_v0  ;;  %375 = vst [vmem:[#allocation2 + $0x41] sm:$0x1] %v9254_v0 }
  0x9d   : > { %376 = vst [vmem:[#allocation2 + $0x59] sm:$0x1] %v9254_v0  ;;  %377 = vst [vmem:[#allocation2 + $0x71] sm:$0x1] %v9254_v0 }
  0x9e   : > { %378 = vst [vmem:[#allocation2 + $0x89] sm:$0x1] %v9254_v0  ;;  %379 = vst [vmem:[#allocation2 + $0xa1] sm:$0x1] %v9254_v0 }
  0x9f   : > { %380 = vst [vmem:[#allocation2 + $0xb9] sm:$0x1] %v9254_v0  ;;  %381 = vst [vmem:[#allocation2 + $0xd1] sm:$0x1] %v9254_v0 }
  0xa0   : > { %382 = vst [vmem:[#allocation2 + $0xe9] sm:$0x1] %v9254_v0  ;;  %383 = vst [vmem:[#allocation2 + $0x101] sm:$0x1] %v9254_v0 }
  0xa1   : > { %384 = vst [vmem:[#allocation2 + $0x119] sm:$0x1] %v9254_v0  ;;  %385 = vst [vmem:[#allocation2 + $0x131] sm:$0x1] %v9254_v0 }
  0xa2   : > { %386 = vst [vmem:[#allocation2 + $0x149] sm:$0x1] %v9254_v0  ;;  %387 = vst [vmem:[#allocation2 + $0x161] sm:$0x1] %v9254_v0 }
  0xa3   : > { %388 = vst [vmem:[#allocation2 + $0x179] sm:$0x1] %v9254_v0  ;;  %389 = vst [vmem:[#allocation2 + $0x191] sm:$0x1] %v9254_v0 }
  0xa4   : > { %355 = vst [vmem:[#allocation2] sm:$0x1] %v9254_v0  ;;  %372 = vst [vmem:[#allocation2 + $0x198] sm:$0x1] %v9254_v0 }
  0xa5   : > { %373 = vst [vmem:[#allocation2 + $0x11] sm:$0x1] %v9254_v0  ;;  %390 = vst [vmem:[#allocation2 + $0x1a9] sm:$0x1] %v9254_v0 }
  0xa6   : > { %9226 = dma.done.wait [#allocation4], 4096 }
  0xa7   : > { %9227 = vsyncadd [#allocation4], 4294963200  ;;  %v534_v1 = vld [vmem:[#allocation5 + $0xf8] sm:$0xff]  ;;  %v533_v2 = vld [vmem:[#allocation5 + $0xf0] sm:$0xff]  ;;  %s6352_s12 = sshll.u32 %s9589_s15, 4  ;;  %s11601_s24 = scalar_lea.hbm %s11658_s8, %s6488_s20  ;;  %s11604_s12 = int_to_ptr.vmem [resolvable:$true] %s6352_s12 }
  0xa8   : > { %8922 = vmatprep.subr.mxu1 %v534_v1  ;;  %7402 = vmatprep.subr.mxu0 %v534_v1  ;;  %v532_v3 = vld [vmem:[#allocation5 + $0xe8] sm:$0xff]  ;;  %v531_v4 = vld [vmem:[#allocation5 + $0xe0] sm:$0xff]  ;;  %v530_v5 = vld [vmem:[#allocation5 + $0xd8] sm:$0xff]  ;;  %s11609_s23 = scalar_lea.sflag [#allocation7], %s302_s14  ;;  %s9168_s16 = scalar_lea.vmem %s11604_s12, 4096 }
  0xa9   : > { %8938 = vmatpush3.msra.mxu1 %v534_v1  ;;  %7403 = vmatpush3.msra.mxu0 %v534_v1  ;;  %v529_v6 = vld [vmem:[#allocation5 + $0xd0] sm:$0xff]  ;;  %v528_v7 = vld [vmem:[#allocation5 + $0xc8] sm:$0xff]  ;;  %v527_v8 = vld [vmem:[#allocation5 + $0xc0] sm:$0xff]  ;;  %p9169_p13 = scmp.ne.s32.totalorder %s11604_s12, %s9168_s16  ;;  %p12031_p8 = scmp.ne.s32.totalorder %s11704_s17, 0 }
  0xaa   : > { %8923 = vmatprep.subr.mxu1 %v533_v2  ;;  %7404 = vmatprep.subr.mxu0 %v533_v2  ;;  %v526_v9 = vld [vmem:[#allocation5 + $0xb8] sm:$0xff]  ;;  %v525_v10 = vld [vmem:[#allocation5 + $0xb0] sm:$0xff]  ;;  %v524_v11 = vld [vmem:[#allocation5 + $0xa8] sm:$0xff]  ;;  %s9260_s9 = smov [#allocation12]  }
  0xab   : > { %8939 = vmatpush3.msra.mxu1 %v533_v2  ;;  %7405 = vmatpush3.msra.mxu0 %v533_v2  ;;  %v523_v12 = vld [vmem:[#allocation5 + $0xa0] sm:$0xff]  ;;  %v522_v13 = vld [vmem:[#allocation5 + $0x98] sm:$0xff]  ;;  %v521_v14 = vld [vmem:[#allocation5 + $0x90] sm:$0xff]  ;;  %p9170_p0 = pnand %p9169_p13, %p12031_p8  ;;  %s9172_s1 = sshll.u32 %s9260_s9, 4  ;;  %s9173_s1 = int_to_ptr.vmem [resolvable:$false] %s9172_s1 }
  0xac   : > { %8924 = vmatprep.subr.mxu1 %v532_v3  ;;  %7406 = vmatprep.subr.mxu0 %v532_v3  ;;  %v520_v15 = vld [vmem:[#allocation5 + $0x88] sm:$0xff]  ;;  %v519_v16 = vld [vmem:[#allocation5 + $0x80] sm:$0xff]  ;;  %v485_v20 = vld [vmem:[#allocation5 + $0x78] sm:$0xff]  ;;  %s9174_s20 = scalar_lea.vmem %s9173_s1, 8192  ;;  %p9175_p4 = scmp.lt.s32.totalorder %s11604_s12, %s9173_s1 }
  0xad   : > { %8940 = vmatpush3.msra.mxu1 %v532_v3  ;;  %7407 = vmatpush3.msra.mxu0 %v532_v3  ;;  %v9591_v17 = vld [vmem:[#allocation2 + $0xc1] sm:$0xff]  ;;  %v9593_v19 = vld [vmem:[#allocation2 + $0xc9] sm:$0xff]  ;;  %v1033_v22 = vld [vmem:[#allocation5 + $0x178] sm:$0xff]  ;;  %p9171_p3 = pneg %p9170_p0  ;;  %p9176_p11 = scmp.lt.s32.totalorder %s9174_s20, %s9168_s16 }
  0xae   : > { %8925 = vmatprep.subr.mxu1 %v531_v4  ;;  %7408 = vmatprep.subr.mxu0 %v531_v4  ;;  %v486_v18 = vld [vmem:[#allocation2 + $0x1] sm:$0xff]  ;;  %v487_v21 = vld [vmem:[#allocation2 + $0x9] sm:$0xff]  ;;  %v9597_v24 = vld [vmem:[#allocation2 + $0xd9] sm:$0xff] }
  0xaf   : > { %8941 = vmatpush3.msra.mxu1 %v531_v4  ;;  %7409 = vmatpush3.msra.mxu0 %v531_v4  ;;  %v484_v23 = vld [vmem:[#allocation5 + $0x70] sm:$0xff]  ;;  %v9599_v26 = vld [vmem:[#allocation2 + $0x19] sm:$0xff]  ;;  %v9601_v27 = vld [vmem:[#allocation2 + $0xe1] sm:$0xff]  ;;  %p9177_p12 = por %p9176_p11, %p9175_p4 }
  0xb0   : > { %8926 = vmatprep.subr.mxu1 %v530_v5  ;;  %7410 = vmatprep.subr.mxu0 %v530_v5  ;;  %v1032_v25 = vld [vmem:[#allocation5 + $0x170] sm:$0xff]  ;;  %v483_v28 = vld [vmem:[#allocation5 + $0x68] sm:$0xff]  ;;  %v482_v31 = vld [vmem:[#allocation5 + $0x60] sm:$0xff] }
  0xb1   : > { %8942 = vmatpush3.msra.mxu1 %v530_v5  ;;  %7411 = vmatpush3.msra.mxu0 %v530_v5  ;;  %v9604_v29 = vld [vmem:[#allocation2 + $0x21] sm:$0xff]  ;;  %v9608_v32 = vld [vmem:[#allocation2 + $0xf1] sm:$0xff]  ;;  %v9613_v35 = vld [vmem:[#allocation2 + $0xf9] sm:$0xff]  ;;  %p9178_p9 = pnand %p9177_p12, %p9171_p3 }
  0xb2   : > { %8927 = vmatprep.subr.mxu1 %v529_v6  ;;  %7412 = vmatprep.subr.mxu0 %v529_v6  ;;  %v1031_v30 = vld [vmem:[#allocation5 + $0x168] sm:$0xff]  ;;  %v1030_v33 = vld [vmem:[#allocation5 + $0x160] sm:$0xff]  ;;  %v9611_v34 = vld [vmem:[#allocation2 + $0x31] sm:$0xff] }
  0xb3   : > { %8943 = vmatpush3.msra.mxu1 %v529_v6  ;;  %7413 = vmatpush3.msra.mxu0 %v529_v6  ;;  %v481_v36 = vld [vmem:[#allocation5 + $0x58] sm:$0xff]  ;;  %v480_v39 = vld [vmem:[#allocation5 + $0x50] sm:$0xff]  ;;  %v479_v44 = vld [vmem:[#allocation5 + $0x48] sm:$0xff] }
  0xb4   : > { %8928 = vmatprep.subr.mxu1 %v528_v7  ;;  %7414 = vmatprep.subr.mxu0 %v528_v7  ;;  %v9616_v37 = vld [vmem:[#allocation2 + $0x39] sm:$0xff]  ;;  %v9620_v40 = vld [vmem:[#allocation2 + $0x109] sm:$0xff]  ;;  %v9625_v43 = vld [vmem:[#allocation2 + $0x111] sm:$0xff] }
  0xb5   : > { %8944 = vmatpush3.msra.mxu1 %v528_v7  ;;  %7415 = vmatpush3.msra.mxu0 %v528_v7  ;;  %v1029_v38 = vld [vmem:[#allocation5 + $0x158] sm:$0xff]  ;;  %v1028_v41 = vld [vmem:[#allocation5 + $0x150] sm:$0xff]  ;;  %v1027_v46 = vld [vmem:[#allocation5 + $0x148] sm:$0xff] }
  0xb6   : > { %8929 = vmatprep.subr.mxu1 %v527_v8  ;;  %7416 = vmatprep.subr.mxu0 %v527_v8  ;;  %v9623_v42 = vld [vmem:[#allocation2 + $0x49] sm:$0xff]  ;;  %v9628_v45 = vld [vmem:[#allocation2 + $0x51] sm:$0xff]  ;;  %v478_v47 = vld [vmem:[#allocation5 + $0x40] sm:$0xff] }
  0xb7   : > { %8945 = vmatpush3.msra.mxu1 %v527_v8  ;;  %7417 = vmatpush3.msra.mxu0 %v527_v8  ;;  %v9632_v48 = vld [vmem:[#allocation2 + $0x121] sm:$0xff]  ;;  %v9637_v51 = vld [vmem:[#allocation2 + $0x129] sm:$0xff]  ;;  %v477_v52 = vld [vmem:[#allocation5 + $0x38] sm:$0xff] }
  0xb8   : > { %8930 = vmatprep.subr.mxu1 %v526_v9  ;;  %7418 = vmatprep.subr.mxu0 %v526_v9  ;;  %v1026_v49 = vld [vmem:[#allocation5 + $0x140] sm:$0xff]  ;;  %v9640_v53 = vld [vmem:[#allocation2 + $0x69] sm:$0xff]  ;;  %v1025_v54 = vld [vmem:[#allocation5 + $0x138] sm:$0xff] }
  0xb9   : > { %8946 = vmatpush3.msra.mxu1 %v526_v9  ;;  %7419 = vmatpush3.msra.mxu0 %v526_v9  ;;  %v9635_v50 = vld [vmem:[#allocation2 + $0x61] sm:$0xff]  ;;  %v476_v55 = vld [vmem:[#allocation5 + $0x30] sm:$0xff]  ;;  %v9644_v56 = vld [vmem:[#allocation2 + $0x139] sm:$0xff] }
  0xba   : > { %8931 = vmatprep.subr.mxu1 %v525_v10  ;;  %7420 = vmatprep.subr.mxu0 %v525_v10  ;;  %v1024_v57 = vld [vmem:[#allocation5 + $0x130] sm:$0xff]  ;;  %v9647_v58 = vld [vmem:[#allocation2 + $0x79] sm:$0xff]  ;;  %v9649_v59 = vld [vmem:[#allocation2 + $0x141] sm:$0xff] }
  0xbb   : > { %8947 = vmatpush3.msra.mxu1 %v525_v10  ;;  %7421 = vmatpush3.msra.mxu0 %v525_v10  ;;  %v475_v60 = vld [vmem:[#allocation5 + $0x28] sm:$0xff]  ;;  %v474_v63 = vld [vmem:[#allocation5 + $0x20] sm:$0xff]  ;;  %v9656_v0 = vld [vmem:[#allocation2 + $0x151] sm:$0xff] }
  0xbc   : > { %8932 = vmatprep.subr.mxu1 %v524_v11  ;;  %7422 = vmatprep.subr.mxu0 %v524_v11  ;;  %v9652_v61 = vld [vmem:[#allocation2 + $0x81] sm:$0xff]  ;;  %11719 = vst [vmem:[#allocation22_spill] sm:$0xff] %v9656_v0  ;;  %v9659_v2 = vld [vmem:[#allocation2 + $0x91] sm:$0xff]  ;;  %v9661_v3 = vld [vmem:[#allocation2 + $0x159] sm:$0xff] }
  0xbd   : > { %8948 = vmatpush3.msra.mxu1 %v524_v11  ;;  %7423 = vmatpush3.msra.mxu0 %v524_v11  ;;  %v1023_v62 = vld [vmem:[#allocation5 + $0x128] sm:$0xff]  ;;  %v1022_v1 = vld [vmem:[#allocation5 + $0x120] sm:$0xff]  ;;  %11720 = vst [vmem:[#allocation23_spill] sm:$0xff] %v9661_v3  ;;  %v473_v4 = vld [vmem:[#allocation5 + $0x18] sm:$0xff] }
  0xbe   : > { %8933 = vmatprep.subr.mxu1 %v523_v12  ;;  %7424 = vmatprep.subr.mxu0 %v523_v12  ;;  %v9664_v5 = vld [vmem:[#allocation2 + $0x99] sm:$0xff]  ;;  %v472_v7 = vld [vmem:[#allocation5 + $0x10] sm:$0xff] }
  0xbf   : > { %8949 = vmatpush3.msra.mxu1 %v523_v12  ;;  %7425 = vmatpush3.msra.mxu0 %v523_v12  ;;  %v1021_v6 = vld [vmem:[#allocation5 + $0x118] sm:$0xff]  ;;  %v9668_v8 = vld [vmem:[#allocation2 + $0x169] sm:$0xff] }
  0xc0   : > { %8934 = vmatprep.subr.mxu1 %v522_v13  ;;  %7426 = vmatprep.subr.mxu0 %v522_v13  ;;  %11721 = vst [vmem:[#allocation24_spill] sm:$0xff] %v9668_v8  ;;  %v1020_v9 = vld [vmem:[#allocation5 + $0x110] sm:$0xff]  ;;  %v471_v12 = vld [vmem:[#allocation5 + $0x8] sm:$0xff] }
  0xc1   : > { %8950 = vmatpush3.msra.mxu1 %v522_v13  ;;  %7427 = vmatpush3.msra.mxu0 %v522_v13  ;;  %v9671_v10 = vld [vmem:[#allocation2 + $0xa9] sm:$0xff]  ;;  %v9673_v11 = vld [vmem:[#allocation2 + $0x171] sm:$0xff] }
  0xc2   : > { %8935 = vmatprep.subr.mxu1 %v521_v14  ;;  %7428 = vmatprep.subr.mxu0 %v521_v14  ;;  %11722 = vst [vmem:[#allocation25_spill] sm:$0xff] %v9673_v11  ;;  %v9676_v13 = vld [vmem:[#allocation2 + $0xb1] sm:$0xff] }
  0xc3   : > { %8951 = vmatpush3.msra.mxu1 %v521_v14  ;;  %7429 = vmatpush3.msra.mxu0 %v521_v14  ;;  %v1019_v14 = vld [vmem:[#allocation5 + $0x108] sm:$0xff] }
  0xc4   : > { %8936 = vmatprep.subr.mxu1 %v520_v15  ;;  %7430 = vmatprep.subr.mxu0 %v520_v15 }
  0xc5   : > { %8952 = vmatpush3.msra.mxu1 %v520_v15  ;;  %7431 = vmatpush3.msra.mxu0 %v520_v15  ;;  %v470_v15 = vld [vmem:[#allocation5] sm:$0xff] }
  0xc6   : > { %8937 = vmatprep.subr.mxu1 %v519_v16  ;;  %7432 = vmatprep.subr.mxu0 %v519_v16 }
  0xc7   : > { %8953 = vmatpush3.msra.mxu1 %v519_v16  ;;  %7458 = vmatprep.mubr.f32.mxu1 %v9591_v17 }
  0xc8   : > { %7433 = vmatpush3.msra.mxu0 %v519_v16  ;;  %7434 = vmatprep.mubr.f32.mxu0 %v486_v18  ;;  %v438_v16 = vld [vmem:[#allocation2] sm:$0xff] }
  0xc9   : > { %7459 = vmatmul.mubr.f32.vlgmr.msra.gmra.mxu1 %v9593_v19  ;;  %7482 = vmatprep.subr.mxu1 %v485_v20  ;;  %v1018_v18 = vld [vmem:[#allocation5 + $0x100] sm:$0xff] }
  0xca   : > { %7435 = vmatmul.mubr.f32.vlgmr.msra.gmra.mxu0 %v487_v21  ;;  %7483 = vmatpush3.msra.mxu1 %v485_v20  ;;  %v439_v20 = vld [vmem:[#allocation2 + $0x8] sm:$0xff] }
  0xcb   : > { %7562 = vmatprep.subr.mxu0 %v1033_v22  ;;  %7484 = vmatprep.subr.mxu1 %v484_v23  ;;  %v985_v21 = vld [vmem:[#allocation2 + $0x2] sm:$0xff] }
  0xcc   : > { %7563 = vmatpush3.msra.mxu0 %v1033_v22  ;;  %7461 = vmatprep.mubr.f32.mxu1 %v9597_v24  ;;  %v1340_v22 = vld [vmem:[#allocation5 + $0x1f8] sm:$0xff] }
  0xcd   : > { %7485 = vmatpush3.msra.mxu1 %v484_v23  ;;  %7564 = vmatprep.subr.mxu0 %v1032_v25  ;;  %v986_v23 = vld [vmem:[#allocation2 + $0xa] sm:$0xff] }
  0xce   : > { %7437 = vmatprep.mubr.f32.mxu0 %v9599_v26  ;;  %7462 = vmatmul.mubr.f32.gmra.mxu1 %v9601_v27 }
  0xcf   : > { %7486 = vmatprep.subr.mxu1 %v483_v28  ;;  %7565 = vmatpush3.msra.mxu0 %v1032_v25  ;;  %v1646_v25 = vld [vmem:[#allocation5 + $0x278] sm:$0xff] }
  0xd0   : > { %7438 = vmatmul.mubr.f32.gmra.mxu0 %v9604_v29  ;;  %7487 = vmatpush3.msra.mxu1 %v483_v28  ;;  %v9681_v28 = vld [vmem:[#allocation2 + $0x18] sm:$0xff] }
  0xd1   : > { %7566 = vmatprep.subr.mxu0 %v1031_v30  ;;  %7488 = vmatprep.subr.mxu1 %v482_v31 }
  0xd2   : > { %7567 = vmatpush3.msra.mxu0 %v1031_v30  ;;  %7464 = vmatprep.mubr.f32.mxu1 %v9608_v32  ;;  %v9683_v30 = vld [vmem:[#allocation2 + $0x20] sm:$0xff] }
  0xd3   : > { %7489 = vmatpush3.msra.mxu1 %v482_v31  ;;  %7568 = vmatprep.subr.mxu0 %v1030_v33  ;;  %v9685_v31 = vld [vmem:[#allocation2 + $0x1a] sm:$0xff] }
  0xd4   : > { %7440 = vmatprep.mubr.f32.mxu0 %v9611_v34  ;;  %7465 = vmatmul.mubr.f32.gmra.mxu1 %v9613_v35  ;;  %11723 = vst [vmem:[#allocation26_spill] sm:$0xff] %v9685_v31 }
  0xd5   : > { %7490 = vmatprep.subr.mxu1 %v481_v36  ;;  %7569 = vmatpush3.msra.mxu0 %v1030_v33  ;;  %v1339_v33 = vld [vmem:[#allocation5 + $0x1f0] sm:$0xff] }
  0xd6   : > { %7441 = vmatmul.mubr.f32.gmra.mxu0 %v9616_v37  ;;  %7491 = vmatpush3.msra.mxu1 %v481_v36  ;;  %v9688_v36 = vld [vmem:[#allocation2 + $0x22] sm:$0xff] }
  0xd7   : > { %7570 = vmatprep.subr.mxu0 %v1029_v38  ;;  %7492 = vmatprep.subr.mxu1 %v480_v39  ;;  %11724 = vst [vmem:[#allocation27_spill] sm:$0xff] %v9688_v36 }
  0xd8   : > { %7571 = vmatpush3.msra.mxu0 %v1029_v38  ;;  %7467 = vmatprep.mubr.f32.mxu1 %v9620_v40  ;;  %v1645_v38 = vld [vmem:[#allocation5 + $0x270] sm:$0xff] }
  0xd9   : > { %7493 = vmatpush3.msra.mxu1 %v480_v39  ;;  %7572 = vmatprep.subr.mxu0 %v1028_v41  ;;  %v9691_v39 = vld [vmem:[#allocation2 + $0x30] sm:$0xff] }
  0xda   : > { %7443 = vmatprep.mubr.f32.mxu0 %v9623_v42  ;;  %7468 = vmatmul.mubr.f32.gmra.mxu1 %v9625_v43 }
  0xdb   : > { %7494 = vmatprep.subr.mxu1 %v479_v44  ;;  %7573 = vmatpush3.msra.mxu0 %v1028_v41  ;;  %v9694_v41 = vld [vmem:[#allocation2 + $0x38] sm:$0xff] }
  0xdc   : > { %7444 = vmatmul.mubr.f32.gmra.mxu0 %v9628_v45  ;;  %7495 = vmatpush3.msra.mxu1 %v479_v44  ;;  %v9697_v44 = vld [vmem:[#allocation2 + $0x32] sm:$0xff] }
  0xdd   : > { %7574 = vmatprep.subr.mxu0 %v1027_v46  ;;  %7496 = vmatprep.subr.mxu1 %v478_v47  ;;  %11725 = vst [vmem:[#allocation28_spill] sm:$0xff] %v9697_v44 }
  0xde   : > { %7575 = vmatpush3.msra.mxu0 %v1027_v46  ;;  %7470 = vmatprep.mubr.f32.mxu1 %v9632_v48  ;;  %v1338_v46 = vld [vmem:[#allocation5 + $0x1e8] sm:$0xff] }
  0xdf   : > { %7497 = vmatpush3.msra.mxu1 %v478_v47  ;;  %7576 = vmatprep.subr.mxu0 %v1026_v49  ;;  %v9700_v47 = vld [vmem:[#allocation2 + $0x3a] sm:$0xff] }
  0xe0   : > { %7446 = vmatprep.mubr.f32.mxu0 %v9635_v50  ;;  %7471 = vmatmul.mubr.f32.gmra.mxu1 %v9637_v51  ;;  %11726 = vst [vmem:[#allocation29_spill] sm:$0xff] %v9700_v47 }
  0xe1   : > { %7498 = vmatprep.subr.mxu1 %v477_v52  ;;  %7577 = vmatpush3.msra.mxu0 %v1026_v49  ;;  %v1644_v49 = vld [vmem:[#allocation5 + $0x268] sm:$0xff] }
  0xe2   : > { %7447 = vmatmul.mubr.f32.gmra.mxu0 %v9640_v53  ;;  %7499 = vmatpush3.msra.mxu1 %v477_v52  ;;  %v9703_v52 = vld [vmem:[#allocation2 + $0x48] sm:$0xff] }
  0xe3   : > { %7578 = vmatprep.subr.mxu0 %v1025_v54  ;;  %7500 = vmatprep.subr.mxu1 %v476_v55 }
  0xe4   : > { %7579 = vmatpush3.msra.mxu0 %v1025_v54  ;;  %7473 = vmatprep.mubr.f32.mxu1 %v9644_v56  ;;  %v9706_v54 = vld [vmem:[#allocation2 + $0x50] sm:$0xff] }
  0xe5   : > { %7501 = vmatpush3.msra.mxu1 %v476_v55  ;;  %7580 = vmatprep.subr.mxu0 %v1024_v57  ;;  %v9709_v55 = vld [vmem:[#allocation2 + $0x4a] sm:$0xff] }
  0xe6   : > { %7449 = vmatprep.mubr.f32.mxu0 %v9647_v58  ;;  %7474 = vmatmul.mubr.f32.gmra.mxu1 %v9649_v59  ;;  %11727 = vst [vmem:[#allocation30_spill] sm:$0xff] %v9709_v55 }
  0xe7   : > { %7502 = vmatprep.subr.mxu1 %v475_v60  ;;  %7581 = vmatpush3.msra.mxu0 %v1024_v57  ;;  %v1337_v57 = vld [vmem:[#allocation5 + $0x1e0] sm:$0xff] }
  0xe8   : > { %7450 = vmatmul.mubr.f32.gmra.mxu0 %v9652_v61  ;;  %7503 = vmatpush3.msra.mxu1 %v475_v60  ;;  %v9712_v60 = vld [vmem:[#allocation2 + $0x52] sm:$0xff] }
  0xe9   : > { %7582 = vmatprep.subr.mxu0 %v1023_v62  ;;  %7504 = vmatprep.subr.mxu1 %v474_v63  ;;  %11728 = vst [vmem:[#allocation31_spill] sm:$0xff] %v9712_v60 }
  0xea   : > { %7583 = vmatpush3.msra.mxu0 %v1023_v62  ;;  %7476 = vmatprep.mubr.f32.mxu1 %v9656_v0  ;;  %v1643_v62 = vld [vmem:[#allocation5 + $0x260] sm:$0xff] }
  0xeb   : > { %7505 = vmatpush3.msra.mxu1 %v474_v63  ;;  %7584 = vmatprep.subr.mxu0 %v1022_v1  ;;  %v9715_v63 = vld [vmem:[#allocation2 + $0x60] sm:$0xff] }
  0xec   : > { %7452 = vmatprep.mubr.f32.mxu0 %v9659_v2  ;;  %7477 = vmatmul.mubr.f32.gmra.mxu1 %v9661_v3  ;;  %v9847_v3 = vld [vmem:[#allocation2 + $0x168] sm:$0xff]  ;;  %v1631_v0 = vld [vmem:[#allocation5 + $0x200] sm:$0xff] }
  0xed   : > { %7506 = vmatprep.subr.mxu1 %v473_v4  ;;  %7585 = vmatpush3.msra.mxu0 %v1022_v1  ;;  %v9718_v1 = vld [vmem:[#allocation2 + $0x68] sm:$0xff] }
  0xee   : > { %7453 = vmatmul.mubr.f32.gmra.mxu0 %v9664_v5  ;;  %7507 = vmatpush3.msra.mxu1 %v473_v4  ;;  %v9721_v4 = vld [vmem:[#allocation2 + $0x62] sm:$0xff] }
  0xef   : > { %7586 = vmatprep.subr.mxu0 %v1021_v6  ;;  %7508 = vmatprep.subr.mxu1 %v472_v7  ;;  %11729 = vst [vmem:[#allocation32_spill] sm:$0xff] %v9721_v4 }
  0xf0   : > { %7587 = vmatpush3.msra.mxu0 %v1021_v6  ;;  %7479 = vmatprep.mubr.f32.mxu1 %v9668_v8  ;;  %v1336_v6 = vld [vmem:[#allocation5 + $0x1d8] sm:$0xff]  ;;  %v1632_v8 = vld [vmem:[#allocation5 + $0x208] sm:$0xff] }
  0xf1   : > { %7509 = vmatpush3.msra.mxu1 %v472_v7  ;;  %7588 = vmatprep.subr.mxu0 %v1020_v9  ;;  %v9724_v7 = vld [vmem:[#allocation2 + $0x6a] sm:$0xff] }
  0xf2   : > { %7455 = vmatprep.mubr.f32.mxu0 %v9671_v10  ;;  %7480 = vmatmul.mubr.f32.gmra.mxu1 %v9673_v11  ;;  %11730 = vst [vmem:[#allocation33_spill] sm:$0xff] %v9724_v7  ;;  %v9835_v11 = vld [vmem:[#allocation2 + $0x150] sm:$0xff] }
  0xf3   : > { %7510 = vmatprep.subr.mxu1 %v471_v12  ;;  %7589 = vmatpush3.msra.mxu0 %v1020_v9  ;;  %v1642_v9 = vld [vmem:[#allocation5 + $0x258] sm:$0xff] }
  0xf4   : > { %7456 = vmatmul.mubr.f32.gmra.mxu0 %v9676_v13  ;;  %7511 = vmatpush3.msra.mxu1 %v471_v12  ;;  %v9727_v12 = vld [vmem:[#allocation2 + $0x78] sm:$0xff] }
  0xf5   : > { %7590 = vmatprep.subr.mxu0 %v1019_v14  ;;  %7512 = vmatprep.subr.mxu1 %v470_v15 }
  0xf6   : > { %7591 = vmatpush3.msra.mxu0 %v1019_v14  ;;  %7513 = vmatpush3.msra.mxu1 %v470_v15  ;;  %v9730_v14 = vld [vmem:[#allocation2 + $0x80] sm:$0xff] }
  0xf7   : > { %7514 = vmatprep.mubr.f32.mxu1 %v438_v16  ;;  %7592 = vmatprep.subr.mxu0 %v1018_v18  ;;  %v9733_v15 = vld [vmem:[#allocation2 + $0x7a] sm:$0xff]  ;;  %v1335_v16 = vld [vmem:[#allocation5 + $0x1d0] sm:$0xff] }
  0xf8   : > { %7515 = vmatmul.mubr.f32.vlgmr.msra.gmra.mxu1 %v439_v20  ;;  %7593 = vmatpush3.msra.mxu0 %v1018_v18  ;;  %11731 = vst [vmem:[#allocation34_spill] sm:$0xff] %v9733_v15  ;;  %v9736_v18 = vld [vmem:[#allocation2 + $0x82] sm:$0xff]  ;;  %v1641_v20 = vld [vmem:[#allocation5 + $0x250] sm:$0xff] }
  0xf9   : > { %7594 = vmatprep.mubr.f32.mxu0 %v985_v21  ;;  %7642 = vmatprep.subr.mxu1 %v1340_v22  ;;  %11732 = vst [vmem:[#allocation35_spill] sm:$0xff] %v9736_v18  ;;  %v9739_v21 = vld [vmem:[#allocation2 + $0x90] sm:$0xff] }
  0xfa   : > { %7595 = vmatmul.mubr.f32.vlgmr.msra.gmra.mxu0 %v986_v23  ;;  %7643 = vmatpush3.msra.mxu1 %v1340_v22  ;;  %v9742_v22 = vld [vmem:[#allocation2 + $0x98] sm:$0xff] }
  0xfb   : > { %7722 = vmatprep.subr.mxu0 %v1646_v25  ;;  %7517 = vmatprep.mubr.f32.mxu1 %v9681_v28  ;;  %v9745_v23 = vld [vmem:[#allocation2 + $0x92] sm:$0xff] }
  0xfc   : > { %7723 = vmatpush3.msra.mxu0 %v1646_v25  ;;  %7518 = vmatmul.mubr.f32.gmra.mxu1 %v9683_v30  ;;  %11733 = vst [vmem:[#allocation36_spill] sm:$0xff] %v9745_v23  ;;  %v1334_v25 = vld [vmem:[#allocation5 + $0x1c8] sm:$0xff] }
  0xfd   : > { %7597 = vmatprep.mubr.f32.mxu0 %v9685_v31  ;;  %7644 = vmatprep.subr.mxu1 %v1339_v33  ;;  %v1633_v31 = vld [vmem:[#allocation5 + $0x210] sm:$0xff] }
  0xfe   : > { %7598 = vmatmul.mubr.f32.gmra.mxu0 %v9688_v36  ;;  %7645 = vmatpush3.msra.mxu1 %v1339_v33  ;;  %v9748_v33 = vld [vmem:[#allocation2 + $0x9a] sm:$0xff] }
  0xff   : > { %7724 = vmatprep.subr.mxu0 %v1645_v38  ;;  %7520 = vmatprep.mubr.f32.mxu1 %v9691_v39  ;;  %11734 = vst [vmem:[#allocation37_spill] sm:$0xff] %v9748_v33  ;;  %v9823_v36 = vld [vmem:[#allocation2 + $0x138] sm:$0xff] }
 0x100   : > { %7725 = vmatpush3.msra.mxu0 %v1645_v38  ;;  %7521 = vmatmul.mubr.f32.gmra.mxu1 %v9694_v41  ;;  %v1640_v38 = vld [vmem:[#allocation5 + $0x248] sm:$0xff] }
 0x101   : > { %7600 = vmatprep.mubr.f32.mxu0 %v9697_v44  ;;  %7646 = vmatprep.subr.mxu1 %v1338_v46  ;;  %v1634_v44 = vld [vmem:[#allocation5 + $0x218] sm:$0xff] }
 0x102   : > { %7601 = vmatmul.mubr.f32.gmra.mxu0 %v9700_v47  ;;  %7647 = vmatpush3.msra.mxu1 %v1338_v46  ;;  %v9751_v46 = vld [vmem:[#allocation2 + $0xa8] sm:$0xff]  ;;  %v9811_v47 = vld [vmem:[#allocation2 + $0x120] sm:$0xff] }
 0x103   : > { %7726 = vmatprep.subr.mxu0 %v1644_v49  ;;  %7523 = vmatprep.mubr.f32.mxu1 %v9703_v52 }
 0x104   : > { %7727 = vmatpush3.msra.mxu0 %v1644_v49  ;;  %7524 = vmatmul.mubr.f32.gmra.mxu1 %v9706_v54  ;;  %v9754_v49 = vld [vmem:[#allocation2 + $0xb0] sm:$0xff] }
 0x105   : > { %7603 = vmatprep.mubr.f32.mxu0 %v9709_v55  ;;  %7648 = vmatprep.subr.mxu1 %v1337_v57  ;;  %v1635_v55 = vld [vmem:[#allocation5 + $0x220] sm:$0xff] }
 0x106   : > { %7604 = vmatmul.mubr.f32.gmra.mxu0 %v9712_v60  ;;  %7649 = vmatpush3.msra.mxu1 %v1337_v57  ;;  %v9757_v57 = vld [vmem:[#allocation2 + $0xaa] sm:$0xff] }
 0x107   : > { %7728 = vmatprep.subr.mxu0 %v1643_v62  ;;  %7526 = vmatprep.mubr.f32.mxu1 %v9715_v63  ;;  %11735 = vst [vmem:[#allocation38_spill] sm:$0xff] %v9757_v57  ;;  %v9799_v60 = vld [vmem:[#allocation2 + $0x108] sm:$0xff] }
 0x108   : > { %7729 = vmatpush3.msra.mxu0 %v1643_v62  ;;  %7527 = vmatmul.mubr.f32.gmra.mxu1 %v9718_v1  ;;  %v1333_v62 = vld [vmem:[#allocation5 + $0x1c0] sm:$0xff] }
 0x109   : > { %7606 = vmatprep.mubr.f32.mxu0 %v9721_v4  ;;  %7650 = vmatprep.subr.mxu1 %v1336_v6  ;;  %v1636_v4 = vld [vmem:[#allocation5 + $0x228] sm:$0xff] }
 0x10a   : > { %7607 = vmatmul.mubr.f32.gmra.mxu0 %v9724_v7  ;;  %7651 = vmatpush3.msra.mxu1 %v1336_v6  ;;  %v9760_v6 = vld [vmem:[#allocation2 + $0xb2] sm:$0xff] }
 0x10b   : > { %7730 = vmatprep.subr.mxu0 %v1642_v9  ;;  %7529 = vmatprep.mubr.f32.mxu1 %v9727_v12  ;;  %11736 = vst [vmem:[#allocation39_spill] sm:$0xff] %v9760_v6  ;;  %v9787_v7 = vld [vmem:[#allocation2 + $0xf0] sm:$0xff] }
 0x10c   : > { %7731 = vmatpush3.msra.mxu0 %v1642_v9  ;;  %7530 = vmatmul.mubr.f32.gmra.mxu1 %v9730_v14  ;;  %v1639_v9 = vld [vmem:[#allocation5 + $0x240] sm:$0xff] }
 0x10d   : > { %7609 = vmatprep.mubr.f32.mxu0 %v9733_v15  ;;  %7652 = vmatprep.subr.mxu1 %v1335_v16  ;;  %v1637_v15 = vld [vmem:[#allocation5 + $0x230] sm:$0xff] }
 0x10e   : > { %7610 = vmatmul.mubr.f32.gmra.mxu0 %v9736_v18  ;;  %7653 = vmatpush3.msra.mxu1 %v1335_v16  ;;  %v9763_v16 = vld [vmem:[#allocation2 + $0xc0] sm:$0xff]  ;;  %v9775_v18 = vld [vmem:[#allocation2 + $0xd8] sm:$0xff] }
 0x10f   : > { %7732 = vmatprep.subr.mxu0 %v1641_v20  ;;  %7532 = vmatprep.mubr.f32.mxu1 %v9739_v21 }
 0x110   : > { %7733 = vmatpush3.msra.mxu0 %v1641_v20  ;;  %7533 = vmatmul.mubr.f32.gmra.mxu1 %v9742_v22  ;;  %v9766_v20 = vld [vmem:[#allocation2 + $0xc8] sm:$0xff] }
 0x111   : > { %7612 = vmatprep.mubr.f32.mxu0 %v9745_v23  ;;  %7654 = vmatprep.subr.mxu1 %v1334_v25  ;;  %v1638_v23 = vld [vmem:[#allocation5 + $0x238] sm:$0xff] }
 0x112   : > { %7613 = vmatmul.mubr.f32.gmra.mxu0 %v9748_v33  ;;  %7655 = vmatpush3.msra.mxu1 %v1334_v25  ;;  %v9769_v25 = vld [vmem:[#allocation2 + $0xc2] sm:$0xff]  ;;  %v1332_v33 = vld [vmem:[#allocation5 + $0x1b8] sm:$0xff] }
 0x113   : > { %7734 = vmatprep.subr.mxu0 %v1640_v38  ;;  %7535 = vmatprep.mubr.f32.mxu1 %v9751_v46  ;;  %11737 = vst [vmem:[#allocation40_spill] sm:$0xff] %v9769_v25 }
 0x114   : > { %7735 = vmatpush3.msra.mxu0 %v1640_v38  ;;  %7536 = vmatmul.mubr.f32.gmra.mxu1 %v9754_v49  ;;  %v9772_v38 = vld [vmem:[#allocation2 + $0xca] sm:$0xff] }
 0x115   : > { %7615 = vmatprep.mubr.f32.mxu0 %v9757_v57  ;;  %7656 = vmatprep.subr.mxu1 %v1333_v62  ;;  %11738 = vst [vmem:[#allocation41_spill] sm:$0xff] %v9772_v38  ;;  %v9778_v57 = vld [vmem:[#allocation2 + $0xe0] sm:$0xff] }
 0x116   : > { %7616 = vmatmul.mubr.f32.gmra.mxu0 %v9760_v6  ;;  %7657 = vmatpush3.msra.mxu1 %v1333_v62  ;;  %v9781_v62 = vld [vmem:[#allocation2 + $0xda] sm:$0xff]  ;;  %v1331_v6 = vld [vmem:[#allocation5 + $0x1b0] sm:$0xff] }
 0x117   : > { %7736 = vmatprep.subr.mxu0 %v1639_v9  ;;  %7538 = vmatprep.mubr.f32.mxu1 %v9763_v16  ;;  %11739 = vst [vmem:[#allocation42_spill] sm:$0xff] %v9781_v62 }
 0x118   : > { %7737 = vmatpush3.msra.mxu0 %v1639_v9  ;;  %7539 = vmatmul.mubr.f32.gmra.mxu1 %v9766_v20  ;;  %v9784_v9 = vld [vmem:[#allocation2 + $0xe2] sm:$0xff] }
 0x119   : > { %7618 = vmatprep.mubr.f32.mxu0 %v9769_v25  ;;  %7658 = vmatprep.subr.mxu1 %v1332_v33  ;;  %11740 = vst [vmem:[#allocation43_spill] sm:$0xff] %v9784_v9  ;;  %v9790_v25 = vld [vmem:[#allocation2 + $0xf8] sm:$0xff] }
 0x11a   : > { %7619 = vmatmul.mubr.f32.gmra.mxu0 %v9772_v38  ;;  %7659 = vmatpush3.msra.mxu1 %v1332_v33  ;;  %v9793_v33 = vld [vmem:[#allocation2 + $0xf2] sm:$0xff]  ;;  %v1330_v38 = vld [vmem:[#allocation5 + $0x1a8] sm:$0xff] }
 0x11b   : > { %7738 = vmatprep.subr.mxu0 %v1638_v23  ;;  %7541 = vmatprep.mubr.f32.mxu1 %v9775_v18  ;;  %11741 = vst [vmem:[#allocation44_spill] sm:$0xff] %v9793_v33 }
 0x11c   : > { %7739 = vmatpush3.msra.mxu0 %v1638_v23  ;;  %7542 = vmatmul.mubr.f32.gmra.mxu1 %v9778_v57  ;;  %v9796_v23 = vld [vmem:[#allocation2 + $0xfa] sm:$0xff] }
 0x11d   : > { %7621 = vmatprep.mubr.f32.mxu0 %v9781_v62  ;;  %7660 = vmatprep.subr.mxu1 %v1331_v6  ;;  %11742 = vst [vmem:[#allocation45_spill] sm:$0xff] %v9796_v23  ;;  %v9802_v62 = vld [vmem:[#allocation2 + $0x110] sm:$0xff] }
 0x11e   : > { %7622 = vmatmul.mubr.f32.gmra.mxu0 %v9784_v9  ;;  %7661 = vmatpush3.msra.mxu1 %v1331_v6  ;;  %v9805_v6 = vld [vmem:[#allocation2 + $0x10a] sm:$0xff]  ;;  %v1329_v9 = vld [vmem:[#allocation5 + $0x1a0] sm:$0xff] }
 0x11f   : > { %7740 = vmatprep.subr.mxu0 %v1637_v15  ;;  %7544 = vmatprep.mubr.f32.mxu1 %v9787_v7  ;;  %11743 = vst [vmem:[#allocation46_spill] sm:$0xff] %v9805_v6 }
 0x120   : > { %7741 = vmatpush3.msra.mxu0 %v1637_v15  ;;  %7545 = vmatmul.mubr.f32.gmra.mxu1 %v9790_v25  ;;  %v9808_v15 = vld [vmem:[#allocation2 + $0x112] sm:$0xff] }
 0x121   : > { %7624 = vmatprep.mubr.f32.mxu0 %v9793_v33  ;;  %7662 = vmatprep.subr.mxu1 %v1330_v38  ;;  %11744 = vst [vmem:[#allocation47_spill] sm:$0xff] %v9808_v15  ;;  %v9814_v33 = vld [vmem:[#allocation2 + $0x128] sm:$0xff] }
 0x122   : > { %7625 = vmatmul.mubr.f32.gmra.mxu0 %v9796_v23  ;;  %7663 = vmatpush3.msra.mxu1 %v1330_v38  ;;  %v9817_v38 = vld [vmem:[#allocation2 + $0x122] sm:$0xff]  ;;  %v1328_v23 = vld [vmem:[#allocation5 + $0x198] sm:$0xff] }
 0x123   : > { %7742 = vmatprep.subr.mxu0 %v1636_v4  ;;  %7547 = vmatprep.mubr.f32.mxu1 %v9799_v60  ;;  %11745 = vst [vmem:[#allocation48_spill] sm:$0xff] %v9817_v38 }
 0x124   : > { %7743 = vmatpush3.msra.mxu0 %v1636_v4  ;;  %7548 = vmatmul.mubr.f32.gmra.mxu1 %v9802_v62  ;;  %v9820_v4 = vld [vmem:[#allocation2 + $0x12a] sm:$0xff] }
 0x125   : > { %7627 = vmatprep.mubr.f32.mxu0 %v9805_v6  ;;  %7664 = vmatprep.subr.mxu1 %v1329_v9  ;;  %11746 = vst [vmem:[#allocation49_spill] sm:$0xff] %v9820_v4  ;;  %v9826_v6 = vld [vmem:[#allocation2 + $0x140] sm:$0xff] }
 0x126   : > { %7628 = vmatmul.mubr.f32.gmra.mxu0 %v9808_v15  ;;  %7665 = vmatpush3.msra.mxu1 %v1329_v9  ;;  %v9829_v9 = vld [vmem:[#allocation2 + $0x13a] sm:$0xff]  ;;  %v1327_v15 = vld [vmem:[#allocation5 + $0x190] sm:$0xff] }
 0x127   : > { %7744 = vmatprep.subr.mxu0 %v1635_v55  ;;  %7550 = vmatprep.mubr.f32.mxu1 %v9811_v47  ;;  %11747 = vst [vmem:[#allocation50_spill] sm:$0xff] %v9829_v9 }
 0x128   : > { %7745 = vmatpush3.msra.mxu0 %v1635_v55  ;;  %7551 = vmatmul.mubr.f32.gmra.mxu1 %v9814_v33  ;;  %v9832_v55 = vld [vmem:[#allocation2 + $0x142] sm:$0xff] }
 0x129   : > { %7630 = vmatprep.mubr.f32.mxu0 %v9817_v38  ;;  %7666 = vmatprep.subr.mxu1 %v1328_v23  ;;  %11748 = vst [vmem:[#allocation51_spill] sm:$0xff] %v9832_v55  ;;  %v9838_v38 = vld [vmem:[#allocation2 + $0x158] sm:$0xff] }
 0x12a   : > { %7631 = vmatmul.mubr.f32.gmra.mxu0 %v9820_v4  ;;  %7667 = vmatpush3.msra.mxu1 %v1328_v23  ;;  %v9841_v23 = vld [vmem:[#allocation2 + $0x152] sm:$0xff]  ;;  %v1326_v4 = vld [vmem:[#allocation5 + $0x188] sm:$0xff] }
 0x12b   : > { %7746 = vmatprep.subr.mxu0 %v1634_v44  ;;  %7553 = vmatprep.mubr.f32.mxu1 %v9823_v36 }
 0x12c   : > { %7747 = vmatpush3.msra.mxu0 %v1634_v44  ;;  %7554 = vmatmul.mubr.f32.gmra.mxu1 %v9826_v6  ;;  %v9844_v44 = vld [vmem:[#allocation2 + $0x15a] sm:$0xff] }
 0x12d   : > { %7633 = vmatprep.mubr.f32.mxu0 %v9829_v9  ;;  %7668 = vmatprep.subr.mxu1 %v1327_v15  ;;  %11749 = vst [vmem:[#allocation52_spill] sm:$0xff] %v9844_v44  ;;  %v9850_v9 = vld [vmem:[#allocation2 + $0x170] sm:$0xff] }
 0x12e   : > { %7634 = vmatmul.mubr.f32.gmra.mxu0 %v9832_v55  ;;  %7669 = vmatpush3.msra.mxu1 %v1327_v15  ;;  %v9853_v15 = vld [vmem:[#allocation2 + $0x16a] sm:$0xff]  ;;  %v1325_v55 = vld [vmem:[#allocation5 + $0x180] sm:$0xff] }
 0x12f   : > { %7748 = vmatprep.subr.mxu0 %v1633_v31  ;;  %7556 = vmatprep.mubr.f32.mxu1 %v9835_v11 }
 0x130   : > { %7749 = vmatpush3.msra.mxu0 %v1633_v31  ;;  %7557 = vmatmul.mubr.f32.gmra.mxu1 %v9838_v38  ;;  %v9856_v31 = vld [vmem:[#allocation2 + $0x172] sm:$0xff] }
 0x131   : > { %7636 = vmatprep.mubr.f32.mxu0 %v9841_v23  ;;  %7670 = vmatprep.subr.mxu1 %v1326_v4 }
 0x132   : > { %7637 = vmatmul.mubr.f32.gmra.mxu0 %v9844_v44  ;;  %7671 = vmatpush3.msra.mxu1 %v1326_v4  ;;  %v1952_v44 = vld [vmem:[#allocation5 + $0x2f8] sm:$0xff] }
 0x133   : > { %7750 = vmatprep.subr.mxu0 %v1632_v8  ;;  %7559 = vmatprep.mubr.f32.mxu1 %v9847_v3  ;;  %v2259_v4 = vld [vmem:[#allocation5 + $0x378] sm:$0xff] }
 0x134   : > { %7751 = vmatpush3.msra.mxu0 %v1632_v8  ;;  %7560 = vmatmul.mubr.f32.gmra.mxu1 %v9850_v9  ;;  %v1951_v8 = vld [vmem:[#allocation5 + $0x2f0] sm:$0xff] }
 0x135   : > { %7639 = vmatprep.mubr.f32.mxu0 %v9853_v15  ;;  %7672 = vmatprep.subr.mxu1 %v1325_v55 }
 0x136   : > { %7640 = vmatmul.mubr.f32.gmra.mxu0 %v9856_v31  ;;  %7673 = vmatpush3.msra.mxu1 %v1325_v55  ;;  %v2258_v55 = vld [vmem:[#allocation5 + $0x370] sm:$0xff] }
 0x137   : > { %7752 = vmatprep.subr.mxu0 %v1631_v0  ;;  %7674 = vmatprep.mubr.f32.mxu1 %v9681_v28  ;;  %v11751_v28 = vld [vmem:[#allocation23_spill] sm:$0xff] }
 0x138   : > { %7753 = vmatpush3.msra.mxu0 %v1631_v0  ;;  %7675 = vmatmul.mubr.f32.vlgmr.msra.gmra.mxu1 %v9683_v30  ;;  %v1950_v0 = vld [vmem:[#allocation5 + $0x2e8] sm:$0xff] }
 0x139   : > { %7754 = vmatprep.mubr.f32.mxu0 %v9599_v26  ;;  %7802 = vmatprep.subr.mxu1 %v1952_v44  ;;  %v2257_v26 = vld [vmem:[#allocation5 + $0x368] sm:$0xff] }
 0x13a   : > { %7755 = vmatmul.mubr.f32.vlgmr.msra.gmra.mxu0 %v9604_v29  ;;  %7803 = vmatpush3.msra.mxu1 %v1952_v44  ;;  %v1949_v29 = vld [vmem:[#allocation5 + $0x2e0] sm:$0xff]  ;;  %v1938_v30 = vld [vmem:[#allocation5 + $0x288] sm:$0xff]  ;;  %v11752_v44 = vld [vmem:[#allocation24_spill] sm:$0xff] }
 0x13b   : > { %7882 = vmatprep.subr.mxu0 %v2259_v4  ;;  %7677 = vmatprep.mubr.f32.mxu1 %v9691_v39 }
 0x13c   : > { %7883 = vmatpush3.msra.mxu0 %v2259_v4  ;;  %7678 = vmatmul.mubr.f32.gmra.mxu1 %v9694_v41  ;;  %v9922_v4 = vld [vmem:[#allocation2 + $0x188] sm:$0xff] }
 0x13d   : > { %7757 = vmatprep.mubr.f32.mxu0 %v9611_v34  ;;  %7804 = vmatprep.subr.mxu1 %v1951_v8  ;;  %v2256_v34 = vld [vmem:[#allocation5 + $0x360] sm:$0xff] }
 0x13e   : > { %7758 = vmatmul.mubr.f32.gmra.mxu0 %v9616_v37  ;;  %7805 = vmatpush3.msra.mxu1 %v1951_v8  ;;  %v1948_v37 = vld [vmem:[#allocation5 + $0x2d8] sm:$0xff] }
 0x13f   : > { %7884 = vmatprep.subr.mxu0 %v2258_v55  ;;  %7680 = vmatprep.mubr.f32.mxu1 %v9703_v52  ;;  %v11753_v8 = vld [vmem:[#allocation25_spill] sm:$0xff] }
 0x140   : > { %7885 = vmatpush3.msra.mxu0 %v2258_v55  ;;  %7681 = vmatmul.mubr.f32.gmra.mxu1 %v9706_v54  ;;  %v9925_v55 = vld [vmem:[#allocation2 + $0x181] sm:$0xff] }
 0x141   : > { %7760 = vmatprep.mubr.f32.mxu0 %v9623_v42  ;;  %7806 = vmatprep.subr.mxu1 %v1950_v0  ;;  %v2255_v42 = vld [vmem:[#allocation5 + $0x358] sm:$0xff] }
 0x142   : > { %7761 = vmatmul.mubr.f32.gmra.mxu0 %v9628_v45  ;;  %7807 = vmatpush3.msra.mxu1 %v1950_v0  ;;  %v1947_v45 = vld [vmem:[#allocation5 + $0x2d0] sm:$0xff]  ;;  %v1937_v0 = vld [vmem:[#allocation5 + $0x280] sm:$0xff] }
 0x143   : > { %7886 = vmatprep.subr.mxu0 %v2257_v26  ;;  %7683 = vmatprep.mubr.f32.mxu1 %v9715_v63 }
 0x144   : > { %7887 = vmatpush3.msra.mxu0 %v2257_v26  ;;  %7684 = vmatmul.mubr.f32.gmra.mxu1 %v9718_v1  ;;  %v9928_v26 = vld [vmem:[#allocation2 + $0x189] sm:$0xff] }
 0x145   : > { %7763 = vmatprep.mubr.f32.mxu0 %v9635_v50  ;;  %7808 = vmatprep.subr.mxu1 %v1949_v29  ;;  %v2254_v50 = vld [vmem:[#allocation5 + $0x350] sm:$0xff] }
 0x146   : > { %7764 = vmatmul.mubr.f32.gmra.mxu0 %v9640_v53  ;;  %7809 = vmatpush3.msra.mxu1 %v1949_v29  ;;  %v1946_v53 = vld [vmem:[#allocation5 + $0x2c8] sm:$0xff]  ;;  %v2244_v29 = vld [vmem:[#allocation5 + $0x300] sm:$0xff] }
 0x147   : > { %7888 = vmatprep.subr.mxu0 %v2256_v34  ;;  %7686 = vmatprep.mubr.f32.mxu1 %v9727_v12 }
 0x148   : > { %7889 = vmatpush3.msra.mxu0 %v2256_v34  ;;  %7687 = vmatmul.mubr.f32.gmra.mxu1 %v9730_v14  ;;  %v2565_v34 = vld [vmem:[#allocation5 + $0x3f8] sm:$0xff] }
 0x149   : > { %7766 = vmatprep.mubr.f32.mxu0 %v9647_v58  ;;  %7810 = vmatprep.subr.mxu1 %v1948_v37  ;;  %v2253_v58 = vld [vmem:[#allocation5 + $0x348] sm:$0xff] }
 0x14a   : > { %7767 = vmatmul.mubr.f32.gmra.mxu0 %v9652_v61  ;;  %7811 = vmatpush3.msra.mxu1 %v1948_v37  ;;  %v1945_v61 = vld [vmem:[#allocation5 + $0x2c0] sm:$0xff] }
 0x14b   : > { %7890 = vmatprep.subr.mxu0 %v2255_v42  ;;  %7689 = vmatprep.mubr.f32.mxu1 %v9739_v21  ;;  %v11754_v37 = vld [vmem:[#allocation26_spill] sm:$0xff] }
 0x14c   : > { %7891 = vmatpush3.msra.mxu0 %v2255_v42  ;;  %7690 = vmatmul.mubr.f32.gmra.mxu1 %v9742_v22  ;;  %v11755_v42 = vld [vmem:[#allocation27_spill] sm:$0xff] }
 0x14d   : > { %7769 = vmatprep.mubr.f32.mxu0 %v9659_v2  ;;  %7812 = vmatprep.subr.mxu1 %v1947_v45  ;;  %v2252_v2 = vld [vmem:[#allocation5 + $0x340] sm:$0xff] }
 0x14e   : > { %7770 = vmatmul.mubr.f32.gmra.mxu0 %v9664_v5  ;;  %7813 = vmatpush3.msra.mxu1 %v1947_v45  ;;  %v1944_v5 = vld [vmem:[#allocation5 + $0x2b8] sm:$0xff] }
 0x14f   : > { %7892 = vmatprep.subr.mxu0 %v2254_v50  ;;  %7692 = vmatprep.mubr.f32.mxu1 %v9751_v46  ;;  %v2871_v45 = vld [vmem:[#allocation5 + $0x478] sm:$0xff] }
 0x150   : > { %7893 = vmatpush3.msra.mxu0 %v2254_v50  ;;  %7693 = vmatmul.mubr.f32.gmra.mxu1 %v9754_v49  ;;  %v2564_v50 = vld [vmem:[#allocation5 + $0x3f0] sm:$0xff] }
 0x151   : > { %7772 = vmatprep.mubr.f32.mxu0 %v9671_v10  ;;  %7814 = vmatprep.subr.mxu1 %v1946_v53  ;;  %v2251_v10 = vld [vmem:[#allocation5 + $0x338] sm:$0xff] }
 0x152   : > { %7773 = vmatmul.mubr.f32.gmra.mxu0 %v9676_v13  ;;  %7815 = vmatpush3.msra.mxu1 %v1946_v53  ;;  %v1943_v13 = vld [vmem:[#allocation5 + $0x2b0] sm:$0xff] }
 0x153   : > { %7894 = vmatprep.subr.mxu0 %v2253_v58  ;;  %7695 = vmatprep.mubr.f32.mxu1 %v9763_v16  ;;  %v11756_v53 = vld [vmem:[#allocation28_spill] sm:$0xff] }
 0x154   : > { %7895 = vmatpush3.msra.mxu0 %v2253_v58  ;;  %7696 = vmatmul.mubr.f32.gmra.mxu1 %v9766_v20  ;;  %v11757_v58 = vld [vmem:[#allocation29_spill] sm:$0xff] }
 0x155   : > { %7775 = vmatprep.mubr.f32.mxu0 %v9591_v17  ;;  %7816 = vmatprep.subr.mxu1 %v1945_v61  ;;  %v2250_v17 = vld [vmem:[#allocation5 + $0x330] sm:$0xff] }
 0x156   : > { %7776 = vmatmul.mubr.f32.gmra.mxu0 %v9593_v19  ;;  %7817 = vmatpush3.msra.mxu1 %v1945_v61  ;;  %v1942_v19 = vld [vmem:[#allocation5 + $0x2a8] sm:$0xff]  ;;  %v2870_v61 = vld [vmem:[#allocation5 + $0x470] sm:$0xff] }
 0x157   : > { %7896 = vmatprep.subr.mxu0 %v2252_v2  ;;  %7698 = vmatprep.mubr.f32.mxu1 %v9775_v18 }
 0x158   : > { %7897 = vmatpush3.msra.mxu0 %v2252_v2  ;;  %7699 = vmatmul.mubr.f32.gmra.mxu1 %v9778_v57  ;;  %v2563_v2 = vld [vmem:[#allocation5 + $0x3e8] sm:$0xff] }
 0x159   : > { %7778 = vmatprep.mubr.f32.mxu0 %v9597_v24  ;;  %7818 = vmatprep.subr.mxu1 %v1944_v5  ;;  %v2249_v24 = vld [vmem:[#allocation5 + $0x328] sm:$0xff] }
 0x15a   : > { %7779 = vmatmul.mubr.f32.gmra.mxu0 %v9601_v27  ;;  %7819 = vmatpush3.msra.mxu1 %v1944_v5  ;;  %v1941_v27 = vld [vmem:[#allocation5 + $0x2a0] sm:$0xff]  ;;  %v2869_v5 = vld [vmem:[#allocation5 + $0x468] sm:$0xff] }
 0x15b   : > { %7898 = vmatprep.subr.mxu0 %v2251_v10  ;;  %7701 = vmatprep.mubr.f32.mxu1 %v9787_v7 }
 0x15c   : > { %7899 = vmatpush3.msra.mxu0 %v2251_v10  ;;  %7702 = vmatmul.mubr.f32.gmra.mxu1 %v9790_v25  ;;  %v2562_v10 = vld [vmem:[#allocation5 + $0x3e0] sm:$0xff] }
 0x15d   : > { %7781 = vmatprep.mubr.f32.mxu0 %v9608_v32  ;;  %7820 = vmatprep.subr.mxu1 %v1943_v13  ;;  %v2248_v32 = vld [vmem:[#allocation5 + $0x320] sm:$0xff] }
 0x15e   : > { %7782 = vmatmul.mubr.f32.gmra.mxu0 %v9613_v35  ;;  %7821 = vmatpush3.msra.mxu1 %v1943_v13  ;;  %v1940_v35 = vld [vmem:[#allocation5 + $0x298] sm:$0xff]  ;;  %v2868_v13 = vld [vmem:[#allocation5 + $0x460] sm:$0xff] }
 0x15f   : > { %7900 = vmatprep.subr.mxu0 %v2250_v17  ;;  %7704 = vmatprep.mubr.f32.mxu1 %v9799_v60 }
 0x160   : > { %7901 = vmatpush3.msra.mxu0 %v2250_v17  ;;  %7705 = vmatmul.mubr.f32.gmra.mxu1 %v9802_v62  ;;  %v2561_v17 = vld [vmem:[#allocation5 + $0x3d8] sm:$0xff] }
 0x161   : > { %7784 = vmatprep.mubr.f32.mxu0 %v9620_v40  ;;  %7822 = vmatprep.subr.mxu1 %v1942_v19  ;;  %v2247_v40 = vld [vmem:[#allocation5 + $0x318] sm:$0xff] }
 0x162   : > { %7785 = vmatmul.mubr.f32.gmra.mxu0 %v9625_v43  ;;  %7823 = vmatpush3.msra.mxu1 %v1942_v19  ;;  %v1939_v43 = vld [vmem:[#allocation5 + $0x290] sm:$0xff]  ;;  %v2867_v19 = vld [vmem:[#allocation5 + $0x458] sm:$0xff] }
 0x163   : > { %7902 = vmatprep.subr.mxu0 %v2249_v24  ;;  %7707 = vmatprep.mubr.f32.mxu1 %v9811_v47 }
 0x164   : > { %7903 = vmatpush3.msra.mxu0 %v2249_v24  ;;  %7708 = vmatmul.mubr.f32.gmra.mxu1 %v9814_v33 }
 0x165   : > { %7787 = vmatprep.mubr.f32.mxu0 %v9632_v48  ;;  %7824 = vmatprep.subr.mxu1 %v1941_v27  ;;  %v2246_v48 = vld [vmem:[#allocation5 + $0x310] sm:$0xff] }
 0x166   : > { %7788 = vmatmul.mubr.f32.gmra.mxu0 %v9637_v51  ;;  %7825 = vmatpush3.msra.mxu1 %v1941_v27  ;;  %v11750_v51 = vld [vmem:[#allocation22_spill] sm:$0xff] }
 0x167   : > { %7904 = vmatprep.subr.mxu0 %v2248_v32  ;;  %7710 = vmatprep.mubr.f32.mxu1 %v9823_v36 }
 0x168   : > { %7905 = vmatpush3.msra.mxu0 %v2248_v32  ;;  %7711 = vmatmul.mubr.f32.gmra.mxu1 %v9826_v6 }
 0x169   : > { %7790 = vmatprep.mubr.f32.mxu0 %v9644_v56  ;;  %7826 = vmatprep.subr.mxu1 %v1940_v35  ;;  %v2245_v56 = vld [vmem:[#allocation5 + $0x308] sm:$0xff] }
 0x16a   : > { %7791 = vmatmul.mubr.f32.gmra.mxu0 %v9649_v59  ;;  %7827 = vmatpush3.msra.mxu1 %v1940_v35  ;;  %v9919_v59 = vld [vmem:[#allocation2 + $0x180] sm:$0xff]  ;;  %v11765_v35 = vld [vmem:[#allocation37_spill] sm:$0xff] }
 0x16b   : > { %7906 = vmatprep.subr.mxu0 %v2247_v40  ;;  %7713 = vmatprep.mubr.f32.mxu1 %v9835_v11 }
 0x16c   : > { %7907 = vmatpush3.msra.mxu0 %v2247_v40  ;;  %7714 = vmatmul.mubr.f32.gmra.mxu1 %v9838_v38  ;;  %v2866_v40 = vld [vmem:[#allocation5 + $0x450] sm:$0xff] }
 0x16d   : > { %7793 = vmatprep.mubr.f32.mxu0 %v11750_v51  ;;  %7828 = vmatprep.subr.mxu1 %v1939_v43  ;;  %v11767_v51 = vld [vmem:[#allocation39_spill] sm:$0xff] }
 0x16e   : > { %7794 = vmatmul.mubr.f32.gmra.mxu0 %v11751_v28  ;;  %7829 = vmatpush3.msra.mxu1 %v1939_v43  ;;  %v2865_v28 = vld [vmem:[#allocation5 + $0x448] sm:$0xff] }
 0x16f   : > { %7908 = vmatprep.subr.mxu0 %v2246_v48  ;;  %7716 = vmatprep.mubr.f32.mxu1 %v9847_v3 }
 0x170   : > { %7909 = vmatpush3.msra.mxu0 %v2246_v48  ;;  %7717 = vmatmul.mubr.f32.gmra.mxu1 %v9850_v9  ;;  %v11766_v48 = vld [vmem:[#allocation38_spill] sm:$0xff] }
 0x171   : > { %7796 = vmatprep.mubr.f32.mxu0 %v11752_v44  ;;  %7830 = vmatprep.subr.mxu1 %v1938_v30  ;;  %v11768_v44 = vld [vmem:[#allocation40_spill] sm:$0xff] }
 0x172   : > { %7797 = vmatmul.mubr.f32.gmra.mxu0 %v11753_v8  ;;  %7831 = vmatpush3.msra.mxu1 %v1938_v30  ;;  %v11769_v8 = vld [vmem:[#allocation41_spill] sm:$0xff] }
 0x173   : > { %7910 = vmatprep.subr.mxu0 %v2245_v56  ;;  %7719 = vmatprep.mubr.f32.mxu1 %v9919_v59 }
 0x174   : > { %7911 = vmatpush3.msra.mxu0 %v2245_v56  ;;  %7720 = vmatmul.mubr.f32.gmra.mxu1 %v9922_v4 }
 0x175   : > { %7799 = vmatprep.mubr.f32.mxu0 %v9925_v55  ;;  %7832 = vmatprep.subr.mxu1 %v1937_v0 }
 0x176   : > { %7800 = vmatmul.mubr.f32.gmra.mxu0 %v9928_v26  ;;  %7833 = vmatpush3.msra.mxu1 %v1937_v0  ;;  %v2864_v0 = vld [vmem:[#allocation5 + $0x440] sm:$0xff] }
 0x177   : > { %7912 = vmatprep.subr.mxu0 %v2244_v29  ;;  %7834 = vmatprep.mubr.f32.mxu1 %v11754_v37  ;;  %v11770_v37 = vld [vmem:[#allocation42_spill] sm:$0xff] }
 0x178   : > { %7913 = vmatpush3.msra.mxu0 %v2244_v29  ;;  %7835 = vmatmul.mubr.f32.vlgmr.msra.gmra.mxu1 %v11755_v42  ;;  %v11771_v42 = vld [vmem:[#allocation43_spill] sm:$0xff] }
 0x179   : > { %7914 = vmatprep.mubr.f32.mxu0 %v9691_v39  ;;  %7962 = vmatprep.subr.mxu1 %v2565_v34  ;;  %v11758_v39 = vld [vmem:[#allocation30_spill] sm:$0xff] }
 0x17a   : > { %7915 = vmatmul.mubr.f32.vlgmr.msra.gmra.mxu0 %v9694_v41  ;;  %7963 = vmatpush3.msra.mxu1 %v2565_v34  ;;  %v11759_v41 = vld [vmem:[#allocation31_spill] sm:$0xff] }
 0x17b   : > { %8042 = vmatprep.subr.mxu0 %v2871_v45  ;;  %7837 = vmatprep.mubr.f32.mxu1 %v11756_v53  ;;  %v11772_v53 = vld [vmem:[#allocation44_spill] sm:$0xff] }
 0x17c   : > { %8043 = vmatpush3.msra.mxu0 %v2871_v45  ;;  %7838 = vmatmul.mubr.f32.gmra.mxu1 %v11757_v58  ;;  %v2863_v45 = vld [vmem:[#allocation5 + $0x438] sm:$0xff] }
 0x17d   : > { %7917 = vmatprep.mubr.f32.mxu0 %v9703_v52  ;;  %7964 = vmatprep.subr.mxu1 %v2564_v50  ;;  %v11760_v52 = vld [vmem:[#allocation32_spill] sm:$0xff]  ;;  %v11773_v58 = vld [vmem:[#allocation45_spill] sm:$0xff] }
 0x17e   : > { %7918 = vmatmul.mubr.f32.gmra.mxu0 %v9706_v54  ;;  %7965 = vmatpush3.msra.mxu1 %v2564_v50  ;;  %v11761_v54 = vld [vmem:[#allocation33_spill] sm:$0xff] }
 0x17f   : > { %8044 = vmatprep.subr.mxu0 %v2870_v61  ;;  %7840 = vmatprep.mubr.f32.mxu1 %v11758_v39 }
 0x180   : > { %8045 = vmatpush3.msra.mxu0 %v2870_v61  ;;  %7841 = vmatmul.mubr.f32.gmra.mxu1 %v11759_v41  ;;  %v2862_v61 = vld [vmem:[#allocation5 + $0x430] sm:$0xff]  ;;  %v11774_v41 = vld [vmem:[#allocation46_spill] sm:$0xff] }
 0x181   : > { %7920 = vmatprep.mubr.f32.mxu0 %v9715_v63  ;;  %7966 = vmatprep.subr.mxu1 %v2563_v2  ;;  %v11762_v63 = vld [vmem:[#allocation34_spill] sm:$0xff] }
 0x182   : > { %7921 = vmatmul.mubr.f32.gmra.mxu0 %v9718_v1  ;;  %7967 = vmatpush3.msra.mxu1 %v2563_v2  ;;  %v11763_v1 = vld [vmem:[#allocation35_spill] sm:$0xff] }
 0x183   : > { %8046 = vmatprep.subr.mxu0 %v2869_v5  ;;  %7843 = vmatprep.mubr.f32.mxu1 %v11760_v52 }
 0x184   : > { %8047 = vmatpush3.msra.mxu0 %v2869_v5  ;;  %7844 = vmatmul.mubr.f32.gmra.mxu1 %v11761_v54  ;;  %v11775_v5 = vld [vmem:[#allocation47_spill] sm:$0xff] }
 0x185   : > { %7923 = vmatprep.mubr.f32.mxu0 %v9727_v12  ;;  %7968 = vmatprep.subr.mxu1 %v2562_v10  ;;  %v2560_v12 = vld [vmem:[#allocation5 + $0x3d0] sm:$0xff] }
 0x186   : > { %7924 = vmatmul.mubr.f32.gmra.mxu0 %v9730_v14  ;;  %7969 = vmatpush3.msra.mxu1 %v2562_v10  ;;  %v11764_v14 = vld [vmem:[#allocation36_spill] sm:$0xff]  ;;  %v2861_v10 = vld [vmem:[#allocation5 + $0x428] sm:$0xff] }
 0x187   : > { %8048 = vmatprep.subr.mxu0 %v2868_v13  ;;  %7846 = vmatprep.mubr.f32.mxu1 %v11762_v63  ;;  %v2860_v63 = vld [vmem:[#allocation5 + $0x420] sm:$0xff] }
 0x188   : > { %8049 = vmatpush3.msra.mxu0 %v2868_v13  ;;  %7847 = vmatmul.mubr.f32.gmra.mxu1 %v11763_v1  ;;  %v11777_v13 = vld [vmem:[#allocation48_spill] sm:$0xff] }
 0x189   : > { %7926 = vmatprep.mubr.f32.mxu0 %v9739_v21  ;;  %7970 = vmatprep.subr.mxu1 %v2561_v17  ;;  %v9952_v24 = vpop.f32.mrf.mxu1  ;;  %v2559_v21 = vld [vmem:[#allocation5 + $0x3c8] sm:$0xff] }
 0x18a   : > { %7927 = vmatmul.mubr.f32.gmra.mxu0 %v9742_v22  ;;  %7971 = vmatpush3.msra.mxu1 %v2561_v17  ;;  %v9955_v27 = vpop.f32.mrf.mxu0  ;;  %v11778_v17 = vld [vmem:[#allocation49_spill] sm:$0xff] }
 0x18b   : > { %8050 = vmatprep.subr.mxu0 %v2867_v19  ;;  %7849 = vmatprep.mubr.f32.mxu1 %v11764_v14  ;;  %v9958_v32 = vpop.f32.mrf.mxu1  ;;  %v2859_v14 = vld [vmem:[#allocation5 + $0x418] sm:$0xff] }
 0x18c   : > { %8051 = vmatpush3.msra.mxu0 %v2867_v19  ;;  %7850 = vmatmul.mubr.f32.gmra.mxu1 %v11765_v35  ;;  %v9961_v43 = vpop.f32.mrf.mxu0  ;;  %v11779_v19 = vld [vmem:[#allocation50_spill] sm:$0xff] }
 0x18d   : > { %7929 = vmatprep.mubr.f32.mxu0 %v9751_v46  ;;  %7972 = vmatprep.subr.mxu1 %v2560_v12  ;;  %v2558_v46 = vld [vmem:[#allocation5 + $0x3c0] sm:$0xff] }
 0x18e   : > { %7930 = vmatmul.mubr.f32.gmra.mxu0 %v9754_v49  ;;  %7973 = vmatpush3.msra.mxu1 %v2560_v12  ;;  %v9965_v22 = vpop.f32.mrf.mxu1  ;;  %v11780_v12 = vld [vmem:[#allocation51_spill] sm:$0xff] }
 0x18f   : > { %8052 = vmatprep.subr.mxu0 %v2866_v40  ;;  %7852 = vmatprep.mubr.f32.mxu1 %v11766_v48  ;;  %v2858_v48 = vld [vmem:[#allocation5 + $0x410] sm:$0xff] }
 0x190   : > { %8053 = vmatpush3.msra.mxu0 %v2866_v40  ;;  %7853 = vmatmul.mubr.f32.gmra.mxu1 %v11767_v51  ;;  %v9969_v30 = vpop.f32.mrf.mxu0  ;;  %v9971_v56 = vpop.f32.mrf.mxu1 }
 0x191   : > { %7932 = vmatprep.mubr.f32.mxu0 %v9763_v16  ;;  %7974 = vmatprep.subr.mxu1 %v2559_v21  ;;  %v2557_v16 = vld [vmem:[#allocation5 + $0x3b8] sm:$0xff] }
 0x192   : > { %7933 = vmatmul.mubr.f32.gmra.mxu0 %v9766_v20  ;;  %7975 = vmatpush3.msra.mxu1 %v2559_v21  ;;  %v9975_v49 = vpop.f32.mrf.mxu0  ;;  %v11782_v21 = vld [vmem:[#allocation52_spill] sm:$0xff] }
 0x193   : > { %8054 = vmatprep.subr.mxu0 %v2865_v28  ;;  %7855 = vmatprep.mubr.f32.mxu1 %v11768_v44  ;;  %v10047_v44 = vld [vmem:[#allocation2 + $0x182] sm:$0xff] }
 0x194   : > { %8055 = vmatpush3.msra.mxu0 %v2865_v28  ;;  %7856 = vmatmul.mubr.f32.gmra.mxu1 %v11769_v8  ;;  %v9979_v29 = vpop.f32.mrf.mxu1  ;;  %v2241_v8 = vld [vmem:[#allocation2 + $0x198] sm:$0xff] }
 0x195   : > { %7935 = vmatprep.mubr.f32.mxu0 %v9775_v18  ;;  %7976 = vmatprep.subr.mxu1 %v2558_v46  ;;  %v2556_v18 = vld [vmem:[#allocation5 + $0x3b0] sm:$0xff] }
 0x196   : > { %7936 = vmatmul.mubr.f32.gmra.mxu0 %v9778_v57  ;;  %7977 = vmatpush3.msra.mxu1 %v2558_v46  ;;  %v9983_v20 = vpop.f32.mrf.mxu0  ;;  %v9985_v34 = vpop.f32.mrf.mxu1 }
 0x197   : > { %8056 = vmatprep.subr.mxu0 %v2864_v0  ;;  %7858 = vmatprep.mubr.f32.mxu1 %v11770_v37  ;;  %v2517_v37 = vld [vmem:[#allocation2 + $0x31] sm:$0xff] }
 0x198   : > { %8057 = vmatpush3.msra.mxu0 %v2864_v0  ;;  %7859 = vmatmul.mubr.f32.gmra.mxu1 %v11771_v42  ;;  %v9989_v50 = vpop.f32.mrf.mxu0 }
 0x199   : > { %7938 = vmatprep.mubr.f32.mxu0 %v9787_v7  ;;  %7978 = vmatprep.subr.mxu1 %v2557_v16  ;;  %v2555_v7 = vld [vmem:[#allocation5 + $0x3a8] sm:$0xff] }
 0x19a   : > { %7939 = vmatmul.mubr.f32.gmra.mxu0 %v9790_v25  ;;  %7979 = vmatpush3.msra.mxu1 %v2557_v16  ;;  %v9993_v57 = vpop.f32.mrf.mxu1  ;;  %v2856_v16 = vld [vmem:[#allocation5 + $0x400] sm:$0xff] }
 0x19b   : > { %8058 = vmatprep.subr.mxu0 %v2863_v45  ;;  %7861 = vmatprep.mubr.f32.mxu1 %v11772_v53  ;;  %v2824_v53 = vld [vmem:[#allocation2 + $0x3a] sm:$0xff] }
 0x19c   : > { %8059 = vmatpush3.msra.mxu0 %v2863_v45  ;;  %7862 = vmatmul.mubr.f32.gmra.mxu1 %v11773_v58  ;;  %v9997_v2 = vpop.f32.mrf.mxu0  ;;  %v9999_v39 = vpop.f32.mrf.mxu1  ;;  %v2823_v45 = vld [vmem:[#allocation2 + $0x32] sm:$0xff] }
 0x19d   : > { %7941 = vmatprep.mubr.f32.mxu0 %v9799_v60  ;;  %7980 = vmatprep.subr.mxu1 %v2556_v18  ;;  %v2554_v60 = vld [vmem:[#allocation5 + $0x3a0] sm:$0xff] }
 0x19e   : > { %7942 = vmatmul.mubr.f32.gmra.mxu0 %v9802_v62  ;;  %7981 = vmatpush3.msra.mxu1 %v2556_v18  ;;  %v10003_v25 = vpop.f32.mrf.mxu0  ;;  %v2519_v18 = vld [vmem:[#allocation2 + $0x49] sm:$0xff] }
 0x19f   : > { %8060 = vmatprep.subr.mxu0 %v2862_v61  ;;  %7864 = vmatprep.mubr.f32.mxu1 %v11774_v41  ;;  %v2520_v41 = vld [vmem:[#allocation2 + $0x51] sm:$0xff] }
 0x1a0   : > { %8061 = vmatpush3.msra.mxu0 %v2862_v61  ;;  %7865 = vmatmul.mubr.f32.gmra.mxu1 %v11775_v5  ;;  %v10007_v52 = vpop.f32.mrf.mxu1  ;;  %v2825_v61 = vld [vmem:[#allocation2 + $0x4a] sm:$0xff] }
 0x1a1   : > { %7944 = vmatprep.mubr.f32.mxu0 %v9811_v47  ;;  %7982 = vmatprep.subr.mxu1 %v2555_v7  ;;  %v2553_v47 = vld [vmem:[#allocation5 + $0x398] sm:$0xff] }
 0x1a2   : > { %7945 = vmatmul.mubr.f32.gmra.mxu0 %v9814_v33  ;;  %7983 = vmatpush3.msra.mxu1 %v2555_v7  ;;  %v10011_v62 = vpop.f32.mrf.mxu0  ;;  %v10013_v54 = vpop.f32.mrf.mxu1 }
 0x1a3   : > { %11776 = vst [vmem:[#allocation22_spill] sm:$0xff] %v10013_v54  ;;  %8062 = vmatprep.subr.mxu0 %v2861_v10  ;;  %7867 = vmatprep.mubr.f32.mxu1 %v11777_v13 }
 0x1a4   : > { %8063 = vmatpush3.msra.mxu0 %v2861_v10  ;;  %7868 = vmatmul.mubr.f32.gmra.mxu1 %v11778_v17  ;;  %v10017_v1 = vpop.f32.mrf.mxu0 }
 0x1a5   : > { %7947 = vmatprep.mubr.f32.mxu0 %v9823_v36  ;;  %7984 = vmatprep.subr.mxu1 %v2554_v60  ;;  %v2552_v36 = vld [vmem:[#allocation5 + $0x390] sm:$0xff] }
 0x1a6   : > { %7948 = vmatmul.mubr.f32.gmra.mxu0 %v9826_v6  ;;  %7985 = vmatpush3.msra.mxu1 %v2554_v60  ;;  %v10021_v33 = vpop.f32.mrf.mxu1  ;;  %v2521_v60 = vld [vmem:[#allocation2 + $0x61] sm:$0xff] }
 0x1a7   : > { %8064 = vmatprep.subr.mxu0 %v2860_v63  ;;  %7870 = vmatprep.mubr.f32.mxu1 %v11779_v19 }
 0x1a8   : > { %8065 = vmatpush3.msra.mxu0 %v2860_v63  ;;  %7871 = vmatmul.mubr.f32.gmra.mxu1 %v11780_v12  ;;  %v10025_v35 = vpop.f32.mrf.mxu0  ;;  %v10027_v40 = vpop.f32.mrf.mxu1  ;;  %v2826_v63 = vld [vmem:[#allocation2 + $0x52] sm:$0xff]  ;;  %v2827_v12 = vld [vmem:[#allocation2 + $0x62] sm:$0xff] }
 0x1a9   : > { %11781 = vst [vmem:[#allocation23_spill] sm:$0xff] %v10027_v40  ;;  %7950 = vmatprep.mubr.f32.mxu0 %v9835_v11  ;;  %7986 = vmatprep.subr.mxu1 %v2553_v47  ;;  %v2551_v11 = vld [vmem:[#allocation5 + $0x388] sm:$0xff] }
 0x1aa   : > { %7951 = vmatmul.mubr.f32.gmra.mxu0 %v9838_v38  ;;  %7987 = vmatpush3.msra.mxu1 %v2553_v47  ;;  %v10031_v6 = vpop.f32.mrf.mxu0 }
 0x1ab   : > { %8066 = vmatprep.subr.mxu0 %v2859_v14  ;;  %7873 = vmatprep.mubr.f32.mxu1 %v9841_v23  ;;  %v2857_v23 = vld [vmem:[#allocation5 + $0x408] sm:$0xff] }
 0x1ac   : > { %8067 = vmatpush3.msra.mxu0 %v2859_v14  ;;  %7874 = vmatmul.mubr.f32.gmra.mxu1 %v11782_v21  ;;  %v10035_v51 = vpop.f32.mrf.mxu1 }
 0x1ad   : > { %7953 = vmatprep.mubr.f32.mxu0 %v9847_v3  ;;  %7988 = vmatprep.subr.mxu1 %v2552_v36  ;;  %v10050_v3 = vld [vmem:[#allocation2 + $0x18a] sm:$0xff] }
 0x1ae   : > { %7954 = vmatmul.mubr.f32.gmra.mxu0 %v9850_v9  ;;  %7989 = vmatpush3.msra.mxu1 %v2552_v36  ;;  %v10039_v38 = vpop.f32.mrf.mxu0  ;;  %v10041_v28 = vpop.f32.mrf.mxu1  ;;  %v2522_v36 = vld [vmem:[#allocation2 + $0x69] sm:$0xff] }
 0x1af   : > { %11783 = vst [vmem:[#allocation24_spill] sm:$0xff] %v10041_v28  ;;  %8068 = vmatprep.subr.mxu0 %v2858_v48  ;;  %7876 = vmatprep.mubr.f32.mxu1 %v9853_v15  ;;  %v2550_v15 = vld [vmem:[#allocation5 + $0x380] sm:$0xff]  ;;  %v4133_v28 = vld [vmem:[#allocation8 + $0x1f0] sm:$0xff] }
 0x1b0   : > { %8069 = vmatpush3.msra.mxu0 %v2858_v48  ;;  %7877 = vmatmul.mubr.f32.gmra.mxu1 %v9856_v31  ;;  %v10045_v46 = vpop.f32.mrf.mxu0  ;;  %v2242_v31 = vld [vmem:[#allocation2 + $0x1a0] sm:$0xff] }
 0x1b1   : > { %7956 = vmatprep.mubr.f32.mxu0 %v9919_v59  ;;  %7990 = vmatprep.subr.mxu1 %v2551_v11 }
 0x1b2   : > { %7957 = vmatmul.mubr.f32.gmra.mxu0 %v9922_v4  ;;  %7991 = vmatpush3.msra.mxu1 %v2551_v11  ;;  %v10053_v9 = vpop.f32.mrf.mxu1  ;;  %v2518_v4 = vld [vmem:[#allocation2 + $0x39] sm:$0xff] }
 0x1b3   : > { %8070 = vmatprep.subr.mxu0 %v2857_v23  ;;  %7879 = vmatprep.mubr.f32.mxu1 %v10047_v44  ;;  %v2523_v11 = vld [vmem:[#allocation2 + $0x79] sm:$0xff] }
 0x1b4   : > { %8071 = vmatpush3.msra.mxu0 %v2857_v23  ;;  %7880 = vmatmul.mubr.f32.gmra.mxu1 %v10050_v3  ;;  %v10057_v0 = vpop.f32.mrf.mxu0  ;;  %v10059_v59 = vpop.f32.mrf.mxu1 }
 0x1b5   : > { %11784 = vst [vmem:[#allocation25_spill] sm:$0xff] %v10059_v59  ;;  %7959 = vmatprep.mubr.f32.mxu0 %v2241_v8  ;;  %7992 = vmatprep.subr.mxu1 %v2550_v15  ;;  %v2828_v8 = vld [vmem:[#allocation2 + $0x6a] sm:$0xff] }
 0x1b6   : > { %7960 = vmatmul.mubr.f32.gmra.mxu0 %v2242_v31  ;;  %7993 = vmatpush3.msra.mxu1 %v2550_v15  ;;  %v10061_v42 = vpop.f32.mrf.mxu0 }
 0x1b7   : > { %8072 = vmatprep.subr.mxu0 %v2856_v16  ;;  %7994 = vmatprep.mubr.f32.mxu1 %v2517_v37 }
 0x1b8   : > { %8073 = vmatpush3.msra.mxu0 %v2856_v16  ;;  %v7516_v58 = vpop.f32.mrf.mxu1  ;;  %7995 = vmatmul.mubr.f32.vlgmr.msra.gmra.mxu1 %v2518_v4  ;;  %v2829_v16 = vld [vmem:[#allocation2 + $0x7a] sm:$0xff] }
 0x1b9   : > { %v832_v7 = vadd.f32 %v7516_v58, %v9955_v27  ;;  %8074 = vmatprep.mubr.f32.mxu0 %v2823_v45  ;;  %7997 = vmatprep.mubr.f32.mxu1 %v2519_v18  ;;  %v2524_v4 = vld [vmem:[#allocation2 + $0x81] sm:$0xff] }
 0x1ba   : > { %v7596_v5 = vpop.f32.mrf.mxu0  ;;  %8075 = vmatmul.mubr.f32.vlgmr.msra.gmra.mxu0 %v2824_v53  ;;  %v826_v10 = vpop.f32.mrf.mxu1  ;;  %v2525_v53 = vld [vmem:[#allocation2 + $0x91] sm:$0xff] }
 0x1bb   : > { %v10064_v13 = vadd.f32 %v7596_v5, %v832_v7  ;;  %v827_v17 = vadd.f32 %v826_v10, %v9961_v43  ;;  %8077 = vmatprep.mubr.f32.mxu0 %v2825_v61  ;;  %v2830_v61 = vld [vmem:[#allocation2 + $0x82] sm:$0xff]  ;;  %v2831_v5 = vld [vmem:[#allocation2 + $0x92] sm:$0xff] }
 0x1bc   : > { %v1100_v47 = vpop.f32.mrf.mxu0  ;;  %v7519_v19 = vpop.f32.mrf.mxu1  ;;  %7998 = vmatmul.mubr.f32.gmra.mxu1 %v2520_v41 }
 0x1bd   : > { %v10067_v14 = vadd.f32 %v1100_v47, %v827_v17  ;;  %v842_v27 = vadd.f32 %v7519_v19, %v9969_v30  ;;  %8000 = vmatprep.mubr.f32.mxu1 %v2521_v60  ;;  %v2526_v60 = vld [vmem:[#allocation2 + $0x99] sm:$0xff]  ;;  %v2527_v47 = vld [vmem:[#allocation2 + $0xa9] sm:$0xff] }
 0x1be   : > { %v7599_v21 = vpop.f32.mrf.mxu0  ;;  %8078 = vmatmul.mubr.f32.gmra.mxu0 %v2826_v63  ;;  %v836_v48 = vpop.f32.mrf.mxu1 }
 0x1bf   : > { %v10070_v23 = vadd.f32 %v7599_v21, %v842_v27  ;;  %v837_v43 = vadd.f32 %v836_v48, %v9975_v49  ;;  %8080 = vmatprep.mubr.f32.mxu0 %v2827_v12  ;;  %v2832_v12 = vld [vmem:[#allocation2 + $0x9a] sm:$0xff]  ;;  %v2833_v21 = vld [vmem:[#allocation2 + $0xaa] sm:$0xff] }
 0x1c0   : > { %v1110_v15 = vpop.f32.mrf.mxu0  ;;  %v7522_v31 = vpop.f32.mrf.mxu1  ;;  %8001 = vmatmul.mubr.f32.gmra.mxu1 %v2522_v36 }
 0x1c1   : > { %v10073_v37 = vadd.f32 %v1110_v15, %v837_v43  ;;  %v852_v30 = vadd.f32 %v7522_v31, %v9983_v20  ;;  %8003 = vmatprep.mubr.f32.mxu1 %v2523_v11  ;;  %v2528_v11 = vld [vmem:[#allocation2 + $0xb1] sm:$0xff]  ;;  %v2529_v31 = vld [vmem:[#allocation2 + $0xc1] sm:$0xff] }
 0x1c2   : > { %v7602_v45 = vpop.f32.mrf.mxu0  ;;  %8081 = vmatmul.mubr.f32.gmra.mxu0 %v2828_v8  ;;  %v846_v18 = vpop.f32.mrf.mxu1  ;;  %v3329_v43 = vld [vmem:[#allocation8 + $0xf8] sm:$0xff] }
 0x1c3   : > { %v10076_v58 = vadd.f32 %v7602_v45, %v852_v30  ;;  %v847_v49 = vadd.f32 %v846_v18, %v9989_v50  ;;  %8083 = vmatprep.mubr.f32.mxu0 %v2829_v16  ;;  %8122 = vmatprep.subr.mxu1 %v3329_v43  ;;  %v2834_v30 = vld [vmem:[#allocation2 + $0xb2] sm:$0xff] }
 0x1c4   : > { %v1120_v7 = vpop.f32.mrf.mxu0  ;;  %v7525_v41 = vpop.f32.mrf.mxu1  ;;  %8004 = vmatmul.mubr.f32.gmra.mxu1 %v2524_v4  ;;  %v3280_v4 = vld [vmem:[#allocation8 + $0x78] sm:$0xff] }
 0x1c5   : > { %v10079_v10 = vadd.f32 %v1120_v7, %v847_v49  ;;  %v862_v20 = vadd.f32 %v7525_v41, %v9997_v2  ;;  %8006 = vmatprep.mubr.f32.mxu1 %v2525_v53  ;;  %8123 = vmatpush3.msra.mxu1 %v3329_v43  ;;  %v3328_v7 = vld [vmem:[#allocation8 + $0xf0] sm:$0xff] }
 0x1c6   : > { %v7605_v17 = vpop.f32.mrf.mxu0  ;;  %8084 = vmatmul.mubr.f32.gmra.mxu0 %v2830_v61  ;;  %v856_v63 = vpop.f32.mrf.mxu1  ;;  %8202 = vmatprep.subr.mxu0 %v3280_v4  ;;  %v2530_v61 = vld [vmem:[#allocation2 + $0xc9] sm:$0xff] }
 0x1c7   : > { %v10082_v19 = vadd.f32 %v7605_v17, %v862_v20  ;;  %v857_v50 = vadd.f32 %v856_v63, %v10003_v25  ;;  %8086 = vmatprep.mubr.f32.mxu0 %v2831_v5  ;;  %8203 = vmatpush3.msra.mxu0 %v3280_v4  ;;  %v2531_v5 = vld [vmem:[#allocation2 + $0xd9] sm:$0xff]  ;;  %v2836_v17 = vld [vmem:[#allocation2 + $0xca] sm:$0xff] }
 0x1c8   : > { %v1130_v27 = vpop.f32.mrf.mxu0  ;;  %v7528_v36 = vpop.f32.mrf.mxu1  ;;  %8007 = vmatmul.mubr.f32.gmra.mxu1 %v2526_v60  ;;  %8124 = vmatprep.subr.mxu1 %v3328_v7  ;;  %v3279_v63 = vld [vmem:[#allocation8 + $0x70] sm:$0xff] }
 0x1c9   : > { %v10085_v48 = vadd.f32 %v1130_v27, %v857_v50  ;;  %v872_v2 = vadd.f32 %v7528_v36, %v10011_v62  ;;  %8009 = vmatprep.mubr.f32.mxu1 %v2527_v47  ;;  %v2835_v62 = vld [vmem:[#allocation2 + $0xc2] sm:$0xff]  ;;  %8125 = vmatpush3.msra.mxu1 %v3328_v7 }
 0x1ca   : > { %v7608_v8 = vpop.f32.mrf.mxu0  ;;  %8087 = vmatmul.mubr.f32.gmra.mxu0 %v2832_v12  ;;  %v866_v15 = vpop.f32.mrf.mxu1  ;;  %8204 = vmatprep.subr.mxu0 %v3279_v63  ;;  %v2532_v36 = vld [vmem:[#allocation2 + $0xe1] sm:$0xff] }
 0x1cb   : > { %v10088_v16 = vadd.f32 %v7608_v8, %v872_v2  ;;  %v867_v25 = vadd.f32 %v866_v15, %v10017_v1  ;;  %8089 = vmatprep.mubr.f32.mxu0 %v2833_v21  ;;  %8205 = vmatpush3.msra.mxu0 %v3279_v63  ;;  %v3327_v21 = vld [vmem:[#allocation8 + $0xe8] sm:$0xff] }
 0x1cc   : > { %v1140_v45 = vpop.f32.mrf.mxu0  ;;  %v7531_v18 = vpop.f32.mrf.mxu1  ;;  %8010 = vmatmul.mubr.f32.gmra.mxu1 %v2528_v11  ;;  %v2533_v11 = vld [vmem:[#allocation2 + $0xf1] sm:$0xff]  ;;  %8126 = vmatprep.subr.mxu1 %v3327_v21  ;;  %v2838_v15 = vld [vmem:[#allocation2 + $0xe2] sm:$0xff] }
 0x1cd   : > { %v10091_v53 = vadd.f32 %v1140_v45, %v867_v25  ;;  %v882_v49 = vadd.f32 %v7531_v18, %v10025_v35  ;;  %8012 = vmatprep.mubr.f32.mxu1 %v2529_v31  ;;  %v2837_v35 = vld [vmem:[#allocation2 + $0xda] sm:$0xff]  ;;  %8127 = vmatpush3.msra.mxu1 %v3327_v21  ;;  %v3278_v31 = vld [vmem:[#allocation8 + $0x68] sm:$0xff] }
 0x1ce   : > { %v7611_v41 = vpop.f32.mrf.mxu0  ;;  %8090 = vmatmul.mubr.f32.gmra.mxu0 %v2834_v30  ;;  %v876_v1 = vpop.f32.mrf.mxu1  ;;  %8206 = vmatprep.subr.mxu0 %v3278_v31  ;;  %v2534_v18 = vld [vmem:[#allocation2 + $0xf9] sm:$0xff] }
 0x1cf   : > { %v10094_v20 = vadd.f32 %v7611_v41, %v882_v49  ;;  %v877_v60 = vadd.f32 %v876_v1, %v10031_v6  ;;  %8092 = vmatprep.mubr.f32.mxu0 %v2835_v62  ;;  %8207 = vmatpush3.msra.mxu0 %v3278_v31  ;;  %v3326_v62 = vld [vmem:[#allocation8 + $0xe0] sm:$0xff] }
 0x1d0   : > { %v1150_v47 = vpop.f32.mrf.mxu0  ;;  %v7534_v50 = vpop.f32.mrf.mxu1  ;;  %8013 = vmatmul.mubr.f32.gmra.mxu1 %v2530_v61  ;;  %v2535_v61 = vld [vmem:[#allocation2 + $0x109] sm:$0xff]  ;;  %8128 = vmatprep.subr.mxu1 %v3326_v62  ;;  %v2840_v1 = vld [vmem:[#allocation2 + $0xfa] sm:$0xff] }
 0x1d1   : > { %v10097_v12 = vadd.f32 %v1150_v47, %v877_v60  ;;  %v892_v27 = vadd.f32 %v7534_v50, %v10039_v38  ;;  %8015 = vmatprep.mubr.f32.mxu1 %v2531_v5  ;;  %v2839_v38 = vld [vmem:[#allocation2 + $0xf2] sm:$0xff]  ;;  %8129 = vmatpush3.msra.mxu1 %v3326_v62  ;;  %v3277_v5 = vld [vmem:[#allocation8 + $0x60] sm:$0xff] }
 0x1d2   : > { %v7614_v2 = vpop.f32.mrf.mxu0  ;;  %8093 = vmatmul.mubr.f32.gmra.mxu0 %v2836_v17  ;;  %v886_v6 = vpop.f32.mrf.mxu1  ;;  %8208 = vmatprep.subr.mxu0 %v3277_v5  ;;  %v2536_v50 = vld [vmem:[#allocation2 + $0x111] sm:$0xff] }
 0x1d3   : > { %v10100_v43 = vadd.f32 %v7614_v2, %v892_v27  ;;  %v887_v8 = vadd.f32 %v886_v6, %v10045_v46  ;;  %8095 = vmatprep.mubr.f32.mxu0 %v2837_v35  ;;  %8209 = vmatpush3.msra.mxu0 %v3277_v5  ;;  %v3325_v35 = vld [vmem:[#allocation8 + $0xd8] sm:$0xff]  ;;  %v2540_v5 = vld [vmem:[#allocation2 + $0x141] sm:$0xff] }
 0x1d4   : > { %v1160_v25 = vpop.f32.mrf.mxu0  ;;  %v7537_v30 = vpop.f32.mrf.mxu1  ;;  %8016 = vmatmul.mubr.f32.gmra.mxu1 %v2532_v36  ;;  %v2537_v36 = vld [vmem:[#allocation2 + $0x121] sm:$0xff]  ;;  %8130 = vmatprep.subr.mxu1 %v3325_v35  ;;  %v2842_v6 = vld [vmem:[#allocation2 + $0x112] sm:$0xff] }
 0x1d5   : > { %v10103_v4 = vadd.f32 %v1160_v25, %v887_v8  ;;  %v902_v45 = vadd.f32 %v7537_v30, %v10057_v0  ;;  %8018 = vmatprep.mubr.f32.mxu1 %v2533_v11  ;;  %v2841_v0 = vld [vmem:[#allocation2 + $0x10a] sm:$0xff]  ;;  %8131 = vmatpush3.msra.mxu1 %v3325_v35  ;;  %v3276_v11 = vld [vmem:[#allocation8 + $0x58] sm:$0xff]  ;;  %v2846_v35 = vld [vmem:[#allocation2 + $0x142] sm:$0xff] }
 0x1d6   : > { %v7617_v49 = vpop.f32.mrf.mxu0  ;;  %8096 = vmatmul.mubr.f32.gmra.mxu0 %v2838_v15  ;;  %v896_v46 = vpop.f32.mrf.mxu1  ;;  %8210 = vmatprep.subr.mxu0 %v3276_v11  ;;  %v2538_v30 = vld [vmem:[#allocation2 + $0x129] sm:$0xff] }
 0x1d7   : > { %v10106_v7 = vadd.f32 %v7617_v49, %v902_v45  ;;  %v897_v41 = vadd.f32 %v896_v46, %v10061_v42  ;;  %8098 = vmatprep.mubr.f32.mxu0 %v2839_v38  ;;  %8211 = vmatpush3.msra.mxu0 %v3276_v11  ;;  %v3324_v38 = vld [vmem:[#allocation8 + $0xd0] sm:$0xff]  ;;  %v3322_v11 = vld [vmem:[#allocation8 + $0xc0] sm:$0xff] }
 0x1d8   : > { %v1170_v60 = vpop.f32.mrf.mxu0  ;;  %v7540_v17 = vpop.f32.mrf.mxu1  ;;  %8019 = vmatmul.mubr.f32.gmra.mxu1 %v2534_v18  ;;  %v2539_v18 = vld [vmem:[#allocation2 + $0x139] sm:$0xff]  ;;  %8132 = vmatprep.subr.mxu1 %v3324_v38  ;;  %v2844_v49 = vld [vmem:[#allocation2 + $0x12a] sm:$0xff] }
 0x1d9   : > { %v10109_v63 = vadd.f32 %v1170_v60, %v897_v41  ;;  %v912_v47 = vadd.f32 %v7540_v17, %v9952_v24  ;;  %8021 = vmatprep.mubr.f32.mxu1 %v2535_v61  ;;  %v2843_v24 = vld [vmem:[#allocation2 + $0x122] sm:$0xff]  ;;  %8133 = vmatpush3.msra.mxu1 %v3324_v38  ;;  %v3275_v46 = vld [vmem:[#allocation8 + $0x50] sm:$0xff] }
 0x1da   : > { %v7620_v27 = vpop.f32.mrf.mxu0  ;;  %8099 = vmatmul.mubr.f32.gmra.mxu0 %v2840_v1  ;;  %v906_v42 = vpop.f32.mrf.mxu1  ;;  %8212 = vmatprep.subr.mxu0 %v3275_v46  ;;  %v3323_v60 = vld [vmem:[#allocation8 + $0xc8] sm:$0xff]  ;;  %v3273_v38 = vld [vmem:[#allocation8 + $0x40] sm:$0xff] }
 0x1db   : > { %11785 = vst [vmem:[#allocation26_spill] sm:$0xff] %v10109_v63  ;;  %v10112_v21 = vadd.f32 %v7620_v27, %v912_v47  ;;  %v907_v2 = vadd.f32 %v906_v42, %v9958_v32  ;;  %8101 = vmatprep.mubr.f32.mxu0 %v2841_v0  ;;  %8213 = vmatpush3.msra.mxu0 %v3275_v46  ;;  %v2541_v47 = vld [vmem:[#allocation2 + $0x151] sm:$0xff]  ;;  %v3274_v27 = vld [vmem:[#allocation8 + $0x48] sm:$0xff] }
 0x1dc   : > { %v1180_v8 = vpop.f32.mrf.mxu0  ;;  %v7543_v15 = vpop.f32.mrf.mxu1  ;;  %8022 = vmatmul.mubr.f32.gmra.mxu1 %v2536_v50  ;;  %8134 = vmatprep.subr.mxu1 %v3323_v60  ;;  %v2544_v46 = vld [vmem:[#allocation2 + $0x171] sm:$0xff] }
 0x1dd   : > { %v10115_v31 = vadd.f32 %v1180_v8, %v907_v2  ;;  %v922_v25 = vadd.f32 %v7543_v15, %v9965_v22  ;;  %8024 = vmatprep.mubr.f32.mxu1 %v2537_v36  ;;  %v2845_v22 = vld [vmem:[#allocation2 + $0x13a] sm:$0xff]  ;;  %8135 = vmatpush3.msra.mxu1 %v3323_v60  ;;  %v2850_v60 = vld [vmem:[#allocation2 + $0x172] sm:$0xff] }
 0x1de   : > { %v7623_v45 = vpop.f32.mrf.mxu0  ;;  %8102 = vmatmul.mubr.f32.gmra.mxu0 %v2842_v6  ;;  %v10118_v32 = vpop.f32.mrf.mxu1  ;;  %8214 = vmatprep.subr.mxu0 %v3274_v27  ;;  %v2542_v6 = vld [vmem:[#allocation2 + $0x159] sm:$0xff] }
 0x1df   : > { %11786 = vst [vmem:[#allocation27_spill] sm:$0xff] %v10115_v31  ;;  %v10120_v62 = vadd.f32 %v7623_v45, %v922_v25  ;;  %8104 = vmatprep.mubr.f32.mxu0 %v2843_v24  ;;  %8215 = vmatpush3.msra.mxu0 %v3274_v27  ;;  %v2543_v24 = vld [vmem:[#allocation2 + $0x169] sm:$0xff] }
 0x1e0   : > { %v10122_v61 = vpop.f32.mrf.mxu0  ;;  %v7546_v41 = vpop.f32.mrf.mxu1  ;;  %8025 = vmatmul.mubr.f32.gmra.mxu1 %v2538_v30  ;;  %8136 = vmatprep.subr.mxu1 %v3322_v11  ;;  %v2848_v30 = vld [vmem:[#allocation2 + $0x15a] sm:$0xff]  ;;  %v3320_v27 = vld [vmem:[#allocation8 + $0xb0] sm:$0xff] }
 0x1e1   : > { %v932_v1 = vadd.f32 %v7546_v41, %v9979_v29  ;;  %8027 = vmatprep.mubr.f32.mxu1 %v2539_v18  ;;  %v2847_v29 = vld [vmem:[#allocation2 + $0x152] sm:$0xff]  ;;  %8137 = vmatpush3.msra.mxu1 %v3322_v11 }
 0x1e2   : > { %v7626_v17 = vpop.f32.mrf.mxu0  ;;  %8105 = vmatmul.mubr.f32.gmra.mxu0 %v2844_v49  ;;  %v10125_v0 = vpop.f32.mrf.mxu1  ;;  %8216 = vmatprep.subr.mxu0 %v3273_v38  ;;  %v3321_v41 = vld [vmem:[#allocation8 + $0xb8] sm:$0xff]  ;;  %v3271_v11 = vld [vmem:[#allocation8 + $0x30] sm:$0xff] }
 0x1e3   : > { %v10127_v50 = vadd.f32 %v7626_v17, %v932_v1  ;;  %8107 = vmatprep.mubr.f32.mxu0 %v2845_v22  ;;  %8217 = vmatpush3.msra.mxu0 %v3273_v38  ;;  %v3272_v17 = vld [vmem:[#allocation8 + $0x38] sm:$0xff]  ;;  %v3319_v38 = vld [vmem:[#allocation8 + $0xa8] sm:$0xff] }
 0x1e4   : > { %v10129_v42 = vpop.f32.mrf.mxu0  ;;  %v7549_v36 = vpop.f32.mrf.mxu1  ;;  %8028 = vmatmul.mubr.f32.gmra.mxu1 %v2540_v5  ;;  %8138 = vmatprep.subr.mxu1 %v3321_v41 }
 0x1e5   : > { %11787 = vst [vmem:[#allocation28_spill] sm:$0xff] %v10129_v42  ;;  %v942_v2 = vadd.f32 %v7549_v36, %v9993_v57  ;;  %8030 = vmatprep.mubr.f32.mxu1 %v2541_v47  ;;  %v2849_v57 = vld [vmem:[#allocation2 + $0x16a] sm:$0xff]  ;;  %8139 = vmatpush3.msra.mxu1 %v3321_v41 }
 0x1e6   : > { %v7629_v8 = vpop.f32.mrf.mxu0  ;;  %8108 = vmatmul.mubr.f32.gmra.mxu0 %v2846_v35  ;;  %v10132_v15 = vpop.f32.mrf.mxu1  ;;  %8218 = vmatprep.subr.mxu0 %v3272_v17 }
 0x1e7   : > { %v10134_v25 = vadd.f32 %v7629_v8, %v942_v2  ;;  %8110 = vmatprep.mubr.f32.mxu0 %v2847_v29  ;;  %8219 = vmatpush3.msra.mxu0 %v3272_v17  ;;  %v2547_v2 = vld [vmem:[#allocation2 + $0x199] sm:$0xff] }
 0x1e8   : > { %v10136_v45 = vpop.f32.mrf.mxu0  ;;  %v7552_v18 = vpop.f32.mrf.mxu1  ;;  %8031 = vmatmul.mubr.f32.gmra.mxu1 %v2542_v6  ;;  %8140 = vmatprep.subr.mxu1 %v3320_v27 }
 0x1e9   : > { %11788 = vst [vmem:[#allocation29_spill] sm:$0xff] %v10136_v45  ;;  %v952_v49 = vadd.f32 %v7552_v18, %v10007_v52  ;;  %8033 = vmatprep.mubr.f32.mxu1 %v2543_v24  ;;  %8141 = vmatpush3.msra.mxu1 %v3320_v27 }
 0x1ea   : > { %v7632_v22 = vpop.f32.mrf.mxu0  ;;  %8111 = vmatmul.mubr.f32.gmra.mxu0 %v2848_v30  ;;  %v10139_v1 = vpop.f32.mrf.mxu1  ;;  %8220 = vmatprep.subr.mxu0 %v3271_v11  ;;  %v2548_v30 = vld [vmem:[#allocation2 + $0x1a1] sm:$0xff] }
 0x1eb   : > { %11789 = vst [vmem:[#allocation30_spill] sm:$0xff] %v10139_v1  ;;  %v10141_v5 = vadd.f32 %v7632_v22, %v952_v49  ;;  %8113 = vmatprep.mubr.f32.mxu0 %v2849_v57  ;;  %8221 = vmatpush3.msra.mxu0 %v3271_v11  ;;  %v2854_v49 = vld [vmem:[#allocation2 + $0x1a2] sm:$0xff] }
 0x1ec   : > { %v10143_v47 = vpop.f32.mrf.mxu0  ;;  %v7555_v35 = vpop.f32.mrf.mxu1  ;;  %8034 = vmatmul.mubr.f32.gmra.mxu1 %v2544_v46  ;;  %8142 = vmatprep.subr.mxu1 %v3319_v38  ;;  %v3318_v22 = vld [vmem:[#allocation8 + $0xa0] sm:$0xff] }
 0x1ed   : > { %11790 = vst [vmem:[#allocation31_spill] sm:$0xff] %v10143_v47  ;;  %v962_v52 = vadd.f32 %v7555_v35, %v10021_v33  ;;  %8036 = vmatprep.mubr.f32.mxu1 %v9925_v55  ;;  %v2853_v55 = vld [vmem:[#allocation2 + $0x19a] sm:$0xff]  ;;  %8143 = vmatpush3.msra.mxu1 %v3319_v38 }
 0x1ee   : > { %v7635_v36 = vpop.f32.mrf.mxu0  ;;  %8114 = vmatmul.mubr.f32.gmra.mxu0 %v2850_v60  ;;  %v10147_v29 = vpop.f32.mrf.mxu1  ;;  %8144 = vmatprep.subr.mxu1 %v3318_v22  ;;  %v3269_v35 = vld [vmem:[#allocation8 + $0x20] sm:$0xff] }
 0x1ef   : > { %11791 = vst [vmem:[#allocation32_spill] sm:$0xff] %v10147_v29  ;;  %v10149_v6 = vadd.f32 %v7635_v36, %v962_v52  ;;  %8116 = vmatprep.mubr.f32.mxu0 %v10047_v44  ;;  %8145 = vmatpush3.msra.mxu1 %v3318_v22  ;;  %v3314_v22 = vld [vmem:[#allocation8 + $0x80] sm:$0xff]  ;;  %v4132_v29 = vld [vmem:[#allocation8 + $0x1e8] sm:$0xff] }
 0x1f0   : > { %v10152_v8 = vpop.f32.mrf.mxu0  ;;  %v7558_v24 = vpop.f32.mrf.mxu1  ;;  %8037 = vmatmul.mubr.f32.gmra.mxu1 %v9928_v26  ;;  %v3270_v26 = vld [vmem:[#allocation8 + $0x28] sm:$0xff]  ;;  %v4131_v47 = vld [vmem:[#allocation8 + $0x1e0] sm:$0xff] }
 0x1f1   : > { %11792 = vst [vmem:[#allocation33_spill] sm:$0xff] %v10152_v8  ;;  %v972_v33 = vadd.f32 %v7558_v24, %v10035_v51  ;;  %8039 = vmatprep.mubr.f32.mxu1 %v2547_v2  ;;  %8222 = vmatprep.subr.mxu0 %v3270_v26  ;;  %v3317_v2 = vld [vmem:[#allocation8 + $0x98] sm:$0xff] }
 0x1f2   : > { %v7638_v18 = vpop.f32.mrf.mxu0  ;;  %8117 = vmatmul.mubr.f32.gmra.mxu0 %v10050_v3  ;;  %v10157_v57 = vpop.f32.mrf.mxu1  ;;  %8146 = vmatprep.subr.mxu1 %v3317_v2 }
 0x1f3   : > { %11793 = vst [vmem:[#allocation34_spill] sm:$0xff] %v10157_v57  ;;  %v10159_v44 = vadd.f32 %v7638_v18, %v972_v33  ;;  %8119 = vmatprep.mubr.f32.mxu0 %v2853_v55  ;;  %8223 = vmatpush3.msra.mxu0 %v3270_v26  ;;  %v3316_v55 = vld [vmem:[#allocation8 + $0x90] sm:$0xff]  ;;  %v3268_v18 = vld [vmem:[#allocation8 + $0x18] sm:$0xff] }
 0x1f4   : > { %v10161_v46 = vpop.f32.mrf.mxu0  ;;  %v7561_v41 = vpop.f32.mrf.mxu1  ;;  %8040 = vmatmul.mubr.f32.gmra.mxu1 %v2548_v30  ;;  %8224 = vmatprep.subr.mxu0 %v3269_v35 }
 0x1f5   : > { %11794 = vst [vmem:[#allocation35_spill] sm:$0xff] %v10161_v46  ;;  %v982_v51 = vadd.f32 %v7561_v41, %v10053_v9  ;;  %8225 = vmatpush3.msra.mxu0 %v3269_v35  ;;  %8147 = vmatpush3.msra.mxu1 %v3317_v2  ;;  %v3282_v2 = vld [vmem:[#allocation3 + $0x9] sm:$0xff] }
 0x1f6   : > { %v7641_v60 = vpop.f32.mrf.mxu0  ;;  %v10164_v3 = vpop.f32.mrf.mxu1  ;;  %8120 = vmatmul.mubr.f32.gmra.mxu0 %v2854_v49  ;;  %8148 = vmatprep.subr.mxu1 %v3316_v55  ;;  %v3315_v49 = vld [vmem:[#allocation8 + $0x88] sm:$0xff] }
 0x1f7   : > { %11795 = vst [vmem:[#allocation36_spill] sm:$0xff] %v10164_v3  ;;  %v10166_v17 = vadd.f32 %v7641_v60, %v982_v51  ;;  %8149 = vmatpush3.msra.mxu1 %v3316_v55  ;;  %8226 = vmatprep.subr.mxu0 %v3268_v18  ;;  %v3267_v51 = vld [vmem:[#allocation8 + $0x10] sm:$0xff] }
 0x1f8   : > { %v10168_v52 = vpop.f32.mrf.mxu0  ;;  %v7676_v27 = vpop.f32.mrf.mxu1  ;;  %8150 = vmatprep.subr.mxu1 %v3315_v49  ;;  %8227 = vmatpush3.msra.mxu0 %v3268_v18 }
 0x1f9   : > { %11796 = vst [vmem:[#allocation37_spill] sm:$0xff] %v10168_v52  ;;  %v1567_v36 = vadd.f32 %v7676_v27, %v10064_v13  ;;  %8151 = vmatpush3.msra.mxu1 %v3315_v49  ;;  %8228 = vmatprep.subr.mxu0 %v3267_v51 }
 0x1fa   : > { %v7756_v9 = vpop.f32.mrf.mxu0  ;;  %v10171_v11 = vpop.f32.mrf.mxu1  ;;  %8152 = vmatprep.subr.mxu1 %v3314_v22  ;;  %8229 = vmatpush3.msra.mxu0 %v3267_v51  ;;  %v3234_v51 = vld [vmem:[#allocation3 + $0x8] sm:$0xff] }
 0x1fb   : > { %v10173_v24 = vadd.f32 %v7756_v9, %v1567_v36  ;;  %v3266_v36 = vld [vmem:[#allocation8 + $0x8] sm:$0xff]  ;;  %8153 = vmatpush3.msra.mxu1 %v3314_v22 }
 0x1fc   : > { %v10175_v33 = vpop.f32.mrf.mxu0  ;;  %v7679_v30 = vpop.f32.mrf.mxu1  ;;  %8230 = vmatprep.subr.mxu0 %v3266_v36 }
 0x1fd   : > { %v1569_v38 = vadd.f32 %v7679_v30, %v10070_v23  ;;  %v3281_v23 = vld [vmem:[#allocation3 + $0x1] sm:$0xff]  ;;  %8231 = vmatpush3.msra.mxu0 %v3266_v36 }
 0x1fe   : > { %v7759_v13 = vpop.f32.mrf.mxu0  ;;  %v10178_v26 = vpop.f32.mrf.mxu1  ;;  %8154 = vmatprep.mubr.f32.mxu1 %v3281_v23 }
 0x1ff   : > { %v10180_v41 = vadd.f32 %v7759_v13, %v1569_v38  ;;  %v3265_v38 = vld [vmem:[#allocation8] sm:$0xff]  ;;  %8155 = vmatmul.mubr.f32.vlgmr.msra.gmra.mxu1 %v3282_v2  ;;  %v3233_v13 = vld [vmem:[#allocation3] sm:$0xff] }
 0x200   : > { %v10182_v60 = vpop.f32.mrf.mxu0  ;;  %v7682_v35 = vpop.f32.mrf.mxu1  ;;  %8232 = vmatprep.subr.mxu0 %v3265_v38  ;;  %8234 = vmatprep.mubr.f32.mxu0 %v3233_v13 }
 0x201   : > { %v1571_v27 = vadd.f32 %v7682_v35, %v10076_v58  ;;  %8233 = vmatpush3.msra.mxu0 %v3265_v38 }
 0x202   : > { %v7762_v9 = vpop.f32.mrf.mxu0  ;;  %v10185_v55 = vpop.f32.mrf.mxu1  ;;  %8235 = vmatmul.mubr.f32.vlgmr.msra.gmra.mxu0 %v3234_v51  ;;  %v3828_v51 = vld [vmem:[#allocation8 + $0x178] sm:$0xff] }
 0x203   : > { %v10187_v30 = vadd.f32 %v7762_v9, %v1571_v27  ;;  %8282 = vmatprep.subr.mxu1 %v3828_v51 }
 0x204   : > { %v10189_v18 = vpop.f32.mrf.mxu0  ;;  %v7685_v49 = vpop.f32.mrf.mxu1  ;;  %8283 = vmatpush3.msra.mxu1 %v3828_v51  ;;  %v3826_v51 = vld [vmem:[#allocation8 + $0x168] sm:$0xff] }
 0x205   : > { %v1573_v58 = vadd.f32 %v7685_v49, %v10082_v19 }
 0x206   : > { %v7765_v22 = vpop.f32.mrf.mxu0  ;;  %v10192_v35 = vpop.f32.mrf.mxu1 }
 0x207   : > { %v10194_v23 = vadd.f32 %v7765_v22, %v1573_v58 }
 0x208   : > { %v10196_v27 = vpop.f32.mrf.mxu0  ;;  %v7688_v36 = vpop.f32.mrf.mxu1 }
 0x209   : > { %v1575_v2 = vadd.f32 %v7688_v36, %v10088_v16  ;;  %v4134_v36 = vld [vmem:[#allocation8 + $0x1f8] sm:$0xff] }
 0x20a   : > { %v7768_v9 = vpop.f32.mrf.mxu0  ;;  %v10199_v52 = vpop.f32.mrf.mxu1  ;;  %8362 = vmatprep.subr.mxu0 %v4134_v36 }
 0x20b   : > { %v10201_v3 = vadd.f32 %v7768_v9, %v1575_v2  ;;  %8363 = vmatpush3.msra.mxu0 %v4134_v36 }
 0x20c   : > { %v10203_v19 = vpop.f32.mrf.mxu0  ;;  %v7691_v38 = vpop.f32.mrf.mxu1  ;;  %8364 = vmatprep.subr.mxu0 %v4133_v28 }
 0x20d   : > { %v1577_v49 = vadd.f32 %v7691_v38, %v10094_v20  ;;  %v3827_v20 = vld [vmem:[#allocation8 + $0x170] sm:$0xff]  ;;  %8365 = vmatpush3.msra.mxu0 %v4133_v28 }
 0x20e   : > { %v7771_v13 = vpop.f32.mrf.mxu0  ;;  %v10206_v59 = vpop.f32.mrf.mxu1  ;;  %8284 = vmatprep.subr.mxu1 %v3827_v20  ;;  %8366 = vmatprep.subr.mxu0 %v4132_v29 }
 0x20f   : > { %v10208_v58 = vadd.f32 %v7771_v13, %v1577_v49  ;;  %8285 = vmatpush3.msra.mxu1 %v3827_v20  ;;  %8367 = vmatpush3.msra.mxu0 %v4132_v29 }
 0x210   : > { %v10210_v22 = vpop.f32.mrf.mxu0  ;;  %v7694_v46 = vpop.f32.mrf.mxu1  ;;  %8286 = vmatprep.subr.mxu1 %v3826_v51  ;;  %8368 = vmatprep.subr.mxu0 %v4131_v47 }
 0x211   : > { %v1579_v16 = vadd.f32 %v7694_v46, %v10100_v43  ;;  %8287 = vmatpush3.msra.mxu1 %v3826_v51  ;;  %8369 = vmatpush3.msra.mxu0 %v4131_v47 }
 0x212   : > { %v7774_v2 = vpop.f32.mrf.mxu0  ;;  %v10213_v9 = vpop.f32.mrf.mxu1 }
 0x213   : > { %v10215_v57 = vadd.f32 %v7774_v2, %v1579_v16 }
 0x214   : > { %v10217_v38 = vpop.f32.mrf.mxu0  ;;  %v7697_v49 = vpop.f32.mrf.mxu1 }
 0x215   : > { %11797 = vst [vmem:[#allocation38_spill] sm:$0xff] %v10215_v57  ;;  %11798 = vst [vmem:[#allocation39_spill] sm:$0xff] %v10217_v38  ;;  %v1581_v13 = vadd.f32 %v7697_v49, %v10106_v7  ;;  %v3825_v49 = vld [vmem:[#allocation8 + $0x160] sm:$0xff] }
 0x216   : > { %v7777_v8 = vpop.f32.mrf.mxu0  ;;  %v10220_v43 = vpop.f32.mrf.mxu1  ;;  %8288 = vmatprep.subr.mxu1 %v3825_v49 }
 0x217   : > { %11799 = vst [vmem:[#allocation40_spill] sm:$0xff] %v10220_v43  ;;  %v10222_v46 = vadd.f32 %v7777_v8, %v1581_v13  ;;  %8289 = vmatpush3.msra.mxu1 %v3825_v49 }
 0x218   : > { %v10224_v16 = vpop.f32.mrf.mxu0  ;;  %v7700_v36 = vpop.f32.mrf.mxu1 }
 0x219   : > { %11800 = vst [vmem:[#allocation41_spill] sm:$0xff] %v10222_v46  ;;  %11801 = vst [vmem:[#allocation42_spill] sm:$0xff] %v10224_v16  ;;  %v1583_v2 = vadd.f32 %v7700_v36, %v10112_v21  ;;  %v3824_v36 = vld [vmem:[#allocation8 + $0x158] sm:$0xff] }
 0x21a   : > { %v7780_v40 = vpop.f32.mrf.mxu0  ;;  %v10227_v7 = vpop.f32.mrf.mxu1  ;;  %8290 = vmatprep.subr.mxu1 %v3824_v36 }
 0x21b   : > { %11802 = vst [vmem:[#allocation43_spill] sm:$0xff] %v10227_v7  ;;  %v10229_v20 = vadd.f32 %v7780_v40, %v1583_v2  ;;  %8291 = vmatpush3.msra.mxu1 %v3824_v36  ;;  %v10316_v7 = vld [vmem:[#allocation8 + $0x278] sm:$0xff] }
 0x21c   : > { %v10231_v8 = vpop.f32.mrf.mxu0  ;;  %v7703_v28 = vpop.f32.mrf.mxu1  ;;  %11826 = vst [vmem:[#allocation67_spill] sm:$0xff] %v10316_v7 }
 0x21d   : > { %11803 = vst [vmem:[#allocation44_spill] sm:$0xff] %v10229_v20  ;;  %11804 = vst [vmem:[#allocation45_spill] sm:$0xff] %v10231_v8  ;;  %v1585_v13 = vadd.f32 %v7703_v28, %v10120_v62  ;;  %v4130_v20 = vld [vmem:[#allocation8 + $0x1d8] sm:$0xff]  ;;  %v3823_v28 = vld [vmem:[#allocation8 + $0x150] sm:$0xff] }
 0x21e   : > { %v7783_v46 = vpop.f32.mrf.mxu0  ;;  %v10234_v21 = vpop.f32.mrf.mxu1  ;;  %8370 = vmatprep.subr.mxu0 %v4130_v20  ;;  %8292 = vmatprep.subr.mxu1 %v3823_v28 }
 0x21f   : > { %11805 = vst [vmem:[#allocation46_spill] sm:$0xff] %v10234_v21  ;;  %v10236_v51 = vadd.f32 %v7783_v46, %v1585_v13  ;;  %8371 = vmatpush3.msra.mxu0 %v4130_v20  ;;  %8293 = vmatpush3.msra.mxu1 %v3823_v28 }
 0x220   : > { %v10238_v40 = vpop.f32.mrf.mxu0  ;;  %v7706_v29 = vpop.f32.mrf.mxu1 }
 0x221   : > { %11806 = vst [vmem:[#allocation47_spill] sm:$0xff] %v10236_v51  ;;  %11807 = vst [vmem:[#allocation48_spill] sm:$0xff] %v10238_v40  ;;  %v1587_v2 = vadd.f32 %v7706_v29, %v10127_v50  ;;  %v4129_v51 = vld [vmem:[#allocation8 + $0x1d0] sm:$0xff]  ;;  %v3822_v29 = vld [vmem:[#allocation8 + $0x148] sm:$0xff] }
 0x222   : > { %v7786_v8 = vpop.f32.mrf.mxu0  ;;  %v10241_v62 = vpop.f32.mrf.mxu1  ;;  %8372 = vmatprep.subr.mxu0 %v4129_v51  ;;  %8294 = vmatprep.subr.mxu1 %v3822_v29 }
 0x223   : > { %11808 = vst [vmem:[#allocation49_spill] sm:$0xff] %v10241_v62  ;;  %v10243_v49 = vadd.f32 %v7786_v8, %v1587_v2  ;;  %8373 = vmatpush3.msra.mxu0 %v4129_v51  ;;  %8295 = vmatpush3.msra.mxu1 %v3822_v29 }
 0x224   : > { %v10245_v46 = vpop.f32.mrf.mxu0  ;;  %v7709_v47 = vpop.f32.mrf.mxu1 }
 0x225   : > { %11809 = vst [vmem:[#allocation50_spill] sm:$0xff] %v10243_v49  ;;  %11810 = vst [vmem:[#allocation51_spill] sm:$0xff] %v10245_v46  ;;  %v1589_v13 = vadd.f32 %v7709_v47, %v10134_v25  ;;  %v4128_v49 = vld [vmem:[#allocation8 + $0x1c8] sm:$0xff]  ;;  %v3821_v47 = vld [vmem:[#allocation8 + $0x140] sm:$0xff] }
 0x226   : > { %v7789_v40 = vpop.f32.mrf.mxu0  ;;  %v10248_v50 = vpop.f32.mrf.mxu1  ;;  %8374 = vmatprep.subr.mxu0 %v4128_v49  ;;  %8296 = vmatprep.subr.mxu1 %v3821_v47 }
 0x227   : > { %11811 = vst [vmem:[#allocation52_spill] sm:$0xff] %v10248_v50  ;;  %v10250_v36 = vadd.f32 %v7789_v40, %v1589_v13  ;;  %8375 = vmatpush3.msra.mxu0 %v4128_v49  ;;  %8297 = vmatpush3.msra.mxu1 %v3821_v47 }
 0x228   : > { %v10252_v8 = vpop.f32.mrf.mxu0  ;;  %v7712_v20 = vpop.f32.mrf.mxu1 }
 0x229   : > { %11812 = vst [vmem:[#allocation53_spill] sm:$0xff] %v10250_v36  ;;  %11813 = vst [vmem:[#allocation54_spill] sm:$0xff] %v10252_v8  ;;  %v1591_v2 = vadd.f32 %v7712_v20, %v10141_v5  ;;  %v4127_v36 = vld [vmem:[#allocation8 + $0x1c0] sm:$0xff]  ;;  %v3820_v20 = vld [vmem:[#allocation8 + $0x138] sm:$0xff] }
 0x22a   : > { %v7792_v46 = vpop.f32.mrf.mxu0  ;;  %v10255_v25 = vpop.f32.mrf.mxu1  ;;  %8376 = vmatprep.subr.mxu0 %v4127_v36  ;;  %8298 = vmatprep.subr.mxu1 %v3820_v20 }
 0x22b   : > { %11814 = vst [vmem:[#allocation55_spill] sm:$0xff] %v10255_v25  ;;  %v10257_v28 = vadd.f32 %v7792_v46, %v1591_v2  ;;  %8377 = vmatpush3.msra.mxu0 %v4127_v36  ;;  %8299 = vmatpush3.msra.mxu1 %v3820_v20 }
 0x22c   : > { %v10259_v40 = vpop.f32.mrf.mxu0  ;;  %v7715_v51 = vpop.f32.mrf.mxu1 }
 0x22d   : > { %11815 = vst [vmem:[#allocation56_spill] sm:$0xff] %v10257_v28  ;;  %11816 = vst [vmem:[#allocation57_spill] sm:$0xff] %v10259_v40  ;;  %v1593_v13 = vadd.f32 %v7715_v51, %v10149_v6  ;;  %v4126_v28 = vld [vmem:[#allocation8 + $0x1b8] sm:$0xff]  ;;  %v3819_v51 = vld [vmem:[#allocation8 + $0x130] sm:$0xff] }
 0x22e   : > { %v7795_v8 = vpop.f32.mrf.mxu0  ;;  %v10262_v5 = vpop.f32.mrf.mxu1  ;;  %8378 = vmatprep.subr.mxu0 %v4126_v28  ;;  %8300 = vmatprep.subr.mxu1 %v3819_v51 }
 0x22f   : > { %11817 = vst [vmem:[#allocation58_spill] sm:$0xff] %v10262_v5  ;;  %v10264_v29 = vadd.f32 %v7795_v8, %v1593_v13  ;;  %8379 = vmatpush3.msra.mxu0 %v4126_v28  ;;  %8301 = vmatpush3.msra.mxu1 %v3819_v51  ;;  %v3817_v28 = vld [vmem:[#allocation8 + $0x120] sm:$0xff] }
 0x230   : > { %v10266_v46 = vpop.f32.mrf.mxu0  ;;  %v7718_v49 = vpop.f32.mrf.mxu1 }
 0x231   : > { %11818 = vst [vmem:[#allocation59_spill] sm:$0xff] %v10264_v29  ;;  %11819 = vst [vmem:[#allocation60_spill] sm:$0xff] %v10266_v46  ;;  %v1595_v2 = vadd.f32 %v7718_v49, %v10159_v44  ;;  %v4125_v29 = vld [vmem:[#allocation8 + $0x1b0] sm:$0xff]  ;;  %v3818_v46 = vld [vmem:[#allocation8 + $0x128] sm:$0xff] }
 0x232   : > { %v7798_v40 = vpop.f32.mrf.mxu0  ;;  %v10269_v6 = vpop.f32.mrf.mxu1  ;;  %8380 = vmatprep.subr.mxu0 %v4125_v29  ;;  %8302 = vmatprep.subr.mxu1 %v3818_v46 }
 0x233   : > { %11820 = vst [vmem:[#allocation61_spill] sm:$0xff] %v10269_v6  ;;  %v10271_v47 = vadd.f32 %v7798_v40, %v1595_v2  ;;  %8381 = vmatpush3.msra.mxu0 %v4125_v29  ;;  %8303 = vmatpush3.msra.mxu1 %v3818_v46 }
 0x234   : > { %v10273_v8 = vpop.f32.mrf.mxu0  ;;  %v7721_v36 = vpop.f32.mrf.mxu1  ;;  %8304 = vmatprep.subr.mxu1 %v3817_v28 }
 0x235   : > { %11821 = vst [vmem:[#allocation62_spill] sm:$0xff] %v10271_v47  ;;  %11822 = vst [vmem:[#allocation63_spill] sm:$0xff] %v10273_v8  ;;  %v1597_v13 = vadd.f32 %v7721_v36, %v10166_v17  ;;  %v4124_v47 = vld [vmem:[#allocation8 + $0x1a8] sm:$0xff]  ;;  %8305 = vmatpush3.msra.mxu1 %v3817_v28  ;;  %v3816_v17 = vld [vmem:[#allocation8 + $0x118] sm:$0xff] }
 0x236   : > { %v7801_v44 = vpop.f32.mrf.mxu0  ;;  %v10276_v20 = vpop.f32.mrf.mxu1  ;;  %8382 = vmatprep.subr.mxu0 %v4124_v47  ;;  %8306 = vmatprep.subr.mxu1 %v3816_v17  ;;  %v4121_v8 = vld [vmem:[#allocation8 + $0x190] sm:$0xff] }
 0x237   : > { %11823 = vst [vmem:[#allocation64_spill] sm:$0xff] %v10276_v20  ;;  %v10278_v49 = vadd.f32 %v7801_v44, %v1597_v13  ;;  %8383 = vmatpush3.msra.mxu0 %v4124_v47  ;;  %8307 = vmatpush3.msra.mxu1 %v3816_v17  ;;  %v3815_v13 = vld [vmem:[#allocation8 + $0x110] sm:$0xff]  ;;  %v4123_v44 = vld [vmem:[#allocation8 + $0x1a0] sm:$0xff]  ;;  %v4122_v20 = vld [vmem:[#allocation8 + $0x198] sm:$0xff] }
 0x238   : > { %v10280_v40 = vpop.f32.mrf.mxu0  ;;  %v10282_v2 = vpop.f32.mrf.mxu1  ;;  %8308 = vmatprep.subr.mxu1 %v3815_v13  ;;  %8384 = vmatprep.subr.mxu0 %v4123_v44  ;;  %v3813_v47 = vld [vmem:[#allocation8 + $0x100] sm:$0xff] }
 0x239   : > { %11824 = vst [vmem:[#allocation65_spill] sm:$0xff] %v10278_v49  ;;  %11825 = vst [vmem:[#allocation66_spill] sm:$0xff] %v10280_v40  ;;  %8309 = vmatpush3.msra.mxu1 %v3815_v13  ;;  %v3814_v49 = vld [vmem:[#allocation8 + $0x108] sm:$0xff]  ;;  %8385 = vmatpush3.msra.mxu0 %v4123_v44 }
 0x23a   : > { %v10284_v51 = vpop.f32.mrf.mxu0  ;;  %v10286_v36 = vpop.f32.mrf.mxu1  ;;  %8310 = vmatprep.subr.mxu1 %v3814_v49  ;;  %8386 = vmatprep.subr.mxu0 %v4122_v20  ;;  %v4120_v13 = vld [vmem:[#allocation8 + $0x188] sm:$0xff] }
 0x23b   : > { %8311 = vmatpush3.msra.mxu1 %v3814_v49  ;;  %8387 = vmatpush3.msra.mxu0 %v4122_v20  ;;  %v4119_v49 = vld [vmem:[#allocation8 + $0x180] sm:$0xff] }
 0x23c   : > { %v10288_v29 = vpop.f32.mrf.mxu0  ;;  %v10290_v46 = vpop.f32.mrf.mxu1  ;;  %8312 = vmatprep.subr.mxu1 %v3813_v47  ;;  %8388 = vmatprep.subr.mxu0 %v4121_v8 }
 0x23d   : > { %8313 = vmatpush3.msra.mxu1 %v3813_v47  ;;  %8389 = vmatpush3.msra.mxu0 %v4121_v8  ;;  %v10319_v8 = vld [vmem:[#allocation8 + $0x2f8] sm:$0xff] }
 0x23e   : > { %v10292_v40 = vpop.f32.mrf.mxu0  ;;  %v10294_v28 = vpop.f32.mrf.mxu1  ;;  %8390 = vmatprep.subr.mxu0 %v4120_v13  ;;  %8442 = vmatprep.subr.mxu1 %v10316_v7  ;;  %11827 = vst [vmem:[#allocation68_spill] sm:$0xff] %v10319_v8 }
 0x23f   : > { %8391 = vmatpush3.msra.mxu0 %v4120_v13 }
 0x240   : > { %v10296_v17 = vpop.f32.mrf.mxu0  ;;  %v10298_v6 = vpop.f32.mrf.mxu1  ;;  %8392 = vmatprep.subr.mxu0 %v4119_v49 }
 0x241   : > { %8393 = vmatpush3.msra.mxu0 %v4119_v49 }
 0x242   : > { %v10300_v5 = vpop.f32.mrf.mxu0  ;;  %v10302_v25 = vpop.f32.mrf.mxu1  ;;  %8522 = vmatprep.subr.mxu0 %v10319_v8 }
 0x244   : > { %v10304_v44 = vpop.f32.mrf.mxu0  ;;  %v10306_v50 = vpop.f32.mrf.mxu1 }
 0x246   : > { %v10308_v62 = vpop.f32.mrf.mxu0  ;;  %v10310_v21 = vpop.f32.mrf.mxu1 }
 0x248   : > { %v10312_v20 = vpop.f32.mrf.mxu0  ;;  %v10314_v47 = vpop.f32.mrf.mxu1 }
 0x24a   : > { %v10321_v31 = vpop.f32.mrf.mxu0  ;;  %v10323_v13 = vpop.f32.mrf.mxu1 }
 0x24c   : > { %v10326_v16 = vpop.f32.mrf.mxu0  ;;  %v10328_v1 = vpop.f32.mrf.mxu1 }
 0x24d   : > { %11828 = vst [vmem:[#allocation69_spill] sm:$0xff] %v10326_v16 }
 0x24e   : > { %v10330_v49 = vpop.f32.mrf.mxu0  ;;  %v10332_v54 = vpop.f32.mrf.mxu1 }
 0x24f   : > { %11829 = vst [vmem:[#allocation70_spill] sm:$0xff] %v10330_v49  ;;  %11830 = vst [vmem:[#allocation71_spill] sm:$0xff] %v10332_v54 }
 0x250   : > { %v10334_v57 = vpop.f32.mrf.mxu0  ;;  %v10336_v43 = vpop.f32.mrf.mxu1 }
 0x251   : > { %11831 = vst [vmem:[#allocation72_spill] sm:$0xff] %v10334_v57  ;;  %11832 = vst [vmem:[#allocation73_spill] sm:$0xff] %v10336_v43 }
 0x252   : > { %v10338_v7 = vpop.f32.mrf.mxu0  ;;  %v10340_v63 = vpop.f32.mrf.mxu1 }
 0x253   : > { %11833 = vst [vmem:[#allocation74_spill] sm:$0xff] %v10338_v7  ;;  %11834 = vst [vmem:[#allocation75_spill] sm:$0xff] %v10340_v63 }
 0x254   : > { %v10342_v38 = vpop.f32.mrf.mxu0  ;;  %v10344_v45 = vpop.f32.mrf.mxu1 }
 0x255   : > { %11835 = vst [vmem:[#allocation76_spill] sm:$0xff] %v10342_v38  ;;  %11836 = vst [vmem:[#allocation77_spill] sm:$0xff] %v10344_v45 }
 0x256   : > { %v10346_v8 = vpop.f32.mrf.mxu0  ;;  %v10348_v16 = vpop.f32.mrf.mxu1 }
 0x257   : > { %11837 = vst [vmem:[#allocation78_spill] sm:$0xff] %v10346_v8  ;;  %11838 = vst [vmem:[#allocation79_spill] sm:$0xff] %v10348_v16 }
 0x258   : > { %v10350_v42 = vpop.f32.mrf.mxu0  ;;  %v10352_v49 = vpop.f32.mrf.mxu1 }
 0x259   : > { %11839 = vst [vmem:[#allocation80_spill] sm:$0xff] %v10350_v42  ;;  %11840 = vst [vmem:[#allocation81_spill] sm:$0xff] %v10352_v49 }
 0x25a   : > { %v10354_v54 = vpop.f32.mrf.mxu0  ;;  %v10356_v57 = vpop.f32.mrf.mxu1 }
 0x25b   : > { %11841 = vst [vmem:[#allocation82_spill] sm:$0xff] %v10354_v54  ;;  %11842 = vst [vmem:[#allocation83_spill] sm:$0xff] %v10356_v57 }
 0x25c   : > { %v10358_v43 = vpop.f32.mrf.mxu0  ;;  %v10360_v7 = vpop.f32.mrf.mxu1 }
 0x25d   : > { %11843 = vst [vmem:[#allocation84_spill] sm:$0xff] %v10358_v43  ;;  %11844 = vst [vmem:[#allocation85_spill] sm:$0xff] %v10360_v7 }
 0x25e   : > { %v10362_v63 = vpop.f32.mrf.mxu0  ;;  %v10364_v38 = vpop.f32.mrf.mxu1 }
 0x25f   : > { %11845 = vst [vmem:[#allocation86_spill] sm:$0xff] %v10362_v63  ;;  %11846 = vst [vmem:[#allocation87_spill] sm:$0xff] %v10364_v38 }
 0x260   : > { %v10366_v45 = vpop.f32.mrf.mxu0  ;;  %v10368_v8 = vpop.f32.mrf.mxu1 }
 0x261   : > { %11847 = vst [vmem:[#allocation88_spill] sm:$0xff] %v10366_v45  ;;  %11848 = vst [vmem:[#allocation89_spill] sm:$0xff] %v10368_v8 }
 0x262   : > { %v10370_v16 = vpop.f32.mrf.mxu0  ;;  %v10372_v42 = vpop.f32.mrf.mxu1 }
 0x263   : > { %11849 = vst [vmem:[#allocation90_spill] sm:$0xff] %v10370_v16  ;;  %11850 = vst [vmem:[#allocation91_spill] sm:$0xff] %v10372_v42 }
 0x264   : > { %v10374_v49 = vpop.f32.mrf.mxu0  ;;  %v10376_v54 = vpop.f32.mrf.mxu1 }
 0x265   : > { %11851 = vst [vmem:[#allocation92_spill] sm:$0xff] %v10374_v49 }
 0x266   : > { %v10378_v57 = vpop.f32.mrf.mxu0  ;;  %v10380_v43 = vpop.f32.mrf.mxu1 }
 0x267   : > { %11852 = vst [vmem:[#allocation93_spill] sm:$0xff] %v10378_v57  ;;  %11853 = vst [vmem:[#allocation94_spill] sm:$0xff] %v10380_v43  ;;  %v1566_v57 = vadd.f32 %v10171_v11, %v10067_v14  ;;  %v1570_v11 = vadd.f32 %v10185_v55, %v10079_v10  ;;  %v1572_v55 = vadd.f32 %v10192_v35, %v10085_v48 }
 0x268   : > { %v10382_v7 = vpop.f32.mrf.mxu0  ;;  %v10384_v63 = vpop.f32.mrf.mxu1 }
 0x269   : > { %11854 = vst [vmem:[#allocation95_spill] sm:$0xff] %v10382_v7  ;;  %11855 = vst [vmem:[#allocation96_spill] sm:$0xff] %v10384_v63  ;;  %v1876_v10 = vadd.f32 %v10189_v18, %v1570_v11  ;;  %v917_v18 = vadd.f32 %v10118_v32, %v9971_v56  ;;  %v2185_v56 = vadd.f32 %v10306_v50, %v10194_v23 }
 0x26a   : > { %v10386_v38 = vpop.f32.mrf.mxu0  ;;  %v10388_v45 = vpop.f32.mrf.mxu1 }
 0x26b   : > { %11856 = vst [vmem:[#allocation97_spill] sm:$0xff] %v10386_v38  ;;  %11857 = vst [vmem:[#allocation98_spill] sm:$0xff] %v10388_v45  ;;  %v1872_v45 = vadd.f32 %v10175_v33, %v1566_v57 }
 0x26c   : > { %v10390_v8 = vpop.f32.mrf.mxu0  ;;  %v10392_v16 = vpop.f32.mrf.mxu1 }
 0x26d   : > { %11858 = vst [vmem:[#allocation99_spill] sm:$0xff] %v10390_v8  ;;  %11859 = vst [vmem:[#allocation100_spill] sm:$0xff] %v10392_v16  ;;  %v1568_v8 = vadd.f32 %v10178_v26, %v10073_v37  ;;  %v2178_v14 = vadd.f32 %v10286_v36, %v1872_v45 }
 0x26e   : > { %v10394_v42 = vpop.f32.mrf.mxu0  ;;  %v10396_v49 = vpop.f32.mrf.mxu1 }
 0x26f   : > { %11860 = vst [vmem:[#allocation101_spill] sm:$0xff] %v10394_v42  ;;  %11861 = vst [vmem:[#allocation102_spill] sm:$0xff] %v10396_v49  ;;  %v2179_v42 = vadd.f32 %v10282_v2, %v10173_v24  ;;  %v1874_v57 = vadd.f32 %v10182_v60, %v1568_v8  ;;  %v2181_v24 = vadd.f32 %v10290_v46, %v10180_v41  ;;  %v10440_v41 = vld [vmem:[%s11652_s2] ss:$0 sm:$0xff] }
 0x270   : > { %v10400_v43 = vpop.f32.mrf.mxu0  ;;  %v10402_v7 = vpop.f32.mrf.mxu1  ;;  %v2485_v2 = vadd.f32 %v10288_v29, %v2178_v14  ;;  %v2183_v60 = vadd.f32 %v10298_v6, %v10187_v30  ;;  %v2182_v8 = vadd.f32 %v10302_v25, %v1876_v10 }
 0x271   : > { %v2486_v37 = vadd.f32 %v10284_v51, %v2179_v42  ;;  %v2180_v45 = vadd.f32 %v10294_v28, %v1874_v57  ;;  %v2488_v29 = vadd.f32 %v10292_v40, %v2181_v24  ;;  %v1878_v57 = vadd.f32 %v10196_v27, %v1572_v55 }
 0x272   : > { %v10404_v63 = vpop.f32.mrf.mxu0  ;;  %v10406_v38 = vpop.f32.mrf.mxu1  ;;  %v1574_v40 = vadd.f32 %v10199_v52, %v10091_v53  ;;  %v2489_v27 = vadd.f32 %v10304_v44, %v2182_v8  ;;  %v2187_v44 = vadd.f32 %v10314_v47, %v10201_v3 }
 0x273   : > { %11862 = vst [vmem:[#allocation103_spill] sm:$0xff] %v10404_v63  ;;  %11863 = vst [vmem:[#allocation104_spill] sm:$0xff] %v10406_v38  ;;  %v2487_v30 = vadd.f32 %v10296_v17, %v2180_v45  ;;  %v10456_v45 = vadd.f32 %v10122_v61, %v917_v18  ;;  %v2492_v61 = vadd.f32 %v10308_v62, %v2185_v56 }
 0x274   : > { %v10413_v49 = vpop.f32.mrf.mxu0  ;;  %v10415_v16 = vpop.f32.mrf.mxu1  ;;  %v1880_v55 = vadd.f32 %v10203_v19, %v1574_v40  ;;  %v927_v19 = vadd.f32 %v10125_v0, %v9985_v34  ;;  %v1578_v34 = vadd.f32 %v10213_v9, %v10103_v4  ;;  %v2189_v0 = vadd.f32 %v10328_v1, %v10208_v58  ;;  %v11866_v4 = vld [vmem:[#allocation69_spill] sm:$0xff]  ;;  %v11867_v9 = vld [vmem:[#allocation71_spill] sm:$0xff] }
 0x276   : > { %v10420_v63 = vpop.f32.mrf.mxu0  ;;  %v10422_v38 = vpop.f32.mrf.mxu1  ;;  %v2186_v62 = vadd.f32 %v10323_v13, %v1880_v55 }
 0x278   : > { %v10428_v33 = vpop.f32.mrf.mxu0  ;;  %v7996_v26 = vpop.f32.mrf.mxu1 }
 0x279   : > { %v2792_v36 = vadd.f32 %v7996_v26, %v2486_v37  ;;  %v2490_v37 = vadd.f32 %v10300_v5, %v2183_v60  ;;  %v1576_v60 = vadd.f32 %v10206_v59, %v10097_v12  ;;  %v937_v59 = vadd.f32 %v10132_v15, %v9999_v39 }
 0x27a   : > { %v8076_v42 = vpop.f32.mrf.mxu0  ;;  %v2632_v51 = vpop.f32.mrf.mxu1  ;;  %v2494_v39 = vadd.f32 %v10321_v31, %v2187_v44  ;;  %v2493_v31 = vadd.f32 %v11866_v4, %v2186_v62  ;;  %v11877_v62 = vld [vmem:[#allocation75_spill] sm:$0xff] }
 0x27b   : > { %v3098_v46 = vadd.f32 %v8076_v42, %v2792_v36  ;;  %v2791_v28 = vadd.f32 %v2632_v51, %v2485_v2  ;;  %v2184_v36 = vadd.f32 %v10310_v21, %v1878_v57  ;;  %v11864_v57 = vld [vmem:[#allocation28_spill] sm:$0xff] }
 0x27c   : > { %v2938_v48 = vpop.f32.mrf.mxu0  ;;  %v7999_v35 = vpop.f32.mrf.mxu1  ;;  %v10483_v40 = vadd.f32 %v11864_v57, %v927_v19  ;;  %v11883_v57 = vld [vmem:[#allocation77_spill] sm:$0xff] }
 0x27d   : > { %v3137_v6 = vadd.f32 %v10440_v41, %v3098_v46  ;;  %v3097_v14 = vadd.f32 %v2938_v48, %v2791_v28  ;;  %v2794_v11 = vadd.f32 %v7999_v35, %v2488_v29  ;;  %v2491_v12 = vadd.f32 %v10312_v20, %v2184_v36  ;;  %v11870_v36 = vld [vmem:[#allocation40_spill] sm:$0xff] }
 0x27e   : > { %v8079_v32 = vpop.f32.mrf.mxu0  ;;  %v2642_v25 = vpop.f32.mrf.mxu1 }
 0x27f   : > { %v3169_v24 = vmax.f32 %v3137_v6, 0.0  ;;  %v3136_v26 = vadd.f32 %v10440_v41, %v3097_v14  ;;  %v3100_v17 = vadd.f32 %v8079_v32, %v2794_v11  ;;  %v2793_v2 = vadd.f32 %v2642_v25, %v2487_v30 }
 0x280   : > { %v2948_v53 = vpop.f32.mrf.mxu0  ;;  %v8002_v52 = vpop.f32.mrf.mxu1  ;;  %v1882_v30 = vadd.f32 %v10210_v22, %v1576_v60  ;;  %v11865_v22 = vld [vmem:[#allocation29_spill] sm:$0xff] }
 0x281   : > { %3202 = vst [vmem:[#allocation3 + $0x21] sm:$0xff] %v3169_v24  ;;  %v3168_v5 = vmax.f32 %v3136_v26, 0.0  ;;  %v3139_v23 = vadd.f32 %v10440_v41, %v3100_v17  ;;  %v3099_v50 = vadd.f32 %v2948_v53, %v2793_v2  ;;  %v2796_v10 = vadd.f32 %v8002_v52, %v2490_v37  ;;  %v11868_v17 = vld [vmem:[#allocation39_spill] sm:$0xff]  ;;  %v11871_v52 = vld [vmem:[#allocation70_spill] sm:$0xff] }
 0x282   : > { %v8082_v42 = vpop.f32.mrf.mxu0  ;;  %v2652_v21 = vpop.f32.mrf.mxu1  ;;  %v10486_v37 = vadd.f32 %v11865_v22, %v937_v59  ;;  %v2188_v56 = vadd.f32 %v11867_v9, %v1882_v30  ;;  %v1884_v2 = vadd.f32 %v11868_v17, %v1578_v34  ;;  %v11876_v59 = vld [vmem:[#allocation72_spill] sm:$0xff]  ;;  %v11878_v34 = vld [vmem:[#allocation42_spill] sm:$0xff] }
 0x283   : > { %3201 = vst [vmem:[#allocation3 + $0x19] sm:$0xff] %v3168_v5  ;;  %v3171_v51 = vmax.f32 %v3139_v23, 0.0  ;;  %v3138_v29 = vadd.f32 %v10440_v41, %v3099_v50  ;;  %v3102_v46 = vadd.f32 %v8082_v42, %v2796_v10  ;;  %v2795_v28 = vadd.f32 %v2652_v21, %v2489_v27  ;;  %8157 = vmatprep.mubr.f32.mxu1 %v3168_v5  ;;  %v11869_v27 = vld [vmem:[#allocation26_spill] sm:$0xff]  ;;  %v11873_v50 = vld [vmem:[#allocation73_spill] sm:$0xff] }
 0x284   : > { %v2958_v3 = vpop.f32.mrf.mxu0  ;;  %v8005_v47 = vpop.f32.mrf.mxu1  ;;  %8158 = vmatmul.mubr.f32.gmra.mxu1 %v3169_v24  ;;  %v1580_v53 = vadd.f32 %v11870_v36, %v11869_v27  ;;  %v2496_v5 = vadd.f32 %v11871_v52, %v2189_v0  ;;  %v11872_v23 = vld [vmem:[#allocation38_spill] sm:$0xff]  ;;  %v11879_v0 = vld [vmem:[#allocation27_spill] sm:$0xff] }
 0x285   : > { %3204 = vst [vmem:[#allocation3 + $0x39] sm:$0xff] %v3171_v51  ;;  %v3170_v18 = vmax.f32 %v3138_v29, 0.0  ;;  %v3141_v8 = vadd.f32 %v10440_v41, %v3102_v46  ;;  %v3101_v48 = vadd.f32 %v2958_v3, %v2795_v28  ;;  %v2798_v35 = vadd.f32 %v8005_v47, %v2492_v61  ;;  %v11874_v46 = vld [vmem:[#allocation22_spill] sm:$0xff] }
 0x286   : > { %v8085_v15 = vpop.f32.mrf.mxu0  ;;  %v2662_v20 = vpop.f32.mrf.mxu1  ;;  %v2191_v10 = vadd.f32 %v11873_v50, %v11872_v23  ;;  %v11875_v28 = vld [vmem:[#allocation30_spill] sm:$0xff]  ;;  %v2190_v3 = vadd.f32 %v11877_v62, %v1884_v2  ;;  %v11886_v2 = vld [vmem:[#allocation79_spill] sm:$0xff] }
 0x287   : > { %3203 = vst [vmem:[#allocation3 + $0x31] sm:$0xff] %v3170_v18  ;;  %v3173_v13 = vmax.f32 %v3141_v8, 0.0  ;;  %v3140_v6 = vadd.f32 %v10440_v41, %v3101_v48  ;;  %v3104_v14 = vadd.f32 %v8085_v15, %v2798_v35  ;;  %v2797_v11 = vadd.f32 %v2662_v20, %v2491_v12  ;;  %8160 = vmatprep.mubr.f32.mxu1 %v3170_v18  ;;  %v11880_v15 = vld [vmem:[#allocation43_spill] sm:$0xff] }
 0x288   : > { %v2968_v1 = vpop.f32.mrf.mxu0  ;;  %v8008_v58 = vpop.f32.mrf.mxu1  ;;  %8161 = vmatmul.mubr.f32.gmra.mxu1 %v3171_v51  ;;  %v947_v19 = vadd.f32 %v11875_v28, %v11874_v46  ;;  %v2495_v12 = vadd.f32 %v11876_v59, %v2188_v56  ;;  %v1582_v20 = vadd.f32 %v11880_v15, %v11879_v0  ;;  %v11890_v46 = vld [vmem:[#allocation44_spill] sm:$0xff]  ;;  %v11891_v28 = vld [vmem:[#allocation81_spill] sm:$0xff] }
 0x289   : > { %3206 = vst [vmem:[#allocation3 + $0x51] sm:$0xff] %v3173_v13  ;;  %v3172_v32 = vmax.f32 %v3140_v6, 0.0  ;;  %v3143_v25 = vadd.f32 %v10440_v41, %v3104_v14  ;;  %v3103_v24 = vadd.f32 %v2968_v1, %v2797_v11  ;;  %v2800_v26 = vadd.f32 %v8008_v58, %v2494_v39  ;;  %v11881_v6 = vld [vmem:[#allocation74_spill] sm:$0xff]  ;;  %v11882_v11 = vld [vmem:[#allocation41_spill] sm:$0xff] }
 0x28a   : > { %v8088_v55 = vpop.f32.mrf.mxu0  ;;  %v2672_v60 = vpop.f32.mrf.mxu1  ;;  %v10497_v61 = vld [vmem:[#allocation3 + $0x18] sm:$0xff]  ;;  %v10499_v44 = vld [vmem:[#allocation3 + $0x20] sm:$0xff]  ;;  %v1886_v39 = vadd.f32 %v11878_v34, %v1580_v53  ;;  %v2498_v14 = vadd.f32 %v11881_v6, %v2191_v10  ;;  %v2193_v22 = vadd.f32 %v11883_v57, %v11882_v11  ;;  %v11887_v10 = vld [vmem:[#allocation45_spill] sm:$0xff] }
 0x28b   : > { %3205 = vst [vmem:[#allocation3 + $0x49] sm:$0xff] %v3172_v32  ;;  %v3175_v42 = vmax.f32 %v3143_v25, 0.0  ;;  %v3142_v21 = vadd.f32 %v10440_v41, %v3103_v24  ;;  %v3106_v51 = vadd.f32 %v8088_v55, %v2800_v26  ;;  %v2799_v29 = vadd.f32 %v2672_v60, %v2493_v31  ;;  %8237 = vmatprep.mubr.f32.mxu0 %v10497_v61  ;;  %v11884_v25 = vld [vmem:[#allocation31_spill] sm:$0xff]  ;;  %v11885_v26 = vld [vmem:[#allocation76_spill] sm:$0xff]  ;;  %v11888_v60 = vld [vmem:[#allocation46_spill] sm:$0xff] }
 0x28c   : > { %8163 = vmatprep.mubr.f32.mxu1 %v3172_v32  ;;  %v2978_v47 = vpop.f32.mrf.mxu0  ;;  %v8011_v18 = vpop.f32.mrf.mxu1  ;;  %8238 = vmatmul.mubr.f32.gmra.mxu0 %v10499_v44  ;;  %v10522_v24 = vadd.f32 %v11884_v25, %v947_v19  ;;  %v2497_v17 = vadd.f32 %v11885_v26, %v2190_v3  ;;  %v2192_v27 = vadd.f32 %v11886_v2, %v1886_v39  ;;  %v11895_v39 = vld [vmem:[#allocation83_spill] sm:$0xff]  ;;  %v11900_v26 = vld [vmem:[#allocation85_spill] sm:$0xff] }
 0x28d   : > { %8164 = vmatmul.mubr.f32.gmra.mxu1 %v3173_v13  ;;  %3208 = vst [vmem:[#allocation3 + $0x69] sm:$0xff] %v3175_v42  ;;  %v3174_v8 = vmax.f32 %v3142_v21, 0.0  ;;  %v3145_v48 = vadd.f32 %v10440_v41, %v3106_v51  ;;  %v3105_v35 = vadd.f32 %v2978_v47, %v2799_v29  ;;  %v2802_v30 = vadd.f32 %v8011_v18, %v2496_v5  ;;  %v11889_v51 = vld [vmem:[#allocation78_spill] sm:$0xff]  ;;  %v11899_v25 = vld [vmem:[#allocation47_spill] sm:$0xff] }
 0x28e   : > { %v8091_v4 = vpop.f32.mrf.mxu0  ;;  %v2682_v31 = vpop.f32.mrf.mxu1  ;;  %v10515_v9 = vld [vmem:[#allocation3 + $0x30] sm:$0xff]  ;;  %v10517_v13 = vld [vmem:[#allocation3 + $0x38] sm:$0xff]  ;;  %v1888_v55 = vadd.f32 %v11887_v10, %v1582_v20  ;;  %v1584_v21 = vadd.f32 %v11888_v60, %v10456_v45  ;;  %v2500_v29 = vadd.f32 %v11889_v51, %v2193_v22  ;;  %v2195_v19 = vadd.f32 %v11891_v28, %v11890_v46  ;;  %v11896_v22 = vld [vmem:[#allocation48_spill] sm:$0xff] }
 0x28f   : > { %3207 = vst [vmem:[#allocation3 + $0x61] sm:$0xff] %v3174_v8  ;;  %v3177_v56 = vmax.f32 %v3145_v48, 0.0  ;;  %v3144_v1 = vadd.f32 %v10440_v41, %v3105_v35  ;;  %v3108_v58 = vadd.f32 %v8091_v4, %v2802_v30  ;;  %v2801_v32 = vadd.f32 %v2682_v31, %v2495_v12  ;;  %8240 = vmatprep.mubr.f32.mxu0 %v10515_v9  ;;  %v11892_v45 = vld [vmem:[#allocation23_spill] sm:$0xff]  ;;  %v11893_v48 = vld [vmem:[#allocation32_spill] sm:$0xff]  ;;  %v11897_v31 = vld [vmem:[#allocation49_spill] sm:$0xff] }
 0x290   : > { %8166 = vmatprep.mubr.f32.mxu1 %v3174_v8  ;;  %v2988_v36 = vpop.f32.mrf.mxu0  ;;  %v8014_v53 = vpop.f32.mrf.mxu1  ;;  %8241 = vmatmul.mubr.f32.gmra.mxu0 %v10517_v13  ;;  %v957_v35 = vadd.f32 %v11893_v48, %v11892_v45  ;;  %v11894_v30 = vld [vmem:[#allocation80_spill] sm:$0xff]  ;;  %v2194_v0 = vadd.f32 %v11895_v39, %v1888_v55  ;;  %v1890_v4 = vadd.f32 %v11896_v22, %v1584_v21  ;;  %v11903_v60 = vld [vmem:[#allocation87_spill] sm:$0xff]  ;;  %v11906_v45 = vld [vmem:[#allocation86_spill] sm:$0xff] }
 0x291   : > { %8167 = vmatmul.mubr.f32.gmra.mxu1 %v3175_v42  ;;  %3210 = vst [vmem:[#allocation3 + $0x81] sm:$0xff] %v3177_v56  ;;  %v3176_v52 = vmax.f32 %v3144_v1, 0.0  ;;  %v3147_v5 = vadd.f32 %v10440_v41, %v3108_v58  ;;  %v3107_v23 = vadd.f32 %v2988_v36, %v2801_v32  ;;  %v2804_v50 = vadd.f32 %v8014_v53, %v2498_v14  ;;  %v11898_v58 = vld [vmem:[#allocation82_spill] sm:$0xff]  ;;  %v11902_v10 = vld [vmem:[#allocation84_spill] sm:$0xff] }
 0x292   : > { %v8094_v59 = vpop.f32.mrf.mxu0  ;;  %v2692_v12 = vpop.f32.mrf.mxu1  ;;  %v10534_v62 = vld [vmem:[#allocation3 + $0x48] sm:$0xff]  ;;  %v10536_v42 = vld [vmem:[#allocation3 + $0x50] sm:$0xff]  ;;  %v2499_v34 = vadd.f32 %v11894_v30, %v2192_v27  ;;  %v1586_v1 = vadd.f32 %v11897_v31, %v10483_v40  ;;  %v2502_v32 = vadd.f32 %v11898_v58, %v2195_v19  ;;  %v2501_v55 = vadd.f32 %v11902_v10, %v2194_v0 }
 0x293   : > { %3209 = vst [vmem:[#allocation3 + $0x79] sm:$0xff] %v3176_v52  ;;  %v3179_v3 = vmax.f32 %v3147_v5, 0.0  ;;  %v3146_v47 = vadd.f32 %v10440_v41, %v3107_v23  ;;  %v3110_v18 = vadd.f32 %v8094_v59, %v2804_v50  ;;  %v2803_v8 = vadd.f32 %v2692_v12, %v2497_v17  ;;  %8243 = vmatprep.mubr.f32.mxu0 %v10534_v62  ;;  %v11901_v40 = vld [vmem:[#allocation33_spill] sm:$0xff]  ;;  %v11904_v12 = vld [vmem:[#allocation51_spill] sm:$0xff]  ;;  %v11915_v10 = vld [vmem:[#allocation90_spill] sm:$0xff] }
 0x294   : > { %8169 = vmatprep.mubr.f32.mxu1 %v3176_v52  ;;  %v2998_v15 = vpop.f32.mrf.mxu0  ;;  %v8017_v20 = vpop.f32.mrf.mxu1  ;;  %8244 = vmatmul.mubr.f32.gmra.mxu0 %v10536_v42  ;;  %v2197_v17 = vadd.f32 %v11900_v26, %v11899_v25  ;;  %v10559_v50 = vadd.f32 %v11901_v40, %v957_v35  ;;  %v2196_v21 = vadd.f32 %v11903_v60, %v1890_v4  ;;  %v11907_v35 = vld [vmem:[#allocation50_spill] sm:$0xff]  ;;  %v11908_v30 = vld [vmem:[#allocation89_spill] sm:$0xff]  ;;  %v11911_v4 = vld [vmem:[#allocation88_spill] sm:$0xff] }
 0x295   : > { %8170 = vmatmul.mubr.f32.gmra.mxu1 %v3177_v56  ;;  %3212 = vst [vmem:[#allocation3 + $0x99] sm:$0xff] %v3179_v3  ;;  %v3178_v6 = vmax.f32 %v3146_v47, 0.0  ;;  %v3149_v14 = vadd.f32 %v10440_v41, %v3110_v18  ;;  %v3109_v11 = vadd.f32 %v2998_v15, %v2803_v8  ;;  %v2806_v57 = vadd.f32 %v8017_v20, %v2500_v29  ;;  %v11905_v18 = vld [vmem:[#allocation52_spill] sm:$0xff]  ;;  %v11916_v60 = vld [vmem:[#allocation53_spill] sm:$0xff] }
 0x296   : > { %v8097_v2 = vpop.f32.mrf.mxu0  ;;  %v2702_v27 = vpop.f32.mrf.mxu1  ;;  %v10552_v36 = vld [vmem:[#allocation3 + $0x60] sm:$0xff]  ;;  %v10554_v56 = vld [vmem:[#allocation3 + $0x68] sm:$0xff]  ;;  %v1892_v47 = vadd.f32 %v11904_v12, %v1586_v1  ;;  %v1588_v8 = vadd.f32 %v11905_v18, %v10486_v37  ;;  %v2504_v48 = vadd.f32 %v11906_v45, %v2197_v17  ;;  %v2503_v31 = vadd.f32 %v11911_v4, %v2196_v21  ;;  %v11912_v1 = vld [vmem:[#allocation91_spill] sm:$0xff] }
 0x297   : > { %3211 = vst [vmem:[#allocation3 + $0x91] sm:$0xff] %v3178_v6  ;;  %v3181_v53 = vmax.f32 %v3149_v14, 0.0  ;;  %v3148_v52 = vadd.f32 %v10440_v41, %v3109_v11  ;;  %v3112_v5 = vadd.f32 %v8097_v2, %v2806_v57  ;;  %v2805_v23 = vadd.f32 %v2702_v27, %v2499_v34  ;;  %8246 = vmatprep.mubr.f32.mxu0 %v10552_v36  ;;  %v11909_v37 = vld [vmem:[#allocation24_spill] sm:$0xff]  ;;  %v11910_v57 = vld [vmem:[#allocation34_spill] sm:$0xff] }
 0x298   : > { %8172 = vmatprep.mubr.f32.mxu1 %v3178_v6  ;;  %v3008_v51 = vpop.f32.mrf.mxu0  ;;  %v8020_v29 = vpop.f32.mrf.mxu1  ;;  %8247 = vmatmul.mubr.f32.gmra.mxu0 %v10554_v56  ;;  %v2199_v34 = vadd.f32 %v11908_v30, %v11907_v35  ;;  %v967_v22 = vadd.f32 %v11910_v57, %v11909_v37  ;;  %v2198_v58 = vadd.f32 %v11912_v1, %v1892_v47  ;;  %v11918_v18 = vld [vmem:[#allocation92_spill] sm:$0xff]  ;;  %v11922_v57 = vld [vmem:[#allocation93_spill] sm:$0xff] }
 0x299   : > { %8173 = vmatmul.mubr.f32.gmra.mxu1 %v3179_v3  ;;  %3214 = vst [vmem:[#allocation3 + $0xb1] sm:$0xff] %v3181_v53  ;;  %v3180_v46 = vmax.f32 %v3148_v52, 0.0  ;;  %v3151_v28 = vadd.f32 %v10440_v41, %v3112_v5  ;;  %v3111_v19 = vadd.f32 %v3008_v51, %v2805_v23  ;;  %v2808_v59 = vadd.f32 %v8020_v29, %v2502_v32  ;;  %v11913_v52 = vld [vmem:[#allocation54_spill] sm:$0xff]  ;;  %v11914_v23 = vld [vmem:[#allocation55_spill] sm:$0xff]  ;;  %v11923_v4 = vld [vmem:[#allocation56_spill] sm:$0xff] }
 0x29a   : > { %v8100_v39 = vpop.f32.mrf.mxu0  ;;  %v2712_v0 = vpop.f32.mrf.mxu1  ;;  %v10571_v15 = vld [vmem:[#allocation3 + $0x78] sm:$0xff]  ;;  %v10573_v3 = vld [vmem:[#allocation3 + $0x80] sm:$0xff]  ;;  %v1894_v5 = vadd.f32 %v11913_v52, %v1588_v8  ;;  %v1590_v40 = vadd.f32 %v11914_v23, %v10522_v24  ;;  %v2201_v21 = vadd.f32 %v10376_v54, %v11916_v60  ;;  %v2505_v8 = vadd.f32 %v11918_v18, %v2198_v58  ;;  %v11919_v54 = vld [vmem:[#allocation94_spill] sm:$0xff] }
 0x29b   : > { %3213 = vst [vmem:[#allocation3 + $0xa9] sm:$0xff] %v3180_v46  ;;  %v3183_v20 = vmax.f32 %v3151_v28, 0.0  ;;  %v3150_v6 = vadd.f32 %v10440_v41, %v3111_v19  ;;  %v3114_v14 = vadd.f32 %v8100_v39, %v2808_v59  ;;  %v2807_v11 = vadd.f32 %v2712_v0, %v2501_v55  ;;  %8249 = vmatprep.mubr.f32.mxu0 %v10571_v15  ;;  %v11917_v24 = vld [vmem:[#allocation35_spill] sm:$0xff]  ;;  %v11926_v52 = vld [vmem:[#allocation36_spill] sm:$0xff]  ;;  %v11930_v18 = vld [vmem:[#allocation61_spill] sm:$0xff] }
 0x29c   : > { %8175 = vmatprep.mubr.f32.mxu1 %v3180_v46  ;;  %v3018_v32 = vpop.f32.mrf.mxu0  ;;  %v8023_v25 = vpop.f32.mrf.mxu1  ;;  %8250 = vmatmul.mubr.f32.gmra.mxu0 %v10573_v3  ;;  %v2506_v55 = vadd.f32 %v11915_v10, %v2199_v34  ;;  %v1287_v47 = vadd.f32 %v11917_v24, %v967_v22  ;;  %v2200_v45 = vadd.f32 %v11919_v54, %v1894_v5  ;;  %v11927_v23 = vld [vmem:[#allocation95_spill] sm:$0xff]  ;;  %v11928_v10 = vld [vmem:[#allocation98_spill] sm:$0xff]  ;;  %v11931_v54 = vld [vmem:[#allocation97_spill] sm:$0xff] }
 0x29d   : > { %8176 = vmatmul.mubr.f32.gmra.mxu1 %v3181_v53  ;;  %3216 = vst [vmem:[#allocation3 + $0xc9] sm:$0xff] %v3183_v20  ;;  %v3182_v26 = vmax.f32 %v3150_v6, 0.0  ;;  %v3153_v17 = vadd.f32 %v10440_v41, %v3114_v14  ;;  %v3113_v2 = vadd.f32 %v3018_v32, %v2807_v11  ;;  %v2810_v27 = vadd.f32 %v8023_v25, %v2504_v48  ;;  %v11920_v6 = vld [vmem:[#allocation57_spill] sm:$0xff]  ;;  %v11921_v11 = vld [vmem:[#allocation58_spill] sm:$0xff] }
 0x29e   : > { %v8103_v51 = vpop.f32.mrf.mxu0  ;;  %v2722_v29 = vpop.f32.mrf.mxu1  ;;  %v10589_v46 = vld [vmem:[#allocation3 + $0x90] sm:$0xff]  ;;  %v10591_v53 = vld [vmem:[#allocation3 + $0x98] sm:$0xff]  ;;  %v1896_v14 = vadd.f32 %v11920_v6, %v1590_v40  ;;  %v1592_v37 = vadd.f32 %v11921_v11, %v10559_v50  ;;  %v2508_v22 = vadd.f32 %v11922_v57, %v2201_v21  ;;  %v11925_v50 = vld [vmem:[#allocation25_spill] sm:$0xff]  ;;  %v2507_v40 = vadd.f32 %v11927_v23, %v2200_v45 }
 0x29f   : > { %3215 = vst [vmem:[#allocation3 + $0xc1] sm:$0xff] %v3182_v26  ;;  %v3185_v28 = vmax.f32 %v3153_v17, 0.0  ;;  %v3152_v19 = vadd.f32 %v10440_v41, %v3113_v2  ;;  %v3116_v59 = vadd.f32 %v8103_v51, %v2810_v27  ;;  %v2809_v12 = vadd.f32 %v2722_v29, %v2503_v31  ;;  %8252 = vmatprep.mubr.f32.mxu0 %v10589_v46  ;;  %v11924_v31 = vld [vmem:[#allocation96_spill] sm:$0xff]  ;;  %v11932_v45 = vld [vmem:[#allocation59_spill] sm:$0xff] }
 0x2a0   : > { %8178 = vmatprep.mubr.f32.mxu1 %v3182_v26  ;;  %v3028_v48 = vpop.f32.mrf.mxu0  ;;  %v8026_v35 = vpop.f32.mrf.mxu1  ;;  %8253 = vmatmul.mubr.f32.gmra.mxu0 %v10591_v53  ;;  %v2203_v1 = vadd.f32 %v11924_v31, %v11923_v4  ;;  %v977_v5 = vadd.f32 %v11926_v52, %v11925_v50  ;;  %v11936_v31 = vld [vmem:[#allocation102_spill] sm:$0xff]  ;;  %v11937_v52 = vld [vmem:[#allocation63_spill] sm:$0xff] }
 0x2a1   : > { %8179 = vmatmul.mubr.f32.gmra.mxu1 %v3183_v20  ;;  %3218 = vst [vmem:[#allocation3 + $0xe1] sm:$0xff] %v3185_v28  ;;  %v3184_v30 = vmax.f32 %v3152_v19, 0.0  ;;  %v3155_v34 = vadd.f32 %v10440_v41, %v3116_v59  ;;  %v3115_v39 = vadd.f32 %v3028_v48, %v2809_v12  ;;  %v2812_v0 = vadd.f32 %v8026_v35, %v2506_v55  ;;  %v11929_v12 = vld [vmem:[#allocation60_spill] sm:$0xff] }
 0x2a2   : > { %v8106_v58 = vpop.f32.mrf.mxu0  ;;  %v2732_v32 = vpop.f32.mrf.mxu1  ;;  %v10606_v25 = vld [vmem:[#allocation3 + $0xa8] sm:$0xff]  ;;  %v10608_v20 = vld [vmem:[#allocation3 + $0xb0] sm:$0xff]  ;;  %v2202_v55 = vadd.f32 %v11928_v10, %v1896_v14  ;;  %v1898_v24 = vadd.f32 %v11929_v12, %v1592_v37  ;;  %v2510_v48 = vadd.f32 %v11931_v54, %v2203_v1  ;;  %v11933_v35 = vld [vmem:[#allocation100_spill] sm:$0xff] }
 0x2a3   : > { %3217 = vst [vmem:[#allocation3 + $0xd9] sm:$0xff] %v3184_v30  ;;  %v3187_v26 = vmax.f32 %v3155_v34, 0.0  ;;  %v3154_v17 = vadd.f32 %v10440_v41, %v3115_v39  ;;  %v3118_v2 = vadd.f32 %v8106_v58, %v2812_v0  ;;  %v2811_v27 = vadd.f32 %v2732_v32, %v2505_v8  ;;  %8255 = vmatprep.mubr.f32.mxu0 %v10606_v25  ;;  %v11941_v54 = vld [vmem:[#allocation104_spill] sm:$0xff] }
 0x2a4   : > { %8181 = vmatprep.mubr.f32.mxu1 %v3184_v30  ;;  %v3038_v60 = vpop.f32.mrf.mxu0  ;;  %v8029_v21 = vpop.f32.mrf.mxu1  ;;  %8256 = vmatmul.mubr.f32.gmra.mxu0 %v10608_v20  ;;  %v1594_v8 = vadd.f32 %v11930_v18, %v1287_v47  ;;  %v2205_v30 = vadd.f32 %v11933_v35, %v11932_v45  ;;  %v11934_v47 = vld [vmem:[#allocation37_spill] sm:$0xff]  ;;  %v2204_v1 = vadd.f32 %v11936_v31, %v1898_v24 }
 0x2a5   : > { %8182 = vmatmul.mubr.f32.gmra.mxu1 %v3185_v28  ;;  %3220 = vst [vmem:[#allocation3 + $0xf9] sm:$0xff] %v3187_v26  ;;  %v3186_v51 = vmax.f32 %v3154_v17, 0.0  ;;  %v3157_v29 = vadd.f32 %v10440_v41, %v3118_v2  ;;  %v3117_v19 = vadd.f32 %v3038_v60, %v2811_v27  ;;  %v2814_v59 = vadd.f32 %v8029_v21, %v2508_v22  ;;  %v11935_v22 = vld [vmem:[#allocation99_spill] sm:$0xff] }
 0x2a6   : > { %v8109_v34 = vpop.f32.mrf.mxu0  ;;  %v2742_v39 = vpop.f32.mrf.mxu1  ;;  %v10623_v0 = vld [vmem:[#allocation3 + $0xc0] sm:$0xff]  ;;  %v10625_v28 = vld [vmem:[#allocation3 + $0xc8] sm:$0xff]  ;;  %v1289_v37 = vadd.f32 %v11934_v47, %v977_v5  ;;  %v2509_v4 = vadd.f32 %v11935_v22, %v2202_v55  ;;  %v1900_v23 = vadd.f32 %v11937_v52, %v1594_v8  ;;  %v11940_v55 = vld [vmem:[#allocation62_spill] sm:$0xff]  ;;  %v2511_v8 = vadd.f32 %v10400_v43, %v2204_v1 }
 0x2a7   : > { %3219 = vst [vmem:[#allocation3 + $0xf1] sm:$0xff] %v3186_v51  ;;  %v3189_v6 = vmax.f32 %v3157_v29, 0.0  ;;  %v3156_v14 = vadd.f32 %v10440_v41, %v3117_v19  ;;  %v3120_v11 = vadd.f32 %v8109_v34, %v2814_v59  ;;  %v2813_v57 = vadd.f32 %v2742_v39, %v2507_v40  ;;  %8258 = vmatprep.mubr.f32.mxu0 %v10623_v0  ;;  %v11938_v40 = vld [vmem:[#allocation64_spill] sm:$0xff]  ;;  %v11939_v5 = vld [vmem:[#allocation101_spill] sm:$0xff] }
 0x2a8   : > { %8184 = vmatprep.mubr.f32.mxu1 %v3186_v51  ;;  %v3048_v58 = vpop.f32.mrf.mxu0  ;;  %v8032_v32 = vpop.f32.mrf.mxu1  ;;  %8259 = vmatmul.mubr.f32.gmra.mxu0 %v10625_v28  ;;  %v1596_v10 = vadd.f32 %v11938_v40, %v1289_v37  ;;  %v2512_v60 = vadd.f32 %v11939_v5, %v2205_v30  ;;  %v2207_v21 = vadd.f32 %v10402_v7, %v11940_v55  ;;  %v11944_v37 = vld [vmem:[#allocation65_spill] sm:$0xff] }
 0x2a9   : > { %8185 = vmatmul.mubr.f32.gmra.mxu1 %v3187_v26  ;;  %3222 = vst [vmem:[#allocation3 + $0x111] sm:$0xff] %v3189_v6  ;;  %v3188_v17 = vmax.f32 %v3156_v14, 0.0  ;;  %v3159_v2 = vadd.f32 %v10440_v41, %v3120_v11  ;;  %v3119_v27 = vadd.f32 %v3048_v58, %v2813_v57  ;;  %v2816_v50 = vadd.f32 %v8032_v32, %v2510_v48  ;;  %v11942_v14 = vld [vmem:[#allocation66_spill] sm:$0xff]  ;;  %v11943_v57 = vld [vmem:[#allocation103_spill] sm:$0xff] }
 0x2aa   : > { %v8112_v51 = vpop.f32.mrf.mxu0  ;;  %v2752_v29 = vpop.f32.mrf.mxu1  ;;  %v10639_v19 = vld [vmem:[#allocation3 + $0xd8] sm:$0xff]  ;;  %v10641_v26 = vld [vmem:[#allocation3 + $0xe0] sm:$0xff]  ;;  %v2206_v48 = vadd.f32 %v11941_v54, %v1900_v23  ;;  %v1902_v11 = vadd.f32 %v11942_v14, %v1596_v10  ;;  %v2514_v47 = vadd.f32 %v11943_v57, %v2207_v21  ;;  %v2209_v43 = vadd.f32 %v10415_v16, %v11944_v37 }
 0x2ab   : > { %3221 = vst [vmem:[#allocation3 + $0x109] sm:$0xff] %v3188_v17  ;;  %v3191_v59 = vmax.f32 %v3159_v2, 0.0  ;;  %v3158_v12 = vadd.f32 %v10440_v41, %v3119_v27  ;;  %v3122_v24 = vadd.f32 %v8112_v51, %v2816_v50  ;;  %v2815_v18 = vadd.f32 %v2752_v29, %v2509_v4  ;;  %8261 = vmatprep.mubr.f32.mxu0 %v10639_v19 }
 0x2ac   : > { %8187 = vmatprep.mubr.f32.mxu1 %v3188_v17  ;;  %v3058_v7 = vpop.f32.mrf.mxu0  ;;  %v8035_v45 = vpop.f32.mrf.mxu1  ;;  %8262 = vmatmul.mubr.f32.gmra.mxu0 %v10641_v26  ;;  %v2513_v2 = vadd.f32 %v10413_v49, %v2206_v48  ;;  %v2208_v27 = vadd.f32 %v10422_v38, %v1902_v11  ;;  %v2516_v5 = vadd.f32 %v10420_v63, %v2209_v43 }
 0x2ad   : > { %8188 = vmatmul.mubr.f32.gmra.mxu1 %v3189_v6  ;;  %3224 = vst [vmem:[#allocation3 + $0x129] sm:$0xff] %v3191_v59  ;;  %v3190_v35 = vmax.f32 %v3158_v12, 0.0  ;;  %v3161_v30 = vadd.f32 %v10440_v41, %v3122_v24  ;;  %v3121_v34 = vadd.f32 %v3058_v7, %v2815_v18  ;;  %v2818_v39 = vadd.f32 %v8035_v45, %v2512_v60 }
 0x2ae   : > { %v8115_v22 = vpop.f32.mrf.mxu0  ;;  %v2762_v4 = vpop.f32.mrf.mxu1  ;;  %v10653_v31 = vld [vmem:[#allocation3 + $0xf0] sm:$0xff]  ;;  %v10655_v1 = vld [vmem:[#allocation3 + $0xf8] sm:$0xff]  ;;  %v2515_v12 = vadd.f32 %v10428_v33, %v2208_v27 }
 0x2af   : > { %3223 = vst [vmem:[#allocation3 + $0x121] sm:$0xff] %v3190_v35  ;;  %v3193_v6 = vmax.f32 %v3161_v30, 0.0  ;;  %v3160_v58 = vadd.f32 %v10440_v41, %v3121_v34  ;;  %v3124_v32 = vadd.f32 %v8115_v22, %v2818_v39  ;;  %v2817_v17 = vadd.f32 %v2762_v4, %v2511_v8  ;;  %8264 = vmatprep.mubr.f32.mxu0 %v10653_v31  ;;  %v3780_v4 = vld [vmem:[#allocation3 + $0x2] sm:$0xff] }
 0x2b0   : > { %8190 = vmatprep.mubr.f32.mxu1 %v3190_v35  ;;  %v3068_v16 = vpop.f32.mrf.mxu0  ;;  %v8038_v50 = vpop.f32.mrf.mxu1  ;;  %8265 = vmatmul.mubr.f32.gmra.mxu0 %v10655_v1 }
 0x2b1   : > { %8191 = vmatmul.mubr.f32.gmra.mxu1 %v3191_v59  ;;  %3226 = vst [vmem:[#allocation3 + $0x141] sm:$0xff] %v3193_v6  ;;  %v3192_v52 = vmax.f32 %v3160_v58, 0.0  ;;  %v3163_v23 = vadd.f32 %v10440_v41, %v3124_v32  ;;  %v3123_v40 = vadd.f32 %v3068_v16, %v2817_v17  ;;  %v2820_v10 = vadd.f32 %v8038_v50, %v2514_v47  ;;  %v3781_v17 = vld [vmem:[#allocation3 + $0xa] sm:$0xff]  ;;  %v10708_v16 = vld [vmem:[#allocation3 + $0x1a] sm:$0xff] }
 0x2b2   : > { %v8118_v60 = vpop.f32.mrf.mxu0  ;;  %v2772_v55 = vpop.f32.mrf.mxu1  ;;  %v10664_v21 = vld [vmem:[#allocation3 + $0x108] sm:$0xff]  ;;  %v10666_v49 = vld [vmem:[#allocation3 + $0x110] sm:$0xff]  ;;  %v11945_v50 = vld [vmem:[#allocation67_spill] sm:$0xff] }
 0x2b3   : > { %3225 = vst [vmem:[#allocation3 + $0x139] sm:$0xff] %v3192_v52  ;;  %v3195_v38 = vmax.f32 %v3163_v23, 0.0  ;;  %v3162_v51 = vadd.f32 %v10440_v41, %v3123_v40  ;;  %v3126_v29 = vadd.f32 %v8118_v60, %v2820_v10  ;;  %v2819_v59 = vadd.f32 %v2772_v55, %v2513_v2  ;;  %8267 = vmatprep.mubr.f32.mxu0 %v10664_v21  ;;  %v10717_v40 = vld [vmem:[#allocation3 + $0x22] sm:$0xff]  ;;  %v4438_v10 = vld [vmem:[#allocation8 + $0x268] sm:$0xff] }
 0x2b4   : > { %8193 = vmatprep.mubr.f32.mxu1 %v3192_v52  ;;  %v3078_v24 = vpop.f32.mrf.mxu0  ;;  %v8041_v18 = vpop.f32.mrf.mxu1  ;;  %8268 = vmatmul.mubr.f32.gmra.mxu0 %v10666_v49 }
 0x2b5   : > { %8194 = vmatmul.mubr.f32.gmra.mxu1 %v3193_v6  ;;  %3228 = vst [vmem:[#allocation3 + $0x159] sm:$0xff] %v3195_v38  ;;  %v3194_v63 = vmax.f32 %v3162_v51, 0.0  ;;  %v3165_v8 = vadd.f32 %v10440_v41, %v3126_v29  ;;  %v3125_v54 = vadd.f32 %v3078_v24, %v2819_v59  ;;  %v2822_v48 = vadd.f32 %v8041_v18, %v2516_v5  ;;  %v10721_v5 = vld [vmem:[#allocation3 + $0x32] sm:$0xff]  ;;  %v10725_v51 = vld [vmem:[#allocation3 + $0x3a] sm:$0xff] }
 0x2b6   : > { %v2782_v7 = vpop.f32.mrf.mxu1  ;;  %v8121_v45 = vpop.f32.mrf.mxu0  ;;  %v10673_v35 = vld [vmem:[#allocation3 + $0x120] sm:$0xff]  ;;  %v10675_v30 = vld [vmem:[#allocation3 + $0x128] sm:$0xff]  ;;  %v4437_v59 = vld [vmem:[#allocation8 + $0x260] sm:$0xff] }
 0x2b7   : > { %3227 = vst [vmem:[#allocation3 + $0x151] sm:$0xff] %v3194_v63  ;;  %v3197_v34 = vmax.f32 %v3165_v8, 0.0  ;;  %v3164_v33 = vadd.f32 %v10440_v41, %v3125_v54  ;;  %v2821_v39 = vadd.f32 %v2782_v7, %v2515_v12  ;;  %v3128_v14 = vadd.f32 %v8121_v45, %v2822_v48  ;;  %8270 = vmatprep.mubr.f32.mxu0 %v10673_v35  ;;  %v11946_v12 = vld [vmem:[#allocation68_spill] sm:$0xff]  ;;  %v4744_v24 = vld [vmem:[#allocation8 + $0x2e8] sm:$0xff]  ;;  %v4743_v18 = vld [vmem:[#allocation8 + $0x2e0] sm:$0xff] }
 0x2b8   : > { %8196 = vmatprep.mubr.f32.mxu1 %v3194_v63  ;;  %v3088_v11 = vpop.f32.mrf.mxu0  ;;  %8271 = vmatmul.mubr.f32.gmra.mxu0 %v10675_v30  ;;  %v10741_v63 = vld [vmem:[#allocation3 + $0x62] sm:$0xff]  ;;  %v10749_v54 = vld [vmem:[#allocation3 + $0x7a] sm:$0xff]  ;;  %v10757_v7 = vld [vmem:[#allocation3 + $0x92] sm:$0xff] }
 0x2b9   : > { %8197 = vmatmul.mubr.f32.gmra.mxu1 %v3195_v38  ;;  %3230 = vst [vmem:[#allocation3 + $0x171] sm:$0xff] %v3197_v34  ;;  %v10680_v57 = vmax.f32 %v3164_v33, 0.0  ;;  %v10683_v47 = vadd.f32 %v10440_v41, %v3128_v14  ;;  %v3127_v37 = vadd.f32 %v3088_v11, %v2821_v39  ;;  %v4745_v38 = vld [vmem:[#allocation8 + $0x2f0] sm:$0xff]  ;;  %v4742_v8 = vld [vmem:[#allocation8 + $0x2d8] sm:$0xff]  ;;  %v4740_v45 = vld [vmem:[#allocation8 + $0x2c8] sm:$0xff] }
 0x2ba   : > { %v10685_v43 = vld [vmem:[#allocation3 + $0x138] sm:$0xff]  ;;  %v10687_v22 = vld [vmem:[#allocation3 + $0x140] sm:$0xff]  ;;  %v4739_v33 = vld [vmem:[#allocation8 + $0x2c0] sm:$0xff] }
 0x2bb   : > { %3229 = vst [vmem:[#allocation3 + $0x169] sm:$0xff] %v10680_v57  ;;  %v3199_v6 = vmax.f32 %v10683_v47, 0.0  ;;  %v10692_v58 = vadd.f32 %v10440_v41, %v3127_v37  ;;  %8273 = vmatprep.mubr.f32.mxu0 %v10685_v43  ;;  %8199 = vmatprep.mubr.f32.mxu1 %v10680_v57  ;;  %v4439_v41 = vld [vmem:[#allocation8 + $0x270] sm:$0xff]  ;;  %v4738_v14 = vld [vmem:[#allocation8 + $0x2b8] sm:$0xff] }
 0x2bc   : > { %8274 = vmatmul.mubr.f32.gmra.mxu0 %v10687_v22  ;;  %v4741_v48 = vld [vmem:[#allocation8 + $0x2d0] sm:$0xff] }
 0x2bd   : > { %8200 = vmatmul.mubr.f32.gmra.mxu1 %v3197_v34  ;;  %3232 = vst [vmem:[#allocation3 + $0x189] sm:$0xff] %v3199_v6  ;;  %v3198_v32 = vmax.f32 %v10692_v58, 0.0  ;;  %v10765_v34 = vld [vmem:[#allocation3 + $0xaa] sm:$0xff]  ;;  %v10773_v39 = vld [vmem:[#allocation3 + $0xc2] sm:$0xff]  ;;  %v10781_v11 = vld [vmem:[#allocation3 + $0xda] sm:$0xff] }
 0x2be   : > { %8314 = vmatprep.mubr.f32.mxu1 %v3780_v4  ;;  %v10700_v2 = vld [vmem:[#allocation3 + $0x150] sm:$0xff]  ;;  %v10702_v27 = vld [vmem:[#allocation3 + $0x158] sm:$0xff]  ;;  %v4737_v37 = vld [vmem:[#allocation8 + $0x2b0] sm:$0xff] }
 0x2bf   : > { %3231 = vst [vmem:[#allocation3 + $0x181] sm:$0xff] %v3198_v32  ;;  %8276 = vmatprep.mubr.f32.mxu0 %v10700_v2  ;;  %v8156_v60 = vpop.f32.mrf.mxu1  ;;  %v10789_v4 = vld [vmem:[#allocation3 + $0xf2] sm:$0xff] }
 0x2c0   : > { %8277 = vmatmul.mubr.f32.gmra.mxu0 %v10702_v27 }
 0x2c1   : > { %8315 = vmatmul.mubr.f32.vlgmr.msra.gmra.mxu1 %v3781_v17  ;;  %v4736_v17 = vld [vmem:[#allocation8 + $0x2a8] sm:$0xff] }
 0x2c2   : > { %8317 = vmatprep.mubr.f32.mxu1 %v10708_v16  ;;  %8443 = vmatpush3.msra.mxu1 %v11945_v50  ;;  %v10712_v52 = vld [vmem:[#allocation3 + $0x168] sm:$0xff]  ;;  %v10714_v23 = vld [vmem:[#allocation3 + $0x170] sm:$0xff]  ;;  %v8236_v55 = vpop.f32.mrf.mxu0 }
 0x2c3   : > { %8444 = vmatprep.subr.mxu1 %v4439_v41  ;;  %8279 = vmatprep.mubr.f32.mxu0 %v10712_v52  ;;  %v10727_v29 = vadd.f32 %v8236_v55, %v8156_v60  ;;  %v4735_v50 = vld [vmem:[#allocation8 + $0x2a0] sm:$0xff]  ;;  %v4734_v60 = vld [vmem:[#allocation8 + $0x298] sm:$0xff]  ;;  %v10813_v55 = vld [vmem:[#allocation3 + $0x13a] sm:$0xff] }
 0x2c4   : > { %8445 = vmatpush3.msra.mxu1 %v4439_v41  ;;  %8280 = vmatmul.mubr.f32.gmra.mxu0 %v10714_v23  ;;  %v10797_v41 = vld [vmem:[#allocation3 + $0x10a] sm:$0xff] }
 0x2c5   : > { %8318 = vmatmul.mubr.f32.gmra.mxu1 %v10717_v40  ;;  %8394 = vmatprep.mubr.f32.mxu0 %v10497_v61  ;;  %v10733_v61 = vld [vmem:[#allocation3 + $0x4a] sm:$0xff] }
 0x2c6   : > { %8320 = vmatprep.mubr.f32.mxu1 %v10721_v5  ;;  %8446 = vmatprep.subr.mxu1 %v4438_v10  ;;  %v4728_v58 = vld [vmem:[#allocation3 + $0x182] sm:$0xff]  ;;  %v4729_v47 = vld [vmem:[#allocation3 + $0x18a] sm:$0xff] }
 0x2c7   : > { %8447 = vmatpush3.msra.mxu1 %v4438_v10  ;;  %v10805_v10 = vld [vmem:[#allocation3 + $0x122] sm:$0xff] }
 0x2c8   : > { %8395 = vmatmul.mubr.f32.vlgmr.msra.gmra.mxu0 %v10499_v44  ;;  %8448 = vmatprep.subr.mxu1 %v4437_v59  ;;  %v10738_v44 = vld [vmem:[#allocation3 + $0x52] sm:$0xff] }
 0x2c9   : > { %8321 = vmatmul.mubr.f32.gmra.mxu1 %v10725_v51  ;;  %8397 = vmatprep.mubr.f32.mxu0 %v10515_v9  ;;  %v4436_v9 = vld [vmem:[#allocation8 + $0x258] sm:$0xff] }
 0x2ca   : > { %8523 = vmatpush3.msra.mxu0 %v11946_v12  ;;  %8323 = vmatprep.mubr.f32.mxu1 %v10733_v61  ;;  %v4732_v12 = vld [vmem:[#allocation8 + $0x288] sm:$0xff] }
 0x2cb   : > { %8524 = vmatprep.subr.mxu0 %v4745_v38  ;;  %8449 = vmatpush3.msra.mxu1 %v4437_v59  ;;  %v10821_v59 = vld [vmem:[#allocation3 + $0x152] sm:$0xff] }
 0x2cc   : > { %8525 = vmatpush3.msra.mxu0 %v4745_v38  ;;  %8450 = vmatprep.subr.mxu1 %v4436_v9  ;;  %v4733_v38 = vld [vmem:[#allocation8 + $0x290] sm:$0xff] }
 0x2cd   : > { %8398 = vmatmul.mubr.f32.gmra.mxu0 %v10517_v13  ;;  %8526 = vmatprep.subr.mxu0 %v4744_v24  ;;  %v10746_v13 = vld [vmem:[#allocation3 + $0x6a] sm:$0xff] }
 0x2ce   : > { %8400 = vmatprep.mubr.f32.mxu0 %v10534_v62  ;;  %8527 = vmatpush3.msra.mxu0 %v4744_v24  ;;  %v4435_v62 = vld [vmem:[#allocation8 + $0x250] sm:$0xff]  ;;  %v10829_v24 = vld [vmem:[#allocation3 + $0x16a] sm:$0xff] }
 0x2cf   : > { %8324 = vmatmul.mubr.f32.gmra.mxu1 %v10738_v44  ;;  %8528 = vmatprep.subr.mxu0 %v4743_v18 }
 0x2d0   : > { %8326 = vmatprep.mubr.f32.mxu1 %v10741_v63  ;;  %8529 = vmatpush3.msra.mxu0 %v4743_v18  ;;  %v4731_v18 = vld [vmem:[#allocation8 + $0x280] sm:$0xff] }
 0x2d1   : > { %8401 = vmatmul.mubr.f32.gmra.mxu0 %v10536_v42  ;;  %8530 = vmatprep.subr.mxu0 %v4742_v8  ;;  %v10754_v42 = vld [vmem:[#allocation3 + $0x82] sm:$0xff] }
 0x2d2   : > { %8403 = vmatprep.mubr.f32.mxu0 %v10552_v36  ;;  %8451 = vmatpush3.msra.mxu1 %v4436_v9  ;;  %v4434_v36 = vld [vmem:[#allocation8 + $0x248] sm:$0xff] }
 0x2d3   : > { %8327 = vmatmul.mubr.f32.gmra.mxu1 %v10746_v13  ;;  %8452 = vmatprep.subr.mxu1 %v4435_v62  ;;  %v4392_v9 = vld [vmem:[#allocation3 + $0x19] sm:$0xff] }
 0x2d4   : > { %8329 = vmatprep.mubr.f32.mxu1 %v10749_v54  ;;  %8531 = vmatpush3.msra.mxu0 %v4742_v8  ;;  %v5359_v8 = vld [vmem:[#allocation8 + $0x3f8] sm:$0xff] }
 0x2d5   : > { %8404 = vmatmul.mubr.f32.gmra.mxu0 %v10554_v56  ;;  %8532 = vmatprep.subr.mxu0 %v4741_v48  ;;  %v10762_v56 = vld [vmem:[#allocation3 + $0x9a] sm:$0xff] }
 0x2d6   : > { %8406 = vmatprep.mubr.f32.mxu0 %v10571_v15  ;;  %8453 = vmatpush3.msra.mxu1 %v4435_v62  ;;  %v4433_v15 = vld [vmem:[#allocation8 + $0x240] sm:$0xff]  ;;  %v4116_v62 = vld [vmem:[#allocation3 + $0x180] sm:$0xff] }
 0x2d7   : > { %8330 = vmatmul.mubr.f32.gmra.mxu1 %v10754_v42  ;;  %8454 = vmatprep.subr.mxu1 %v4434_v36 }
 0x2d8   : > { %8332 = vmatprep.mubr.f32.mxu1 %v10757_v7  ;;  %8533 = vmatpush3.msra.mxu0 %v4741_v48  ;;  %v5052_v48 = vld [vmem:[#allocation8 + $0x370] sm:$0xff] }
 0x2d9   : > { %8407 = vmatmul.mubr.f32.gmra.mxu0 %v10573_v3  ;;  %8534 = vmatprep.subr.mxu0 %v4740_v45  ;;  %v10770_v3 = vld [vmem:[#allocation3 + $0xb2] sm:$0xff] }
 0x2da   : > { %8409 = vmatprep.mubr.f32.mxu0 %v10589_v46  ;;  %8455 = vmatpush3.msra.mxu1 %v4434_v36  ;;  %v4432_v46 = vld [vmem:[#allocation8 + $0x238] sm:$0xff] }
 0x2db   : > { %8333 = vmatmul.mubr.f32.gmra.mxu1 %v10762_v56  ;;  %8456 = vmatprep.subr.mxu1 %v4433_v15  ;;  %v4117_v36 = vld [vmem:[#allocation3 + $0x188] sm:$0xff] }
 0x2dc   : > { %8335 = vmatprep.mubr.f32.mxu1 %v10765_v34  ;;  %8535 = vmatpush3.msra.mxu0 %v4740_v45  ;;  %v5051_v45 = vld [vmem:[#allocation8 + $0x368] sm:$0xff] }
 0x2dd   : > { %8410 = vmatmul.mubr.f32.gmra.mxu0 %v10591_v53  ;;  %8536 = vmatprep.subr.mxu0 %v4739_v33  ;;  %v10778_v53 = vld [vmem:[#allocation3 + $0xca] sm:$0xff] }
 0x2de   : > { %8412 = vmatprep.mubr.f32.mxu0 %v10606_v25  ;;  %8457 = vmatpush3.msra.mxu1 %v4433_v15  ;;  %v4431_v25 = vld [vmem:[#allocation8 + $0x230] sm:$0xff]  ;;  %v5050_v15 = vld [vmem:[#allocation8 + $0x360] sm:$0xff] }
 0x2df   : > { %8336 = vmatmul.mubr.f32.gmra.mxu1 %v10770_v3  ;;  %8458 = vmatprep.subr.mxu1 %v4432_v46 }
 0x2e0   : > { %8338 = vmatprep.mubr.f32.mxu1 %v10773_v39  ;;  %8537 = vmatpush3.msra.mxu0 %v4739_v33  ;;  %v10845_v33 = vld [vmem:[#allocation3 + $0x49] sm:$0xff] }
 0x2e1   : > { %8413 = vmatmul.mubr.f32.gmra.mxu0 %v10608_v20  ;;  %8538 = vmatprep.subr.mxu0 %v4738_v14  ;;  %v10786_v20 = vld [vmem:[#allocation3 + $0xe2] sm:$0xff] }
 0x2e2   : > { %8415 = vmatprep.mubr.f32.mxu0 %v10623_v0  ;;  %8459 = vmatpush3.msra.mxu1 %v4432_v46  ;;  %v4430_v0 = vld [vmem:[#allocation8 + $0x228] sm:$0xff]  ;;  %v5358_v46 = vld [vmem:[#allocation8 + $0x3f0] sm:$0xff] }
 0x2e3   : > { %8339 = vmatmul.mubr.f32.gmra.mxu1 %v10778_v53  ;;  %8460 = vmatprep.subr.mxu1 %v4431_v25 }
 0x2e4   : > { %8341 = vmatprep.mubr.f32.mxu1 %v10781_v11  ;;  %8539 = vmatpush3.msra.mxu0 %v4738_v14  ;;  %v5357_v14 = vld [vmem:[#allocation8 + $0x3e8] sm:$0xff] }
 0x2e5   : > { %8416 = vmatmul.mubr.f32.gmra.mxu0 %v10625_v28  ;;  %8540 = vmatprep.subr.mxu0 %v4737_v37  ;;  %v10794_v28 = vld [vmem:[#allocation3 + $0xfa] sm:$0xff] }
 0x2e6   : > { %8418 = vmatprep.mubr.f32.mxu0 %v10639_v19  ;;  %8461 = vmatpush3.msra.mxu1 %v4431_v25  ;;  %v4429_v19 = vld [vmem:[#allocation8 + $0x220] sm:$0xff]  ;;  %v10853_v25 = vld [vmem:[#allocation3 + $0x61] sm:$0xff] }
 0x2e7   : > { %8342 = vmatmul.mubr.f32.gmra.mxu1 %v10786_v20  ;;  %8462 = vmatprep.subr.mxu1 %v4430_v0 }
 0x2e8   : > { %8344 = vmatprep.mubr.f32.mxu1 %v10789_v4  ;;  %8541 = vmatpush3.msra.mxu0 %v4737_v37  ;;  %v5356_v37 = vld [vmem:[#allocation8 + $0x3e0] sm:$0xff] }
 0x2e9   : > { %8419 = vmatmul.mubr.f32.gmra.mxu0 %v10641_v26  ;;  %8542 = vmatprep.subr.mxu0 %v4736_v17  ;;  %v10802_v26 = vld [vmem:[#allocation3 + $0x112] sm:$0xff] }
 0x2ea   : > { %8421 = vmatprep.mubr.f32.mxu0 %v10653_v31  ;;  %8463 = vmatpush3.msra.mxu1 %v4430_v0  ;;  %v4428_v31 = vld [vmem:[#allocation8 + $0x218] sm:$0xff]  ;;  %v10861_v0 = vld [vmem:[#allocation3 + $0x79] sm:$0xff] }
 0x2eb   : > { %8345 = vmatmul.mubr.f32.gmra.mxu1 %v10794_v28  ;;  %8464 = vmatprep.subr.mxu1 %v4429_v19 }
 0x2ec   : > { %8347 = vmatprep.mubr.f32.mxu1 %v10797_v41  ;;  %8543 = vmatpush3.msra.mxu0 %v4736_v17  ;;  %v5355_v17 = vld [vmem:[#allocation8 + $0x3d8] sm:$0xff] }
 0x2ed   : > { %8422 = vmatmul.mubr.f32.gmra.mxu0 %v10655_v1  ;;  %8544 = vmatprep.subr.mxu0 %v4735_v50  ;;  %v10810_v1 = vld [vmem:[#allocation3 + $0x12a] sm:$0xff] }
 0x2ee   : > { %8424 = vmatprep.mubr.f32.mxu0 %v10664_v21  ;;  %8465 = vmatpush3.msra.mxu1 %v4429_v19  ;;  %v4427_v21 = vld [vmem:[#allocation8 + $0x210] sm:$0xff]  ;;  %v10869_v19 = vld [vmem:[#allocation3 + $0x91] sm:$0xff] }
 0x2ef   : > { %8348 = vmatmul.mubr.f32.gmra.mxu1 %v10802_v26  ;;  %8466 = vmatprep.subr.mxu1 %v4428_v31 }
 0x2f0   : > { %8350 = vmatprep.mubr.f32.mxu1 %v10805_v10  ;;  %8545 = vmatpush3.msra.mxu0 %v4735_v50  ;;  %v5354_v50 = vld [vmem:[#allocation8 + $0x3d0] sm:$0xff] }
 0x2f1   : > { %8425 = vmatmul.mubr.f32.gmra.mxu0 %v10666_v49  ;;  %8546 = vmatprep.subr.mxu0 %v4734_v60  ;;  %v10818_v49 = vld [vmem:[#allocation3 + $0x142] sm:$0xff] }
 0x2f2   : > { %8427 = vmatprep.mubr.f32.mxu0 %v10673_v35  ;;  %8467 = vmatpush3.msra.mxu1 %v4428_v31  ;;  %v4426_v35 = vld [vmem:[#allocation8 + $0x208] sm:$0xff]  ;;  %v10877_v31 = vld [vmem:[#allocation3 + $0xa9] sm:$0xff] }
 0x2f3   : > { %8351 = vmatmul.mubr.f32.gmra.mxu1 %v10810_v1  ;;  %8468 = vmatprep.subr.mxu1 %v4427_v21 }
 0x2f4   : > { %8353 = vmatprep.mubr.f32.mxu1 %v10813_v55  ;;  %8547 = vmatpush3.msra.mxu0 %v4734_v60  ;;  %v5353_v60 = vld [vmem:[#allocation8 + $0x3c8] sm:$0xff] }
 0x2f5   : > { %8428 = vmatmul.mubr.f32.gmra.mxu0 %v10675_v30  ;;  %8548 = vmatprep.subr.mxu0 %v4733_v38  ;;  %v10826_v30 = vld [vmem:[#allocation3 + $0x15a] sm:$0xff] }
 0x2f6   : > { %8430 = vmatprep.mubr.f32.mxu0 %v10685_v43  ;;  %8469 = vmatpush3.msra.mxu1 %v4427_v21  ;;  %v4425_v43 = vld [vmem:[#allocation8 + $0x200] sm:$0xff]  ;;  %v10885_v21 = vld [vmem:[#allocation3 + $0xc1] sm:$0xff] }
 0x2f7   : > { %8354 = vmatmul.mubr.f32.gmra.mxu1 %v10818_v49  ;;  %8470 = vmatprep.subr.mxu1 %v4426_v35 }
 0x2f8   : > { %8356 = vmatprep.mubr.f32.mxu1 %v10821_v59  ;;  %8549 = vmatpush3.msra.mxu0 %v4733_v38  ;;  %v5352_v38 = vld [vmem:[#allocation8 + $0x3c0] sm:$0xff] }
 0x2f9   : > { %8431 = vmatmul.mubr.f32.gmra.mxu0 %v10687_v22  ;;  %8550 = vmatprep.subr.mxu0 %v4732_v12  ;;  %v10834_v22 = vld [vmem:[#allocation3 + $0x172] sm:$0xff] }
 0x2fa   : > { %8433 = vmatprep.mubr.f32.mxu0 %v10700_v2  ;;  %8471 = vmatpush3.msra.mxu1 %v4426_v35  ;;  %v5053_v2 = vld [vmem:[#allocation8 + $0x378] sm:$0xff]  ;;  %v10893_v35 = vld [vmem:[#allocation3 + $0xd9] sm:$0xff] }
 0x2fb   : > { %8357 = vmatmul.mubr.f32.gmra.mxu1 %v10826_v30  ;;  %8472 = vmatprep.subr.mxu1 %v4425_v43 }
 0x2fc   : > { %8359 = vmatprep.mubr.f32.mxu1 %v10829_v24  ;;  %8551 = vmatpush3.msra.mxu0 %v4732_v12  ;;  %v5351_v12 = vld [vmem:[#allocation8 + $0x3b8] sm:$0xff] }
 0x2fd   : > { %8434 = vmatmul.mubr.f32.gmra.mxu0 %v10702_v27  ;;  %8552 = vmatprep.subr.mxu0 %v4731_v18  ;;  %v4393_v27 = vld [vmem:[#allocation3 + $0x21] sm:$0xff] }
 0x2fe   : > { %8436 = vmatprep.mubr.f32.mxu0 %v10712_v52  ;;  %8473 = vmatpush3.msra.mxu1 %v4425_v43  ;;  %v10838_v52 = vld [vmem:[#allocation3 + $0x31] sm:$0xff] }
 0x2ff   : > { %8360 = vmatmul.mubr.f32.gmra.mxu1 %v10834_v22  ;;  %8602 = vmatprep.subr.mxu1 %v5053_v2  ;;  %v10901_v43 = vld [vmem:[#allocation3 + $0xf1] sm:$0xff] }
 0x300   : > { %8474 = vmatprep.mubr.f32.mxu1 %v4392_v9  ;;  %8553 = vmatpush3.msra.mxu0 %v4731_v18  ;;  %v5350_v18 = vld [vmem:[#allocation8 + $0x3b0] sm:$0xff]  ;;  %v5349_v9 = vld [vmem:[#allocation8 + $0x3a8] sm:$0xff] }
 0x301   : > { %8437 = vmatmul.mubr.f32.gmra.mxu0 %v10714_v23  ;;  %8682 = vmatprep.subr.mxu0 %v5359_v8  ;;  %v10842_v23 = vld [vmem:[#allocation3 + $0x39] sm:$0xff] }
 0x302   : > { %8439 = vmatprep.mubr.f32.mxu0 %v4116_v62  ;;  %v5348_v62 = vld [vmem:[#allocation8 + $0x3a0] sm:$0xff] }
 0x303   : > { %8475 = vmatmul.mubr.f32.vlgmr.msra.gmra.mxu1 %v4393_v27  ;;  %v10925_v27 = vld [vmem:[#allocation3 + $0x139] sm:$0xff] }
 0x304   : > { %8477 = vmatprep.mubr.f32.mxu1 %v10838_v52  ;;  %8603 = vmatpush3.msra.mxu1 %v5053_v2  ;;  %v10909_v2 = vld [vmem:[#allocation3 + $0x109] sm:$0xff] }
 0x305   : > { %8440 = vmatmul.mubr.f32.gmra.mxu0 %v4117_v36  ;;  %8604 = vmatprep.subr.mxu1 %v5052_v48  ;;  %v10933_v36 = vld [vmem:[#allocation3 + $0x151] sm:$0xff] }
 0x306   : > { %8554 = vmatprep.mubr.f32.mxu0 %v10708_v16  ;;  %8605 = vmatpush3.msra.mxu1 %v5052_v48  ;;  %v10850_v16 = vld [vmem:[#allocation3 + $0x51] sm:$0xff]  ;;  %v5347_v48 = vld [vmem:[#allocation8 + $0x398] sm:$0xff] }
 0x307   : > { %8478 = vmatmul.mubr.f32.gmra.mxu1 %v10842_v23  ;;  %8606 = vmatprep.subr.mxu1 %v5051_v45 }
 0x308   : > { %8480 = vmatprep.mubr.f32.mxu1 %v10845_v33  ;;  %8607 = vmatpush3.msra.mxu1 %v5051_v45  ;;  %v5346_v45 = vld [vmem:[#allocation8 + $0x390] sm:$0xff] }
 0x309   : > { %8555 = vmatmul.mubr.f32.vlgmr.msra.gmra.mxu0 %v10717_v40  ;;  %8608 = vmatprep.subr.mxu1 %v5050_v15  ;;  %v10858_v40 = vld [vmem:[#allocation3 + $0x69] sm:$0xff] }
 0x30a   : > { %8557 = vmatprep.mubr.f32.mxu0 %v10721_v5  ;;  %8683 = vmatpush3.msra.mxu0 %v5359_v8  ;;  %v5049_v5 = vld [vmem:[#allocation8 + $0x358] sm:$0xff] }
 0x30b   : > { %8684 = vmatprep.subr.mxu0 %v5358_v46  ;;  %8481 = vmatmul.mubr.f32.gmra.mxu1 %v10850_v16  ;;  %v10917_v8 = vld [vmem:[#allocation3 + $0x121] sm:$0xff] }
 0x30c   : > { %8685 = vmatpush3.msra.mxu0 %v5358_v46  ;;  %8483 = vmatprep.mubr.f32.mxu1 %v10853_v25  ;;  %v5344_v46 = vld [vmem:[#allocation8 + $0x380] sm:$0xff] }
 0x30d   : > { %8558 = vmatmul.mubr.f32.gmra.mxu0 %v10725_v51  ;;  %8686 = vmatprep.subr.mxu0 %v5357_v14  ;;  %v10866_v51 = vld [vmem:[#allocation3 + $0x81] sm:$0xff] }
 0x30e   : > { %8560 = vmatprep.mubr.f32.mxu0 %v10733_v61  ;;  %8687 = vmatpush3.msra.mxu0 %v5357_v14  ;;  %v5048_v61 = vld [vmem:[#allocation8 + $0x350] sm:$0xff]  ;;  %v5007_v14 = vld [vmem:[#allocation3 + $0x48] sm:$0xff] }
 0x30f   : > { %8484 = vmatmul.mubr.f32.gmra.mxu1 %v10858_v40  ;;  %8688 = vmatprep.subr.mxu0 %v5356_v37 }
 0x310   : > { %8486 = vmatprep.mubr.f32.mxu1 %v10861_v0  ;;  %8609 = vmatpush3.msra.mxu1 %v5050_v15  ;;  %v5345_v15 = vld [vmem:[#allocation8 + $0x388] sm:$0xff] }
 0x311   : > { %8561 = vmatmul.mubr.f32.gmra.mxu0 %v10738_v44  ;;  %8610 = vmatprep.subr.mxu1 %v5049_v5  ;;  %v10874_v44 = vld [vmem:[#allocation3 + $0x99] sm:$0xff] }
 0x312   : > { %8563 = vmatprep.mubr.f32.mxu0 %v10741_v63  ;;  %8689 = vmatpush3.msra.mxu0 %v5356_v37  ;;  %v5047_v63 = vld [vmem:[#allocation8 + $0x348] sm:$0xff] }
 0x313   : > { %8487 = vmatmul.mubr.f32.gmra.mxu1 %v10866_v51  ;;  %8690 = vmatprep.subr.mxu0 %v5355_v17 }
 0x314   : > { %8489 = vmatprep.mubr.f32.mxu1 %v10869_v19  ;;  %8611 = vmatpush3.msra.mxu1 %v5049_v5  ;;  %v5662_v5 = vld [vmem:[#allocation8 + $0x460] sm:$0xff] }
 0x315   : > { %8564 = vmatmul.mubr.f32.gmra.mxu0 %v10746_v13  ;;  %8612 = vmatprep.subr.mxu1 %v5048_v61  ;;  %v10882_v13 = vld [vmem:[#allocation3 + $0xb1] sm:$0xff] }
 0x316   : > { %8566 = vmatprep.mubr.f32.mxu0 %v10749_v54  ;;  %8691 = vmatpush3.msra.mxu0 %v5355_v17  ;;  %v5046_v54 = vld [vmem:[#allocation8 + $0x340] sm:$0xff]  ;;  %v5009_v17 = vld [vmem:[#allocation3 + $0x60] sm:$0xff] }
 0x317   : > { %8490 = vmatmul.mubr.f32.gmra.mxu1 %v10874_v44  ;;  %8692 = vmatprep.subr.mxu0 %v5354_v50 }
 0x318   : > { %8492 = vmatprep.mubr.f32.mxu1 %v10877_v31  ;;  %8613 = vmatpush3.msra.mxu1 %v5048_v61 }
 0x319   : > { %8567 = vmatmul.mubr.f32.gmra.mxu0 %v10754_v42  ;;  %8614 = vmatprep.subr.mxu1 %v5047_v63  ;;  %v10890_v42 = vld [vmem:[#allocation3 + $0xc9] sm:$0xff] }
 0x31a   : > { %8569 = vmatprep.mubr.f32.mxu0 %v10757_v7  ;;  %8693 = vmatpush3.msra.mxu0 %v5354_v50  ;;  %v5045_v7 = vld [vmem:[#allocation8 + $0x338] sm:$0xff]  ;;  %v6008_v50 = vld [vmem:[#allocation11 + $0x70] sm:$0xff] }
 0x31b   : > { %8493 = vmatmul.mubr.f32.gmra.mxu1 %v10882_v13  ;;  %8694 = vmatprep.subr.mxu0 %v5353_v60 }
 0x31c   : > { %8495 = vmatprep.mubr.f32.mxu1 %v10885_v21  ;;  %8615 = vmatpush3.msra.mxu1 %v5047_v63 }
 0x31d   : > { %8570 = vmatmul.mubr.f32.gmra.mxu0 %v10762_v56  ;;  %8616 = vmatprep.subr.mxu1 %v5046_v54  ;;  %v10898_v56 = vld [vmem:[#allocation3 + $0xe1] sm:$0xff] }
 0x31e   : > { %8572 = vmatprep.mubr.f32.mxu0 %v10765_v34  ;;  %8695 = vmatpush3.msra.mxu0 %v5353_v60  ;;  %v5044_v34 = vld [vmem:[#allocation8 + $0x330] sm:$0xff]  ;;  %v5010_v60 = vld [vmem:[#allocation3 + $0x68] sm:$0xff] }
 0x31f   : > { %8496 = vmatmul.mubr.f32.gmra.mxu1 %v10890_v42  ;;  %8696 = vmatprep.subr.mxu0 %v5352_v38 }
 0x320   : > { %8498 = vmatprep.mubr.f32.mxu1 %v10893_v35  ;;  %8617 = vmatpush3.msra.mxu1 %v5046_v54  ;;  %v6007_v54 = vld [vmem:[#allocation11 + $0x68] sm:$0xff] }
 0x321   : > { %8573 = vmatmul.mubr.f32.gmra.mxu0 %v10770_v3  ;;  %8618 = vmatprep.subr.mxu1 %v5045_v7  ;;  %v10906_v3 = vld [vmem:[#allocation3 + $0xf9] sm:$0xff] }
 0x322   : > { %8575 = vmatprep.mubr.f32.mxu0 %v10773_v39  ;;  %8697 = vmatpush3.msra.mxu0 %v5352_v38  ;;  %v5043_v39 = vld [vmem:[#allocation8 + $0x328] sm:$0xff] }
 0x323   : > { %8499 = vmatmul.mubr.f32.gmra.mxu1 %v10898_v56  ;;  %8698 = vmatprep.subr.mxu0 %v5351_v12  ;;  %v5011_v38 = vld [vmem:[#allocation3 + $0x78] sm:$0xff] }
 0x324   : > { %8501 = vmatprep.mubr.f32.mxu1 %v10901_v43  ;;  %8619 = vmatpush3.msra.mxu1 %v5045_v7 }
 0x325   : > { %8576 = vmatmul.mubr.f32.gmra.mxu0 %v10778_v53  ;;  %8620 = vmatprep.subr.mxu1 %v5044_v34  ;;  %v10914_v53 = vld [vmem:[#allocation3 + $0x111] sm:$0xff] }
 0x326   : > { %8578 = vmatprep.mubr.f32.mxu0 %v10781_v11  ;;  %8699 = vmatpush3.msra.mxu0 %v5351_v12  ;;  %v5042_v11 = vld [vmem:[#allocation8 + $0x320] sm:$0xff] }
 0x327   : > { %8502 = vmatmul.mubr.f32.gmra.mxu1 %v10906_v3  ;;  %8700 = vmatprep.subr.mxu0 %v5350_v18  ;;  %v6006_v12 = vld [vmem:[#allocation11 + $0x60] sm:$0xff] }
 0x328   : > { %8504 = vmatprep.mubr.f32.mxu1 %v10909_v2  ;;  %8621 = vmatpush3.msra.mxu1 %v5044_v34 }
 0x329   : > { %8579 = vmatmul.mubr.f32.gmra.mxu0 %v10786_v20  ;;  %8622 = vmatprep.subr.mxu1 %v5043_v39  ;;  %v10922_v20 = vld [vmem:[#allocation3 + $0x129] sm:$0xff] }
 0x32a   : > { %8581 = vmatprep.mubr.f32.mxu0 %v10789_v4  ;;  %8701 = vmatpush3.msra.mxu0 %v5350_v18  ;;  %v5041_v4 = vld [vmem:[#allocation8 + $0x318] sm:$0xff] }
 0x32b   : > { %8505 = vmatmul.mubr.f32.gmra.mxu1 %v10914_v53  ;;  %8702 = vmatprep.subr.mxu0 %v5349_v9 }
 0x32c   : > { %8507 = vmatprep.mubr.f32.mxu1 %v10917_v8  ;;  %8623 = vmatpush3.msra.mxu1 %v5043_v39  ;;  %v5661_v39 = vld [vmem:[#allocation8 + $0x458] sm:$0xff] }
 0x32d   : > { %8582 = vmatmul.mubr.f32.gmra.mxu0 %v10794_v28  ;;  %8624 = vmatprep.subr.mxu1 %v5042_v11  ;;  %v10930_v28 = vld [vmem:[#allocation3 + $0x141] sm:$0xff] }
 0x32e   : > { %8584 = vmatprep.mubr.f32.mxu0 %v10797_v41  ;;  %8703 = vmatpush3.msra.mxu0 %v5349_v9  ;;  %v5040_v41 = vld [vmem:[#allocation8 + $0x310] sm:$0xff] }
 0x32f   : > { %8508 = vmatmul.mubr.f32.gmra.mxu1 %v10922_v20  ;;  %8704 = vmatprep.subr.mxu0 %v5348_v62 }
 0x330   : > { %8510 = vmatprep.mubr.f32.mxu1 %v10925_v27  ;;  %8625 = vmatpush3.msra.mxu1 %v5042_v11  ;;  %v5013_v11 = vld [vmem:[#allocation3 + $0x90] sm:$0xff] }
 0x331   : > { %8585 = vmatmul.mubr.f32.gmra.mxu0 %v10802_v26  ;;  %8626 = vmatprep.subr.mxu1 %v5041_v4  ;;  %v10938_v26 = vld [vmem:[#allocation3 + $0x159] sm:$0xff] }
 0x332   : > { %8587 = vmatprep.mubr.f32.mxu0 %v10805_v10  ;;  %8705 = vmatpush3.msra.mxu0 %v5348_v62  ;;  %v5039_v10 = vld [vmem:[#allocation8 + $0x308] sm:$0xff] }
 0x333   : > { %8511 = vmatmul.mubr.f32.gmra.mxu1 %v10930_v28  ;;  %8706 = vmatprep.subr.mxu0 %v5347_v48 }
 0x334   : > { %8513 = vmatprep.mubr.f32.mxu1 %v10933_v36  ;;  %8627 = vmatpush3.msra.mxu1 %v5041_v4 }
 0x335   : > { %8588 = vmatmul.mubr.f32.gmra.mxu0 %v10810_v1  ;;  %8628 = vmatprep.subr.mxu1 %v5040_v41  ;;  %v10944_v1 = vld [vmem:[#allocation3 + $0x171] sm:$0xff] }
 0x336   : > { %8590 = vmatprep.mubr.f32.mxu0 %v10813_v55  ;;  %8707 = vmatpush3.msra.mxu0 %v5347_v48  ;;  %v5038_v55 = vld [vmem:[#allocation8 + $0x300] sm:$0xff]  ;;  %v6005_v48 = vld [vmem:[#allocation11 + $0x58] sm:$0xff] }
 0x337   : > { %8514 = vmatmul.mubr.f32.gmra.mxu1 %v10938_v26  ;;  %8708 = vmatprep.subr.mxu0 %v5346_v45 }
 0x338   : > { %8516 = vmatprep.mubr.f32.mxu1 %v10680_v57  ;;  %8629 = vmatpush3.msra.mxu1 %v5040_v41  ;;  %v5665_v57 = vld [vmem:[#allocation8 + $0x478] sm:$0xff] }
 0x339   : > { %8591 = vmatmul.mubr.f32.gmra.mxu0 %v10818_v49  ;;  %8630 = vmatprep.subr.mxu1 %v5039_v10  ;;  %v5005_v49 = vld [vmem:[#allocation3 + $0x30] sm:$0xff] }
 0x33a   : > { %8593 = vmatprep.mubr.f32.mxu0 %v10821_v59  ;;  %8709 = vmatpush3.msra.mxu0 %v5346_v45  ;;  %v6009_v59 = vld [vmem:[#allocation11 + $0x78] sm:$0xff] }
 0x33b   : > { %8517 = vmatmul.mubr.f32.gmra.mxu1 %v10944_v1  ;;  %8710 = vmatprep.subr.mxu0 %v5345_v15 }
 0x33c   : > { %8519 = vmatprep.mubr.f32.mxu1 %v3198_v32  ;;  %8631 = vmatpush3.msra.mxu1 %v5039_v10  ;;  %v10954_v32 = vpop.f32.mrf.mxu1  ;;  %v5660_v10 = vld [vmem:[#allocation8 + $0x450] sm:$0xff] }
 0x33d   : > { %8594 = vmatmul.mubr.f32.gmra.mxu0 %v10826_v30  ;;  %8632 = vmatprep.subr.mxu1 %v5038_v55  ;;  %v5006_v30 = vld [vmem:[#allocation3 + $0x38] sm:$0xff] }
 0x33e   : > { %8596 = vmatprep.mubr.f32.mxu0 %v10829_v24  ;;  %8711 = vmatpush3.msra.mxu0 %v5345_v15  ;;  %v5664_v24 = vld [vmem:[#allocation8 + $0x470] sm:$0xff] }
 0x33f   : > { %8520 = vmatmul.mubr.f32.gmra.mxu1 %v3199_v6  ;;  %8712 = vmatprep.subr.mxu0 %v5344_v46  ;;  %v5663_v6 = vld [vmem:[#allocation8 + $0x468] sm:$0xff] }
 0x340   : > { %8633 = vmatpush3.msra.mxu1 %v5038_v55  ;;  %8634 = vmatprep.mubr.f32.mxu1 %v5005_v49  ;;  %v5015_v55 = vld [vmem:[#allocation3 + $0xa8] sm:$0xff]  ;;  %v6004_v49 = vld [vmem:[#allocation11 + $0x50] sm:$0xff] }
 0x341   : > { %8597 = vmatmul.mubr.f32.gmra.mxu0 %v10834_v22  ;;  %8762 = vmatprep.subr.mxu1 %v5665_v57  ;;  %v5008_v22 = vld [vmem:[#allocation3 + $0x50] sm:$0xff] }
 0x342   : > { %8599 = vmatprep.mubr.f32.mxu0 %v4728_v58  ;;  %8713 = vmatpush3.msra.mxu0 %v5344_v46 }
 0x343   : > { %8635 = vmatmul.mubr.f32.vlgmr.msra.gmra.mxu1 %v5006_v30  ;;  %8842 = vmatprep.subr.mxu0 %v6009_v59  ;;  %v5659_v30 = vld [vmem:[#allocation8 + $0x448] sm:$0xff] }
 0x344   : > { %8637 = vmatprep.mubr.f32.mxu1 %v5007_v14  ;;  %8763 = vmatpush3.msra.mxu1 %v5665_v57  ;;  %v8159_v37 = vpop.f32.mrf.mxu1  ;;  %v5017_v14 = vld [vmem:[#allocation3 + $0xc0] sm:$0xff] }
 0x345   : > { %8600 = vmatmul.mubr.f32.gmra.mxu0 %v4729_v47  ;;  %8764 = vmatprep.subr.mxu1 %v5664_v24 }
 0x346   : > { %8714 = vmatprep.mubr.f32.mxu0 %v10838_v52  ;;  %8765 = vmatpush3.msra.mxu1 %v5664_v24  ;;  %v3406_v61 = vpop.f32.mrf.mxu1  ;;  %v10959_v52 = vpop.f32.mrf.mxu0 }
 0x347   : > { %8638 = vmatmul.mubr.f32.gmra.mxu1 %v5008_v22  ;;  %8766 = vmatprep.subr.mxu1 %v5663_v6 }
 0x348   : > { %8640 = vmatprep.mubr.f32.mxu1 %v5009_v17  ;;  %8767 = vmatpush3.msra.mxu1 %v5663_v6  ;;  %v8162_v63 = vpop.f32.mrf.mxu1  ;;  %v5658_v17 = vld [vmem:[#allocation8 + $0x440] sm:$0xff] }
 0x349   : > { %8715 = vmatmul.mubr.f32.vlgmr.msra.gmra.mxu0 %v10842_v23  ;;  %8768 = vmatprep.subr.mxu1 %v5662_v5 }
 0x34a   : > { %8717 = vmatprep.mubr.f32.mxu0 %v10845_v33  ;;  %8843 = vmatpush3.msra.mxu0 %v6009_v59  ;;  %v3416_v7 = vpop.f32.mrf.mxu1  ;;  %v5012_v33 = vld [vmem:[#allocation3 + $0x80] sm:$0xff] }
 0x34b   : > { %8844 = vmatprep.subr.mxu0 %v6008_v50  ;;  %8641 = vmatmul.mubr.f32.gmra.mxu1 %v5010_v60 }
 0x34c   : > { %8845 = vmatpush3.msra.mxu0 %v6008_v50  ;;  %8643 = vmatprep.mubr.f32.mxu1 %v5011_v38  ;;  %v8239_v34 = vpop.f32.mrf.mxu0  ;;  %v5019_v50 = vld [vmem:[#allocation3 + $0xd8] sm:$0xff] }
 0x34d   : > { %8718 = vmatmul.mubr.f32.gmra.mxu0 %v10850_v16  ;;  %8846 = vmatprep.subr.mxu0 %v6007_v54  ;;  %v8165_v23 = vpop.f32.mrf.mxu1  ;;  %v10962_v18 = vadd.f32 %v8239_v34, %v8159_v37  ;;  %v6003_v37 = vld [vmem:[#allocation11 + $0x48] sm:$0xff] }
 0x34e   : > { %8720 = vmatprep.mubr.f32.mxu0 %v10853_v25  ;;  %8847 = vmatpush3.msra.mxu0 %v6007_v54  ;;  %v3631_v9 = vpop.f32.mrf.mxu0  ;;  %v5014_v25 = vld [vmem:[#allocation3 + $0x98] sm:$0xff]  ;;  %v6002_v54 = vld [vmem:[#allocation11 + $0x40] sm:$0xff] }
 0x34f   : > { %8644 = vmatmul.mubr.f32.gmra.mxu1 %v5012_v33  ;;  %v3426_v62 = vpop.f32.mrf.mxu1  ;;  %8848 = vmatprep.subr.mxu0 %v6006_v12  ;;  %v10965_v4 = vadd.f32 %v3631_v9, %v3406_v61  ;;  %v6001_v9 = vld [vmem:[#allocation11 + $0x38] sm:$0xff] }
 0x350   : > { %8646 = vmatprep.mubr.f32.mxu1 %v5013_v11  ;;  %8769 = vmatpush3.msra.mxu1 %v5662_v5  ;;  %v8242_v16 = vpop.f32.mrf.mxu0 }
 0x351   : > { %8721 = vmatmul.mubr.f32.gmra.mxu0 %v10858_v40  ;;  %v8168_v41 = vpop.f32.mrf.mxu1  ;;  %8770 = vmatprep.subr.mxu1 %v5661_v39  ;;  %v10968_v45 = vadd.f32 %v8242_v16, %v8162_v63 }
 0x352   : > { %8723 = vmatprep.mubr.f32.mxu0 %v10861_v0  ;;  %8849 = vmatpush3.msra.mxu0 %v6006_v12  ;;  %v3641_v15 = vpop.f32.mrf.mxu0  ;;  %v5016_v0 = vld [vmem:[#allocation3 + $0xb0] sm:$0xff]  ;;  %v5657_v12 = vld [vmem:[#allocation8 + $0x438] sm:$0xff] }
 0x353   : > { %8647 = vmatmul.mubr.f32.gmra.mxu1 %v5014_v25  ;;  %v3436_v46 = vpop.f32.mrf.mxu1  ;;  %8850 = vmatprep.subr.mxu0 %v6005_v48  ;;  %v10971_v57 = vadd.f32 %v3641_v15, %v3416_v7  ;;  %v6000_v15 = vld [vmem:[#allocation11 + $0x30] sm:$0xff] }
 0x354   : > { %8649 = vmatprep.mubr.f32.mxu1 %v5015_v55  ;;  %8771 = vmatpush3.msra.mxu1 %v5661_v39  ;;  %v8245_v40 = vpop.f32.mrf.mxu0 }
 0x355   : > { %8724 = vmatmul.mubr.f32.gmra.mxu0 %v10866_v51  ;;  %v8171_v59 = vpop.f32.mrf.mxu1  ;;  %8772 = vmatprep.subr.mxu1 %v5660_v10  ;;  %v10974_v58 = vadd.f32 %v8245_v40, %v8165_v23  ;;  %v5021_v23 = vld [vmem:[#allocation3 + $0xf0] sm:$0xff] }
 0x356   : > { %8726 = vmatprep.mubr.f32.mxu0 %v10869_v19  ;;  %8851 = vmatpush3.msra.mxu0 %v6005_v48  ;;  %v3651_v24 = vpop.f32.mrf.mxu0  ;;  %v5018_v19 = vld [vmem:[#allocation3 + $0xc8] sm:$0xff]  ;;  %v5656_v48 = vld [vmem:[#allocation8 + $0x430] sm:$0xff] }
 0x357   : > { %8650 = vmatmul.mubr.f32.gmra.mxu1 %v5016_v0  ;;  %v3446_v47 = vpop.f32.mrf.mxu1  ;;  %8852 = vmatprep.subr.mxu0 %v6004_v49  ;;  %v10977_v6 = vadd.f32 %v3651_v24, %v3426_v62  ;;  %v5999_v24 = vld [vmem:[#allocation11 + $0x28] sm:$0xff] }
 0x358   : > { %8652 = vmatprep.mubr.f32.mxu1 %v5017_v14  ;;  %8773 = vmatpush3.msra.mxu1 %v5660_v10  ;;  %v8248_v51 = vpop.f32.mrf.mxu0 }
 0x359   : > { %8727 = vmatmul.mubr.f32.gmra.mxu0 %v10874_v44  ;;  %v8174_v22 = vpop.f32.mrf.mxu1  ;;  %8774 = vmatprep.subr.mxu1 %v5659_v30  ;;  %v10980_v5 = vadd.f32 %v8248_v51, %v8168_v41  ;;  %v5023_v41 = vld [vmem:[#allocation3 + $0x108] sm:$0xff] }
 0x35a   : > { %8729 = vmatprep.mubr.f32.mxu0 %v10877_v31  ;;  %8853 = vmatpush3.msra.mxu0 %v6004_v49  ;;  %v3661_v61 = vpop.f32.mrf.mxu0  ;;  %v5020_v31 = vld [vmem:[#allocation3 + $0xe0] sm:$0xff]  ;;  %v5655_v49 = vld [vmem:[#allocation8 + $0x428] sm:$0xff] }
 0x35b   : > { %8653 = vmatmul.mubr.f32.gmra.mxu1 %v5018_v19  ;;  %v3456_v63 = vpop.f32.mrf.mxu1  ;;  %8854 = vmatprep.subr.mxu0 %v6003_v37  ;;  %v10983_v60 = vadd.f32 %v3661_v61, %v3436_v46  ;;  %v5998_v61 = vld [vmem:[#allocation11 + $0x20] sm:$0xff] }
 0x35c   : > { %8655 = vmatprep.mubr.f32.mxu1 %v5019_v50  ;;  %8775 = vmatpush3.msra.mxu1 %v5659_v30  ;;  %v8251_v44 = vpop.f32.mrf.mxu0 }
 0x35d   : > { %8730 = vmatmul.mubr.f32.gmra.mxu0 %v10882_v13  ;;  %v8177_v38 = vpop.f32.mrf.mxu1  ;;  %8776 = vmatprep.subr.mxu1 %v5658_v17  ;;  %v10986_v7 = vadd.f32 %v8251_v44, %v8171_v59  ;;  %v5025_v59 = vld [vmem:[#allocation3 + $0x120] sm:$0xff] }
 0x35e   : > { %8732 = vmatprep.mubr.f32.mxu0 %v10885_v21  ;;  %8855 = vmatpush3.msra.mxu0 %v6003_v37  ;;  %v3671_v34 = vpop.f32.mrf.mxu0  ;;  %v5022_v21 = vld [vmem:[#allocation3 + $0xf8] sm:$0xff]  ;;  %v5654_v37 = vld [vmem:[#allocation8 + $0x420] sm:$0xff] }
 0x35f   : > { %8656 = vmatmul.mubr.f32.gmra.mxu1 %v5020_v31  ;;  %v3466_v33 = vpop.f32.mrf.mxu1  ;;  %8856 = vmatprep.subr.mxu0 %v6002_v54  ;;  %v10989_v39 = vadd.f32 %v3671_v34, %v3446_v47  ;;  %v5997_v34 = vld [vmem:[#allocation11 + $0x18] sm:$0xff] }
 0x360   : > { %8658 = vmatprep.mubr.f32.mxu1 %v5021_v23  ;;  %8777 = vmatpush3.msra.mxu1 %v5658_v17  ;;  %v8254_v13 = vpop.f32.mrf.mxu0 }
 0x361   : > { %8733 = vmatmul.mubr.f32.gmra.mxu0 %v10890_v42  ;;  %v8180_v11 = vpop.f32.mrf.mxu1  ;;  %8778 = vmatprep.subr.mxu1 %v5657_v12  ;;  %v10992_v62 = vadd.f32 %v8254_v13, %v8174_v22  ;;  %v5027_v22 = vld [vmem:[#allocation3 + $0x138] sm:$0xff] }
 0x362   : > { %8735 = vmatprep.mubr.f32.mxu0 %v10893_v35  ;;  %8857 = vmatpush3.msra.mxu0 %v6002_v54  ;;  %v3681_v16 = vpop.f32.mrf.mxu0  ;;  %v5024_v35 = vld [vmem:[#allocation3 + $0x110] sm:$0xff]  ;;  %v5653_v54 = vld [vmem:[#allocation8 + $0x418] sm:$0xff] }
 0x363   : > { %8659 = vmatmul.mubr.f32.gmra.mxu1 %v5022_v21  ;;  %v3476_v25 = vpop.f32.mrf.mxu1  ;;  %8858 = vmatprep.subr.mxu0 %v6001_v9  ;;  %v10995_v10 = vadd.f32 %v3681_v16, %v3456_v63  ;;  %v5996_v16 = vld [vmem:[#allocation11 + $0x10] sm:$0xff] }
 0x364   : > { %8661 = vmatprep.mubr.f32.mxu1 %v5023_v41  ;;  %8779 = vmatpush3.msra.mxu1 %v5657_v12  ;;  %v8257_v42 = vpop.f32.mrf.mxu0 }
 0x365   : > { %8736 = vmatmul.mubr.f32.gmra.mxu0 %v10898_v56  ;;  %v8183_v55 = vpop.f32.mrf.mxu1  ;;  %8780 = vmatprep.subr.mxu1 %v5656_v48  ;;  %v10998_v46 = vadd.f32 %v8257_v42, %v8177_v38  ;;  %v5029_v38 = vld [vmem:[#allocation3 + $0x150] sm:$0xff] }
 0x366   : > { %8738 = vmatprep.mubr.f32.mxu0 %v10901_v43  ;;  %8859 = vmatpush3.msra.mxu0 %v6001_v9  ;;  %v3691_v40 = vpop.f32.mrf.mxu0  ;;  %v5026_v43 = vld [vmem:[#allocation3 + $0x128] sm:$0xff]  ;;  %v5652_v9 = vld [vmem:[#allocation8 + $0x410] sm:$0xff] }
 0x367   : > { %8662 = vmatmul.mubr.f32.gmra.mxu1 %v5024_v35  ;;  %v3486_v0 = vpop.f32.mrf.mxu1  ;;  %8860 = vmatprep.subr.mxu0 %v6000_v15  ;;  %v11001_v30 = vadd.f32 %v3691_v40, %v3466_v33  ;;  %v5995_v40 = vld [vmem:[#allocation11 + $0x8] sm:$0xff] }
 0x368   : > { %8664 = vmatprep.mubr.f32.mxu1 %v5025_v59  ;;  %8781 = vmatpush3.msra.mxu1 %v5656_v48  ;;  %v8260_v56 = vpop.f32.mrf.mxu0  ;;  %v5337_v59 = vld [vmem:[#allocation3 + $0x169] sm:$0xff] }
 0x369   : > { %8739 = vmatmul.mubr.f32.gmra.mxu0 %v10906_v3  ;;  %v8186_v14 = vpop.f32.mrf.mxu1  ;;  %8782 = vmatprep.subr.mxu1 %v5655_v49  ;;  %v11004_v47 = vadd.f32 %v8260_v56, %v8180_v11  ;;  %v5031_v11 = vld [vmem:[#allocation3 + $0x168] sm:$0xff] }
 0x36a   : > { %8741 = vmatprep.mubr.f32.mxu0 %v10909_v2  ;;  %8861 = vmatpush3.msra.mxu0 %v6000_v15  ;;  %v3701_v51 = vpop.f32.mrf.mxu0  ;;  %v5028_v2 = vld [vmem:[#allocation3 + $0x140] sm:$0xff]  ;;  %v5651_v15 = vld [vmem:[#allocation8 + $0x408] sm:$0xff]  ;;  %v5034_v56 = vld [vmem:[#allocation3 + $0x188] sm:$0xff] }
 0x36b   : > { %8665 = vmatmul.mubr.f32.gmra.mxu1 %v5026_v43  ;;  %v3496_v19 = vpop.f32.mrf.mxu1  ;;  %8862 = vmatprep.subr.mxu0 %v5999_v24  ;;  %v11007_v17 = vadd.f32 %v3701_v51, %v3476_v25 }
 0x36c   : > { %8667 = vmatprep.mubr.f32.mxu1 %v5027_v22  ;;  %8783 = vmatpush3.msra.mxu1 %v5655_v49  ;;  %v8263_v3 = vpop.f32.mrf.mxu0  ;;  %v5036_v22 = vld [vmem:[#allocation3 + $0x1a0] sm:$0xff] }
 0x36d   : > { %8742 = vmatmul.mubr.f32.gmra.mxu0 %v10914_v53  ;;  %v8189_v50 = vpop.f32.mrf.mxu1  ;;  %8784 = vmatprep.subr.mxu1 %v5654_v37  ;;  %v11010_v63 = vadd.f32 %v8263_v3, %v8183_v55  ;;  %v5033_v55 = vld [vmem:[#allocation3 + $0x180] sm:$0xff] }
 0x36e   : > { %8744 = vmatprep.mubr.f32.mxu0 %v10917_v8  ;;  %8863 = vmatpush3.msra.mxu0 %v5999_v24  ;;  %v3711_v44 = vpop.f32.mrf.mxu0  ;;  %v5030_v8 = vld [vmem:[#allocation3 + $0x158] sm:$0xff] }
 0x36f   : > { %8668 = vmatmul.mubr.f32.gmra.mxu1 %v5028_v2  ;;  %v3506_v31 = vpop.f32.mrf.mxu1  ;;  %8864 = vmatprep.subr.mxu0 %v5998_v61  ;;  %v11013_v12 = vadd.f32 %v3711_v44, %v3486_v0  ;;  %v5617_v44 = vld [vmem:[#allocation3 + $0x32] sm:$0xff] }
 0x370   : > { %8670 = vmatprep.mubr.f32.mxu1 %v5029_v38  ;;  %8785 = vmatpush3.msra.mxu1 %v5654_v37  ;;  %v8266_v53 = vpop.f32.mrf.mxu0 }
 0x371   : > { %8745 = vmatmul.mubr.f32.gmra.mxu0 %v10922_v20  ;;  %v8192_v23 = vpop.f32.mrf.mxu1  ;;  %8786 = vmatprep.subr.mxu1 %v5653_v54  ;;  %v11016_v33 = vadd.f32 %v8266_v53, %v8186_v14  ;;  %v5650_v14 = vld [vmem:[#allocation8 + $0x400] sm:$0xff] }
 0x372   : > { %8747 = vmatprep.mubr.f32.mxu0 %v10925_v27  ;;  %8865 = vmatpush3.msra.mxu0 %v5998_v61  ;;  %v3721_v13 = vpop.f32.mrf.mxu0  ;;  %v5032_v27 = vld [vmem:[#allocation3 + $0x170] sm:$0xff]  ;;  %v5339_v61 = vld [vmem:[#allocation3 + $0x181] sm:$0xff] }
 0x373   : > { %8671 = vmatmul.mubr.f32.gmra.mxu1 %v5030_v8  ;;  %v3516_v21 = vpop.f32.mrf.mxu1  ;;  %8866 = vmatprep.subr.mxu0 %v5997_v34  ;;  %v11019_v48 = vadd.f32 %v3721_v13, %v3496_v19  ;;  %v5342_v8 = vld [vmem:[#allocation3 + $0x1a1] sm:$0xff] }
 0x374   : > { %8673 = vmatprep.mubr.f32.mxu1 %v5031_v11  ;;  %8787 = vmatpush3.msra.mxu1 %v5653_v54  ;;  %v8269_v20 = vpop.f32.mrf.mxu0  ;;  %v5341_v54 = vld [vmem:[#allocation3 + $0x199] sm:$0xff] }
 0x375   : > { %8748 = vmatmul.mubr.f32.gmra.mxu0 %v10930_v28  ;;  %v8195_v41 = vpop.f32.mrf.mxu1  ;;  %8788 = vmatprep.subr.mxu1 %v5652_v9  ;;  %v11022_v25 = vadd.f32 %v8269_v20, %v8189_v50  ;;  %v5618_v13 = vld [vmem:[#allocation3 + $0x3a] sm:$0xff] }
 0x376   : > { %8750 = vmatprep.mubr.f32.mxu0 %v10933_v36  ;;  %8867 = vmatpush3.msra.mxu0 %v5997_v34  ;;  %v3731_v42 = vpop.f32.mrf.mxu0  ;;  %v5035_v36 = vld [vmem:[#allocation3 + $0x198] sm:$0xff]  ;;  %v5340_v34 = vld [vmem:[#allocation3 + $0x189] sm:$0xff] }
 0x377   : > { %8674 = vmatmul.mubr.f32.gmra.mxu1 %v5032_v27  ;;  %v3526_v35 = vpop.f32.mrf.mxu1  ;;  %8868 = vmatprep.subr.mxu0 %v5996_v16  ;;  %v11025_v49 = vadd.f32 %v3731_v42, %v3506_v31 }
 0x378   : > { %8676 = vmatprep.mubr.f32.mxu1 %v5033_v55  ;;  %8789 = vmatpush3.msra.mxu1 %v5652_v9  ;;  %v8272_v28 = vpop.f32.mrf.mxu0  ;;  %v5963_v55 = vld [vmem:[%s9476_s10 + $0x8] sm:$0xff] }
 0x379   : > { %8751 = vmatmul.mubr.f32.gmra.mxu0 %v10938_v26  ;;  %v8198_v0 = vpop.f32.mrf.mxu1  ;;  %8790 = vmatprep.subr.mxu1 %v5651_v15  ;;  %v11028_v24 = vadd.f32 %v8272_v28, %v8192_v23  ;;  %v5994_v26 = vld [vmem:[#allocation11] sm:$0xff]  ;;  %v5964_v28 = vld [vmem:[%s9476_s10 + $0x10] sm:$0xff] }
 0x37a   : > { %8753 = vmatprep.mubr.f32.mxu0 %v5337_v59  ;;  %8869 = vmatpush3.msra.mxu0 %v5996_v16  ;;  %v3741_v43 = vpop.f32.mrf.mxu0  ;;  %v5619_v16 = vld [vmem:[#allocation3 + $0x4a] sm:$0xff]  ;;  %v5621_v59 = vld [vmem:[#allocation3 + $0x62] sm:$0xff] }
 0x37b   : > { %8677 = vmatmul.mubr.f32.gmra.mxu1 %v5034_v56  ;;  %v3536_v37 = vpop.f32.mrf.mxu1  ;;  %8870 = vmatprep.subr.mxu0 %v5995_v40  ;;  %v11030_v51 = vadd.f32 %v3741_v43, %v3516_v21  ;;  %v5962_v21 = vld [vmem:[%s9476_s10] sm:$0xff] }
 0x37c   : > { %8791 = vmatpush3.msra.mxu1 %v5651_v15  ;;  %8679 = vmatprep.mubr.f32.mxu1 %v5035_v36  ;;  %v8275_v19 = vpop.f32.mrf.mxu0  ;;  %v3622_v36 = vadd.f32 %v10959_v52, %v10954_v32  ;;  %v5966_v32 = vld [vmem:[%s9476_s10 + $0x20] sm:$0xff]  ;;  %v5623_v52 = vld [vmem:[#allocation3 + $0x7a] sm:$0xff] }
 0x37d   : > { %8754 = vmatmul.mubr.f32.gmra.mxu0 %v10944_v1  ;;  %v8201_v3 = vpop.f32.mrf.mxu1  ;;  %8792 = vmatprep.subr.mxu1 %v5650_v14  ;;  %v11033_v50 = vadd.f32 %v8275_v19, %v8195_v41 }
 0x37e   : > { %8756 = vmatprep.mubr.f32.mxu0 %v5339_v61  ;;  %8871 = vmatpush3.msra.mxu0 %v5995_v40  ;;  %v3751_v2 = vpop.f32.mrf.mxu0  ;;  %v5622_v61 = vld [vmem:[#allocation3 + $0x6a] sm:$0xff] }
 0x37f   : > { %8680 = vmatmul.mubr.f32.gmra.mxu1 %v5036_v22  ;;  %v3546_v38 = vpop.f32.mrf.mxu1  ;;  %8872 = vmatprep.subr.mxu0 %v5994_v26  ;;  %v11035_v31 = vadd.f32 %v3751_v2, %v3526_v35 }
 0x380   : > { %8793 = vmatpush3.msra.mxu1 %v5650_v14  ;;  %8794 = vmatprep.mubr.f32.mxu1 %v5617_v44  ;;  %v8278_v1 = vpop.f32.mrf.mxu0 }
 0x381   : > { %8757 = vmatmul.mubr.f32.gmra.mxu0 %v5340_v34  ;;  %v8316_v53 = vpop.f32.mrf.mxu1  ;;  %v11037_v23 = vadd.f32 %v8278_v1, %v8198_v0  ;;  %v5967_v34 = vld [vmem:[%s9476_s10 + $0x28] sm:$0xff] }
 0x382   : > { %8759 = vmatprep.mubr.f32.mxu0 %v5341_v54  ;;  %8873 = vmatpush3.msra.mxu0 %v5994_v26  ;;  %v4055_v9 = vadd.f32 %v8316_v53, %v10727_v29  ;;  %v3761_v11 = vpop.f32.mrf.mxu0  ;;  %v5620_v29 = vld [vmem:[#allocation3 + $0x52] sm:$0xff]  ;;  %v5965_v26 = vld [vmem:[%s9476_s10 + $0x18] sm:$0xff] }
 0x383   : > { %8795 = vmatmul.mubr.f32.vlgmr.msra.gmra.mxu1 %v5618_v13  ;;  %v3895_v20 = vpop.f32.mrf.mxu1  ;;  %v11041_v41 = vadd.f32 %v3761_v11, %v3536_v37 }
 0x384   : > { %8797 = vmatprep.mubr.f32.mxu1 %v5619_v16  ;;  %v8281_v27 = vpop.f32.mrf.mxu0  ;;  %v4054_v22 = vadd.f32 %v3895_v20, %v3622_v36  ;;  %v5969_v20 = vld [vmem:[%s9476_s10 + $0x38] sm:$0xff] }
 0x385   : > { %8760 = vmatmul.mubr.f32.gmra.mxu0 %v5342_v8  ;;  %v8319_v15 = vpop.f32.mrf.mxu1  ;;  %v11043_v42 = vadd.f32 %v8281_v27, %v8201_v3  ;;  %v5968_v8 = vld [vmem:[%s9476_s10 + $0x30] sm:$0xff] }
 0x386   : > { %8874 = vmatprep.mubr.f32.mxu0 %v5962_v21  ;;  %v4057_v35 = vadd.f32 %v8319_v15, %v10962_v18  ;;  %v3771_v40 = vpop.f32.mrf.mxu0  ;;  %v5626_v15 = vld [vmem:[#allocation3 + $0x9a] sm:$0xff] }
 0x387   : > { %8798 = vmatmul.mubr.f32.gmra.mxu1 %v5620_v29  ;;  %v3905_v0 = vpop.f32.mrf.mxu1  ;;  %v11050_v56 = vadd.f32 %v3771_v40, %v3546_v38  ;;  %v5970_v29 = vld [vmem:[%s9476_s10 + $0x40] sm:$0xff] }
 0x388   : > { %8800 = vmatprep.mubr.f32.mxu1 %v5621_v59  ;;  %v4056_v14 = vadd.f32 %v3905_v0, %v10965_v4  ;;  %v8396_v43 = vpop.f32.mrf.mxu0  ;;  %v5627_v40 = vld [vmem:[#allocation3 + $0xaa] sm:$0xff] }
 0x389   : > { %8875 = vmatmul.mubr.f32.vlgmr.msra.gmra.mxu0 %v5963_v55  ;;  %v8322_v37 = vpop.f32.mrf.mxu1  ;;  %v11053_v18 = vadd.f32 %v8396_v43, %v4055_v9  ;;  %v5625_v9 = vld [vmem:[#allocation3 + $0x92] sm:$0xff] }
 0x38a   : > { %8877 = vmatprep.mubr.f32.mxu0 %v5964_v28  ;;  %v4059_v19 = vadd.f32 %v8322_v37, %v10968_v45  ;;  %v4201_v3 = vpop.f32.mrf.mxu0  ;;  %v5624_v45 = vld [vmem:[#allocation3 + $0x82] sm:$0xff]  ;;  %v5628_v43 = vld [vmem:[#allocation3 + $0xb2] sm:$0xff] }
 0x38b   : > { %8801 = vmatmul.mubr.f32.gmra.mxu1 %v5622_v61  ;;  %v3915_v2 = vpop.f32.mrf.mxu1  ;;  %v11058_v54 = vadd.f32 %v4201_v3, %v4054_v22 }
 0x38c   : > { %8803 = vmatprep.mubr.f32.mxu1 %v5623_v52  ;;  %v4058_v4 = vadd.f32 %v3915_v2, %v10971_v57  ;;  %v5973_v2 = vld [vmem:[%s9476_s10 + $0x58] sm:$0xff] }
 0x38d   : > { %v8399_v44 = vpop.f32.mrf.mxu0  ;;  %8878 = vmatmul.mubr.f32.gmra.mxu0 %v5965_v26  ;;  %v5972_v26 = vld [vmem:[%s9476_s10 + $0x50] sm:$0xff] }
 0x38e   : > { %v11061_v38 = vadd.f32 %v8399_v44, %v4057_v35  ;;  %8880 = vmatprep.mubr.f32.mxu0 %v5966_v32 }
 0x38f   : > { %v4211_v1 = vpop.f32.mrf.mxu0  ;;  %v8325_v53 = vpop.f32.mrf.mxu1  ;;  %8804 = vmatmul.mubr.f32.gmra.mxu1 %v5624_v45  ;;  %v5974_v45 = vld [vmem:[%s9476_s10 + $0x60] sm:$0xff] }
 0x390   : > { %v11065_v13 = vadd.f32 %v4211_v1, %v4056_v14  ;;  %v4061_v11 = vadd.f32 %v8325_v53, %v10974_v58  ;;  %8806 = vmatprep.mubr.f32.mxu1 %v5625_v9  ;;  %v5971_v14 = vld [vmem:[%s9476_s10 + $0x48] sm:$0xff] }
 0x391   : > { %v8402_v57 = vpop.f32.mrf.mxu0  ;;  %8881 = vmatmul.mubr.f32.gmra.mxu0 %v5967_v34  ;;  %v3925_v21 = vpop.f32.mrf.mxu1  ;;  %v5631_v1 = vld [vmem:[#allocation3 + $0xda] sm:$0xff] }
 0x392   : > { %v11068_v16 = vadd.f32 %v8402_v57, %v4059_v19  ;;  %8883 = vmatprep.mubr.f32.mxu0 %v5968_v8  ;;  %v4060_v27 = vadd.f32 %v3925_v21, %v10977_v6  ;;  %v5629_v19 = vld [vmem:[#allocation3 + $0xc2] sm:$0xff]  ;;  %v5975_v57 = vld [vmem:[%s9476_s10 + $0x68] sm:$0xff] }
 0x393   : > { %v4221_v55 = vpop.f32.mrf.mxu0  ;;  %v8328_v35 = vpop.f32.mrf.mxu1  ;;  %8807 = vmatmul.mubr.f32.gmra.mxu1 %v5626_v15  ;;  %v5632_v21 = vld [vmem:[#allocation3 + $0xe2] sm:$0xff] }
 0x394   : > { %v11073_v28 = vadd.f32 %v4221_v55, %v4058_v4  ;;  %v4063_v58 = vadd.f32 %v8328_v35, %v10980_v5  ;;  %8809 = vmatprep.mubr.f32.mxu1 %v5627_v40  ;;  %v5630_v4 = vld [vmem:[#allocation3 + $0xca] sm:$0xff]  ;;  %v5976_v15 = vld [vmem:[%s9476_s10 + $0x70] sm:$0xff]  ;;  %v5633_v55 = vld [vmem:[#allocation3 + $0xf2] sm:$0xff] }
 0x395   : > { %v8405_v59 = vpop.f32.mrf.mxu0  ;;  %8884 = vmatmul.mubr.f32.gmra.mxu0 %v5969_v20  ;;  %v3935_v0 = vpop.f32.mrf.mxu1 }
 0x396   : > { %v11076_v36 = vadd.f32 %v8405_v59, %v4061_v11  ;;  %8886 = vmatprep.mubr.f32.mxu0 %v5970_v29  ;;  %v4062_v6 = vadd.f32 %v3935_v0, %v10983_v60  ;;  %v5977_v59 = vld [vmem:[%s9476_s10 + $0x78] sm:$0xff]  ;;  %v5634_v0 = vld [vmem:[#allocation3 + $0xfa] sm:$0xff] }
 0x397   : > { %v4231_v37 = vpop.f32.mrf.mxu0  ;;  %v8331_v22 = vpop.f32.mrf.mxu1  ;;  %8810 = vmatmul.mubr.f32.gmra.mxu1 %v5628_v43  ;;  %v5978_v43 = vld [vmem:[%s9476_s10 + $0x80] sm:$0xff] }
 0x398   : > { %v11081_v61 = vadd.f32 %v4231_v37, %v4060_v27  ;;  %v4065_v5 = vadd.f32 %v8331_v22, %v10986_v7  ;;  %8812 = vmatprep.mubr.f32.mxu1 %v5629_v19  ;;  %v5635_v37 = vld [vmem:[#allocation3 + $0x10a] sm:$0xff] }
 0x399   : > { %v8408_v3 = vpop.f32.mrf.mxu0  ;;  %8887 = vmatmul.mubr.f32.gmra.mxu0 %v5971_v14  ;;  %v3945_v32 = vpop.f32.mrf.mxu1 }
 0x39a   : > { %v11084_v52 = vadd.f32 %v8408_v3, %v4063_v58  ;;  %8889 = vmatprep.mubr.f32.mxu0 %v5972_v26  ;;  %v4064_v60 = vadd.f32 %v3945_v32, %v10989_v39  ;;  %v5979_v3 = vld [vmem:[%s9476_s10 + $0x88] sm:$0xff] }
 0x39b   : > { %v4241_v44 = vpop.f32.mrf.mxu0  ;;  %v8334_v34 = vpop.f32.mrf.mxu1  ;;  %8813 = vmatmul.mubr.f32.gmra.mxu1 %v5630_v4  ;;  %v5636_v32 = vld [vmem:[#allocation3 + $0x112] sm:$0xff]  ;;  %v5980_v4 = vld [vmem:[%s9476_s10 + $0x90] sm:$0xff] }
 0x39c   : > { %v11089_v53 = vadd.f32 %v4241_v44, %v4062_v6  ;;  %v4067_v7 = vadd.f32 %v8334_v34, %v10992_v62  ;;  %8815 = vmatprep.mubr.f32.mxu1 %v5631_v1  ;;  %v5637_v44 = vld [vmem:[#allocation3 + $0x122] sm:$0xff] }
 0x39d   : > { %v8411_v8 = vpop.f32.mrf.mxu0  ;;  %8890 = vmatmul.mubr.f32.gmra.mxu0 %v5973_v2  ;;  %v3955_v9 = vpop.f32.mrf.mxu1 }
 0x39e   : > { %v11092_v11 = vadd.f32 %v8411_v8, %v4065_v5  ;;  %8892 = vmatprep.mubr.f32.mxu0 %v5974_v45  ;;  %v4066_v39 = vadd.f32 %v3955_v9, %v10995_v10  ;;  %v5981_v8 = vld [vmem:[%s9476_s10 + $0x98] sm:$0xff] }
 0x39f   : > { %v4251_v20 = vpop.f32.mrf.mxu0  ;;  %v8337_v27 = vpop.f32.mrf.mxu1  ;;  %8816 = vmatmul.mubr.f32.gmra.mxu1 %v5632_v21  ;;  %v5638_v9 = vld [vmem:[#allocation3 + $0x12a] sm:$0xff] }
 0x3a0   : > { %v11097_v35 = vadd.f32 %v4251_v20, %v4064_v60  ;;  %v4069_v62 = vadd.f32 %v8337_v27, %v10998_v46  ;;  %8818 = vmatprep.mubr.f32.mxu1 %v5633_v55  ;;  %v5982_v21 = vld [vmem:[%s9476_s10 + $0xa0] sm:$0xff]  ;;  %v5639_v20 = vld [vmem:[#allocation3 + $0x13a] sm:$0xff] }
 0x3a1   : > { %v8414_v29 = vpop.f32.mrf.mxu0  ;;  %8893 = vmatmul.mubr.f32.gmra.mxu0 %v5975_v57  ;;  %v3965_v40 = vpop.f32.mrf.mxu1 }
 0x3a2   : > { %v11100_v58 = vadd.f32 %v8414_v29, %v4067_v7  ;;  %8895 = vmatprep.mubr.f32.mxu0 %v5976_v15  ;;  %v4068_v10 = vadd.f32 %v3965_v40, %v11001_v30  ;;  %v5983_v29 = vld [vmem:[%s9476_s10 + $0xa8] sm:$0xff]  ;;  %v5640_v40 = vld [vmem:[#allocation3 + $0x142] sm:$0xff] }
 0x3a3   : > { %v4261_v14 = vpop.f32.mrf.mxu0  ;;  %v8340_v6 = vpop.f32.mrf.mxu1  ;;  %8819 = vmatmul.mubr.f32.gmra.mxu1 %v5634_v0  ;;  %v5984_v0 = vld [vmem:[%s9476_s10 + $0xb0] sm:$0xff] }
 0x3a4   : > { %v11105_v22 = vadd.f32 %v4261_v14, %v4066_v39  ;;  %v4071_v46 = vadd.f32 %v8340_v6, %v11004_v47  ;;  %8821 = vmatprep.mubr.f32.mxu1 %v5635_v37  ;;  %v5641_v14 = vld [vmem:[#allocation3 + $0x152] sm:$0xff] }
 0x3a5   : > { %v8417_v26 = vpop.f32.mrf.mxu0  ;;  %8896 = vmatmul.mubr.f32.gmra.mxu0 %v5977_v59  ;;  %v3975_v19 = vpop.f32.mrf.mxu1 }
 0x3a6   : > { %v11108_v5 = vadd.f32 %v8417_v26, %v4069_v62  ;;  %8898 = vmatprep.mubr.f32.mxu0 %v5978_v43  ;;  %v4070_v30 = vadd.f32 %v3975_v19, %v11007_v17  ;;  %v5985_v26 = vld [vmem:[%s9476_s10 + $0xb8] sm:$0xff]  ;;  %v5642_v19 = vld [vmem:[#allocation3 + $0x15a] sm:$0xff] }
 0x3a7   : > { %v4271_v2 = vpop.f32.mrf.mxu0  ;;  %v8343_v60 = vpop.f32.mrf.mxu1  ;;  %8822 = vmatmul.mubr.f32.gmra.mxu1 %v5636_v32  ;;  %v5986_v32 = vld [vmem:[%s9476_s10 + $0xc0] sm:$0xff] }
 0x3a8   : > { %v11113_v34 = vadd.f32 %v4271_v2, %v4068_v10  ;;  %v4073_v47 = vadd.f32 %v8343_v60, %v11010_v63  ;;  %8824 = vmatprep.mubr.f32.mxu1 %v5637_v44  ;;  %v5643_v2 = vld [vmem:[#allocation3 + $0x16a] sm:$0xff] }
 0x3a9   : > { %v8420_v45 = vpop.f32.mrf.mxu0  ;;  %8899 = vmatmul.mubr.f32.gmra.mxu0 %v5979_v3  ;;  %v3985_v1 = vpop.f32.mrf.mxu1 }
 0x3aa   : > { %v11116_v7 = vadd.f32 %v8420_v45, %v4071_v46  ;;  %8901 = vmatprep.mubr.f32.mxu0 %v5980_v4  ;;  %v4072_v17 = vadd.f32 %v3985_v1, %v11013_v12  ;;  %v5987_v45 = vld [vmem:[%s9476_s10 + $0xc8] sm:$0xff] }
 0x3ab   : > { %v4281_v57 = vpop.f32.mrf.mxu0  ;;  %v8346_v39 = vpop.f32.mrf.mxu1  ;;  %8825 = vmatmul.mubr.f32.gmra.mxu1 %v5638_v9  ;;  %v5644_v1 = vld [vmem:[#allocation3 + $0x172] sm:$0xff]  ;;  %v5988_v9 = vld [vmem:[%s9476_s10 + $0xd0] sm:$0xff] }
 0x3ac   : > { %v11121_v27 = vadd.f32 %v4281_v57, %v4070_v30  ;;  %v4075_v63 = vadd.f32 %v8346_v39, %v11016_v33  ;;  %8827 = vmatprep.mubr.f32.mxu1 %v5639_v20  ;;  %v5645_v57 = vld [vmem:[#allocation3 + $0x182] sm:$0xff] }
 0x3ad   : > { %v8423_v15 = vpop.f32.mrf.mxu0  ;;  %8902 = vmatmul.mubr.f32.gmra.mxu0 %v5981_v8  ;;  %v3995_v55 = vpop.f32.mrf.mxu1 }
 0x3ae   : > { %v11124_v62 = vadd.f32 %v8423_v15, %v4073_v47  ;;  %8904 = vmatprep.mubr.f32.mxu0 %v5982_v21  ;;  %v4074_v12 = vadd.f32 %v3995_v55, %v11019_v48 }
 0x3af   : > { %v4291_v59 = vpop.f32.mrf.mxu0  ;;  %v8349_v10 = vpop.f32.mrf.mxu1  ;;  %8828 = vmatmul.mubr.f32.gmra.mxu1 %v5640_v40 }
 0x3b0   : > { %v11129_v6 = vadd.f32 %v4291_v59, %v4072_v17  ;;  %v4077_v33 = vadd.f32 %v8349_v10, %v11022_v25  ;;  %8830 = vmatprep.mubr.f32.mxu1 %v5641_v14  ;;  %v5990_v59 = vld [vmem:[%s9476_s10 + $0xe0] sm:$0xff] }
 0x3b1   : > { %v8426_v43 = vpop.f32.mrf.mxu0  ;;  %8905 = vmatmul.mubr.f32.gmra.mxu0 %v5983_v29  ;;  %v4005_v37 = vpop.f32.mrf.mxu1  ;;  %v5646_v29 = vld [vmem:[#allocation3 + $0x18a] sm:$0xff] }
 0x3b2   : > { %v11132_v46 = vadd.f32 %v8426_v43, %v4075_v63  ;;  %8907 = vmatprep.mubr.f32.mxu0 %v5984_v0  ;;  %v4076_v48 = vadd.f32 %v4005_v37, %v11025_v49  ;;  %v5647_v63 = vld [vmem:[#allocation3 + $0x19a] sm:$0xff]  ;;  %v5648_v0 = vld [vmem:[#allocation3 + $0x1a2] sm:$0xff] }
 0x3b3   : > { %v4301_v3 = vpop.f32.mrf.mxu0  ;;  %v8352_v30 = vpop.f32.mrf.mxu1  ;;  %8831 = vmatmul.mubr.f32.gmra.mxu1 %v5642_v19  ;;  %v5992_v19 = vld [vmem:[%s9476_s10 + $0xf0] sm:$0xff] }
 0x3b4   : > { %v11137_v60 = vadd.f32 %v4301_v3, %v4074_v12  ;;  %v4079_v25 = vadd.f32 %v8352_v30, %v11028_v24  ;;  %8833 = vmatprep.mubr.f32.mxu1 %v5643_v2 }
 0x3b5   : > { %v8429_v4 = vpop.f32.mrf.mxu0  ;;  %8908 = vmatmul.mubr.f32.gmra.mxu0 %v5985_v26  ;;  %v4015_v44 = vpop.f32.mrf.mxu1 }
 0x3b6   : > { %v11140_v47 = vadd.f32 %v8429_v4, %v4077_v33  ;;  %8910 = vmatprep.mubr.f32.mxu0 %v5986_v32  ;;  %v4078_v49 = vadd.f32 %v4015_v44, %v11030_v51  ;;  %v5989_v51 = vld [vmem:[%s9476_s10 + $0xd8] sm:$0xff] }
 0x3b7   : > { %v4311_v8 = vpop.f32.mrf.mxu0  ;;  %v8355_v17 = vpop.f32.mrf.mxu1  ;;  %8834 = vmatmul.mubr.f32.gmra.mxu1 %v5644_v1 }
 0x3b8   : > { %v11145_v39 = vadd.f32 %v4311_v8, %v4076_v48  ;;  %v4081_v24 = vadd.f32 %v8355_v17, %v11033_v50  ;;  %8836 = vmatprep.mubr.f32.mxu1 %v5645_v57 }
 0x3b9   : > { %v8432_v21 = vpop.f32.mrf.mxu0  ;;  %8911 = vmatmul.mubr.f32.gmra.mxu0 %v5987_v45  ;;  %v4025_v20 = vpop.f32.mrf.mxu1 }
 0x3ba   : > { %v11148_v15 = vadd.f32 %v8432_v21, %v4079_v25  ;;  %8913 = vmatprep.mubr.f32.mxu0 %v5988_v9  ;;  %v4080_v55 = vadd.f32 %v4025_v20, %v11035_v31  ;;  %v5991_v31 = vld [vmem:[%s9476_s10 + $0xe8] sm:$0xff]  ;;  %v5993_v25 = vld [vmem:[%s9476_s10 + $0xf8] sm:$0xff] }
 0x3bb   : > { %v4321_v12 = vpop.f32.mrf.mxu0  ;;  %v8358_v40 = vpop.f32.mrf.mxu1  ;;  %8837 = vmatmul.mubr.f32.gmra.mxu1 %v5646_v29 }
 0x3bc   : > { %v11153_v10 = vadd.f32 %v4321_v12, %v4078_v49  ;;  %v4083_v50 = vadd.f32 %v8358_v40, %v11037_v23  ;;  %8839 = vmatprep.mubr.f32.mxu1 %v5647_v63 }
 0x3bd   : > { %v8435_v14 = vpop.f32.mrf.mxu0  ;;  %8914 = vmatmul.mubr.f32.gmra.mxu0 %v5989_v51  ;;  %v4035_v33 = vpop.f32.mrf.mxu1 }
 0x3be   : > { %v11156_v43 = vadd.f32 %v8435_v14, %v4081_v24  ;;  %8916 = vmatprep.mubr.f32.mxu0 %v5990_v59  ;;  %v4082_v37 = vadd.f32 %v4035_v33, %v11041_v41 }
 0x3bf   : > { %v4331_v26 = vpop.f32.mrf.mxu0  ;;  %v8361_v48 = vpop.f32.mrf.mxu1  ;;  %8840 = vmatmul.mubr.f32.gmra.mxu1 %v5648_v0 }
 0x3c0   : > { %v11161_v3 = vadd.f32 %v4331_v26, %v4080_v55  ;;  %v4085_v23 = vadd.f32 %v8361_v48, %v11043_v42 }
 0x3c1   : > { %v8438_v30 = vpop.f32.mrf.mxu0  ;;  %8917 = vmatmul.mubr.f32.gmra.mxu0 %v5991_v31  ;;  %v4045_v32 = vpop.f32.mrf.mxu1 }
 0x3c2   : > { %v11164_v2 = vadd.f32 %v8438_v30, %v4083_v50  ;;  %8919 = vmatprep.mubr.f32.mxu0 %v5992_v19  ;;  %v4084_v4 = vadd.f32 %v4045_v32, %v11050_v56 }
 0x3c3   : > { %v4341_v44 = vpop.f32.mrf.mxu0  ;;  %v8476_v45 = vpop.f32.mrf.mxu1 }
 0x3c4   : > { %v11168_v41 = vadd.f32 %v4341_v44, %v4082_v37  ;;  %v4667_v49 = vadd.f32 %v8476_v45, %v11053_v18 }
 0x3c5   : > { %v8441_v1 = vpop.f32.mrf.mxu0  ;;  %8920 = vmatmul.mubr.f32.gmra.mxu0 %v5993_v25  ;;  %v4507_v8 = vpop.f32.mrf.mxu1 }
 0x3c6   : > { %v11171_v17 = vadd.f32 %v8441_v1, %v4085_v23  ;;  %v4666_v42 = vadd.f32 %v4507_v8, %v11058_v54 }
 0x3c7   : > { %v4351_v9 = vpop.f32.mrf.mxu0  ;;  %v8479_v57 = vpop.f32.mrf.mxu1 }
 0x3c8   : > { %v11174_v24 = vadd.f32 %v4351_v9, %v4084_v4  ;;  %v4669_v21 = vadd.f32 %v8479_v57, %v11061_v38 }
 0x3c9   : > { %v8556_v56 = vpop.f32.mrf.mxu0  ;;  %v4517_v20 = vpop.f32.mrf.mxu1 }
 0x3ca   : > { %v11177_v63 = vadd.f32 %v8556_v56, %v4667_v49  ;;  %v4668_v51 = vadd.f32 %v4517_v20, %v11065_v13 }
 0x3cb   : > { %v4813_v18 = vpop.f32.mrf.mxu0  ;;  %v8482_v55 = vpop.f32.mrf.mxu1 }
 0x3cc   : > { %v11180_v29 = vadd.f32 %v4813_v18, %v4666_v42  ;;  %v4671_v12 = vadd.f32 %v8482_v55, %v11068_v16 }
 0x3cd   : > { %v8559_v40 = vpop.f32.mrf.mxu0  ;;  %v4527_v54 = vpop.f32.mrf.mxu1 }
 0x3ce   : > { %v11183_v59 = vadd.f32 %v8559_v40, %v4669_v21  ;;  %v4670_v50 = vadd.f32 %v4527_v54, %v11073_v28 }
 0x3cf   : > { %v4823_v0 = vpop.f32.mrf.mxu0  ;;  %v8485_v38 = vpop.f32.mrf.mxu1 }
 0x3d0   : > { %v11186_v14 = vadd.f32 %v4823_v0, %v4668_v51  ;;  %v4673_v33 = vadd.f32 %v8485_v38, %v11076_v36 }
 0x3d1   : > { %v8562_v31 = vpop.f32.mrf.mxu0  ;;  %v4537_v13 = vpop.f32.mrf.mxu1 }
 0x3d2   : > { %v11189_v37 = vadd.f32 %v8562_v31, %v4671_v12  ;;  %v4672_v26 = vadd.f32 %v4537_v13, %v11081_v61 }
 0x3d3   : > { %v4833_v48 = vpop.f32.mrf.mxu0  ;;  %v8488_v16 = vpop.f32.mrf.mxu1 }
 0x3d4   : > { %v11192_v19 = vadd.f32 %v4833_v48, %v4670_v50  ;;  %v4675_v23 = vadd.f32 %v8488_v16, %v11084_v52 }
 0x3d5   : > { %v8565_v30 = vpop.f32.mrf.mxu0  ;;  %v4547_v28 = vpop.f32.mrf.mxu1 }
 0x3d6   : > { %v11195_v32 = vadd.f32 %v8565_v30, %v4673_v33  ;;  %v4674_v25 = vadd.f32 %v4547_v28, %v11089_v53 }
 0x3d7   : > { %v4843_v4 = vpop.f32.mrf.mxu0  ;;  %v8491_v36 = vpop.f32.mrf.mxu1 }
 0x3d8   : > { %v11198_v44 = vadd.f32 %v4843_v4, %v4672_v26  ;;  %v4677_v45 = vadd.f32 %v8491_v36, %v11092_v11 }
 0x3d9   : > { %v8568_v49 = vpop.f32.mrf.mxu0  ;;  %v4557_v61 = vpop.f32.mrf.mxu1 }
 0x3da   : > { %v11201_v1 = vadd.f32 %v8568_v49, %v4675_v23  ;;  %v4676_v8 = vadd.f32 %v4557_v61, %v11097_v35 }
 0x3db   : > { %v4853_v42 = vpop.f32.mrf.mxu0  ;;  %v8494_v52 = vpop.f32.mrf.mxu1 }
 0x3dc   : > { %v11204_v9 = vadd.f32 %v4853_v42, %v4674_v25  ;;  %v4679_v57 = vadd.f32 %v8494_v52, %v11100_v58 }
 0x3dd   : > { %v8571_v21 = vpop.f32.mrf.mxu0  ;;  %v4567_v53 = vpop.f32.mrf.mxu1 }
 0x3de   : > { %v11207_v56 = vadd.f32 %v8571_v21, %v4677_v45  ;;  %v4678_v20 = vadd.f32 %v4567_v53, %v11105_v22 }
 0x3df   : > { %v4863_v51 = vpop.f32.mrf.mxu0  ;;  %v8497_v11 = vpop.f32.mrf.mxu1 }
 0x3e0   : > { %v11210_v18 = vadd.f32 %v4863_v51, %v4676_v8  ;;  %v4681_v55 = vadd.f32 %v8497_v11, %v11108_v5 }
 0x3e1   : > { %v8574_v12 = vpop.f32.mrf.mxu0  ;;  %v4577_v35 = vpop.f32.mrf.mxu1 }
 0x3e2   : > { %v11213_v40 = vadd.f32 %v8574_v12, %v4679_v57  ;;  %v4680_v54 = vadd.f32 %v4577_v35, %v11113_v34 }
 0x3e3   : > { %v4873_v50 = vpop.f32.mrf.mxu0  ;;  %v8500_v58 = vpop.f32.mrf.mxu1 }
 0x3e4   : > { %v11216_v0 = vadd.f32 %v4873_v50, %v4678_v20  ;;  %v4683_v38 = vadd.f32 %v8500_v58, %v11116_v7 }
 0x3e5   : > { %v8577_v33 = vpop.f32.mrf.mxu0  ;;  %v4587_v22 = vpop.f32.mrf.mxu1 }
 0x3e6   : > { %v11219_v31 = vadd.f32 %v8577_v33, %v4681_v55  ;;  %v4682_v13 = vadd.f32 %v4587_v22, %v11121_v27 }
 0x3e7   : > { %v4883_v26 = vpop.f32.mrf.mxu0  ;;  %v8503_v5 = vpop.f32.mrf.mxu1 }
 0x3e8   : > { %v11222_v48 = vadd.f32 %v4883_v26, %v4680_v54  ;;  %v4685_v16 = vadd.f32 %v8503_v5, %v11124_v62 }
 0x3e9   : > { %v8580_v23 = vpop.f32.mrf.mxu0  ;;  %v4597_v34 = vpop.f32.mrf.mxu1 }
 0x3ea   : > { %v11225_v30 = vadd.f32 %v8580_v23, %v4683_v38  ;;  %v4684_v28 = vadd.f32 %v4597_v34, %v11129_v6 }
 0x3eb   : > { %v4893_v25 = vpop.f32.mrf.mxu0  ;;  %v8506_v7 = vpop.f32.mrf.mxu1 }
 0x3ec   : > { %v11228_v4 = vadd.f32 %v4893_v25, %v4682_v13  ;;  %v4687_v36 = vadd.f32 %v8506_v7, %v11132_v46 }
 0x3ed   : > { %v8583_v45 = vpop.f32.mrf.mxu0  ;;  %v4607_v27 = vpop.f32.mrf.mxu1 }
 0x3ee   : > { %v11231_v49 = vadd.f32 %v8583_v45, %v4685_v16  ;;  %v4686_v61 = vadd.f32 %v4607_v27, %v11137_v60 }
 0x3ef   : > { %v4903_v8 = vpop.f32.mrf.mxu0  ;;  %v8509_v62 = vpop.f32.mrf.mxu1 }
 0x3f0   : > { %11947 = vst [vmem:[#allocation28_spill] sm:$0xff] %v11231_v49  ;;  %v11234_v42 = vadd.f32 %v4903_v8, %v4684_v28  ;;  %v4689_v52 = vadd.f32 %v8509_v62, %v11140_v47 }
 0x3f1   : > { %v8586_v57 = vpop.f32.mrf.mxu0  ;;  %v4617_v6 = vpop.f32.mrf.mxu1 }
 0x3f2   : > { %11948 = vst [vmem:[#allocation29_spill] sm:$0xff] %v11234_v42  ;;  %v11237_v21 = vadd.f32 %v8586_v57, %v4687_v36  ;;  %v4688_v53 = vadd.f32 %v4617_v6, %v11145_v39 }
 0x3f3   : > { %v4913_v20 = vpop.f32.mrf.mxu0  ;;  %v8512_v46 = vpop.f32.mrf.mxu1 }
 0x3f4   : > { %11949 = vst [vmem:[#allocation69_spill] sm:$0xff] %v11237_v21  ;;  %v11240_v51 = vadd.f32 %v4913_v20, %v4686_v61  ;;  %v4691_v11 = vadd.f32 %v8512_v46, %v11148_v15 }
 0x3f5   : > { %v8589_v55 = vpop.f32.mrf.mxu0  ;;  %v4627_v60 = vpop.f32.mrf.mxu1 }
 0x3f6   : > { %11950 = vst [vmem:[#allocation71_spill] sm:$0xff] %v11240_v51  ;;  %v11243_v12 = vadd.f32 %v8589_v55, %v4689_v52  ;;  %v4690_v35 = vadd.f32 %v4627_v60, %v11153_v10 }
 0x3f7   : > { %v4923_v54 = vpop.f32.mrf.mxu0  ;;  %v8515_v47 = vpop.f32.mrf.mxu1 }
 0x3f8   : > { %11951 = vst [vmem:[#allocation39_spill] sm:$0xff] %v11243_v12  ;;  %v11246_v50 = vadd.f32 %v4923_v54, %v4688_v53  ;;  %v4693_v58 = vadd.f32 %v8515_v47, %v11156_v43 }
 0x3f9   : > { %v8592_v38 = vpop.f32.mrf.mxu0  ;;  %v4637_v39 = vpop.f32.mrf.mxu1 }
 0x3fa   : > { %11952 = vst [vmem:[#allocation26_spill] sm:$0xff] %v11246_v50  ;;  %v11249_v33 = vadd.f32 %v8592_v38, %v4691_v11  ;;  %v4692_v22 = vadd.f32 %v4637_v39, %v11161_v3 }
 0x3fb   : > { %v4933_v13 = vpop.f32.mrf.mxu0  ;;  %v8518_v15 = vpop.f32.mrf.mxu1 }
 0x3fc   : > { %11953 = vst [vmem:[#allocation40_spill] sm:$0xff] %v11249_v33  ;;  %v11252_v26 = vadd.f32 %v4933_v13, %v4690_v35  ;;  %v4695_v5 = vadd.f32 %v8518_v15, %v11164_v2 }
 0x3fd   : > { %v8595_v16 = vpop.f32.mrf.mxu0  ;;  %v4647_v10 = vpop.f32.mrf.mxu1 }
 0x3fe   : > { %11954 = vst [vmem:[#allocation70_spill] sm:$0xff] %v11252_v26  ;;  %v11255_v23 = vadd.f32 %v8595_v16, %v4693_v58  ;;  %v4694_v34 = vadd.f32 %v4647_v10, %v11168_v41 }
 0x3ff   : > { %v4943_v28 = vpop.f32.mrf.mxu0  ;;  %v8521_v43 = vpop.f32.mrf.mxu1 }
 0x400   : > { %11955 = vst [vmem:[#allocation38_spill] sm:$0xff] %v11255_v23  ;;  %v11258_v25 = vadd.f32 %v4943_v28, %v4692_v22  ;;  %v4697_v7 = vadd.f32 %v8521_v43, %v11171_v17 }
 0x401   : > { %v8598_v36 = vpop.f32.mrf.mxu0  ;;  %v4657_v3 = vpop.f32.mrf.mxu1 }
 0x402   : > { %11956 = vst [vmem:[#allocation73_spill] sm:$0xff] %v11258_v25  ;;  %v11261_v45 = vadd.f32 %v8598_v36, %v4695_v5  ;;  %v4696_v27 = vadd.f32 %v4657_v3, %v11174_v24 }
 0x403   : > { %v4953_v61 = vpop.f32.mrf.mxu0  ;;  %v11264_v2 = vpop.f32.mrf.mxu1 }
 0x404   : > { %11957 = vst [vmem:[#allocation22_spill] sm:$0xff] %v11261_v45  ;;  %v11266_v8 = vadd.f32 %v4953_v61, %v4694_v34 }
 0x405   : > { %v8601_v62 = vpop.f32.mrf.mxu0  ;;  %v11268_v52 = vpop.f32.mrf.mxu1 }
 0x406   : > { %11958 = vst [vmem:[#allocation30_spill] sm:$0xff] %v11266_v8  ;;  %v11270_v41 = vadd.f32 %v8601_v62, %v4697_v7 }
 0x407   : > { %v4963_v57 = vpop.f32.mrf.mxu0  ;;  %v11272_v6 = vpop.f32.mrf.mxu1 }
 0x408   : > { %11959 = vst [vmem:[#allocation72_spill] sm:$0xff] %v11270_v41  ;;  %v11274_v17 = vadd.f32 %v4963_v57, %v4696_v27 }
 0x409   : > { %v8716_v53 = vpop.f32.mrf.mxu0  ;;  %v11276_v20 = vpop.f32.mrf.mxu1 }
 0x40a   : > { %11960 = vst [vmem:[#allocation75_spill] sm:$0xff] %v11274_v17 }
 0x40b   : > { %v11278_v46 = vpop.f32.mrf.mxu0  ;;  %v11280_v24 = vpop.f32.mrf.mxu1 }
 0x40d   : > { %v11282_v11 = vpop.f32.mrf.mxu0  ;;  %v11284_v55 = vpop.f32.mrf.mxu1 }
 0x40f   : > { %v11286_v60 = vpop.f32.mrf.mxu0  ;;  %v11288_v35 = vpop.f32.mrf.mxu1 }
 0x411   : > { %v11290_v54 = vpop.f32.mrf.mxu0  ;;  %v11292_v47 = vpop.f32.mrf.mxu1 }
 0x413   : > { %v11294_v58 = vpop.f32.mrf.mxu0  ;;  %v11296_v38 = vpop.f32.mrf.mxu1 }
 0x415   : > { %v11298_v39 = vpop.f32.mrf.mxu0  ;;  %v11300_v22 = vpop.f32.mrf.mxu1 }
 0x417   : > { %v11302_v13 = vpop.f32.mrf.mxu0  ;;  %v11304_v15 = vpop.f32.mrf.mxu1 }
 0x419   : > { %v11306_v5 = vpop.f32.mrf.mxu0  ;;  %v11308_v16 = vpop.f32.mrf.mxu1 }
 0x41b   : > { %v11310_v10 = vpop.f32.mrf.mxu0  ;;  %v11312_v34 = vpop.f32.mrf.mxu1 }
 0x41d   : > { %v11314_v28 = vpop.f32.mrf.mxu0  ;;  %v11316_v43 = vpop.f32.mrf.mxu1 }
 0x41f   : > { %v11318_v7 = vpop.f32.mrf.mxu0  ;;  %v11320_v36 = vpop.f32.mrf.mxu1 }
 0x421   : > { %v11322_v3 = vpop.f32.mrf.mxu0  ;;  %v11324_v27 = vpop.f32.mrf.mxu1 }
 0x423   : > { %v11326_v61 = vpop.f32.mrf.mxu0  ;;  %v11328_v62 = vpop.f32.mrf.mxu1 }
 0x425   : > { %v11330_v57 = vpop.f32.mrf.mxu0  ;;  %v11332_v17 = vpop.f32.mrf.mxu1 }
 0x427   : > { %v11334_v41 = vpop.f32.mrf.mxu0  ;;  %v11336_v8 = vpop.f32.mrf.mxu1 }
 0x428   : > { %11961 = vst [vmem:[#allocation42_spill] sm:$0xff] %v11336_v8 }
 0x429   : > { %v11338_v45 = vpop.f32.mrf.mxu0  ;;  %v11340_v25 = vpop.f32.mrf.mxu1 }
 0x42a   : > { %11962 = vst [vmem:[#allocation27_spill] sm:$0xff] %v11340_v25 }
 0x42b   : > { %v11342_v23 = vpop.f32.mrf.mxu0  ;;  %v11344_v26 = vpop.f32.mrf.mxu1 }
 0x42c   : > { %11963 = vst [vmem:[#allocation43_spill] sm:$0xff] %v11342_v23  ;;  %11964 = vst [vmem:[#allocation74_spill] sm:$0xff] %v11344_v26 }
 0x42d   : > { %v11346_v33 = vpop.f32.mrf.mxu0  ;;  %v11348_v50 = vpop.f32.mrf.mxu1 }
 0x42e   : > { %11965 = vst [vmem:[#allocation41_spill] sm:$0xff] %v11346_v33  ;;  %11966 = vst [vmem:[#allocation77_spill] sm:$0xff] %v11348_v50 }
 0x42f   : > { %v11350_v12 = vpop.f32.mrf.mxu0  ;;  %v11352_v51 = vpop.f32.mrf.mxu1 }
 0x430   : > { %11967 = vst [vmem:[#allocation31_spill] sm:$0xff] %v11350_v12  ;;  %11968 = vst [vmem:[#allocation76_spill] sm:$0xff] %v11352_v51 }
 0x431   : > { %v11354_v21 = vpop.f32.mrf.mxu0  ;;  %v11356_v42 = vpop.f32.mrf.mxu1 }
 0x432   : > { %11969 = vst [vmem:[#allocation79_spill] sm:$0xff] %v11354_v21  ;;  %11970 = vst [vmem:[#allocation45_spill] sm:$0xff] %v11356_v42 }
 0x433   : > { %v11358_v8 = vpop.f32.mrf.mxu0  ;;  %v11360_v49 = vpop.f32.mrf.mxu1 }
 0x434   : > { %11971 = vst [vmem:[#allocation46_spill] sm:$0xff] %v11358_v8  ;;  %11972 = vst [vmem:[#allocation78_spill] sm:$0xff] %v11360_v49 }
 0x435   : > { %v11362_v25 = vpop.f32.mrf.mxu0  ;;  %v11364_v23 = vpop.f32.mrf.mxu1 }
 0x436   : > { %11973 = vst [vmem:[#allocation44_spill] sm:$0xff] %v11362_v25  ;;  %11974 = vst [vmem:[#allocation81_spill] sm:$0xff] %v11364_v23 }
 0x437   : > { %v11366_v26 = vpop.f32.mrf.mxu0  ;;  %v11368_v33 = vpop.f32.mrf.mxu1 }
 0x438   : > { %11975 = vst [vmem:[#allocation23_spill] sm:$0xff] %v11366_v26  ;;  %11976 = vst [vmem:[#allocation32_spill] sm:$0xff] %v11368_v33  ;;  %v5280_v33 = vadd.f32 %v11264_v2, %v11177_v63  ;;  %v11406_v63 = vld [vmem:[%s11654_s4] ss:$0 sm:$0xff] }
 0x439   : > { %v11370_v50 = vpop.f32.mrf.mxu0  ;;  %v11372_v12 = vpop.f32.mrf.mxu1 }
 0x43a   : > { %11977 = vst [vmem:[#allocation80_spill] sm:$0xff] %v11370_v50  ;;  %11978 = vst [vmem:[#allocation83_spill] sm:$0xff] %v11372_v12  ;;  %v5586_v50 = vadd.f32 %v8716_v53, %v5280_v33 }
 0x43b   : > { %v11374_v51 = vpop.f32.mrf.mxu0  ;;  %v11376_v21 = vpop.f32.mrf.mxu1 }
 0x43c   : > { %11979 = vst [vmem:[#allocation48_spill] sm:$0xff] %v11374_v51  ;;  %11980 = vst [vmem:[#allocation49_spill] sm:$0xff] %v11376_v21  ;;  %v5279_v21 = vadd.f32 %v11268_v52, %v11180_v29  ;;  %v11411_v29 = vld [vmem:[%s11657_s7] ss:$0 sm:$0xff] }
 0x43d   : > { %v11378_v42 = vpop.f32.mrf.mxu0  ;;  %v11380_v8 = vpop.f32.mrf.mxu1 }
 0x43e   : > { %11981 = vst [vmem:[#allocation82_spill] sm:$0xff] %v11378_v42  ;;  %11982 = vst [vmem:[#allocation47_spill] sm:$0xff] %v11380_v8 }
 0x43f   : > { %v11382_v49 = vpop.f32.mrf.mxu0  ;;  %v11384_v25 = vpop.f32.mrf.mxu1 }
 0x440   : > { %11983 = vst [vmem:[#allocation85_spill] sm:$0xff] %v11382_v49  ;;  %11984 = vst [vmem:[#allocation33_spill] sm:$0xff] %v11384_v25  ;;  %v5585_v49 = vadd.f32 %v11278_v46, %v5279_v21  ;;  %v5282_v25 = vadd.f32 %v11272_v6, %v11183_v59  ;;  %v5281_v21 = vadd.f32 %v11276_v20, %v11186_v14 }
 0x441   : > { %v11386_v23 = vpop.f32.mrf.mxu0  ;;  %v11388_v26 = vpop.f32.mrf.mxu1 }
 0x442   : > { %11985 = vst [vmem:[#allocation84_spill] sm:$0xff] %v11386_v23  ;;  %11986 = vst [vmem:[#allocation87_spill] sm:$0xff] %v11388_v26  ;;  %v5588_v2 = vadd.f32 %v11282_v11, %v5282_v25  ;;  %v5587_v6 = vadd.f32 %v11286_v60, %v5281_v21  ;;  %v5283_v25 = vadd.f32 %v11284_v55, %v11192_v19 }
 0x443   : > { %v11392_v12 = vpop.f32.mrf.mxu0  ;;  %v8796_v51 = vpop.f32.mrf.mxu1 }
 0x444   : > { %v5892_v23 = vadd.f32 %v8796_v51, %v5586_v50  ;;  %v5284_v51 = vadd.f32 %v11280_v24, %v11189_v37  ;;  %v5589_v24 = vadd.f32 %v11294_v58, %v5283_v25 }
 0x445   : > { %v11396_v42 = vpop.f32.mrf.mxu0  ;;  %v5732_v8 = vpop.f32.mrf.mxu1 }
 0x446   : > { %11987 = vst [vmem:[#allocation51_spill] sm:$0xff] %v11396_v42  ;;  %v5891_v59 = vadd.f32 %v5732_v8, %v5585_v49  ;;  %v5931_v53 = vadd.f32 %v11406_v63, %v5892_v23  ;;  %v5590_v42 = vadd.f32 %v11290_v54, %v5284_v51  ;;  %v5286_v23 = vadd.f32 %v11288_v35, %v11195_v32 }
 0x447   : > { %v11401_v26 = vpop.f32.mrf.mxu0  ;;  %v8799_v33 = vpop.f32.mrf.mxu1  ;;  %v5285_v51 = vadd.f32 %v11292_v47, %v11198_v44 }
 0x448   : > { %11988 = vst [vmem:[#allocation52_spill] sm:$0xff] %v11401_v26  ;;  %v5894_v26 = vadd.f32 %v8799_v33, %v5588_v2  ;;  %v5930_v8 = vadd.f32 %v11406_v63, %v5891_v59  ;;  %v5592_v59 = vadd.f32 %v11298_v39, %v5286_v23 }
 0x449   : > { %v8876_v50 = vpop.f32.mrf.mxu0  ;;  %v5742_v52 = vpop.f32.mrf.mxu1 }
 0x44a   : > { %v6089_v46 = vadd.f32 %v8876_v50, %v11411_v29  ;;  %v5893_v20 = vadd.f32 %v5742_v52, %v5587_v6  ;;  %v5933_v19 = vadd.f32 %v11406_v63, %v5894_v26  ;;  %v5591_v26 = vadd.f32 %v11302_v13, %v5285_v51 }
 0x44b   : > { %v6083_v11 = vpop.f32.mrf.mxu0  ;;  %v8802_v14 = vpop.f32.mrf.mxu1 }
 0x44c   : > { %v6243_v49 = vadd.f32 %v6089_v46, %v5931_v53  ;;  %v6084_v37 = vadd.f32 %v11411_v29, %v6083_v11  ;;  %v5896_v33 = vadd.f32 %v8802_v14, %v5590_v42  ;;  %v5932_v42 = vadd.f32 %v11406_v63, %v5893_v20 }
 0x44d   : > { %v8879_v60 = vpop.f32.mrf.mxu0  ;;  %v5752_v54 = vpop.f32.mrf.mxu1  ;;  %v5288_v53 = vadd.f32 %v11296_v38, %v11201_v1 }
 0x44e   : > { %v6275_v2 = vmax.f32 %v6243_v49, 0.0  ;;  %v6242_v21 = vadd.f32 %v6084_v37, %v5930_v8  ;;  %v6099_v55 = vadd.f32 %v8879_v60, %v11411_v29  ;;  %v5895_v58 = vadd.f32 %v5752_v54, %v5589_v24 }
 0x44f   : > { %v6093_v50 = vpop.f32.mrf.mxu0  ;;  %v8805_v52 = vpop.f32.mrf.mxu1  ;;  %v5935_v39 = vadd.f32 %v11406_v63, %v5896_v33  ;;  %v5594_v49 = vadd.f32 %v11306_v5, %v5288_v53  ;;  %v5287_v8 = vadd.f32 %v11300_v22, %v11204_v9  ;;  %v5290_v33 = vadd.f32 %v11304_v15, %v11207_v56 }
 0x450   : > { %6307 = vst [vmem:[%s9589_s15 + $0x8] sm:$0xff] %v6275_v2  ;;  %v6274_v32 = vmax.f32 %v6242_v21, 0.0  ;;  %v6245_v35 = vadd.f32 %v6099_v55, %v5933_v19  ;;  %v6094_v6 = vadd.f32 %v11411_v29, %v6093_v50  ;;  %v5898_v14 = vadd.f32 %v8805_v52, %v5592_v59 }
 0x451   : > { %v8882_v46 = vpop.f32.mrf.mxu0  ;;  %v5762_v44 = vpop.f32.mrf.mxu1  ;;  %v5934_v13 = vadd.f32 %v11406_v63, %v5895_v58  ;;  %v5593_v60 = vadd.f32 %v11310_v10, %v5287_v8  ;;  %v5596_v55 = vadd.f32 %v11314_v28, %v5290_v33  ;;  %v5289_v59 = vadd.f32 %v11308_v16, %v11210_v18 }
 0x452   : > { %6306 = vst [vmem:[%s9589_s15] sm:$0xff] %v6274_v32  ;;  %v6277_v47 = vmax.f32 %v6245_v35, 0.0  ;;  %v6244_v25 = vadd.f32 %v6094_v6, %v5932_v42  ;;  %v6109_v11 = vadd.f32 %v8882_v46, %v11411_v29  ;;  %v5897_v23 = vadd.f32 %v5762_v44, %v5591_v26 }
 0x453   : > { %v6103_v37 = vpop.f32.mrf.mxu0  ;;  %v8808_v1 = vpop.f32.mrf.mxu1  ;;  %v5937_v21 = vadd.f32 %v11406_v63, %v5898_v14  ;;  %v5595_v32 = vadd.f32 %v11318_v7, %v5289_v59  ;;  %v5292_v35 = vadd.f32 %v11312_v34, %v11213_v40  ;;  %v5291_v46 = vadd.f32 %v11316_v43, %v11216_v0 }
 0x454   : > { %6309 = vst [vmem:[%s9589_s15 + $0x18] sm:$0xff] %v6277_v47  ;;  %v6276_v38 = vmax.f32 %v6244_v25, 0.0  ;;  %v6247_v20 = vadd.f32 %v6109_v11, %v5935_v39  ;;  %v6104_v24 = vadd.f32 %v11411_v29, %v6103_v37  ;;  %v5900_v54 = vadd.f32 %v8808_v1, %v5594_v49 }
 0x455   : > { %v8885_v5 = vpop.f32.mrf.mxu0  ;;  %v5772_v2 = vpop.f32.mrf.mxu1  ;;  %v5936_v58 = vadd.f32 %v11406_v63, %v5897_v23  ;;  %v5598_v39 = vadd.f32 %v11322_v3, %v5292_v35  ;;  %v5597_v14 = vadd.f32 %v11326_v61, %v5291_v46  ;;  %v5294_v49 = vadd.f32 %v11320_v36, %v11219_v31 }
 0x456   : > { %6308 = vst [vmem:[%s9589_s15 + $0x10] sm:$0xff] %v6276_v38  ;;  %v6279_v9 = vmax.f32 %v6247_v20, 0.0  ;;  %v6246_v22 = vadd.f32 %v6104_v24, %v5934_v13  ;;  %v6119_v19 = vadd.f32 %v8885_v5, %v11411_v29  ;;  %v5899_v51 = vadd.f32 %v5772_v2, %v5593_v60 }
 0x457   : > { %v6113_v10 = vpop.f32.mrf.mxu0  ;;  %v8811_v50 = vpop.f32.mrf.mxu1  ;;  %v5939_v28 = vadd.f32 %v11406_v63, %v5900_v54  ;;  %v5600_v38 = vadd.f32 %v11330_v57, %v5294_v49  ;;  %v5293_v20 = vadd.f32 %v11324_v27, %v11222_v48  ;;  %v5296_v54 = vadd.f32 %v11328_v62, %v11225_v30  ;;  %v11996_v49 = vld [vmem:[#allocation69_spill] sm:$0xff] }
 0x458   : > { %6311 = vst [vmem:[%s9589_s15 + $0x28] sm:$0xff] %v6279_v9  ;;  %v6278_v56 = vmax.f32 %v6246_v22, 0.0  ;;  %v6249_v15 = vadd.f32 %v6119_v19, %v5937_v21  ;;  %v6114_v52 = vadd.f32 %v11411_v29, %v6113_v10  ;;  %v5902_v53 = vadd.f32 %v8811_v50, %v5596_v55 }
 0x459   : > { %v8888_v42 = vpop.f32.mrf.mxu0  ;;  %v5782_v18 = vpop.f32.mrf.mxu1  ;;  %v5938_v7 = vadd.f32 %v11406_v63, %v5899_v51  ;;  %v5599_v5 = vadd.f32 %v11334_v41, %v5293_v20  ;;  %v5602_v19 = vadd.f32 %v11338_v45, %v5296_v54  ;;  %v5295_v55 = vadd.f32 %v11332_v17, %v11228_v4 }
 0x45a   : > { %6310 = vst [vmem:[%s9589_s15 + $0x20] sm:$0xff] %v6278_v56  ;;  %v6281_v16 = vmax.f32 %v6249_v15, 0.0  ;;  %v6248_v6 = vadd.f32 %v6114_v52, %v5936_v58  ;;  %v6129_v26 = vadd.f32 %v8888_v42, %v11411_v29  ;;  %v5901_v11 = vadd.f32 %v5782_v18, %v5595_v32  ;;  %v11989_v56 = vld [vmem:[#allocation43_spill] sm:$0xff]  ;;  %v11990_v58 = vld [vmem:[#allocation28_spill] sm:$0xff]  ;;  %v11991_v52 = vld [vmem:[#allocation42_spill] sm:$0xff] }
 0x45b   : > { %v6123_v44 = vpop.f32.mrf.mxu0  ;;  %v8814_v40 = vpop.f32.mrf.mxu1  ;;  %v5941_v37 = vadd.f32 %v11406_v63, %v5902_v53  ;;  %v5601_v15 = vadd.f32 %v11989_v56, %v5295_v55  ;;  %v5298_v32 = vadd.f32 %v11991_v52, %v11990_v58  ;;  %v11994_v53 = vld [vmem:[#allocation27_spill] sm:$0xff]  ;;  %v12006_v58 = vld [vmem:[#allocation45_spill] sm:$0xff] }
 0x45c   : > { %6313 = vst [vmem:[%s9589_s15 + $0x38] sm:$0xff] %v6281_v16  ;;  %v6280_v34 = vmax.f32 %v6248_v6, 0.0  ;;  %v6251_v47 = vadd.f32 %v6129_v26, %v5939_v28  ;;  %v6124_v25 = vadd.f32 %v11411_v29, %v6123_v44  ;;  %v5904_v8 = vadd.f32 %v8814_v40, %v5598_v39  ;;  %v11992_v16 = vld [vmem:[#allocation41_spill] sm:$0xff] }
 0x45d   : > { %v8891_v3 = vpop.f32.mrf.mxu0  ;;  %v5792_v13 = vpop.f32.mrf.mxu1  ;;  %v5940_v60 = vadd.f32 %v11406_v63, %v5901_v11  ;;  %v5604_v6 = vadd.f32 %v11992_v16, %v5298_v32  ;;  %v11993_v26 = vld [vmem:[#allocation29_spill] sm:$0xff]  ;;  %v11995_v11 = vld [vmem:[#allocation31_spill] sm:$0xff] }
 0x45e   : > { %6312 = vst [vmem:[%s9589_s15 + $0x30] sm:$0xff] %v6280_v34  ;;  %v6283_v0 = vmax.f32 %v6251_v47, 0.0  ;;  %v6250_v43 = vadd.f32 %v6124_v25, %v5938_v7  ;;  %v6139_v1 = vadd.f32 %v8891_v3, %v11411_v29  ;;  %v5903_v24 = vadd.f32 %v5792_v13, %v5597_v14  ;;  %v11997_v3 = vld [vmem:[#allocation74_spill] sm:$0xff] }
 0x45f   : > { %v6133_v61 = vpop.f32.mrf.mxu0  ;;  %v8817_v23 = vpop.f32.mrf.mxu1  ;;  %v5943_v57 = vadd.f32 %v11406_v63, %v5904_v8  ;;  %v5297_v39 = vadd.f32 %v11994_v53, %v11993_v26  ;;  %v5300_v8 = vadd.f32 %v11997_v3, %v11996_v49  ;;  %v12009_v26 = vld [vmem:[#allocation78_spill] sm:$0xff]  ;;  %v12012_v49 = vld [vmem:[#allocation81_spill] sm:$0xff] }
 0x460   : > { %6315 = vst [vmem:[%s9589_s15 + $0x48] sm:$0xff] %v6283_v0  ;;  %v6282_v31 = vmax.f32 %v6250_v43, 0.0  ;;  %v6253_v36 = vadd.f32 %v6139_v1, %v5941_v37  ;;  %v6134_v33 = vadd.f32 %v11411_v29, %v6133_v61  ;;  %v5906_v21 = vadd.f32 %v8817_v23, %v5600_v38  ;;  %v11998_v61 = vld [vmem:[#allocation79_spill] sm:$0xff] }
 0x461   : > { %v8894_v2 = vpop.f32.mrf.mxu0  ;;  %v5802_v48 = vpop.f32.mrf.mxu1  ;;  %v5942_v41 = vadd.f32 %v11406_v63, %v5903_v24  ;;  %v5603_v14 = vadd.f32 %v11995_v11, %v5297_v39  ;;  %v5606_v24 = vadd.f32 %v11998_v61, %v5300_v8  ;;  %v11999_v23 = vld [vmem:[#allocation71_spill] sm:$0xff] }
 0x462   : > { %6314 = vst [vmem:[%s9589_s15 + $0x40] sm:$0xff] %v6282_v31  ;;  %v6285_v27 = vmax.f32 %v6253_v36, 0.0  ;;  %v6252_v9 = vadd.f32 %v6134_v33, %v5940_v60  ;;  %v6149_v22 = vadd.f32 %v8894_v2, %v11411_v29  ;;  %v5905_v50 = vadd.f32 %v5802_v48, %v5599_v5  ;;  %v12000_v31 = vld [vmem:[#allocation77_spill] sm:$0xff] }
 0x463   : > { %v6143_v59 = vpop.f32.mrf.mxu0  ;;  %v8820_v30 = vpop.f32.mrf.mxu1  ;;  %v5945_v42 = vadd.f32 %v11406_v63, %v5906_v21  ;;  %v5299_v36 = vadd.f32 %v12000_v31, %v11999_v23  ;;  %v12003_v21 = vld [vmem:[#allocation76_spill] sm:$0xff] }
 0x464   : > { %6317 = vst [vmem:[%s9589_s15 + $0x58] sm:$0xff] %v6285_v27  ;;  %v6284_v62 = vmax.f32 %v6252_v9, 0.0  ;;  %v6255_v10 = vadd.f32 %v6149_v22, %v5943_v57  ;;  %v6144_v51 = vadd.f32 %v11411_v29, %v6143_v59  ;;  %v5908_v35 = vadd.f32 %v8820_v30, %v5602_v19  ;;  %v12001_v27 = vld [vmem:[#allocation46_spill] sm:$0xff]  ;;  %v12002_v22 = vld [vmem:[#allocation39_spill] sm:$0xff]  ;;  %v12015_v23 = vld [vmem:[#allocation32_spill] sm:$0xff] }
 0x465   : > { %v8897_v45 = vpop.f32.mrf.mxu0  ;;  %v5812_v28 = vpop.f32.mrf.mxu1  ;;  %v5944_v47 = vadd.f32 %v11406_v63, %v5905_v50  ;;  %v5605_v9 = vadd.f32 %v12001_v27, %v5299_v36  ;;  %v5302_v19 = vadd.f32 %v12003_v21, %v12002_v22  ;;  %v12004_v50 = vld [vmem:[#allocation44_spill] sm:$0xff]  ;;  %v12018_v22 = vld [vmem:[#allocation83_spill] sm:$0xff] }
 0x466   : > { %6316 = vst [vmem:[%s9589_s15 + $0x50] sm:$0xff] %v6284_v62  ;;  %v6287_v4 = vmax.f32 %v6255_v10, 0.0  ;;  %v6254_v17 = vadd.f32 %v6144_v51, %v5942_v41  ;;  %v6159_v18 = vadd.f32 %v8897_v45, %v11411_v29  ;;  %v5907_v7 = vadd.f32 %v5812_v28, %v5601_v15  ;;  %v12005_v15 = vld [vmem:[#allocation26_spill] sm:$0xff] }
 0x467   : > { %v6153_v46 = vpop.f32.mrf.mxu0  ;;  %v8823_v44 = vpop.f32.mrf.mxu1  ;;  %v5947_v13 = vadd.f32 %v11406_v63, %v5908_v35  ;;  %v5608_v56 = vadd.f32 %v12004_v50, %v5302_v19  ;;  %v5301_v52 = vadd.f32 %v12006_v58, %v12005_v15  ;;  %v12021_v15 = vld [vmem:[#allocation49_spill] sm:$0xff] }
 0x468   : > { %6319 = vst [vmem:[%s9589_s15 + $0x68] sm:$0xff] %v6287_v4  ;;  %v6286_v40 = vmax.f32 %v6254_v17, 0.0  ;;  %v6257_v34 = vadd.f32 %v6159_v18, %v5945_v42  ;;  %v6154_v25 = vadd.f32 %v11411_v29, %v6153_v46  ;;  %v5910_v20 = vadd.f32 %v8823_v44, %v5604_v6  ;;  %v12007_v18 = vld [vmem:[#allocation23_spill] sm:$0xff]  ;;  %v12008_v6 = vld [vmem:[#allocation40_spill] sm:$0xff] }
 0x469   : > { %v8900_v0 = vpop.f32.mrf.mxu0  ;;  %v5822_v43 = vpop.f32.mrf.mxu1  ;;  %v5946_v60 = vadd.f32 %v11406_v63, %v5907_v7  ;;  %v5607_v16 = vadd.f32 %v12007_v18, %v5301_v52  ;;  %v5304_v53 = vadd.f32 %v12009_v26, %v12008_v6  ;;  %v12024_v6 = vld [vmem:[#allocation47_spill] sm:$0xff] }
 0x46a   : > { %6318 = vst [vmem:[%s9589_s15 + $0x60] sm:$0xff] %v6286_v40  ;;  %v6289_v37 = vmax.f32 %v6257_v34, 0.0  ;;  %v6256_v1 = vadd.f32 %v6154_v25, %v5944_v47  ;;  %v6169_v38 = vadd.f32 %v8900_v0, %v11411_v29  ;;  %v5909_v48 = vadd.f32 %v5822_v43, %v5603_v14  ;;  %v12010_v25 = vld [vmem:[#allocation80_spill] sm:$0xff]  ;;  %v12011_v14 = vld [vmem:[#allocation70_spill] sm:$0xff] }
 0x46b   : > { %v6163_v33 = vpop.f32.mrf.mxu0  ;;  %v8826_v5 = vpop.f32.mrf.mxu1  ;;  %v5949_v10 = vadd.f32 %v11406_v63, %v5910_v20  ;;  %v5610_v11 = vadd.f32 %v12010_v25, %v5304_v53  ;;  %v5303_v3 = vadd.f32 %v12012_v49, %v12011_v14  ;;  %v12013_v20 = vld [vmem:[#allocation48_spill] sm:$0xff] }
 0x46c   : > { %6321 = vst [vmem:[%s9589_s15 + $0x78] sm:$0xff] %v6289_v37  ;;  %v6288_v54 = vmax.f32 %v6256_v1, 0.0  ;;  %v6259_v57 = vadd.f32 %v6169_v38, %v5947_v13  ;;  %v6164_v2 = vadd.f32 %v11411_v29, %v6163_v33  ;;  %v5912_v41 = vadd.f32 %v8826_v5, %v5606_v24  ;;  %v12014_v24 = vld [vmem:[#allocation38_spill] sm:$0xff]  ;;  %v12025_v25 = vld [vmem:[#allocation72_spill] sm:$0xff] }
 0x46d   : > { %v8903_v55 = vpop.f32.mrf.mxu0  ;;  %v5832_v59 = vpop.f32.mrf.mxu1  ;;  %v5948_v17 = vadd.f32 %v11406_v63, %v5909_v48  ;;  %v5609_v61 = vadd.f32 %v12013_v20, %v5303_v3  ;;  %v5306_v31 = vadd.f32 %v12015_v23, %v12014_v24  ;;  %v12016_v48 = vld [vmem:[#allocation82_spill] sm:$0xff]  ;;  %v12028_v20 = vld [vmem:[#allocation75_spill] sm:$0xff] }
 0x46e   : > { %6320 = vst [vmem:[%s9589_s15 + $0x70] sm:$0xff] %v6288_v54  ;;  %v6291_v30 = vmax.f32 %v6259_v57, 0.0  ;;  %v6258_v62 = vadd.f32 %v6164_v2, %v5946_v60  ;;  %v6179_v51 = vadd.f32 %v8903_v55, %v11411_v29  ;;  %v5911_v45 = vadd.f32 %v5832_v59, %v5605_v9  ;;  %v12017_v9 = vld [vmem:[#allocation73_spill] sm:$0xff] }
 0x46f   : > { %v6173_v32 = vpop.f32.mrf.mxu0  ;;  %v8829_v35 = vpop.f32.mrf.mxu1  ;;  %v5951_v39 = vadd.f32 %v11406_v63, %v5912_v41  ;;  %v5612_v27 = vadd.f32 %v12016_v48, %v5306_v31  ;;  %v5305_v21 = vadd.f32 %v12018_v22, %v12017_v9 }
 0x470   : > { %6323 = vst [vmem:[%s9589_s15 + $0x88] sm:$0xff] %v6291_v30  ;;  %v6290_v28 = vmax.f32 %v6258_v62, 0.0  ;;  %v6261_v4 = vadd.f32 %v6179_v51, %v5949_v10  ;;  %v6174_v42 = vadd.f32 %v11411_v29, %v6173_v32  ;;  %v5914_v47 = vadd.f32 %v8829_v35, %v5608_v56  ;;  %v12019_v51 = vld [vmem:[#allocation85_spill] sm:$0xff]  ;;  %v12020_v56 = vld [vmem:[#allocation22_spill] sm:$0xff] }
 0x471   : > { %v8906_v46 = vpop.f32.mrf.mxu0  ;;  %v5842_v7 = vpop.f32.mrf.mxu1  ;;  %v5950_v8 = vadd.f32 %v11406_v63, %v5911_v45  ;;  %v5611_v50 = vadd.f32 %v12019_v51, %v5305_v21  ;;  %v5308_v58 = vadd.f32 %v12021_v15, %v12020_v56 }
 0x472   : > { %6322 = vst [vmem:[%s9589_s15 + $0x80] sm:$0xff] %v6290_v28  ;;  %v6293_v44 = vmax.f32 %v6261_v4, 0.0  ;;  %v6260_v40 = vadd.f32 %v6174_v42, %v5948_v17  ;;  %v6189_v34 = vadd.f32 %v8906_v46, %v11411_v29  ;;  %v5913_v38 = vadd.f32 %v5842_v7, %v5607_v16  ;;  %v12022_v42 = vld [vmem:[#allocation84_spill] sm:$0xff]  ;;  %v12023_v16 = vld [vmem:[#allocation30_spill] sm:$0xff] }
 0x473   : > { %v6183_v13 = vpop.f32.mrf.mxu0  ;;  %v8832_v0 = vpop.f32.mrf.mxu1  ;;  %v5953_v57 = vadd.f32 %v11406_v63, %v5914_v47  ;;  %v5614_v18 = vadd.f32 %v12022_v42, %v5308_v58  ;;  %v5307_v26 = vadd.f32 %v12024_v6, %v12023_v16 }
 0x474   : > { %6325 = vst [vmem:[%s9589_s15 + $0x98] sm:$0xff] %v6293_v44  ;;  %v6292_v43 = vmax.f32 %v6260_v40, 0.0  ;;  %v6263_v37 = vadd.f32 %v6189_v34, %v5951_v39  ;;  %v6184_v1 = vadd.f32 %v11411_v29, %v6183_v13  ;;  %v5916_v60 = vadd.f32 %v8832_v0, %v5610_v11  ;;  %v12026_v11 = vld [vmem:[#allocation33_spill] sm:$0xff] }
 0x475   : > { %v8909_v36 = vpop.f32.mrf.mxu0  ;;  %v5852_v33 = vpop.f32.mrf.mxu1  ;;  %v5952_v62 = vadd.f32 %v11406_v63, %v5913_v38  ;;  %v5613_v47 = vadd.f32 %v11392_v12, %v5307_v26  ;;  %v5310_v14 = vadd.f32 %v12026_v11, %v12025_v25 }
 0x476   : > { %6324 = vst [vmem:[%s9589_s15 + $0x90] sm:$0xff] %v6292_v43  ;;  %v6295_v5 = vmax.f32 %v6263_v37, 0.0  ;;  %v6262_v54 = vadd.f32 %v6184_v1, %v5950_v8  ;;  %v6199_v2 = vadd.f32 %v8909_v36, %v11411_v29  ;;  %v5915_v55 = vadd.f32 %v5852_v33, %v5609_v61  ;;  %v12027_v1 = vld [vmem:[#allocation51_spill] sm:$0xff] }
 0x477   : > { %v6193_v19 = vpop.f32.mrf.mxu0  ;;  %v8835_v41 = vpop.f32.mrf.mxu1  ;;  %v5955_v52 = vadd.f32 %v11406_v63, %v5916_v60  ;;  %v5616_v38 = vadd.f32 %v12027_v1, %v5310_v14  ;;  %v12029_v61 = vld [vmem:[#allocation87_spill] sm:$0xff] }
 0x478   : > { %6327 = vst [vmem:[%s9589_s15 + $0xa8] sm:$0xff] %v6295_v5  ;;  %v6294_v59 = vmax.f32 %v6262_v54, 0.0  ;;  %v6265_v30 = vadd.f32 %v6199_v2, %v5953_v57  ;;  %v6194_v10 = vadd.f32 %v11411_v29, %v6193_v19  ;;  %v5918_v17 = vadd.f32 %v8835_v41, %v5612_v27  ;;  %v12030_v54 = vld [vmem:[#allocation52_spill] sm:$0xff] }
 0x479   : > { %v8912_v32 = vpop.f32.mrf.mxu0  ;;  %v5862_v45 = vpop.f32.mrf.mxu1  ;;  %v5954_v53 = vadd.f32 %v11406_v63, %v5915_v55  ;;  %v5309_v24 = vadd.f32 %v12029_v61, %v12028_v20 }
 0x47a   : > { %6326 = vst [vmem:[%s9589_s15 + $0xa0] sm:$0xff] %v6294_v59  ;;  %v6297_v35 = vmax.f32 %v6265_v30, 0.0  ;;  %v6264_v28 = vadd.f32 %v6194_v10, %v5952_v62  ;;  %v6209_v4 = vadd.f32 %v8912_v32, %v11411_v29  ;;  %v5917_v34 = vadd.f32 %v5862_v45, %v5611_v50 }
 0x47b   : > { %v6203_v39 = vpop.f32.mrf.mxu0  ;;  %v8838_v46 = vpop.f32.mrf.mxu1  ;;  %v5957_v43 = vadd.f32 %v11406_v63, %v5918_v17  ;;  %v5615_v57 = vadd.f32 %v12030_v54, %v5309_v24 }
 0x47c   : > { %6329 = vst [vmem:[%s9589_s15 + $0xb8] sm:$0xff] %v6297_v35  ;;  %v6296_v7 = vmax.f32 %v6264_v28, 0.0  ;;  %v6267_v44 = vadd.f32 %v6209_v4, %v5955_v52  ;;  %v6204_v40 = vadd.f32 %v11411_v29, %v6203_v39  ;;  %v5920_v3 = vadd.f32 %v8838_v46, %v5614_v18 }
 0x47d   : > { %v8915_v49 = vpop.f32.mrf.mxu0  ;;  %v5872_v8 = vpop.f32.mrf.mxu1  ;;  %v5956_v33 = vadd.f32 %v11406_v63, %v5917_v34 }
 0x47e   : > { %6328 = vst [vmem:[%s9589_s15 + $0xb0] sm:$0xff] %v6296_v7  ;;  %v6299_v13 = vmax.f32 %v6267_v44, 0.0  ;;  %v6266_v0 = vadd.f32 %v6204_v40, %v5954_v53  ;;  %v6219_v37 = vadd.f32 %v8915_v49, %v11411_v29  ;;  %v5919_v23 = vadd.f32 %v5872_v8, %v5613_v47 }
 0x47f   : > { %v6213_v12 = vpop.f32.mrf.mxu0  ;;  %v8841_v31 = vpop.f32.mrf.mxu1  ;;  %v5959_v2 = vadd.f32 %v11406_v63, %v5920_v3 }
 0x480   : > { %6331 = vst [vmem:[%s9589_s15 + $0xc8] sm:$0xff] %v6299_v13  ;;  %v6298_v36 = vmax.f32 %v6266_v0, 0.0  ;;  %v6269_v60 = vadd.f32 %v6219_v37, %v5957_v43  ;;  %v6214_v5 = vadd.f32 %v11411_v29, %v6213_v12  ;;  %v5922_v19 = vadd.f32 %v8841_v31, %v5616_v38 }
 0x481   : > { %v8918_v48 = vpop.f32.mrf.mxu0  ;;  %v5882_v27 = vpop.f32.mrf.mxu1  ;;  %v5958_v55 = vadd.f32 %v11406_v63, %v5919_v23 }
 0x482   : > { %6330 = vst [vmem:[%s9589_s15 + $0xc0] sm:$0xff] %v6298_v36  ;;  %v6301_v9 = vmax.f32 %v6269_v60, 0.0  ;;  %v6268_v22 = vadd.f32 %v6214_v5, %v5956_v33  ;;  %v6229_v21 = vadd.f32 %v8918_v48, %v11411_v29  ;;  %v5921_v10 = vadd.f32 %v5882_v27, %v5615_v57 }
 0x483   : > { %v6223_v41 = vpop.f32.mrf.mxu0  ;;  %v5961_v15 = vadd.f32 %v11406_v63, %v5922_v19 }
 0x484   : > { %6333 = vst [vmem:[%s9589_s15 + $0xd8] sm:$0xff] %v6301_v9  ;;  %v6300_v59 = vmax.f32 %v6268_v22, 0.0  ;;  %v6271_v30 = vadd.f32 %v6229_v21, %v5959_v2  ;;  %v6224_v62 = vadd.f32 %v11411_v29, %v6223_v41  ;;  %v5960_v35 = vadd.f32 %v11406_v63, %v5921_v10 }
 0x485   : > { %v8921_v51 = vpop.f32.mrf.mxu0 }
 0x486   : > { %6332 = vst [vmem:[%s9589_s15 + $0xd0] sm:$0xff] %v6300_v59  ;;  %v6303_v50 = vmax.f32 %v6271_v30, 0.0  ;;  %v6270_v56 = vadd.f32 %v6224_v62, %v5958_v55  ;;  %v6239_v58 = vadd.f32 %v8921_v51, %v11411_v29 }
 0x487   : > { %v6233_v52 = vpop.f32.mrf.mxu0 }
 0x488   : > { %6335 = vst [vmem:[%s9589_s15 + $0xe8] sm:$0xff] %v6303_v50  ;;  %v6302_v32 = vmax.f32 %v6270_v56, 0.0  ;;  %v6273_v45 = vadd.f32 %v6239_v58, %v5961_v15  ;;  %v6234_v28 = vadd.f32 %v11411_v29, %v6233_v52 }
 0x48a   : > { %6334 = vst [vmem:[%s9589_s15 + $0xe0] sm:$0xff] %v6302_v32  ;;  %v6305_v4 = vmax.f32 %v6273_v45, 0.0  ;;  %v6272_v17 = vadd.f32 %v6234_v28, %v5960_v35 }
 0x48c   : > { %6337 = vst [vmem:[%s9589_s15 + $0xf8] sm:$0xff] %v6305_v4  ;;  %v6304_v42 = vmax.f32 %v6272_v17, 0.0 }
 0x48e   : > { %6336 = vst [vmem:[%s9589_s15 + $0xf0] sm:$0xff] %v6304_v42 }
 0x48f   : > { %9181 = shalt.err (!%p9178_p9)
}
 0x490   : > { %s9182_s14 = scalar_lea.hbm %s11601_s24, 4096  ;;  %s9186_s19 = scalar_lea.hbm %s11658_s8, 8192 }
 0x491   : > { %p9183_p7 = scmp.ne.s32.totalorder %s11601_s24, %s9182_s14  ;;  %p9187_p1 = scmp.lt.s32.totalorder %s11601_s24, %s11658_s8 }
 0x492   : > { %p9188_p5 = scmp.lt.s32.totalorder %s9186_s19, %s9182_s14 }
 0x493   : > { %p9184_p10 = pnand %p9183_p7, %p12031_p8 }
 0x494   : > { %p9189_p6 = por %p9188_p5, %p9187_p1 }
 0x495   : > { %p9185_p2 = pneg %p9184_p10 }
 0x497   : > { %p9190_p13 = pnand %p9189_p6, %p9185_p2 }
 0x499   : > { %9193 = shalt.err (!%p9190_p13)
}
 0x49a   : > { %s9261_s21 = smov 128   ;;  %s9262_s25 = smov 8  }
 0x49b   : > { %8968 = dma.vmem_to_hbm [thread:$0]  (%p12031_p8), %s11604_s12, 4096, %s11601_s24, %s11609_s23, %s9261_s21, %s9261_s21, %s9262_s25  }
 0x49c PF: > { %s6367_s22 = sand.u32 1, %s9234_s27   ;;  %p12032_p0 = scmp.ne.s32.totalorder %s11705_s18, 0 }
 0x49d   : > { %p12033_p3 = scmp.ge.s32.totalorder %s9246_s30, 2  ;;  %s6368_s11 = scalar_lea.sflag [#allocation7], %s6367_s22 }
 0x49f   : > { %p8985_p4 = pnand %p12033_p3, %p12032_p0 }
 0x4a1   : > { %p8986_p11 = pneg %p8985_p4 }
 0x4a3   : > { %9229 = dma.done.wait (%p8986_p11), %s6368_s11, 4096  }
 0x4a4   : > { %9231 = vsyncadd (%p8986_p11), %s6368_s11, 4294963200  ;;  %s12034_s30 = sld [smem:[#allocation20_spill]]  ;;  %s12036_s27 = smov %s9238_s28 }
 0x4a5   : > { %s12035_s26 = sld [smem:[#allocation21_spill]]  ;;  %s12037_s28 = smov %s9242_s29 }
 0x4aa   : > { %p20_p12 = scmp.ge.s32.totalorder %s12034_s30, 4  }
 0x4ab   : > { %s12038_s29 = smov %s12035_s26 }
 0x4ac   :  { %22 = sbr.rel (!%p20_p12) target bundleno = 8 (0x8), region = 128 }
 0x4b1   :  { %6373 = vsyncpa [#allocation6], 1 }
 0x4b2   :  { %6375 = vsyncpa [#allocation6 + $0x1], 1 }
 0x4b3   :  { %6376 = vsyncpa [#allocation9], 1 }
 0x4b4   :  { %6377 = vsyncpa [#allocation7], 1 }
 0x4b5   :  { %6379 = vsyncpa [#allocation7 + $0x1], 1 }
 0x4b6   :  { %6380 = vsyncmov [#allocation4] }
 0x4b9   :  { %s6381_s17 = vpop.sfrf %6380 }
 0x4ba   :  { %p6486_p8 = scmp.ne.s32.totalorder %s6381_s17, 0 }
 0x4bc   :  { %6385 = shalt.err (%p6486_p8)  }

</bundles_post_ra>
